<compile_context>
chip_gen: v6e
topology: v6e:2x2x1
jax: 0.10.0
libtpu: 0.0.40
codegen_flags: <defaults>
</compile_context>

<pallas_src>
import functools

import numpy as np
import jax
import jax.numpy as jnp
from jax.experimental import pallas as pl
from jax.experimental.pallas import tpu as pltpu

GN_EPS = 1e-5
_LANE = 128


def _round_up(x, m):
    return ((x + m - 1) // m) * m


# ---------------------------------------------------------------------------
# Fused kernel: stem + all FPN layers for one batch element per grid step.
# ---------------------------------------------------------------------------
def _fused_fpn_kernel(*refs, stem_hwp, layer_hwp, f_pad, cg, eps, mm_dtype):
    n_layers = len(layer_hwp)
    it = iter(refs)
    x_ref, sw_ref, sg_ref, sb_ref, gmat_ref, gmat_t_ref = (next(it) for _ in range(6))
    lrefs = [tuple(next(it) for _ in range(8)) for _ in range(n_layers)]
    out_refs = [next(it) for _ in range(n_layers)]
    stem_buf, stem_out = next(it), next(it)
    layer_bufs = [next(it) for _ in range(n_layers)]

    gmat = gmat_ref[...]          # (f_pad, G)  one-hot channel -> group
    gmat_t = gmat_t_ref[...]      # (G, f_pad)

    def group_norm(x, gamma, beta, count):
        """GroupNorm over all rows of x (N, f_pad); reductions on the MXU."""
        n = x.shape[0]
        ones = jnp.ones((1, n), jnp.float32)
        s_c = jnp.dot(ones, x, preferred_element_type=jnp.float32)        # (1, C)
        q_c = jnp.dot(ones, x * x, preferred_element_type=jnp.float32)    # (1, C)
        s_g = jnp.dot(s_c, gmat, preferred_element_type=jnp.float32)      # (1, G)
        q_g = jnp.dot(q_c, gmat, preferred_element_type=jnp.float32)      # (1, G)
        inv_n = 1.0 / float(count)
        mean_g = s_g * inv_n
        var_g = jnp.maximum(q_g * inv_n - mean_g * mean_g, 0.0)
        inv_g = jax.lax.rsqrt(var_g + eps)
        mean_c = jnp.dot(mean_g, gmat_t, preferred_element_type=jnp.float32)
        inv_c = jnp.dot(inv_g, gmat_t, preferred_element_type=jnp.float32)
        scale = inv_c * gamma
        shift = beta - mean_c * scale
        return x * scale + shift

    def fill(buf, value, n_rows, pad):
        # Zero the halo (and middle, cheap) then one aligned store of the data.
        buf[...] = jnp.zeros_like(buf)
        buf[pad:pad + n_rows, :] = value

    def conv3x3(buf, w_ref, n_rows, w_img, pad):
        """3x3 conv (padding=1, no bias) as 9 shifted (N,C)@(C,f_pad) matmuls.

        Vertical out-of-image taps read the zero halo rows of `buf`; the two
        horizontal ones are killed with iota-derived row masks."""
        col = jax.lax.broadcasted_iota(jnp.int32, (n_rows, 1), 0) % w_img
        m_l = (col != 0).astype(jnp.float32)
        m_r = (col != w_img - 1).astype(jnp.float32)
        acc = jnp.zeros((n_rows, f_pad), jnp.float32)
        for k in range(9):
            ky, kx = k // 3, k % 3
            off = pad + (ky - 1) * w_img + (kx - 1)
            lhs = buf[off:off + n_rows, :]
            if kx == 0:
                lhs = lhs * m_l
            elif kx == 2:
                lhs = lhs * m_r
            acc = acc + jnp.dot(lhs.astype(mm_dtype), w_ref[k],
                                preferred_element_type=jnp.float32)
        return acc

    # ----------------- stem: Conv3x3 -> GroupNorm -> ReLU -------------------
    hs, ws, pad_s = stem_hwp
    n_s = hs * ws
    fill(stem_buf, x_ref[0], n_s, pad_s)
    acc = conv3x3(stem_buf, sw_ref, n_s, ws, pad_s)
    y = group_norm(acc, sg_ref[...], sb_ref[...], n_s * cg)
    stem_out[...] = jnp.maximum(y, 0.0)

    # ----------------- FPN layers (top-down path) ---------------------------
    prev_read = lambda: stem_out[...]
    for l in range(n_layers):
        (left_ref, u_ref, pw_ref, pg_ref, pb_ref,
         bw_ref, bg_ref, bb_ref) = lrefs[l]
        h, w, pad = layer_hwp[l]
        n = h * w
        buf = layer_bufs[l]

        # lateral 1x1 projection + GroupNorm
        proj = jnp.dot(left_ref[0].astype(mm_dtype), pw_ref[...],
                       preferred_element_type=jnp.float32)
        proj = group_norm(proj, pg_ref[...], pb_ref[...], n * cg)
        # nearest upsample of the top-down path: 0/1 selection matmul
        up = jnp.dot(u_ref[...], prev_read(), preferred_element_type=jnp.float32)

        fill(buf, proj + up, n, pad)
        acc = conv3x3(buf, bw_ref, n, w, pad)
        y = group_norm(acc, bg_ref[...], bb_ref[...], n * cg)
        out_refs[l][0] = jnp.maximum(y, 0.0)
        prev_read = (lambda r=out_refs[l]: r[0])


# ---------------------------------------------------------------------------
# Wrapper: layout plumbing + one pallas_call for the whole model.
# ---------------------------------------------------------------------------
def maskformer_fpn_forward(features_nchw, params, groups=32, mm_dtype=jnp.float32):
    """Pallas forward of MaskFormerFPNModel.

    features_nchw: list of (B, C_i, H_i, W_i), coarsest last (PyTorch order).
    Returns the FPN feature maps (NCHW), one per FPN layer.
    """
    stem_w, stem_g, stem_b, layer_params = params
    B = features_nchw[0].shape[0]
    F = stem_w.shape[-1]
    f_pad = _round_up(F, _LANE)
    cg = F // groups

    # NCHW -> flattened channels-last (one fused XLA op per input).
    feats, dims = [], []
    for f in features_nchw:
        _, C, H, W = f.shape
        feats.append(jnp.transpose(f, (0, 2, 3, 1)).reshape(B, H * W, C))
        dims.append((H, W, C))

    hs, ws, cin = dims[-1]
    pad_s = _round_up(ws + 1, 8)
    x_stem = feats[-1]
    lefts = feats[:-1][::-1]
    layer_hw = dims[:-1][::-1]

    def pad_f(a):                       # zero-pad the last dim to f_pad
        if a.shape[-1] == f_pad:
            return a
        return jnp.pad(a, [(0, 0)] * (a.ndim - 1) + [(0, f_pad - a.shape[-1])])

    sw = pad_f(stem_w.reshape(9, cin, F)).astype(mm_dtype)
    sg = pad_f(stem_g.reshape(1, F))
    sb = pad_f(stem_b.reshape(1, F))

    # one-hot channel->group matrix (padded channels belong to no group)
    gmat_np = np.zeros((f_pad, groups), np.float32)
    for g in range(groups):
        gmat_np[g * cg:(g + 1) * cg, g] = 1.0
    gmat = jnp.asarray(gmat_np)
    gmat_t = jnp.asarray(np.ascontiguousarray(gmat_np.T))

    def c_spec2(arr):
        return pl.BlockSpec(arr.shape, lambda b: (0, 0))

    def c_spec3(arr):
        return pl.BlockSpec(arr.shape, lambda b: (0, 0, 0))

    def c_spec(arr):
        return c_spec2(arr) if arr.ndim == 2 else c_spec3(arr)

    def b_spec(arr):                    # (1, rows, C) block over the batch dim
        return pl.BlockSpec((1,) + arr.shape[1:], lambda b: (b, 0, 0))

    inputs = [x_stem, sw, sg, sb, gmat, gmat_t]
    in_specs = [b_spec(x_stem), c_spec(sw), c_spec(sg), c_spec(sb),
                c_spec(gmat), c_spec(gmat_t)]

    layer_hwp = []
    prev_hw = (hs, ws)
    prev_n = hs * ws
    flops = 2 * prev_n * 9 * cin * f_pad
    for (h, w, cl), left, (prj_w, prj_g, prj_b, blk_w, blk_g, blk_b) in zip(
            layer_hw, lefts, layer_params):
        hp, wprev = prev_hw
        # PyTorch F.interpolate(mode='nearest') source indices
        hi = (np.arange(h) * hp) // h
        wi = (np.arange(w) * wprev) // w
        src = (hi[:, None] * wprev + wi[None, :]).reshape(-1)
        u_np = np.zeros((h * w, hp * wprev), np.float32)
        u_np[np.arange(h * w), src] = 1.0

        pad = _round_up(w + 1, 8)
        layer_hwp.append((h, w, pad))

        bw9 = blk_w.reshape(9, F, F)
        if f_pad != F:
            bw9 = jnp.pad(bw9, ((0, 0), (0, f_pad - F), (0, f_pad - F)))
        layer_in = [left, jnp.asarray(u_np),
                    pad_f(prj_w.reshape(cl, F)).astype(mm_dtype),
                    pad_f(prj_g.reshape(1, F)), pad_f(prj_b.reshape(1, F)),
                    bw9.astype(mm_dtype),
                    pad_f(blk_g.reshape(1, F)), pad_f(blk_b.reshape(1, F))]
        inputs += layer_in
        in_specs += [b_spec(left)] + [c_spec(a) for a in layer_in[1:]]

        n = h * w
        flops += 2 * n * (cl * f_pad + prev_n * f_pad + 9 * f_pad * f_pad)
        prev_hw, prev_n = (h, w), n
    flops *= B

    out_shape = tuple(jax.ShapeDtypeStruct((B, h * w, f_pad), jnp.float32)
                      for (h, w, _) in layer_hwp)
    out_specs = tuple(pl.BlockSpec((1, h * w, f_pad), lambda b: (b, 0, 0))
                      for (h, w, _) in layer_hwp)

    scratch = [pltpu.VMEM((2 * pad_s + hs * ws, cin), jnp.float32),
               pltpu.VMEM((hs * ws, f_pad), jnp.float32)]
    scratch += [pltpu.VMEM((2 * pad + h * w, f_pad), jnp.float32)
                for (h, w, pad) in layer_hwp]

    bytes_acc = sum(int(a.size) * a.dtype.itemsize for a in inputs)
    bytes_acc += sum(int(np.prod(s.shape)) * 4 for s in out_shape)

    kernel = functools.partial(
        _fused_fpn_kernel, stem_hwp=(hs, ws, pad_s), layer_hwp=tuple(layer_hwp),
        f_pad=f_pad, cg=cg, eps=GN_EPS, mm_dtype=mm_dtype)

    outs = pl.pallas_call(
        kernel,
        grid=(B,),
        in_specs=in_specs,
        out_specs=out_specs,
        out_shape=out_shape,
        scratch_shapes=scratch,
        compiler_params=pltpu.CompilerParams(dimension_semantics=("parallel",)),
        cost_estimate=pl.CostEstimate(
            flops=int(flops),
            transcendentals=int(B * (1 + 2 * len(layer_hwp)) * groups),
            bytes_accessed=int(bytes_acc)),
    )(*inputs)
    if not isinstance(outs, (tuple, list)):
        outs = (outs,)

    fpn = []
    for (h, w, _), y in zip(layer_hwp, outs):
        img = y.reshape(B, h, w, f_pad)[..., :F]
        fpn.append(jnp.transpose(img, (0, 3, 1, 2)))   # back to NCHW
    return fpn


# ---------------------------------------------------------------------------
# Pure-JAX reference mirroring the PyTorch module
# ---------------------------------------------------------------------------
def _nearest(x, H, W):
    Hd, Wd = x.shape[1], x.shape[2]
    hi = (jnp.arange(H) * Hd) // H
    wi = (jnp.arange(W) * Wd) // W
    return x[:, hi][:, :, wi]


def _gn_ref(x, gamma, beta, groups, eps=GN_EPS):
    B, H, W, C = x.shape
    cg = C // groups
    xg = x.reshape(B, H, W, groups, cg)
    mean = jnp.mean(xg, axis=(1, 2, 4), keepdims=True)
    var = jnp.mean((xg - mean) ** 2, axis=(1, 2, 4), keepdims=True)
    xg = (xg - mean) / jnp.sqrt(var + eps)
    return xg.reshape(B, H, W, C) * gamma.reshape(1, 1, 1, C) + beta.reshape(1, 1, 1, C)


def maskformer_fpn_ref(features_nchw, params, groups=32):
    stem_w, stem_g, stem_b, layer_params = params
    feats = [jnp.transpose(f, (0, 2, 3, 1)) for f in features_nchw]
    dn = ('NHWC', 'HWIO', 'NHWC')
    with jax.default_matmul_precision("highest"):
        x = jax.lax.conv_general_dilated(feats[-1], stem_w, (1, 1), ((1, 1), (1, 1)),
                                         dimension_numbers=dn)
        x = jnp.maximum(_gn_ref(x, stem_g, stem_b, groups), 0.0)
        fpn = []
        for (pw, pg, pb, bw, bg, bb), left in zip(layer_params, feats[:-1][::-1]):
            proj = _gn_ref(jnp.einsum('bhwc,cf->bhwf', left, pw), pg, pb, groups)
            H, W = left.shape[1], left.shape[2]
            x = _nearest(x, H, W) + proj
            x = jax.lax.conv_general_dilated(x, bw, (1, 1), ((1, 1), (1, 1)),
                                             dimension_numbers=dn)
            x = jnp.maximum(_gn_ref(x, bg, bb, groups), 0.0)
            fpn.append(jnp.transpose(x, (0, 3, 1, 2)))
    return fpn


# ---------------------------------------------------------------------------
if __name__ == "__main__":
    B, F, G = 2, 64, 32                  # feature_size=64, GroupNorm(32, .)
    chans = [32, 64, 128]                # backbone channel widths
    spats = [16, 8, 4]                   # backbone spatial sizes (coarsest last)
    lateral_widths = chans[:-1]          # [32, 64]
    in_features = chans[-1]              # 128

    key = jax.random.PRNGKey(0)
    keys = iter(jax.random.split(key, 32))

    features = [0.5 * jax.random.normal(next(keys), (B, c, s, s), jnp.float32)
                for c, s in zip(chans, spats)]

    def conv_w(k, kh, kw, cin, cout):
        fan_in = kh * kw * cin
        return jax.random.normal(k, (kh, kw, cin, cout), jnp.float32) / np.sqrt(fan_in)

    stem_w = conv_w(next(keys), 3, 3, in_features, F)
    stem_g = 1.0 + 0.1 * jax.random.normal(next(keys), (F,), jnp.float32)
    stem_b = 0.1 * jax.random.normal(next(keys), (F,), jnp.float32)

    layer_params = []
    for lw in lateral_widths[::-1]:      # module builds layers over reversed widths
        pw = conv_w(next(keys), 1, 1, lw, F).reshape(lw, F)   # 1x1 conv as matrix
        pg = 1.0 + 0.1 * jax.random.normal(next(keys), (F,), jnp.float32)
        pb = 0.1 * jax.random.normal(next(keys), (F,), jnp.float32)
        bw = conv_w(next(keys), 3, 3, F, F)
        bg = 1.0 + 0.1 * jax.random.normal(next(keys), (F,), jnp.float32)
        bb = 0.1 * jax.random.normal(next(keys), (F,), jnp.float32)
        layer_params.append((pw, pg, pb, bw, bg, bb))

    params = (stem_w, stem_g, stem_b, layer_params)

    # f32 MXU inputs: strict correctness check vs. high-precision reference.
    fpn = maskformer_fpn_forward(features, params, groups=G)
    fpn = [jax.block_until_ready(f) for f in fpn]
    fpn_ref = maskformer_fpn_ref(features, params, groups=G)

    assert len(fpn) == len(lateral_widths)
    expected_shapes = [(B, F, 8, 8), (B, F, 16, 16)]
    for i, (a, r, es) in enumerate(zip(fpn, fpn_ref, expected_shapes)):
        assert a.shape == es, (a.shape, es)
        assert a.shape == r.shape, (a.shape, r.shape)
        assert jnp.allclose(a, r, atol=5e-4, rtol=5e-4), f"fpn[{i}] mismatch"

    # bf16 MXU-input variant (the v6e/v7x fast path); GroupNorm stays f32.
    fpn_bf16 = maskformer_fpn_forward(features, params, groups=G,
                                      mm_dtype=jnp.bfloat16)
    fpn_bf16 = [jax.block_until_ready(f) for f in fpn_bf16]
    for a, r in zip(fpn_bf16, fpn_ref):
        assert bool(jnp.all(jnp.isfinite(a)))
        assert float(jnp.max(jnp.abs(a - r))) < 0.2, "bf16 variant diverged"

    print("KERNEL_OK")
</pallas_src>

<mosaic_0001>
module attributes {stable_mosaic.version = 11 : i64} {
  func.func @_fused_fpn_kernel(%arg0: i32, %arg1: memref<1x16x128xf32, #tpu.memory_space<vmem>>, %arg2: memref<9x128x128xf32, #tpu.memory_space<vmem>>, %arg3: memref<1x128xf32, #tpu.memory_space<vmem>>, %arg4: memref<1x128xf32, #tpu.memory_space<vmem>>, %arg5: memref<128x32xf32, #tpu.memory_space<vmem>>, %arg6: memref<32x128xf32, #tpu.memory_space<vmem>>, %arg7: memref<1x64x64xf32, #tpu.memory_space<vmem>>, %arg8: memref<64x16xf32, #tpu.memory_space<vmem>>, %arg9: memref<64x128xf32, #tpu.memory_space<vmem>>, %arg10: memref<1x128xf32, #tpu.memory_space<vmem>>, %arg11: memref<1x128xf32, #tpu.memory_space<vmem>>, %arg12: memref<9x128x128xf32, #tpu.memory_space<vmem>>, %arg13: memref<1x128xf32, #tpu.memory_space<vmem>>, %arg14: memref<1x128xf32, #tpu.memory_space<vmem>>, %arg15: memref<1x256x32xf32, #tpu.memory_space<vmem>>, %arg16: memref<256x64xf32, #tpu.memory_space<vmem>>, %arg17: memref<32x128xf32, #tpu.memory_space<vmem>>, %arg18: memref<1x128xf32, #tpu.memory_space<vmem>>, %arg19: memref<1x128xf32, #tpu.memory_space<vmem>>, %arg20: memref<9x128x128xf32, #tpu.memory_space<vmem>>, %arg21: memref<1x128xf32, #tpu.memory_space<vmem>>, %arg22: memref<1x128xf32, #tpu.memory_space<vmem>>, %arg23: memref<1x64x128xf32, #tpu.memory_space<vmem>>, %arg24: memref<1x256x128xf32, #tpu.memory_space<vmem>>, %arg25: memref<32x128xf32, #tpu.memory_space<vmem>>, %arg26: memref<16x128xf32, #tpu.memory_space<vmem>>, %arg27: memref<96x128xf32, #tpu.memory_space<vmem>>, %arg28: memref<304x128xf32, #tpu.memory_space<vmem>>) attributes {dimension_semantics = [#tpu.dimension_semantics<parallel>], iteration_bounds = array<i64: 2>, scalar_prefetch = 0 : i64, scratch_operands = 4 : i64, tpu.core_type = #tpu.core_type<tc>, window_params = [{transform_indices = @transform_0, window_bounds = array<i64: 1, 16, 128>}, {pipeline_mode = #tpu.pipeline_mode<synchronous>, transform_indices = @transform_1, window_bounds = array<i64: 9, 128, 128>}, {pipeline_mode = #tpu.pipeline_mode<synchronous>, transform_indices = @transform_2, window_bounds = array<i64: 1, 128>}, {pipeline_mode = #tpu.pipeline_mode<synchronous>, transform_indices = @transform_3, window_bounds = array<i64: 1, 128>}, {pipeline_mode = #tpu.pipeline_mode<synchronous>, transform_indices = @transform_4, window_bounds = array<i64: 128, 32>}, {pipeline_mode = #tpu.pipeline_mode<synchronous>, transform_indices = @transform_5, window_bounds = array<i64: 32, 128>}, {transform_indices = @transform_6, window_bounds = array<i64: 1, 64, 64>}, {pipeline_mode = #tpu.pipeline_mode<synchronous>, transform_indices = @transform_7, window_bounds = array<i64: 64, 16>}, {pipeline_mode = #tpu.pipeline_mode<synchronous>, transform_indices = @transform_8, window_bounds = array<i64: 64, 128>}, {pipeline_mode = #tpu.pipeline_mode<synchronous>, transform_indices = @transform_9, window_bounds = array<i64: 1, 128>}, {pipeline_mode = #tpu.pipeline_mode<synchronous>, transform_indices = @transform_10, window_bounds = array<i64: 1, 128>}, {pipeline_mode = #tpu.pipeline_mode<synchronous>, transform_indices = @transform_11, window_bounds = array<i64: 9, 128, 128>}, {pipeline_mode = #tpu.pipeline_mode<synchronous>, transform_indices = @transform_12, window_bounds = array<i64: 1, 128>}, {pipeline_mode = #tpu.pipeline_mode<synchronous>, transform_indices = @transform_13, window_bounds = array<i64: 1, 128>}, {transform_indices = @transform_14, window_bounds = array<i64: 1, 256, 32>}, {pipeline_mode = #tpu.pipeline_mode<synchronous>, transform_indices = @transform_15, window_bounds = array<i64: 256, 64>}, {pipeline_mode = #tpu.pipeline_mode<synchronous>, transform_indices = @transform_16, window_bounds = array<i64: 32, 128>}, {pipeline_mode = #tpu.pipeline_mode<synchronous>, transform_indices = @transform_17, window_bounds = array<i64: 1, 128>}, {pipeline_mode = #tpu.pipeline_mode<synchronous>, transform_indices = @transform_18, window_bounds = array<i64: 1, 128>}, {pipeline_mode = #tpu.pipeline_mode<synchronous>, transform_indices = @transform_19, window_bounds = array<i64: 9, 128, 128>}, {pipeline_mode = #tpu.pipeline_mode<synchronous>, transform_indices = @transform_20, window_bounds = array<i64: 1, 128>}, {pipeline_mode = #tpu.pipeline_mode<synchronous>, transform_indices = @transform_21, window_bounds = array<i64: 1, 128>}, {transform_indices = @transform_22, window_bounds = array<i64: 1, 64, 128>}, {transform_indices = @transform_23, window_bounds = array<i64: 1, 256, 128>}]} {
    %c0 = arith.constant 0 : index
    %c0_0 = arith.constant 0 : index
    %0 = vector.load %arg5[%c0, %c0_0] : memref<128x32xf32, #tpu.memory_space<vmem>>, vector<128x32xf32>
    %c0_1 = arith.constant 0 : index
    %c0_2 = arith.constant 0 : index
    %1 = vector.load %arg6[%c0_1, %c0_2] : memref<32x128xf32, #tpu.memory_space<vmem>>, vector<32x128xf32>
    %c0_3 = arith.constant 0 : index
    %c0_4 = arith.constant 0 : index
    %c0_5 = arith.constant 0 : index
    %2 = vector.load %arg1[%c0_3, %c0_4, %c0_5] : memref<1x16x128xf32, #tpu.memory_space<vmem>>, vector<1x16x128xf32>
    %3 = vector.shape_cast %2 : vector<1x16x128xf32> to vector<16x128xf32>
    %cst = arith.constant 0.000000e+00 : f32
    %4 = vector.broadcast %cst : f32 to vector<32x128xf32>
    %c0_6 = arith.constant 0 : index
    %c0_7 = arith.constant 0 : index
    %5 = vector.load %arg25[%c0_6, %c0_7] : memref<32x128xf32, #tpu.memory_space<vmem>>, vector<32x128xf32>
    tpu.vector_store %arg25[%c0_6, %c0_7], %4 {strides = array<i32>} : memref<32x128xf32, #tpu.memory_space<vmem>>, vector<32x128xf32>,
    %c8 = arith.constant 8 : index
    %c0_8 = arith.constant 0 : index
    %6 = vector.load %arg25[%c8, %c0_8] : memref<32x128xf32, #tpu.memory_space<vmem>>, vector<16x128xf32>
    tpu.vector_store %arg25[%c8, %c0_8], %3 {strides = array<i32>} : memref<32x128xf32, #tpu.memory_space<vmem>>, vector<16x128xf32>,
    %7 = tpu.iota {dimensions = array<i32: 0>} : vector<16x1xi32>
    %c4_i32 = arith.constant 4 : i32
    %c0_i32 = arith.constant 0 : i32
    %8 = arith.cmpi eq, %c4_i32, %c0_i32 : i32
    %c1_i32 = arith.constant 1 : i32
    %9 = arith.select %8, %c1_i32, %c4_i32 : i32
    %10 = vector.broadcast %9 : i32 to vector<16x1xi32>
    %11 = arith.remsi %7, %10 : vector<16x1xi32>
    %c0_i32_9 = arith.constant 0 : i32
    %12 = vector.broadcast %c0_i32_9 : i32 to vector<16x1xi32>
    %13 = arith.cmpi ne, %11, %12 : vector<16x1xi32>
    %c0_i32_10 = arith.constant 0 : i32
    %14 = vector.broadcast %c0_i32_10 : i32 to vector<16x1xi32>
    %15 = arith.cmpi slt, %11, %14 : vector<16x1xi32>
    %c0_i32_11 = arith.constant 0 : i32
    %16 = arith.cmpi slt, %9, %c0_i32_11 : i32
    %17 = vector.broadcast %16 : i1 to vector<16x1xi1>
    %18 = vector.broadcast %17 : vector<16x1xi1> to vector<16x1xi1>
    %19 = arith.xori %15, %18 : vector<16x1xi1>
    %20 = arith.andi %19, %13 : vector<16x1xi1>
    %21 = vector.broadcast %9 : i32 to vector<16x1xi32>
    %22 = arith.addi %11, %21 : vector<16x1xi32>
    %23 = arith.select %20, %22, %11 : vector<16x1xi1>, vector<16x1xi32>
    %c0_i32_12 = arith.constant 0 : i32
    %24 = vector.broadcast %c0_i32_12 : i32 to vector<16x1xi32>
    %25 = arith.cmpi ne, %23, %24 : vector<16x1xi32>
    %26 = arith.extui %25 : vector<16x1xi1> to vector<16x1xi32>
    %27 = arith.sitofp %26 : vector<16x1xi32> to vector<16x1xf32>
    %c3_i32 = arith.constant 3 : i32
    %28 = vector.broadcast %c3_i32 : i32 to vector<16x1xi32>
    %29 = arith.cmpi ne, %23, %28 : vector<16x1xi32>
    %30 = arith.extui %29 : vector<16x1xi1> to vector<16x1xi32>
    %31 = arith.sitofp %30 : vector<16x1xi32> to vector<16x1xf32>
    %cst_13 = arith.constant 0.000000e+00 : f32
    %32 = vector.broadcast %cst_13 : f32 to vector<16x128xf32>
    %c3 = arith.constant 3 : index
    %c0_14 = arith.constant 0 : index
    %33 = vector.load %arg25[%c3, %c0_14] : memref<32x128xf32, #tpu.memory_space<vmem>>, vector<16x128xf32>
    %34 = vector.broadcast %27 : vector<16x1xf32> to vector<16x128xf32>
    %35 = arith.mulf %33, %34 : vector<16x128xf32>
    %c0_15 = arith.constant 0 : index
    %c0_16 = arith.constant 0 : index
    %c0_17 = arith.constant 0 : index
    %36 = vector.load %arg2[%c0_15, %c0_16, %c0_17] : memref<9x128x128xf32, #tpu.memory_space<vmem>>, vector<1x128x128xf32>
    %37 = vector.shape_cast %36 : vector<1x128x128xf32> to vector<128x128xf32>
    %cst_18 = arith.constant dense<0.000000e+00> : vector<16x128xf32>
    %38 = tpu.matmul %35, %37, %cst_18 {dimension_numbers = #tpu.dot_dimension_numbers<[1], [0], [0], [1], [0, 0, 1, 1], [], []>} : vector<16x128xf32>, vector<128x128xf32>, vector<16x128xf32> -> vector<16x128xf32>
    %39 = arith.addf %32, %38 : vector<16x128xf32>
    %c4 = arith.constant 4 : index
    %c0_19 = arith.constant 0 : index
    %40 = vector.load %arg25[%c4, %c0_19] : memref<32x128xf32, #tpu.memory_space<vmem>>, vector<16x128xf32>
    %c1 = arith.constant 1 : index
    %c0_20 = arith.constant 0 : index
    %c0_21 = arith.constant 0 : index
    %41 = vector.load %arg2[%c1, %c0_20, %c0_21] : memref<9x128x128xf32, #tpu.memory_space<vmem>>, vector<1x128x128xf32>
    %42 = vector.shape_cast %41 : vector<1x128x128xf32> to vector<128x128xf32>
    %cst_22 = arith.constant dense<0.000000e+00> : vector<16x128xf32>
    %43 = tpu.matmul %40, %42, %cst_22 {dimension_numbers = #tpu.dot_dimension_numbers<[1], [0], [0], [1], [0, 0, 1, 1], [], []>} : vector<16x128xf32>, vector<128x128xf32>, vector<16x128xf32> -> vector<16x128xf32>
    %44 = arith.addf %39, %43 : vector<16x128xf32>
    %c5 = arith.constant 5 : index
    %c0_23 = arith.constant 0 : index
    %45 = vector.load %arg25[%c5, %c0_23] : memref<32x128xf32, #tpu.memory_space<vmem>>, vector<16x128xf32>
    %46 = vector.broadcast %31 : vector<16x1xf32> to vector<16x128xf32>
    %47 = arith.mulf %45, %46 : vector<16x128xf32>
    %c2 = arith.constant 2 : index
    %c0_24 = arith.constant 0 : index
    %c0_25 = arith.constant 0 : index
    %48 = vector.load %arg2[%c2, %c0_24, %c0_25] : memref<9x128x128xf32, #tpu.memory_space<vmem>>, vector<1x128x128xf32>
    %49 = vector.shape_cast %48 : vector<1x128x128xf32> to vector<128x128xf32>
    %cst_26 = arith.constant dense<0.000000e+00> : vector<16x128xf32>
    %50 = tpu.matmul %47, %49, %cst_26 {dimension_numbers = #tpu.dot_dimension_numbers<[1], [0], [0], [1], [0, 0, 1, 1], [], []>} : vector<16x128xf32>, vector<128x128xf32>, vector<16x128xf32> -> vector<16x128xf32>
    %51 = arith.addf %44, %50 : vector<16x128xf32>
    %c7 = arith.constant 7 : index
    %c0_27 = arith.constant 0 : index
    %52 = vector.load %arg25[%c7, %c0_27] : memref<32x128xf32, #tpu.memory_space<vmem>>, vector<16x128xf32>
    %53 = vector.broadcast %27 : vector<16x1xf32> to vector<16x128xf32>
    %54 = arith.mulf %52, %53 : vector<16x128xf32>
    %c3_28 = arith.constant 3 : index
    %c0_29 = arith.constant 0 : index
    %c0_30 = arith.constant 0 : index
    %55 = vector.load %arg2[%c3_28, %c0_29, %c0_30] : memref<9x128x128xf32, #tpu.memory_space<vmem>>, vector<1x128x128xf32>
    %56 = vector.shape_cast %55 : vector<1x128x128xf32> to vector<128x128xf32>
    %cst_31 = arith.constant dense<0.000000e+00> : vector<16x128xf32>
    %57 = tpu.matmul %54, %56, %cst_31 {dimension_numbers = #tpu.dot_dimension_numbers<[1], [0], [0], [1], [0, 0, 1, 1], [], []>} : vector<16x128xf32>, vector<128x128xf32>, vector<16x128xf32> -> vector<16x128xf32>
    %58 = arith.addf %51, %57 : vector<16x128xf32>
    %c8_32 = arith.constant 8 : index
    %c0_33 = arith.constant 0 : index
    %59 = vector.load %arg25[%c8_32, %c0_33] : memref<32x128xf32, #tpu.memory_space<vmem>>, vector<16x128xf32>
    %c4_34 = arith.constant 4 : index
    %c0_35 = arith.constant 0 : index
    %c0_36 = arith.constant 0 : index
    %60 = vector.load %arg2[%c4_34, %c0_35, %c0_36] : memref<9x128x128xf32, #tpu.memory_space<vmem>>, vector<1x128x128xf32>
    %61 = vector.shape_cast %60 : vector<1x128x128xf32> to vector<128x128xf32>
    %cst_37 = arith.constant dense<0.000000e+00> : vector<16x128xf32>
    %62 = tpu.matmul %59, %61, %cst_37 {dimension_numbers = #tpu.dot_dimension_numbers<[1], [0], [0], [1], [0, 0, 1, 1], [], []>} : vector<16x128xf32>, vector<128x128xf32>, vector<16x128xf32> -> vector<16x128xf32>
    %63 = arith.addf %58, %62 : vector<16x128xf32>
    %c9 = arith.constant 9 : index
    %c0_38 = arith.constant 0 : index
    %64 = vector.load %arg25[%c9, %c0_38] : memref<32x128xf32, #tpu.memory_space<vmem>>, vector<16x128xf32>
    %65 = vector.broadcast %31 : vector<16x1xf32> to vector<16x128xf32>
    %66 = arith.mulf %64, %65 : vector<16x128xf32>
    %c5_39 = arith.constant 5 : index
    %c0_40 = arith.constant 0 : index
    %c0_41 = arith.constant 0 : index
    %67 = vector.load %arg2[%c5_39, %c0_40, %c0_41] : memref<9x128x128xf32, #tpu.memory_space<vmem>>, vector<1x128x128xf32>
    %68 = vector.shape_cast %67 : vector<1x128x128xf32> to vector<128x128xf32>
    %cst_42 = arith.constant dense<0.000000e+00> : vector<16x128xf32>
    %69 = tpu.matmul %66, %68, %cst_42 {dimension_numbers = #tpu.dot_dimension_numbers<[1], [0], [0], [1], [0, 0, 1, 1], [], []>} : vector<16x128xf32>, vector<128x128xf32>, vector<16x128xf32> -> vector<16x128xf32>
    %70 = arith.addf %63, %69 : vector<16x128xf32>
    %c11 = arith.constant 11 : index
    %c0_43 = arith.constant 0 : index
    %71 = vector.load %arg25[%c11, %c0_43] : memref<32x128xf32, #tpu.memory_space<vmem>>, vector<16x128xf32>
    %72 = vector.broadcast %27 : vector<16x1xf32> to vector<16x128xf32>
    %73 = arith.mulf %71, %72 : vector<16x128xf32>
    %c6 = arith.constant 6 : index
    %c0_44 = arith.constant 0 : index
    %c0_45 = arith.constant 0 : index
    %74 = vector.load %arg2[%c6, %c0_44, %c0_45] : memref<9x128x128xf32, #tpu.memory_space<vmem>>, vector<1x128x128xf32>
    %75 = vector.shape_cast %74 : vector<1x128x128xf32> to vector<128x128xf32>
    %cst_46 = arith.constant dense<0.000000e+00> : vector<16x128xf32>
    %76 = tpu.matmul %73, %75, %cst_46 {dimension_numbers = #tpu.dot_dimension_numbers<[1], [0], [0], [1], [0, 0, 1, 1], [], []>} : vector<16x128xf32>, vector<128x128xf32>, vector<16x128xf32> -> vector<16x128xf32>
    %77 = arith.addf %70, %76 : vector<16x128xf32>
    %c12 = arith.constant 12 : index
    %c0_47 = arith.constant 0 : index
    %78 = vector.load %arg25[%c12, %c0_47] : memref<32x128xf32, #tpu.memory_space<vmem>>, vector<16x128xf32>
    %c7_48 = arith.constant 7 : index
    %c0_49 = arith.constant 0 : index
    %c0_50 = arith.constant 0 : index
    %79 = vector.load %arg2[%c7_48, %c0_49, %c0_50] : memref<9x128x128xf32, #tpu.memory_space<vmem>>, vector<1x128x128xf32>
    %80 = vector.shape_cast %79 : vector<1x128x128xf32> to vector<128x128xf32>
    %cst_51 = arith.constant dense<0.000000e+00> : vector<16x128xf32>
    %81 = tpu.matmul %78, %80, %cst_51 {dimension_numbers = #tpu.dot_dimension_numbers<[1], [0], [0], [1], [0, 0, 1, 1], [], []>} : vector<16x128xf32>, vector<128x128xf32>, vector<16x128xf32> -> vector<16x128xf32>
    %82 = arith.addf %77, %81 : vector<16x128xf32>
    %c13 = arith.constant 13 : index
    %c0_52 = arith.constant 0 : index
    %83 = vector.load %arg25[%c13, %c0_52] : memref<32x128xf32, #tpu.memory_space<vmem>>, vector<16x128xf32>
    %84 = vector.broadcast %31 : vector<16x1xf32> to vector<16x128xf32>
    %85 = arith.mulf %83, %84 : vector<16x128xf32>
    %c8_53 = arith.constant 8 : index
    %c0_54 = arith.constant 0 : index
    %c0_55 = arith.constant 0 : index
    %86 = vector.load %arg2[%c8_53, %c0_54, %c0_55] : memref<9x128x128xf32, #tpu.memory_space<vmem>>, vector<1x128x128xf32>
    %87 = vector.shape_cast %86 : vector<1x128x128xf32> to vector<128x128xf32>
    %cst_56 = arith.constant dense<0.000000e+00> : vector<16x128xf32>
    %88 = tpu.matmul %85, %87, %cst_56 {dimension_numbers = #tpu.dot_dimension_numbers<[1], [0], [0], [1], [0, 0, 1, 1], [], []>} : vector<16x128xf32>, vector<128x128xf32>, vector<16x128xf32> -> vector<16x128xf32>
    %89 = arith.addf %82, %88 : vector<16x128xf32>
    %c0_57 = arith.constant 0 : index
    %c0_58 = arith.constant 0 : index
    %90 = vector.load %arg3[%c0_57, %c0_58] : memref<1x128xf32, #tpu.memory_space<vmem>>, vector<1x128xf32>
    %c0_59 = arith.constant 0 : index
    %c0_60 = arith.constant 0 : index
    %91 = vector.load %arg4[%c0_59, %c0_60] : memref<1x128xf32, #tpu.memory_space<vmem>>, vector<1x128xf32>
    %cst_61 = arith.constant 1.000000e+00 : f32
    %92 = vector.broadcast %cst_61 : f32 to vector<1x16xf32>
    %cst_62 = arith.constant dense<0.000000e+00> : vector<1x128xf32>
    %93 = tpu.matmul %92, %89, %cst_62 {dimension_numbers = #tpu.dot_dimension_numbers<[1], [0], [0], [1], [0, 0, 1, 1], [], []>} : vector<1x16xf32>, vector<16x128xf32>, vector<1x128xf32> -> vector<1x128xf32>
    %94 = arith.mulf %89, %89 : vector<16x128xf32>
    %cst_63 = arith.constant dense<0.000000e+00> : vector<1x128xf32>
    %95 = tpu.matmul %92, %94, %cst_63 {dimension_numbers = #tpu.dot_dimension_numbers<[1], [0], [0], [1], [0, 0, 1, 1], [], []>} : vector<1x16xf32>, vector<16x128xf32>, vector<1x128xf32> -> vector<1x128xf32>
    %cst_64 = arith.constant dense<0.000000e+00> : vector<1x32xf32>
    %96 = tpu.matmul %93, %0, %cst_64 {dimension_numbers = #tpu.dot_dimension_numbers<[1], [0], [0], [1], [0, 0, 1, 1], [], []>} : vector<1x128xf32>, vector<128x32xf32>, vector<1x32xf32> -> vector<1x32xf32>
    %cst_65 = arith.constant dense<0.000000e+00> : vector<1x32xf32>
    %97 = tpu.matmul %95, %0, %cst_65 {dimension_numbers = #tpu.dot_dimension_numbers<[1], [0], [0], [1], [0, 0, 1, 1], [], []>} : vector<1x128xf32>, vector<128x32xf32>, vector<1x32xf32> -> vector<1x32xf32>
    %cst_66 = arith.constant 3.125000e-02 : f32
    %98 = vector.broadcast %cst_66 : f32 to vector<1x32xf32>
    %99 = arith.mulf %96, %98 : vector<1x32xf32>
    %cst_67 = arith.constant 3.125000e-02 : f32
    %100 = vector.broadcast %cst_67 : f32 to vector<1x32xf32>
    %101 = arith.mulf %97, %100 : vector<1x32xf32>
    %102 = arith.mulf %99, %99 : vector<1x32xf32>
    %103 = arith.subf %101, %102 : vector<1x32xf32>
    %cst_68 = arith.constant 0.000000e+00 : f32
    %104 = vector.broadcast %cst_68 : f32 to vector<1x32xf32>
    %105 = arith.maximumf %103, %104 : vector<1x32xf32>
    %cst_69 = arith.constant 9.99999974E-6 : f32
    %106 = vector.broadcast %cst_69 : f32 to vector<1x32xf32>
    %107 = arith.addf %105, %106 : vector<1x32xf32>
    %108 = math.rsqrt %107 : vector<1x32xf32>
    %cst_70 = arith.constant dense<0.000000e+00> : vector<1x128xf32>
    %109 = tpu.matmul %99, %1, %cst_70 {dimension_numbers = #tpu.dot_dimension_numbers<[1], [0], [0], [1], [0, 0, 1, 1], [], []>} : vector<1x32xf32>, vector<32x128xf32>, vector<1x128xf32> -> vector<1x128xf32>
    %cst_71 = arith.constant dense<0.000000e+00> : vector<1x128xf32>
    %110 = tpu.matmul %108, %1, %cst_71 {dimension_numbers = #tpu.dot_dimension_numbers<[1], [0], [0], [1], [0, 0, 1, 1], [], []>} : vector<1x32xf32>, vector<32x128xf32>, vector<1x128xf32> -> vector<1x128xf32>
    %111 = arith.mulf %110, %90 : vector<1x128xf32>
    %112 = arith.mulf %109, %111 : vector<1x128xf32>
    %113 = arith.subf %91, %112 : vector<1x128xf32>
    %114 = vector.broadcast %111 : vector<1x128xf32> to vector<16x128xf32>
    %115 = arith.mulf %89, %114 : vector<16x128xf32>
    %116 = vector.broadcast %113 : vector<1x128xf32> to vector<16x128xf32>
    %117 = arith.addf %115, %116 : vector<16x128xf32>
    %cst_72 = arith.constant 0.000000e+00 : f32
    %118 = vector.broadcast %cst_72 : f32 to vector<16x128xf32>
    %119 = arith.maximumf %117, %118 : vector<16x128xf32>
    %c0_73 = arith.constant 0 : index
    %c0_74 = arith.constant 0 : index
    %120 = vector.load %arg26[%c0_73, %c0_74] : memref<16x128xf32, #tpu.memory_space<vmem>>, vector<16x128xf32>
    tpu.vector_store %arg26[%c0_73, %c0_74], %119 {strides = array<i32>} : memref<16x128xf32, #tpu.memory_space<vmem>>, vector<16x128xf32>,
    %c0_75 = arith.constant 0 : index
    %c0_76 = arith.constant 0 : index
    %c0_77 = arith.constant 0 : index
    %121 = vector.load %arg7[%c0_75, %c0_76, %c0_77] : memref<1x64x64xf32, #tpu.memory_space<vmem>>, vector<1x64x64xf32>
    %122 = vector.shape_cast %121 : vector<1x64x64xf32> to vector<64x64xf32>
    %c0_78 = arith.constant 0 : index
    %c0_79 = arith.constant 0 : index
    %123 = vector.load %arg9[%c0_78, %c0_79] : memref<64x128xf32, #tpu.memory_space<vmem>>, vector<64x128xf32>
    %cst_80 = arith.constant dense<0.000000e+00> : vector<64x128xf32>
    %124 = tpu.matmul %122, %123, %cst_80 {dimension_numbers = #tpu.dot_dimension_numbers<[1], [0], [0], [1], [0, 0, 1, 1], [], []>} : vector<64x64xf32>, vector<64x128xf32>, vector<64x128xf32> -> vector<64x128xf32>
    %c0_81 = arith.constant 0 : index
    %c0_82 = arith.constant 0 : index
    %125 = vector.load %arg10[%c0_81, %c0_82] : memref<1x128xf32, #tpu.memory_space<vmem>>, vector<1x128xf32>
    %c0_83 = arith.constant 0 : index
    %c0_84 = arith.constant 0 : index
    %126 = vector.load %arg11[%c0_83, %c0_84] : memref<1x128xf32, #tpu.memory_space<vmem>>, vector<1x128xf32>
    %cst_85 = arith.constant 1.000000e+00 : f32
    %127 = vector.broadcast %cst_85 : f32 to vector<1x64xf32>
    %cst_86 = arith.constant dense<0.000000e+00> : vector<1x128xf32>
    %128 = tpu.matmul %127, %124, %cst_86 {dimension_numbers = #tpu.dot_dimension_numbers<[1], [0], [0], [1], [0, 0, 1, 1], [], []>} : vector<1x64xf32>, vector<64x128xf32>, vector<1x128xf32> -> vector<1x128xf32>
    %129 = arith.mulf %124, %124 : vector<64x128xf32>
    %cst_87 = arith.constant dense<0.000000e+00> : vector<1x128xf32>
    %130 = tpu.matmul %127, %129, %cst_87 {dimension_numbers = #tpu.dot_dimension_numbers<[1], [0], [0], [1], [0, 0, 1, 1], [], []>} : vector<1x64xf32>, vector<64x128xf32>, vector<1x128xf32> -> vector<1x128xf32>
    %cst_88 = arith.constant dense<0.000000e+00> : vector<1x32xf32>
    %131 = tpu.matmul %128, %0, %cst_88 {dimension_numbers = #tpu.dot_dimension_numbers<[1], [0], [0], [1], [0, 0, 1, 1], [], []>} : vector<1x128xf32>, vector<128x32xf32>, vector<1x32xf32> -> vector<1x32xf32>
    %cst_89 = arith.constant dense<0.000000e+00> : vector<1x32xf32>
    %132 = tpu.matmul %130, %0, %cst_89 {dimension_numbers = #tpu.dot_dimension_numbers<[1], [0], [0], [1], [0, 0, 1, 1], [], []>} : vector<1x128xf32>, vector<128x32xf32>, vector<1x32xf32> -> vector<1x32xf32>
    %cst_90 = arith.constant 7.812500e-03 : f32
    %133 = vector.broadcast %cst_90 : f32 to vector<1x32xf32>
    %134 = arith.mulf %131, %133 : vector<1x32xf32>
    %cst_91 = arith.constant 7.812500e-03 : f32
    %135 = vector.broadcast %cst_91 : f32 to vector<1x32xf32>
    %136 = arith.mulf %132, %135 : vector<1x32xf32>
    %137 = arith.mulf %134, %134 : vector<1x32xf32>
    %138 = arith.subf %136, %137 : vector<1x32xf32>
    %cst_92 = arith.constant 0.000000e+00 : f32
    %139 = vector.broadcast %cst_92 : f32 to vector<1x32xf32>
    %140 = arith.maximumf %138, %139 : vector<1x32xf32>
    %cst_93 = arith.constant 9.99999974E-6 : f32
    %141 = vector.broadcast %cst_93 : f32 to vector<1x32xf32>
    %142 = arith.addf %140, %141 : vector<1x32xf32>
    %143 = math.rsqrt %142 : vector<1x32xf32>
    %cst_94 = arith.constant dense<0.000000e+00> : vector<1x128xf32>
    %144 = tpu.matmul %134, %1, %cst_94 {dimension_numbers = #tpu.dot_dimension_numbers<[1], [0], [0], [1], [0, 0, 1, 1], [], []>} : vector<1x32xf32>, vector<32x128xf32>, vector<1x128xf32> -> vector<1x128xf32>
    %cst_95 = arith.constant dense<0.000000e+00> : vector<1x128xf32>
    %145 = tpu.matmul %143, %1, %cst_95 {dimension_numbers = #tpu.dot_dimension_numbers<[1], [0], [0], [1], [0, 0, 1, 1], [], []>} : vector<1x32xf32>, vector<32x128xf32>, vector<1x128xf32> -> vector<1x128xf32>
    %146 = arith.mulf %145, %125 : vector<1x128xf32>
    %147 = arith.mulf %144, %146 : vector<1x128xf32>
    %148 = arith.subf %126, %147 : vector<1x128xf32>
    %149 = vector.broadcast %146 : vector<1x128xf32> to vector<64x128xf32>
    %150 = arith.mulf %124, %149 : vector<64x128xf32>
    %151 = vector.broadcast %148 : vector<1x128xf32> to vector<64x128xf32>
    %152 = arith.addf %150, %151 : vector<64x128xf32>
    %c0_96 = arith.constant 0 : index
    %c0_97 = arith.constant 0 : index
    %153 = vector.load %arg8[%c0_96, %c0_97] : memref<64x16xf32, #tpu.memory_space<vmem>>, vector<64x16xf32>
    %c0_98 = arith.constant 0 : index
    %c0_99 = arith.constant 0 : index
    %154 = vector.load %arg26[%c0_98, %c0_99] : memref<16x128xf32, #tpu.memory_space<vmem>>, vector<16x128xf32>
    %cst_100 = arith.constant dense<0.000000e+00> : vector<64x128xf32>
    %155 = tpu.matmul %153, %154, %cst_100 {dimension_numbers = #tpu.dot_dimension_numbers<[1], [0], [0], [1], [0, 0, 1, 1], [], []>} : vector<64x16xf32>, vector<16x128xf32>, vector<64x128xf32> -> vector<64x128xf32>
    %156 = arith.addf %152, %155 : vector<64x128xf32>
    %cst_101 = arith.constant 0.000000e+00 : f32
    %157 = vector.broadcast %cst_101 : f32 to vector<96x128xf32>
    %c0_102 = arith.constant 0 : index
    %c0_103 = arith.constant 0 : index
    %158 = vector.load %arg27[%c0_102, %c0_103] : memref<96x128xf32, #tpu.memory_space<vmem>>, vector<96x128xf32>
    tpu.vector_store %arg27[%c0_102, %c0_103], %157 {strides = array<i32>} : memref<96x128xf32, #tpu.memory_space<vmem>>, vector<96x128xf32>,
    %c16 = arith.constant 16 : index
    %c0_104 = arith.constant 0 : index
    %159 = vector.load %arg27[%c16, %c0_104] : memref<96x128xf32, #tpu.memory_space<vmem>>, vector<64x128xf32>
    tpu.vector_store %arg27[%c16, %c0_104], %156 {strides = array<i32>} : memref<96x128xf32, #tpu.memory_space<vmem>>, vector<64x128xf32>,
    %160 = tpu.iota {dimensions = array<i32: 0>} : vector<64x1xi32>
    %c8_i32 = arith.constant 8 : i32
    %c0_i32_105 = arith.constant 0 : i32
    %161 = arith.cmpi eq, %c8_i32, %c0_i32_105 : i32
    %c1_i32_106 = arith.constant 1 : i32
    %162 = arith.select %161, %c1_i32_106, %c8_i32 : i32
    %163 = vector.broadcast %162 : i32 to vector<64x1xi32>
    %164 = arith.remsi %160, %163 : vector<64x1xi32>
    %c0_i32_107 = arith.constant 0 : i32
    %165 = vector.broadcast %c0_i32_107 : i32 to vector<64x1xi32>
    %166 = arith.cmpi ne, %164, %165 : vector<64x1xi32>
    %c0_i32_108 = arith.constant 0 : i32
    %167 = vector.broadcast %c0_i32_108 : i32 to vector<64x1xi32>
    %168 = arith.cmpi slt, %164, %167 : vector<64x1xi32>
    %c0_i32_109 = arith.constant 0 : i32
    %169 = arith.cmpi slt, %162, %c0_i32_109 : i32
    %170 = vector.broadcast %169 : i1 to vector<64x1xi1>
    %171 = vector.broadcast %170 : vector<64x1xi1> to vector<64x1xi1>
    %172 = arith.xori %168, %171 : vector<64x1xi1>
    %173 = arith.andi %172, %166 : vector<64x1xi1>
    %174 = vector.broadcast %162 : i32 to vector<64x1xi32>
    %175 = arith.addi %164, %174 : vector<64x1xi32>
    %176 = arith.select %173, %175, %164 : vector<64x1xi1>, vector<64x1xi32>
    %c0_i32_110 = arith.constant 0 : i32
    %177 = vector.broadcast %c0_i32_110 : i32 to vector<64x1xi32>
    %178 = arith.cmpi ne, %176, %177 : vector<64x1xi32>
    %179 = arith.extui %178 : vector<64x1xi1> to vector<64x1xi32>
    %180 = arith.sitofp %179 : vector<64x1xi32> to vector<64x1xf32>
    %c7_i32 = arith.constant 7 : i32
    %181 = vector.broadcast %c7_i32 : i32 to vector<64x1xi32>
    %182 = arith.cmpi ne, %176, %181 : vector<64x1xi32>
    %183 = arith.extui %182 : vector<64x1xi1> to vector<64x1xi32>
    %184 = arith.sitofp %183 : vector<64x1xi32> to vector<64x1xf32>
    %cst_111 = arith.constant 0.000000e+00 : f32
    %185 = vector.broadcast %cst_111 : f32 to vector<64x128xf32>
    %c7_112 = arith.constant 7 : index
    %c0_113 = arith.constant 0 : index
    %186 = vector.load %arg27[%c7_112, %c0_113] : memref<96x128xf32, #tpu.memory_space<vmem>>, vector<64x128xf32>
    %187 = vector.broadcast %180 : vector<64x1xf32> to vector<64x128xf32>
    %188 = arith.mulf %186, %187 : vector<64x128xf32>
    %c0_114 = arith.constant 0 : index
    %c0_115 = arith.constant 0 : index
    %c0_116 = arith.constant 0 : index
    %189 = vector.load %arg12[%c0_114, %c0_115, %c0_116] : memref<9x128x128xf32, #tpu.memory_space<vmem>>, vector<1x128x128xf32>
    %190 = vector.shape_cast %189 : vector<1x128x128xf32> to vector<128x128xf32>
    %cst_117 = arith.constant dense<0.000000e+00> : vector<64x128xf32>
    %191 = tpu.matmul %188, %190, %cst_117 {dimension_numbers = #tpu.dot_dimension_numbers<[1], [0], [0], [1], [0, 0, 1, 1], [], []>} : vector<64x128xf32>, vector<128x128xf32>, vector<64x128xf32> -> vector<64x128xf32>
    %192 = arith.addf %185, %191 : vector<64x128xf32>
    %c8_118 = arith.constant 8 : index
    %c0_119 = arith.constant 0 : index
    %193 = vector.load %arg27[%c8_118, %c0_119] : memref<96x128xf32, #tpu.memory_space<vmem>>, vector<64x128xf32>
    %c1_120 = arith.constant 1 : index
    %c0_121 = arith.constant 0 : index
    %c0_122 = arith.constant 0 : index
    %194 = vector.load %arg12[%c1_120, %c0_121, %c0_122] : memref<9x128x128xf32, #tpu.memory_space<vmem>>, vector<1x128x128xf32>
    %195 = vector.shape_cast %194 : vector<1x128x128xf32> to vector<128x128xf32>
    %cst_123 = arith.constant dense<0.000000e+00> : vector<64x128xf32>
    %196 = tpu.matmul %193, %195, %cst_123 {dimension_numbers = #tpu.dot_dimension_numbers<[1], [0], [0], [1], [0, 0, 1, 1], [], []>} : vector<64x128xf32>, vector<128x128xf32>, vector<64x128xf32> -> vector<64x128xf32>
    %197 = arith.addf %192, %196 : vector<64x128xf32>
    %c9_124 = arith.constant 9 : index
    %c0_125 = arith.constant 0 : index
    %198 = vector.load %arg27[%c9_124, %c0_125] : memref<96x128xf32, #tpu.memory_space<vmem>>, vector<64x128xf32>
    %199 = vector.broadcast %184 : vector<64x1xf32> to vector<64x128xf32>
    %200 = arith.mulf %198, %199 : vector<64x128xf32>
    %c2_126 = arith.constant 2 : index
    %c0_127 = arith.constant 0 : index
    %c0_128 = arith.constant 0 : index
    %201 = vector.load %arg12[%c2_126, %c0_127, %c0_128] : memref<9x128x128xf32, #tpu.memory_space<vmem>>, vector<1x128x128xf32>
    %202 = vector.shape_cast %201 : vector<1x128x128xf32> to vector<128x128xf32>
    %cst_129 = arith.constant dense<0.000000e+00> : vector<64x128xf32>
    %203 = tpu.matmul %200, %202, %cst_129 {dimension_numbers = #tpu.dot_dimension_numbers<[1], [0], [0], [1], [0, 0, 1, 1], [], []>} : vector<64x128xf32>, vector<128x128xf32>, vector<64x128xf32> -> vector<64x128xf32>
    %204 = arith.addf %197, %203 : vector<64x128xf32>
    %c15 = arith.constant 15 : index
    %c0_130 = arith.constant 0 : index
    %205 = vector.load %arg27[%c15, %c0_130] : memref<96x128xf32, #tpu.memory_space<vmem>>, vector<64x128xf32>
    %206 = vector.broadcast %180 : vector<64x1xf32> to vector<64x128xf32>
    %207 = arith.mulf %205, %206 : vector<64x128xf32>
    %c3_131 = arith.constant 3 : index
    %c0_132 = arith.constant 0 : index
    %c0_133 = arith.constant 0 : index
    %208 = vector.load %arg12[%c3_131, %c0_132, %c0_133] : memref<9x128x128xf32, #tpu.memory_space<vmem>>, vector<1x128x128xf32>
    %209 = vector.shape_cast %208 : vector<1x128x128xf32> to vector<128x128xf32>
    %cst_134 = arith.constant dense<0.000000e+00> : vector<64x128xf32>
    %210 = tpu.matmul %207, %209, %cst_134 {dimension_numbers = #tpu.dot_dimension_numbers<[1], [0], [0], [1], [0, 0, 1, 1], [], []>} : vector<64x128xf32>, vector<128x128xf32>, vector<64x128xf32> -> vector<64x128xf32>
    %211 = arith.addf %204, %210 : vector<64x128xf32>
    %c16_135 = arith.constant 16 : index
    %c0_136 = arith.constant 0 : index
    %212 = vector.load %arg27[%c16_135, %c0_136] : memref<96x128xf32, #tpu.memory_space<vmem>>, vector<64x128xf32>
    %c4_137 = arith.constant 4 : index
    %c0_138 = arith.constant 0 : index
    %c0_139 = arith.constant 0 : index
    %213 = vector.load %arg12[%c4_137, %c0_138, %c0_139] : memref<9x128x128xf32, #tpu.memory_space<vmem>>, vector<1x128x128xf32>
    %214 = vector.shape_cast %213 : vector<1x128x128xf32> to vector<128x128xf32>
    %cst_140 = arith.constant dense<0.000000e+00> : vector<64x128xf32>
    %215 = tpu.matmul %212, %214, %cst_140 {dimension_numbers = #tpu.dot_dimension_numbers<[1], [0], [0], [1], [0, 0, 1, 1], [], []>} : vector<64x128xf32>, vector<128x128xf32>, vector<64x128xf32> -> vector<64x128xf32>
    %216 = arith.addf %211, %215 : vector<64x128xf32>
    %c17 = arith.constant 17 : index
    %c0_141 = arith.constant 0 : index
    %217 = vector.load %arg27[%c17, %c0_141] : memref<96x128xf32, #tpu.memory_space<vmem>>, vector<64x128xf32>
    %218 = vector.broadcast %184 : vector<64x1xf32> to vector<64x128xf32>
    %219 = arith.mulf %217, %218 : vector<64x128xf32>
    %c5_142 = arith.constant 5 : index
    %c0_143 = arith.constant 0 : index
    %c0_144 = arith.constant 0 : index
    %220 = vector.load %arg12[%c5_142, %c0_143, %c0_144] : memref<9x128x128xf32, #tpu.memory_space<vmem>>, vector<1x128x128xf32>
    %221 = vector.shape_cast %220 : vector<1x128x128xf32> to vector<128x128xf32>
    %cst_145 = arith.constant dense<0.000000e+00> : vector<64x128xf32>
    %222 = tpu.matmul %219, %221, %cst_145 {dimension_numbers = #tpu.dot_dimension_numbers<[1], [0], [0], [1], [0, 0, 1, 1], [], []>} : vector<64x128xf32>, vector<128x128xf32>, vector<64x128xf32> -> vector<64x128xf32>
    %223 = arith.addf %216, %222 : vector<64x128xf32>
    %c23 = arith.constant 23 : index
    %c0_146 = arith.constant 0 : index
    %224 = vector.load %arg27[%c23, %c0_146] : memref<96x128xf32, #tpu.memory_space<vmem>>, vector<64x128xf32>
    %225 = vector.broadcast %180 : vector<64x1xf32> to vector<64x128xf32>
    %226 = arith.mulf %224, %225 : vector<64x128xf32>
    %c6_147 = arith.constant 6 : index
    %c0_148 = arith.constant 0 : index
    %c0_149 = arith.constant 0 : index
    %227 = vector.load %arg12[%c6_147, %c0_148, %c0_149] : memref<9x128x128xf32, #tpu.memory_space<vmem>>, vector<1x128x128xf32>
    %228 = vector.shape_cast %227 : vector<1x128x128xf32> to vector<128x128xf32>
    %cst_150 = arith.constant dense<0.000000e+00> : vector<64x128xf32>
    %229 = tpu.matmul %226, %228, %cst_150 {dimension_numbers = #tpu.dot_dimension_numbers<[1], [0], [0], [1], [0, 0, 1, 1], [], []>} : vector<64x128xf32>, vector<128x128xf32>, vector<64x128xf32> -> vector<64x128xf32>
    %230 = arith.addf %223, %229 : vector<64x128xf32>
    %c24 = arith.constant 24 : index
    %c0_151 = arith.constant 0 : index
    %231 = vector.load %arg27[%c24, %c0_151] : memref<96x128xf32, #tpu.memory_space<vmem>>, vector<64x128xf32>
    %c7_152 = arith.constant 7 : index
    %c0_153 = arith.constant 0 : index
    %c0_154 = arith.constant 0 : index
    %232 = vector.load %arg12[%c7_152, %c0_153, %c0_154] : memref<9x128x128xf32, #tpu.memory_space<vmem>>, vector<1x128x128xf32>
    %233 = vector.shape_cast %232 : vector<1x128x128xf32> to vector<128x128xf32>
    %cst_155 = arith.constant dense<0.000000e+00> : vector<64x128xf32>
    %234 = tpu.matmul %231, %233, %cst_155 {dimension_numbers = #tpu.dot_dimension_numbers<[1], [0], [0], [1], [0, 0, 1, 1], [], []>} : vector<64x128xf32>, vector<128x128xf32>, vector<64x128xf32> -> vector<64x128xf32>
    %235 = arith.addf %230, %234 : vector<64x128xf32>
    %c25 = arith.constant 25 : index
    %c0_156 = arith.constant 0 : index
    %236 = vector.load %arg27[%c25, %c0_156] : memref<96x128xf32, #tpu.memory_space<vmem>>, vector<64x128xf32>
    %237 = vector.broadcast %184 : vector<64x1xf32> to vector<64x128xf32>
    %238 = arith.mulf %236, %237 : vector<64x128xf32>
    %c8_157 = arith.constant 8 : index
    %c0_158 = arith.constant 0 : index
    %c0_159 = arith.constant 0 : index
    %239 = vector.load %arg12[%c8_157, %c0_158, %c0_159] : memref<9x128x128xf32, #tpu.memory_space<vmem>>, vector<1x128x128xf32>
    %240 = vector.shape_cast %239 : vector<1x128x128xf32> to vector<128x128xf32>
    %cst_160 = arith.constant dense<0.000000e+00> : vector<64x128xf32>
    %241 = tpu.matmul %238, %240, %cst_160 {dimension_numbers = #tpu.dot_dimension_numbers<[1], [0], [0], [1], [0, 0, 1, 1], [], []>} : vector<64x128xf32>, vector<128x128xf32>, vector<64x128xf32> -> vector<64x128xf32>
    %242 = arith.addf %235, %241 : vector<64x128xf32>
    %c0_161 = arith.constant 0 : index
    %c0_162 = arith.constant 0 : index
    %243 = vector.load %arg13[%c0_161, %c0_162] : memref<1x128xf32, #tpu.memory_space<vmem>>, vector<1x128xf32>
    %c0_163 = arith.constant 0 : index
    %c0_164 = arith.constant 0 : index
    %244 = vector.load %arg14[%c0_163, %c0_164] : memref<1x128xf32, #tpu.memory_space<vmem>>, vector<1x128xf32>
    %cst_165 = arith.constant 1.000000e+00 : f32
    %245 = vector.broadcast %cst_165 : f32 to vector<1x64xf32>
    %cst_166 = arith.constant dense<0.000000e+00> : vector<1x128xf32>
    %246 = tpu.matmul %245, %242, %cst_166 {dimension_numbers = #tpu.dot_dimension_numbers<[1], [0], [0], [1], [0, 0, 1, 1], [], []>} : vector<1x64xf32>, vector<64x128xf32>, vector<1x128xf32> -> vector<1x128xf32>
    %247 = arith.mulf %242, %242 : vector<64x128xf32>
    %cst_167 = arith.constant dense<0.000000e+00> : vector<1x128xf32>
    %248 = tpu.matmul %245, %247, %cst_167 {dimension_numbers = #tpu.dot_dimension_numbers<[1], [0], [0], [1], [0, 0, 1, 1], [], []>} : vector<1x64xf32>, vector<64x128xf32>, vector<1x128xf32> -> vector<1x128xf32>
    %cst_168 = arith.constant dense<0.000000e+00> : vector<1x32xf32>
    %249 = tpu.matmul %246, %0, %cst_168 {dimension_numbers = #tpu.dot_dimension_numbers<[1], [0], [0], [1], [0, 0, 1, 1], [], []>} : vector<1x128xf32>, vector<128x32xf32>, vector<1x32xf32> -> vector<1x32xf32>
    %cst_169 = arith.constant dense<0.000000e+00> : vector<1x32xf32>
    %250 = tpu.matmul %248, %0, %cst_169 {dimension_numbers = #tpu.dot_dimension_numbers<[1], [0], [0], [1], [0, 0, 1, 1], [], []>} : vector<1x128xf32>, vector<128x32xf32>, vector<1x32xf32> -> vector<1x32xf32>
    %cst_170 = arith.constant 7.812500e-03 : f32
    %251 = vector.broadcast %cst_170 : f32 to vector<1x32xf32>
    %252 = arith.mulf %249, %251 : vector<1x32xf32>
    %cst_171 = arith.constant 7.812500e-03 : f32
    %253 = vector.broadcast %cst_171 : f32 to vector<1x32xf32>
    %254 = arith.mulf %250, %253 : vector<1x32xf32>
    %255 = arith.mulf %252, %252 : vector<1x32xf32>
    %256 = arith.subf %254, %255 : vector<1x32xf32>
    %cst_172 = arith.constant 0.000000e+00 : f32
    %257 = vector.broadcast %cst_172 : f32 to vector<1x32xf32>
    %258 = arith.maximumf %256, %257 : vector<1x32xf32>
    %cst_173 = arith.constant 9.99999974E-6 : f32
    %259 = vector.broadcast %cst_173 : f32 to vector<1x32xf32>
    %260 = arith.addf %258, %259 : vector<1x32xf32>
    %261 = math.rsqrt %260 : vector<1x32xf32>
    %cst_174 = arith.constant dense<0.000000e+00> : vector<1x128xf32>
    %262 = tpu.matmul %252, %1, %cst_174 {dimension_numbers = #tpu.dot_dimension_numbers<[1], [0], [0], [1], [0, 0, 1, 1], [], []>} : vector<1x32xf32>, vector<32x128xf32>, vector<1x128xf32> -> vector<1x128xf32>
    %cst_175 = arith.constant dense<0.000000e+00> : vector<1x128xf32>
    %263 = tpu.matmul %261, %1, %cst_175 {dimension_numbers = #tpu.dot_dimension_numbers<[1], [0], [0], [1], [0, 0, 1, 1], [], []>} : vector<1x32xf32>, vector<32x128xf32>, vector<1x128xf32> -> vector<1x128xf32>
    %264 = arith.mulf %263, %243 : vector<1x128xf32>
    %265 = arith.mulf %262, %264 : vector<1x128xf32>
    %266 = arith.subf %244, %265 : vector<1x128xf32>
    %267 = vector.broadcast %264 : vector<1x128xf32> to vector<64x128xf32>
    %268 = arith.mulf %242, %267 : vector<64x128xf32>
    %269 = vector.broadcast %266 : vector<1x128xf32> to vector<64x128xf32>
    %270 = arith.addf %268, %269 : vector<64x128xf32>
    %cst_176 = arith.constant 0.000000e+00 : f32
    %271 = vector.broadcast %cst_176 : f32 to vector<64x128xf32>
    %272 = arith.maximumf %270, %271 : vector<64x128xf32>
    %c0_177 = arith.constant 0 : index
    %c0_178 = arith.constant 0 : index
    %c0_179 = arith.constant 0 : index
    %273 = vector.load %arg23[%c0_177, %c0_178, %c0_179] : memref<1x64x128xf32, #tpu.memory_space<vmem>>, vector<1x64x128xf32>
    %274 = vector.shape_cast %273 : vector<1x64x128xf32> to vector<64x128xf32>
    %275 = vector.shape_cast %272 : vector<64x128xf32> to vector<1x64x128xf32>
    tpu.vector_store %arg23[%c0_177, %c0_178, %c0_179], %275 {strides = array<i32>} : memref<1x64x128xf32, #tpu.memory_space<vmem>>, vector<1x64x128xf32>,
    %c0_180 = arith.constant 0 : index
    %c0_181 = arith.constant 0 : index
    %c0_182 = arith.constant 0 : index
    %276 = vector.load %arg15[%c0_180, %c0_181, %c0_182] : memref<1x256x32xf32, #tpu.memory_space<vmem>>, vector<1x256x32xf32>
    %277 = vector.shape_cast %276 : vector<1x256x32xf32> to vector<256x32xf32>
    %c0_183 = arith.constant 0 : index
    %c0_184 = arith.constant 0 : index
    %278 = vector.load %arg17[%c0_183, %c0_184] : memref<32x128xf32, #tpu.memory_space<vmem>>, vector<32x128xf32>
    %cst_185 = arith.constant dense<0.000000e+00> : vector<256x128xf32>
    %279 = tpu.matmul %277, %278, %cst_185 {dimension_numbers = #tpu.dot_dimension_numbers<[1], [0], [0], [1], [0, 0, 1, 1], [], []>} : vector<256x32xf32>, vector<32x128xf32>, vector<256x128xf32> -> vector<256x128xf32>
    %c0_186 = arith.constant 0 : index
    %c0_187 = arith.constant 0 : index
    %280 = vector.load %arg18[%c0_186, %c0_187] : memref<1x128xf32, #tpu.memory_space<vmem>>, vector<1x128xf32>
    %c0_188 = arith.constant 0 : index
    %c0_189 = arith.constant 0 : index
    %281 = vector.load %arg19[%c0_188, %c0_189] : memref<1x128xf32, #tpu.memory_space<vmem>>, vector<1x128xf32>
    %cst_190 = arith.constant 1.000000e+00 : f32
    %282 = vector.broadcast %cst_190 : f32 to vector<1x256xf32>
    %cst_191 = arith.constant dense<0.000000e+00> : vector<1x128xf32>
    %283 = tpu.matmul %282, %279, %cst_191 {dimension_numbers = #tpu.dot_dimension_numbers<[1], [0], [0], [1], [0, 0, 1, 1], [], []>} : vector<1x256xf32>, vector<256x128xf32>, vector<1x128xf32> -> vector<1x128xf32>
    %284 = arith.mulf %279, %279 : vector<256x128xf32>
    %cst_192 = arith.constant dense<0.000000e+00> : vector<1x128xf32>
    %285 = tpu.matmul %282, %284, %cst_192 {dimension_numbers = #tpu.dot_dimension_numbers<[1], [0], [0], [1], [0, 0, 1, 1], [], []>} : vector<1x256xf32>, vector<256x128xf32>, vector<1x128xf32> -> vector<1x128xf32>
    %cst_193 = arith.constant dense<0.000000e+00> : vector<1x32xf32>
    %286 = tpu.matmul %283, %0, %cst_193 {dimension_numbers = #tpu.dot_dimension_numbers<[1], [0], [0], [1], [0, 0, 1, 1], [], []>} : vector<1x128xf32>, vector<128x32xf32>, vector<1x32xf32> -> vector<1x32xf32>
    %cst_194 = arith.constant dense<0.000000e+00> : vector<1x32xf32>
    %287 = tpu.matmul %285, %0, %cst_194 {dimension_numbers = #tpu.dot_dimension_numbers<[1], [0], [0], [1], [0, 0, 1, 1], [], []>} : vector<1x128xf32>, vector<128x32xf32>, vector<1x32xf32> -> vector<1x32xf32>
    %cst_195 = arith.constant 0.001953125 : f32
    %288 = vector.broadcast %cst_195 : f32 to vector<1x32xf32>
    %289 = arith.mulf %286, %288 : vector<1x32xf32>
    %cst_196 = arith.constant 0.001953125 : f32
    %290 = vector.broadcast %cst_196 : f32 to vector<1x32xf32>
    %291 = arith.mulf %287, %290 : vector<1x32xf32>
    %292 = arith.mulf %289, %289 : vector<1x32xf32>
    %293 = arith.subf %291, %292 : vector<1x32xf32>
    %cst_197 = arith.constant 0.000000e+00 : f32
    %294 = vector.broadcast %cst_197 : f32 to vector<1x32xf32>
    %295 = arith.maximumf %293, %294 : vector<1x32xf32>
    %cst_198 = arith.constant 9.99999974E-6 : f32
    %296 = vector.broadcast %cst_198 : f32 to vector<1x32xf32>
    %297 = arith.addf %295, %296 : vector<1x32xf32>
    %298 = math.rsqrt %297 : vector<1x32xf32>
    %cst_199 = arith.constant dense<0.000000e+00> : vector<1x128xf32>
    %299 = tpu.matmul %289, %1, %cst_199 {dimension_numbers = #tpu.dot_dimension_numbers<[1], [0], [0], [1], [0, 0, 1, 1], [], []>} : vector<1x32xf32>, vector<32x128xf32>, vector<1x128xf32> -> vector<1x128xf32>
    %cst_200 = arith.constant dense<0.000000e+00> : vector<1x128xf32>
    %300 = tpu.matmul %298, %1, %cst_200 {dimension_numbers = #tpu.dot_dimension_numbers<[1], [0], [0], [1], [0, 0, 1, 1], [], []>} : vector<1x32xf32>, vector<32x128xf32>, vector<1x128xf32> -> vector<1x128xf32>
    %301 = arith.mulf %300, %280 : vector<1x128xf32>
    %302 = arith.mulf %299, %301 : vector<1x128xf32>
    %303 = arith.subf %281, %302 : vector<1x128xf32>
    %304 = vector.broadcast %301 : vector<1x128xf32> to vector<256x128xf32>
    %305 = arith.mulf %279, %304 : vector<256x128xf32>
    %306 = vector.broadcast %303 : vector<1x128xf32> to vector<256x128xf32>
    %307 = arith.addf %305, %306 : vector<256x128xf32>
    %c0_201 = arith.constant 0 : index
    %c0_202 = arith.constant 0 : index
    %308 = vector.load %arg16[%c0_201, %c0_202] : memref<256x64xf32, #tpu.memory_space<vmem>>, vector<256x64xf32>
    %c0_203 = arith.constant 0 : index
    %c0_204 = arith.constant 0 : index
    %c0_205 = arith.constant 0 : index
    %309 = vector.load %arg23[%c0_203, %c0_204, %c0_205] : memref<1x64x128xf32, #tpu.memory_space<vmem>>, vector<1x64x128xf32>
    %310 = vector.shape_cast %309 : vector<1x64x128xf32> to vector<64x128xf32>
    %cst_206 = arith.constant dense<0.000000e+00> : vector<256x128xf32>
    %311 = tpu.matmul %308, %310, %cst_206 {dimension_numbers = #tpu.dot_dimension_numbers<[1], [0], [0], [1], [0, 0, 1, 1], [], []>} : vector<256x64xf32>, vector<64x128xf32>, vector<256x128xf32> -> vector<256x128xf32>
    %312 = arith.addf %307, %311 : vector<256x128xf32>
    %cst_207 = arith.constant 0.000000e+00 : f32
    %313 = vector.broadcast %cst_207 : f32 to vector<304x128xf32>
    %c0_208 = arith.constant 0 : index
    %c0_209 = arith.constant 0 : index
    %314 = vector.load %arg28[%c0_208, %c0_209] : memref<304x128xf32, #tpu.memory_space<vmem>>, vector<304x128xf32>
    tpu.vector_store %arg28[%c0_208, %c0_209], %313 {strides = array<i32>} : memref<304x128xf32, #tpu.memory_space<vmem>>, vector<304x128xf32>,
    %c24_210 = arith.constant 24 : index
    %c0_211 = arith.constant 0 : index
    %315 = vector.load %arg28[%c24_210, %c0_211] : memref<304x128xf32, #tpu.memory_space<vmem>>, vector<256x128xf32>
    tpu.vector_store %arg28[%c24_210, %c0_211], %312 {strides = array<i32>} : memref<304x128xf32, #tpu.memory_space<vmem>>, vector<256x128xf32>,
    %316 = tpu.iota {dimensions = array<i32: 0>} : vector<256x1xi32>
    %c16_i32 = arith.constant 16 : i32
    %c0_i32_212 = arith.constant 0 : i32
    %317 = arith.cmpi eq, %c16_i32, %c0_i32_212 : i32
    %c1_i32_213 = arith.constant 1 : i32
    %318 = arith.select %317, %c1_i32_213, %c16_i32 : i32
    %319 = vector.broadcast %318 : i32 to vector<256x1xi32>
    %320 = arith.remsi %316, %319 : vector<256x1xi32>
    %c0_i32_214 = arith.constant 0 : i32
    %321 = vector.broadcast %c0_i32_214 : i32 to vector<256x1xi32>
    %322 = arith.cmpi ne, %320, %321 : vector<256x1xi32>
    %c0_i32_215 = arith.constant 0 : i32
    %323 = vector.broadcast %c0_i32_215 : i32 to vector<256x1xi32>
    %324 = arith.cmpi slt, %320, %323 : vector<256x1xi32>
    %c0_i32_216 = arith.constant 0 : i32
    %325 = arith.cmpi slt, %318, %c0_i32_216 : i32
    %326 = vector.broadcast %325 : i1 to vector<256x1xi1>
    %327 = vector.broadcast %326 : vector<256x1xi1> to vector<256x1xi1>
    %328 = arith.xori %324, %327 : vector<256x1xi1>
    %329 = arith.andi %328, %322 : vector<256x1xi1>
    %330 = vector.broadcast %318 : i32 to vector<256x1xi32>
    %331 = arith.addi %320, %330 : vector<256x1xi32>
    %332 = arith.select %329, %331, %320 : vector<256x1xi1>, vector<256x1xi32>
    %c0_i32_217 = arith.constant 0 : i32
    %333 = vector.broadcast %c0_i32_217 : i32 to vector<256x1xi32>
    %334 = arith.cmpi ne, %332, %333 : vector<256x1xi32>
    %335 = arith.extui %334 : vector<256x1xi1> to vector<256x1xi32>
    %336 = arith.sitofp %335 : vector<256x1xi32> to vector<256x1xf32>
    %c15_i32 = arith.constant 15 : i32
    %337 = vector.broadcast %c15_i32 : i32 to vector<256x1xi32>
    %338 = arith.cmpi ne, %332, %337 : vector<256x1xi32>
    %339 = arith.extui %338 : vector<256x1xi1> to vector<256x1xi32>
    %340 = arith.sitofp %339 : vector<256x1xi32> to vector<256x1xf32>
    %cst_218 = arith.constant 0.000000e+00 : f32
    %341 = vector.broadcast %cst_218 : f32 to vector<256x128xf32>
    %c7_219 = arith.constant 7 : index
    %c0_220 = arith.constant 0 : index
    %342 = vector.load %arg28[%c7_219, %c0_220] : memref<304x128xf32, #tpu.memory_space<vmem>>, vector<256x128xf32>
    %343 = vector.broadcast %336 : vector<256x1xf32> to vector<256x128xf32>
    %344 = arith.mulf %342, %343 : vector<256x128xf32>
    %c0_221 = arith.constant 0 : index
    %c0_222 = arith.constant 0 : index
    %c0_223 = arith.constant 0 : index
    %345 = vector.load %arg20[%c0_221, %c0_222, %c0_223] : memref<9x128x128xf32, #tpu.memory_space<vmem>>, vector<1x128x128xf32>
    %346 = vector.shape_cast %345 : vector<1x128x128xf32> to vector<128x128xf32>
    %cst_224 = arith.constant dense<0.000000e+00> : vector<256x128xf32>
    %347 = tpu.matmul %344, %346, %cst_224 {dimension_numbers = #tpu.dot_dimension_numbers<[1], [0], [0], [1], [0, 0, 1, 1], [], []>} : vector<256x128xf32>, vector<128x128xf32>, vector<256x128xf32> -> vector<256x128xf32>
    %348 = arith.addf %341, %347 : vector<256x128xf32>
    %c8_225 = arith.constant 8 : index
    %c0_226 = arith.constant 0 : index
    %349 = vector.load %arg28[%c8_225, %c0_226] : memref<304x128xf32, #tpu.memory_space<vmem>>, vector<256x128xf32>
    %c1_227 = arith.constant 1 : index
    %c0_228 = arith.constant 0 : index
    %c0_229 = arith.constant 0 : index
    %350 = vector.load %arg20[%c1_227, %c0_228, %c0_229] : memref<9x128x128xf32, #tpu.memory_space<vmem>>, vector<1x128x128xf32>
    %351 = vector.shape_cast %350 : vector<1x128x128xf32> to vector<128x128xf32>
    %cst_230 = arith.constant dense<0.000000e+00> : vector<256x128xf32>
    %352 = tpu.matmul %349, %351, %cst_230 {dimension_numbers = #tpu.dot_dimension_numbers<[1], [0], [0], [1], [0, 0, 1, 1], [], []>} : vector<256x128xf32>, vector<128x128xf32>, vector<256x128xf32> -> vector<256x128xf32>
    %353 = arith.addf %348, %352 : vector<256x128xf32>
    %c9_231 = arith.constant 9 : index
    %c0_232 = arith.constant 0 : index
    %354 = vector.load %arg28[%c9_231, %c0_232] : memref<304x128xf32, #tpu.memory_space<vmem>>, vector<256x128xf32>
    %355 = vector.broadcast %340 : vector<256x1xf32> to vector<256x128xf32>
    %356 = arith.mulf %354, %355 : vector<256x128xf32>
    %c2_233 = arith.constant 2 : index
    %c0_234 = arith.constant 0 : index
    %c0_235 = arith.constant 0 : index
    %357 = vector.load %arg20[%c2_233, %c0_234, %c0_235] : memref<9x128x128xf32, #tpu.memory_space<vmem>>, vector<1x128x128xf32>
    %358 = vector.shape_cast %357 : vector<1x128x128xf32> to vector<128x128xf32>
    %cst_236 = arith.constant dense<0.000000e+00> : vector<256x128xf32>
    %359 = tpu.matmul %356, %358, %cst_236 {dimension_numbers = #tpu.dot_dimension_numbers<[1], [0], [0], [1], [0, 0, 1, 1], [], []>} : vector<256x128xf32>, vector<128x128xf32>, vector<256x128xf32> -> vector<256x128xf32>
    %360 = arith.addf %353, %359 : vector<256x128xf32>
    %c23_237 = arith.constant 23 : index
    %c0_238 = arith.constant 0 : index
    %361 = vector.load %arg28[%c23_237, %c0_238] : memref<304x128xf32, #tpu.memory_space<vmem>>, vector<256x128xf32>
    %362 = vector.broadcast %336 : vector<256x1xf32> to vector<256x128xf32>
    %363 = arith.mulf %361, %362 : vector<256x128xf32>
    %c3_239 = arith.constant 3 : index
    %c0_240 = arith.constant 0 : index
    %c0_241 = arith.constant 0 : index
    %364 = vector.load %arg20[%c3_239, %c0_240, %c0_241] : memref<9x128x128xf32, #tpu.memory_space<vmem>>, vector<1x128x128xf32>
    %365 = vector.shape_cast %364 : vector<1x128x128xf32> to vector<128x128xf32>
    %cst_242 = arith.constant dense<0.000000e+00> : vector<256x128xf32>
    %366 = tpu.matmul %363, %365, %cst_242 {dimension_numbers = #tpu.dot_dimension_numbers<[1], [0], [0], [1], [0, 0, 1, 1], [], []>} : vector<256x128xf32>, vector<128x128xf32>, vector<256x128xf32> -> vector<256x128xf32>
    %367 = arith.addf %360, %366 : vector<256x128xf32>
    %c24_243 = arith.constant 24 : index
    %c0_244 = arith.constant 0 : index
    %368 = vector.load %arg28[%c24_243, %c0_244] : memref<304x128xf32, #tpu.memory_space<vmem>>, vector<256x128xf32>
    %c4_245 = arith.constant 4 : index
    %c0_246 = arith.constant 0 : index
    %c0_247 = arith.constant 0 : index
    %369 = vector.load %arg20[%c4_245, %c0_246, %c0_247] : memref<9x128x128xf32, #tpu.memory_space<vmem>>, vector<1x128x128xf32>
    %370 = vector.shape_cast %369 : vector<1x128x128xf32> to vector<128x128xf32>
    %cst_248 = arith.constant dense<0.000000e+00> : vector<256x128xf32>
    %371 = tpu.matmul %368, %370, %cst_248 {dimension_numbers = #tpu.dot_dimension_numbers<[1], [0], [0], [1], [0, 0, 1, 1], [], []>} : vector<256x128xf32>, vector<128x128xf32>, vector<256x128xf32> -> vector<256x128xf32>
    %372 = arith.addf %367, %371 : vector<256x128xf32>
    %c25_249 = arith.constant 25 : index
    %c0_250 = arith.constant 0 : index
    %373 = vector.load %arg28[%c25_249, %c0_250] : memref<304x128xf32, #tpu.memory_space<vmem>>, vector<256x128xf32>
    %374 = vector.broadcast %340 : vector<256x1xf32> to vector<256x128xf32>
    %375 = arith.mulf %373, %374 : vector<256x128xf32>
    %c5_251 = arith.constant 5 : index
    %c0_252 = arith.constant 0 : index
    %c0_253 = arith.constant 0 : index
    %376 = vector.load %arg20[%c5_251, %c0_252, %c0_253] : memref<9x128x128xf32, #tpu.memory_space<vmem>>, vector<1x128x128xf32>
    %377 = vector.shape_cast %376 : vector<1x128x128xf32> to vector<128x128xf32>
    %cst_254 = arith.constant dense<0.000000e+00> : vector<256x128xf32>
    %378 = tpu.matmul %375, %377, %cst_254 {dimension_numbers = #tpu.dot_dimension_numbers<[1], [0], [0], [1], [0, 0, 1, 1], [], []>} : vector<256x128xf32>, vector<128x128xf32>, vector<256x128xf32> -> vector<256x128xf32>
    %379 = arith.addf %372, %378 : vector<256x128xf32>
    %c39 = arith.constant 39 : index
    %c0_255 = arith.constant 0 : index
    %380 = vector.load %arg28[%c39, %c0_255] : memref<304x128xf32, #tpu.memory_space<vmem>>, vector<256x128xf32>
    %381 = vector.broadcast %336 : vector<256x1xf32> to vector<256x128xf32>
    %382 = arith.mulf %380, %381 : vector<256x128xf32>
    %c6_256 = arith.constant 6 : index
    %c0_257 = arith.constant 0 : index
    %c0_258 = arith.constant 0 : index
    %383 = vector.load %arg20[%c6_256, %c0_257, %c0_258] : memref<9x128x128xf32, #tpu.memory_space<vmem>>, vector<1x128x128xf32>
    %384 = vector.shape_cast %383 : vector<1x128x128xf32> to vector<128x128xf32>
    %cst_259 = arith.constant dense<0.000000e+00> : vector<256x128xf32>
    %385 = tpu.matmul %382, %384, %cst_259 {dimension_numbers = #tpu.dot_dimension_numbers<[1], [0], [0], [1], [0, 0, 1, 1], [], []>} : vector<256x128xf32>, vector<128x128xf32>, vector<256x128xf32> -> vector<256x128xf32>
    %386 = arith.addf %379, %385 : vector<256x128xf32>
    %c40 = arith.constant 40 : index
    %c0_260 = arith.constant 0 : index
    %387 = vector.load %arg28[%c40, %c0_260] : memref<304x128xf32, #tpu.memory_space<vmem>>, vector<256x128xf32>
    %c7_261 = arith.constant 7 : index
    %c0_262 = arith.constant 0 : index
    %c0_263 = arith.constant 0 : index
    %388 = vector.load %arg20[%c7_261, %c0_262, %c0_263] : memref<9x128x128xf32, #tpu.memory_space<vmem>>, vector<1x128x128xf32>
    %389 = vector.shape_cast %388 : vector<1x128x128xf32> to vector<128x128xf32>
    %cst_264 = arith.constant dense<0.000000e+00> : vector<256x128xf32>
    %390 = tpu.matmul %387, %389, %cst_264 {dimension_numbers = #tpu.dot_dimension_numbers<[1], [0], [0], [1], [0, 0, 1, 1], [], []>} : vector<256x128xf32>, vector<128x128xf32>, vector<256x128xf32> -> vector<256x128xf32>
    %391 = arith.addf %386, %390 : vector<256x128xf32>
    %c41 = arith.constant 41 : index
    %c0_265 = arith.constant 0 : index
    %392 = vector.load %arg28[%c41, %c0_265] : memref<304x128xf32, #tpu.memory_space<vmem>>, vector<256x128xf32>
    %393 = vector.broadcast %340 : vector<256x1xf32> to vector<256x128xf32>
    %394 = arith.mulf %392, %393 : vector<256x128xf32>
    %c8_266 = arith.constant 8 : index
    %c0_267 = arith.constant 0 : index
    %c0_268 = arith.constant 0 : index
    %395 = vector.load %arg20[%c8_266, %c0_267, %c0_268] : memref<9x128x128xf32, #tpu.memory_space<vmem>>, vector<1x128x128xf32>
    %396 = vector.shape_cast %395 : vector<1x128x128xf32> to vector<128x128xf32>
    %cst_269 = arith.constant dense<0.000000e+00> : vector<256x128xf32>
    %397 = tpu.matmul %394, %396, %cst_269 {dimension_numbers = #tpu.dot_dimension_numbers<[1], [0], [0], [1], [0, 0, 1, 1], [], []>} : vector<256x128xf32>, vector<128x128xf32>, vector<256x128xf32> -> vector<256x128xf32>
    %398 = arith.addf %391, %397 : vector<256x128xf32>
    %c0_270 = arith.constant 0 : index
    %c0_271 = arith.constant 0 : index
    %399 = vector.load %arg21[%c0_270, %c0_271] : memref<1x128xf32, #tpu.memory_space<vmem>>, vector<1x128xf32>
    %c0_272 = arith.constant 0 : index
    %c0_273 = arith.constant 0 : index
    %400 = vector.load %arg22[%c0_272, %c0_273] : memref<1x128xf32, #tpu.memory_space<vmem>>, vector<1x128xf32>
    %cst_274 = arith.constant 1.000000e+00 : f32
    %401 = vector.broadcast %cst_274 : f32 to vector<1x256xf32>
    %cst_275 = arith.constant dense<0.000000e+00> : vector<1x128xf32>
    %402 = tpu.matmul %401, %398, %cst_275 {dimension_numbers = #tpu.dot_dimension_numbers<[1], [0], [0], [1], [0, 0, 1, 1], [], []>} : vector<1x256xf32>, vector<256x128xf32>, vector<1x128xf32> -> vector<1x128xf32>
    %403 = arith.mulf %398, %398 : vector<256x128xf32>
    %cst_276 = arith.constant dense<0.000000e+00> : vector<1x128xf32>
    %404 = tpu.matmul %401, %403, %cst_276 {dimension_numbers = #tpu.dot_dimension_numbers<[1], [0], [0], [1], [0, 0, 1, 1], [], []>} : vector<1x256xf32>, vector<256x128xf32>, vector<1x128xf32> -> vector<1x128xf32>
    %cst_277 = arith.constant dense<0.000000e+00> : vector<1x32xf32>
    %405 = tpu.matmul %402, %0, %cst_277 {dimension_numbers = #tpu.dot_dimension_numbers<[1], [0], [0], [1], [0, 0, 1, 1], [], []>} : vector<1x128xf32>, vector<128x32xf32>, vector<1x32xf32> -> vector<1x32xf32>
    %cst_278 = arith.constant dense<0.000000e+00> : vector<1x32xf32>
    %406 = tpu.matmul %404, %0, %cst_278 {dimension_numbers = #tpu.dot_dimension_numbers<[1], [0], [0], [1], [0, 0, 1, 1], [], []>} : vector<1x128xf32>, vector<128x32xf32>, vector<1x32xf32> -> vector<1x32xf32>
    %cst_279 = arith.constant 0.001953125 : f32
    %407 = vector.broadcast %cst_279 : f32 to vector<1x32xf32>
    %408 = arith.mulf %405, %407 : vector<1x32xf32>
    %cst_280 = arith.constant 0.001953125 : f32
    %409 = vector.broadcast %cst_280 : f32 to vector<1x32xf32>
    %410 = arith.mulf %406, %409 : vector<1x32xf32>
    %411 = arith.mulf %408, %408 : vector<1x32xf32>
    %412 = arith.subf %410, %411 : vector<1x32xf32>
    %cst_281 = arith.constant 0.000000e+00 : f32
    %413 = vector.broadcast %cst_281 : f32 to vector<1x32xf32>
    %414 = arith.maximumf %412, %413 : vector<1x32xf32>
    %cst_282 = arith.constant 9.99999974E-6 : f32
    %415 = vector.broadcast %cst_282 : f32 to vector<1x32xf32>
    %416 = arith.addf %414, %415 : vector<1x32xf32>
    %417 = math.rsqrt %416 : vector<1x32xf32>
    %cst_283 = arith.constant dense<0.000000e+00> : vector<1x128xf32>
    %418 = tpu.matmul %408, %1, %cst_283 {dimension_numbers = #tpu.dot_dimension_numbers<[1], [0], [0], [1], [0, 0, 1, 1], [], []>} : vector<1x32xf32>, vector<32x128xf32>, vector<1x128xf32> -> vector<1x128xf32>
    %cst_284 = arith.constant dense<0.000000e+00> : vector<1x128xf32>
    %419 = tpu.matmul %417, %1, %cst_284 {dimension_numbers = #tpu.dot_dimension_numbers<[1], [0], [0], [1], [0, 0, 1, 1], [], []>} : vector<1x32xf32>, vector<32x128xf32>, vector<1x128xf32> -> vector<1x128xf32>
    %420 = arith.mulf %419, %399 : vector<1x128xf32>
    %421 = arith.mulf %418, %420 : vector<1x128xf32>
    %422 = arith.subf %400, %421 : vector<1x128xf32>
    %423 = vector.broadcast %420 : vector<1x128xf32> to vector<256x128xf32>
    %424 = arith.mulf %398, %423 : vector<256x128xf32>
    %425 = vector.broadcast %422 : vector<1x128xf32> to vector<256x128xf32>
    %426 = arith.addf %424, %425 : vector<256x128xf32>
    %cst_285 = arith.constant 0.000000e+00 : f32
    %427 = vector.broadcast %cst_285 : f32 to vector<256x128xf32>
    %428 = arith.maximumf %426, %427 : vector<256x128xf32>
    %c0_286 = arith.constant 0 : index
    %c0_287 = arith.constant 0 : index
    %c0_288 = arith.constant 0 : index
    %429 = vector.load %arg24[%c0_286, %c0_287, %c0_288] : memref<1x256x128xf32, #tpu.memory_space<vmem>>, vector<1x256x128xf32>
    %430 = vector.shape_cast %429 : vector<1x256x128xf32> to vector<256x128xf32>
    %431 = vector.shape_cast %428 : vector<256x128xf32> to vector<1x256x128xf32>
    tpu.vector_store %arg24[%c0_286, %c0_287, %c0_288], %431 {strides = array<i32>} : memref<1x256x128xf32, #tpu.memory_space<vmem>>, vector<1x256x128xf32>,
    return
  }
  func.func @transform_0(%arg0: i32) -> (i32, i32, i32) {
    %c0_i32 = arith.constant 0 : i32
    %c0_i32_0 = arith.constant 0 : i32
    %c0_i32_1 = arith.constant 0 : i32
    return %arg0, %c0_i32, %c0_i32_0 : i32, i32, i32
  }
  func.func @transform_1(%arg0: i32) -> (i32, i32, i32) {
    %c0_i32 = arith.constant 0 : i32
    %c0_i32_0 = arith.constant 0 : i32
    %c0_i32_1 = arith.constant 0 : i32
    %c0_i32_2 = arith.constant 0 : i32
    return %c0_i32, %c0_i32_0, %c0_i32_1 : i32, i32, i32
  }
  func.func @transform_2(%arg0: i32) -> (i32, i32) {
    %c0_i32 = arith.constant 0 : i32
    %c0_i32_0 = arith.constant 0 : i32
    %c0_i32_1 = arith.constant 0 : i32
    return %c0_i32, %c0_i32_0 : i32, i32
  }
  func.func @transform_3(%arg0: i32) -> (i32, i32) {
    %c0_i32 = arith.constant 0 : i32
    %c0_i32_0 = arith.constant 0 : i32
    %c0_i32_1 = arith.constant 0 : i32
    return %c0_i32, %c0_i32_0 : i32, i32
  }
  func.func @transform_4(%arg0: i32) -> (i32, i32) {
    %c0_i32 = arith.constant 0 : i32
    %c0_i32_0 = arith.constant 0 : i32
    %c0_i32_1 = arith.constant 0 : i32
    return %c0_i32, %c0_i32_0 : i32, i32
  }
  func.func @transform_5(%arg0: i32) -> (i32, i32) {
    %c0_i32 = arith.constant 0 : i32
    %c0_i32_0 = arith.constant 0 : i32
    %c0_i32_1 = arith.constant 0 : i32
    return %c0_i32, %c0_i32_0 : i32, i32
  }
  func.func @transform_6(%arg0: i32) -> (i32, i32, i32) {
    %c0_i32 = arith.constant 0 : i32
    %c0_i32_0 = arith.constant 0 : i32
    %c0_i32_1 = arith.constant 0 : i32
    return %arg0, %c0_i32, %c0_i32_0 : i32, i32, i32
  }
  func.func @transform_7(%arg0: i32) -> (i32, i32) {
    %c0_i32 = arith.constant 0 : i32
    %c0_i32_0 = arith.constant 0 : i32
    %c0_i32_1 = arith.constant 0 : i32
    return %c0_i32, %c0_i32_0 : i32, i32
  }
  func.func @transform_8(%arg0: i32) -> (i32, i32) {
    %c0_i32 = arith.constant 0 : i32
    %c0_i32_0 = arith.constant 0 : i32
    %c0_i32_1 = arith.constant 0 : i32
    return %c0_i32, %c0_i32_0 : i32, i32
  }
  func.func @transform_9(%arg0: i32) -> (i32, i32) {
    %c0_i32 = arith.constant 0 : i32
    %c0_i32_0 = arith.constant 0 : i32
    %c0_i32_1 = arith.constant 0 : i32
    return %c0_i32, %c0_i32_0 : i32, i32
  }
  func.func @transform_10(%arg0: i32) -> (i32, i32) {
    %c0_i32 = arith.constant 0 : i32
    %c0_i32_0 = arith.constant 0 : i32
    %c0_i32_1 = arith.constant 0 : i32
    return %c0_i32, %c0_i32_0 : i32, i32
  }
  func.func @transform_11(%arg0: i32) -> (i32, i32, i32) {
    %c0_i32 = arith.constant 0 : i32
    %c0_i32_0 = arith.constant 0 : i32
    %c0_i32_1 = arith.constant 0 : i32
    %c0_i32_2 = arith.constant 0 : i32
    return %c0_i32, %c0_i32_0, %c0_i32_1 : i32, i32, i32
  }
  func.func @transform_12(%arg0: i32) -> (i32, i32) {
    %c0_i32 = arith.constant 0 : i32
    %c0_i32_0 = arith.constant 0 : i32
    %c0_i32_1 = arith.constant 0 : i32
    return %c0_i32, %c0_i32_0 : i32, i32
  }
  func.func @transform_13(%arg0: i32) -> (i32, i32) {
    %c0_i32 = arith.constant 0 : i32
    %c0_i32_0 = arith.constant 0 : i32
    %c0_i32_1 = arith.constant 0 : i32
    return %c0_i32, %c0_i32_0 : i32, i32
  }
  func.func @transform_14(%arg0: i32) -> (i32, i32, i32) {
    %c0_i32 = arith.constant 0 : i32
    %c0_i32_0 = arith.constant 0 : i32
    %c0_i32_1 = arith.constant 0 : i32
    return %arg0, %c0_i32, %c0_i32_0 : i32, i32, i32
  }
  func.func @transform_15(%arg0: i32) -> (i32, i32) {
    %c0_i32 = arith.constant 0 : i32
    %c0_i32_0 = arith.constant 0 : i32
    %c0_i32_1 = arith.constant 0 : i32
    return %c0_i32, %c0_i32_0 : i32, i32
  }
  func.func @transform_16(%arg0: i32) -> (i32, i32) {
    %c0_i32 = arith.constant 0 : i32
    %c0_i32_0 = arith.constant 0 : i32
    %c0_i32_1 = arith.constant 0 : i32
    return %c0_i32, %c0_i32_0 : i32, i32
  }
  func.func @transform_17(%arg0: i32) -> (i32, i32) {
    %c0_i32 = arith.constant 0 : i32
    %c0_i32_0 = arith.constant 0 : i32
    %c0_i32_1 = arith.constant 0 : i32
    return %c0_i32, %c0_i32_0 : i32, i32
  }
  func.func @transform_18(%arg0: i32) -> (i32, i32) {
    %c0_i32 = arith.constant 0 : i32
    %c0_i32_0 = arith.constant 0 : i32
    %c0_i32_1 = arith.constant 0 : i32
    return %c0_i32, %c0_i32_0 : i32, i32
  }
  func.func @transform_19(%arg0: i32) -> (i32, i32, i32) {
    %c0_i32 = arith.constant 0 : i32
    %c0_i32_0 = arith.constant 0 : i32
    %c0_i32_1 = arith.constant 0 : i32
    %c0_i32_2 = arith.constant 0 : i32
    return %c0_i32, %c0_i32_0, %c0_i32_1 : i32, i32, i32
  }
  func.func @transform_20(%arg0: i32) -> (i32, i32) {
    %c0_i32 = arith.constant 0 : i32
    %c0_i32_0 = arith.constant 0 : i32
    %c0_i32_1 = arith.constant 0 : i32
    return %c0_i32, %c0_i32_0 : i32, i32
  }
  func.func @transform_21(%arg0: i32) -> (i32, i32) {
    %c0_i32 = arith.constant 0 : i32
    %c0_i32_0 = arith.constant 0 : i32
    %c0_i32_1 = arith.constant 0 : i32
    return %c0_i32, %c0_i32_0 : i32, i32
  }
  func.func @transform_22(%arg0: i32) -> (i32, i32, i32) {
    %c0_i32 = arith.constant 0 : i32
    %c0_i32_0 = arith.constant 0 : i32
    %c0_i32_1 = arith.constant 0 : i32
    return %arg0, %c0_i32, %c0_i32_0 : i32, i32, i32
  }
  func.func @transform_23(%arg0: i32) -> (i32, i32, i32) {
    %c0_i32 = arith.constant 0 : i32
    %c0_i32_0 = arith.constant 0 : i32
    %c0_i32_1 = arith.constant 0 : i32
    return %arg0, %c0_i32, %c0_i32_0 : i32, i32, i32
  }
}

</mosaic_0001>

<bundles_post_ra>
// kernel: tpu_custom_call.1
= control target key start
LH: loop header
LB: loop body
LE: loop exit
PB: predicated region body
PF: predicated region fallthrough
CT: control target
= control target key end

     0   :  { %s19465_s0 = inlined_call_operand.hbm [shape: f32[2,16,128], index: 0, kind: input, shape index: {}]   ;;  %s19466_s1 = inlined_call_operand.vmem [shape: f32[9,128,128], index: 1, kind: input, shape index: {}]   ;;  %s19467_s2 = inlined_call_operand.vmem [shape: f32[1,128], index: 2, kind: input, shape index: {}]   ;;  %s19468_s3 = inlined_call_operand.vmem [shape: f32[1,128], index: 3, kind: input, shape index: {}]   ;;  %s19469_s4 = inlined_call_operand.vmem [shape: f32[128,32], index: 4, kind: input, shape index: {}]   ;;  %s19470_s5 = inlined_call_operand.hbm [shape: f32[32,128], index: 5, kind: input, shape index: {}]   ;;  %s19471_s6 = inlined_call_operand.hbm [shape: f32[2,64,64], index: 6, kind: input, shape index: {}]   ;;  %s19472_s7 = inlined_call_operand.vmem [shape: f32[64,16], index: 7, kind: input, shape index: {}]   ;;  %s19473_s8 = inlined_call_operand.hbm [shape: f32[64,128], index: 8, kind: input, shape index: {}]   ;;  %s19474_s9 = inlined_call_operand.vmem [shape: f32[1,128], index: 9, kind: input, shape index: {}]   ;;  %s19475_s10 = inlined_call_operand.vmem [shape: f32[1,128], index: 10, kind: input, shape index: {}]   ;;  %s19476_s11 = inlined_call_operand.hbm [shape: f32[9,128,128], index: 11, kind: input, shape index: {}]   ;;  %s19477_s12 = inlined_call_operand.vmem [shape: f32[1,128], index: 12, kind: input, shape index: {}]   ;;  %s19478_s13 = inlined_call_operand.hbm [shape: f32[1,128], index: 13, kind: input, shape index: {}]   ;;  %s19479_s14 = inlined_call_operand.vmem [shape: f32[2,256,32], index: 14, kind: input, shape index: {}]   ;;  %s19480_s15 = inlined_call_operand.vmem [shape: f32[256,64], index: 15, kind: input, shape index: {}]   ;;  %s19481_s16 = inlined_call_operand.hbm [shape: f32[32,128], index: 16, kind: input, shape index: {}]   ;;  %s19482_s17 = inlined_call_operand.vmem [shape: f32[1,128], index: 17, kind: input, shape index: {}]   ;;  %s19483_s18 = inlined_call_operand.vmem [shape: f32[1,128], index: 18, kind: input, shape index: {}]   ;;  %s19484_s19 = inlined_call_operand.hbm [shape: f32[9,128,128], index: 19, kind: input, shape index: {}]   ;;  %s19485_s20 = inlined_call_operand.vmem [shape: f32[1,128], index: 20, kind: input, shape index: {}]   ;;  %s19486_s21 = inlined_call_operand.vmem [shape: f32[1,128], index: 21, kind: input, shape index: {}]   ;;  %s19487_s22 = inlined_call_operand.hbm [shape: f32[2,64,128], index: 22, kind: output, shape index: {0}]   ;;  %s19488_s23 = inlined_call_operand.hbm [shape: f32[2,256,128], index: 23, kind: output, shape index: {1}]  }
   0x1   :  { %19618 = sst [smem:[#allocation89_spill]] %s19465_s0 }
   0x2   :  { %19619 = sst [smem:[#allocation90_spill]] %s19466_s1 }
   0x3   :  { %19620 = sst [smem:[#allocation91_spill]] %s19467_s2 }
   0x4   :  { %19621 = sst [smem:[#allocation92_spill]] %s19468_s3 }
   0x5   :  { %19622 = sst [smem:[#allocation93_spill]] %s19469_s4 }
   0x6   :  { %19623 = sst [smem:[#allocation94_spill]] %s19470_s5 }
   0x7   :  { %19624 = sst [smem:[#allocation95_spill]] %s19471_s6 }
   0x8   :  { %19625 = sst [smem:[#allocation96_spill]] %s19472_s7 }
   0x9   :  { %19626 = sst [smem:[#allocation97_spill]] %s19476_s11 }
   0xa   :  { %19627 = sst [smem:[#allocation98_spill]] %s19481_s16 }
   0xb   :  { %19628 = sst [smem:[#allocation99_spill]] %s19485_s20 }
   0xc   :  { %19629 = sst [smem:[#allocation100_spill]] %s19486_s21 }
   0xd   :  { %19630 = sst [smem:[#allocation101_spill]] %s19487_s22 }
   0xe   :  { %19631 = sst [smem:[#allocation102_spill]] %s19488_s23 }
   0xf   :  { %29 = vsyncpa [#allocation7], 0 }
  0x10   :  { %31 = vsyncpa [#allocation7 + $0x1], 0 }
  0x11   :  { %32 = vsyncpa [#allocation10], 0 }
  0x12   :  { %33 = vsyncpa [#allocation14], 0 }
  0x13   :  { %34 = vsyncpa [#allocation17], 0 }
  0x14   :  { %35 = vsyncpa [#allocation8], 0 }
  0x15   :  { %37 = vsyncpa [#allocation8 + $0x1], 0 }
  0x16   :  { %38 = vsyncpa [#allocation21], 0 }
  0x17   :  { %40 = vsyncpa [#allocation21 + $0x1], 0  ;;  %s15101_s4 = smov 0   ;;  %s15103_s30 = smov 0  }
  0x18   :  { %s15105_s24 = smov 0   ;;  %s15107_s25 = smov 0  }
  0x19 LB: > { %19632 = sst [smem:[#allocation30_spill]] %s14950_s4  ;;  %s14964_s5 = smov [#allocation9]   ;;  %s14962_s25 = sphi %s15107_s25, %s19989_s25   ;;  %s14958_s24 = sphi %s15105_s24, %s19991_s24   ;;  %s14954_s30 = sphi %s15103_s30, %s19993_s30   ;;  %s14950_s4 = sphi %s15101_s4, %s19992_s4  }
  0x1a   : > { %19633 = sst [smem:[#allocation31_spill]] %s14958_s24  ;;  %s604_s1 = sshll.u32 %s14964_s5, 4  ;;  %s605_s1 = int_to_ptr.vmem [resolvable:$true] %s604_s1 }
  0x1b   : > { %s15122_s26 = sadd.s32 4294967295, %s14962_s25   ;;  %p10664_p0 = scmp.ge.s32.totalorder %s14962_s25, 1 }
  0x1c   : > { %p19508_p1 = scmp.eq.s32.totalorder %s15122_s26, 0  ;;  %p580_p2 = scmp.lt.s32.totalorder %s14962_s25, 3 }
  0x1d   : > { %s14965_s6 = smov [#allocation13]   ;;  %s14966_s28 = smov [#allocation16]  }
  0x1e   : > { %p15127_p3 = pnand %p10664_p0, %p580_p2  ;;  %s639_s27 = sshll.u32 %s14965_s6, 4  ;;  %s15140_s27 = int_to_ptr.vmem [resolvable:$true] %s639_s27 }
  0x1f   : > { %s669_s29 = sshll.u32 %s14966_s28, 4  ;;  %s14647_s0 = scalar_lea.vmem %s605_s1, 512  ;;  %s15142_s29 = int_to_ptr.vmem [resolvable:$true] %s669_s29 }
  0x20   : > { %s19634_s2 = scalar_select %p15127_p3, 1, 0 }
  0x21   : > { %p14471_p5 = pneg %p15127_p3  ;;  %p14648_p8 = scmp.ne.s32.totalorder %s605_s1, %s14647_s0 }
  0x22   : > { %p14655_p11 = scmp.lt.s32.totalorder %s605_s1, %s605_s1  ;;  %p14656_p12 = scmp.lt.s32.totalorder %s14647_s0, %s14647_s0 }
  0x23   : > { %p15136_p6 = pnand %p14471_p5, %p19508_p1 }
  0x24   : > { %p14657_p13 = por %p14656_p12, %p14655_p11 }
  0x25   : > { %s19635_s7 = scalar_select %p15136_p6, 1, 0 }
  0x26   : > { %p15146_p7 = pneg %p15136_p6 }
  0x28   : > { %p14650_p9 = pnand %p14648_p8, %p15146_p7 }
  0x2a   : > { %p14651_p10 = pneg %p14650_p9 }
  0x2c   : > { %p14658_p0 = pnand %p14657_p13, %p14651_p10 }
  0x2e   : > { %14661 = shalt.err (!%p14658_p0)
}
  0x2f   : > { %s19496_s5 = smov 128   ;;  %s19498_s6 = smov 8  }
  0x30   : > { %s19637_s21 = sld [smem:[#allocation94_spill]]  ;;  %s14673_s20 = scalar_lea.vmem %s15140_s27, 18432 }
  0x31   : > { %p14674_p2 = scmp.ne.s32.totalorder %s15140_s27, %s14673_s20  ;;  %p14681_p9 = scmp.lt.s32.totalorder %s15140_s27, %s15140_s27 }
  0x32   : > { %p14682_p10 = scmp.lt.s32.totalorder %s14673_s20, %s14673_s20 }
  0x33   : > { %p14676_p5 = pnand %p14674_p2, %p15146_p7 }
  0x34   : > { %p14683_p11 = por %p14682_p10, %p14681_p9 }
  0x35   : > { %p14677_p8 = pneg %p14676_p5 }
  0x36   : > { %14474 = dma.hbm_to_vmem [thread:$0]  (!%p15136_p6), %s19637_s21, 512, %s605_s1, [#allocation10], %s19496_s5, %s19496_s5, %s19498_s6  }
  0x37   : > { %p14684_p12 = pnand %p14683_p11, %p14677_p8 }
  0x39   : > { %14687 = shalt.err (!%p14684_p12)
}
  0x3a   : > { %s19638_s11 = sld [smem:[#allocation97_spill]]  ;;  %s14699_s21 = scalar_lea.vmem %s15142_s29, 512 }
  0x3b   : > { %p14700_p13 = scmp.ne.s32.totalorder %s15142_s29, %s14699_s21  ;;  %p14707_p5 = scmp.lt.s32.totalorder %s15142_s29, %s15142_s29 }
  0x3c   : > { %p14708_p8 = scmp.lt.s32.totalorder %s14699_s21, %s14699_s21 }
  0x3d   : > { %p14702_p0 = pnand %p14700_p13, %p15146_p7 }
  0x3e   : > { %p14709_p9 = por %p14708_p8, %p14707_p5 }
  0x3f   : > { %p14703_p2 = pneg %p14702_p0 }
  0x40   : > { %14480 = dma.hbm_to_vmem [thread:$0]  (!%p15136_p6), %s19638_s11, 18432, %s15140_s27, [#allocation14], %s19496_s5, %s19496_s5, %s19498_s6  }
  0x41   : > { %p14710_p10 = pnand %p14709_p9, %p14703_p2 }
  0x43   : > { %14713 = shalt.err (!%p14710_p10)
}
  0x44   : > { %s19639_s16 = sld [smem:[#allocation98_spill]]  ;;  %s10663_s27 = sadd.s32 4294967294, %s14962_s25  }
  0x45   : > { %s15192_s28 = sadd.s32 1, %s14962_s25   ;;  %s53_s0 = sadd.s32 1, %s14958_s24 }
  0x46   : > { %19640 = sst [smem:[#allocation32_spill]] %s15192_s28  ;;  %s50_s23 = ssub.s32 %s14962_s25, %s15192_s28 }
  0x47   : > { %p60_p11 = scmp.ne.s32.totalorder %s14958_s24, %s14954_s30  ;;  %p51_p12 = scmp.eq.s32.totalorder %s50_s23, 0 }
  0x48   : > { %p61_p13 = scmp.eq.s32.totalorder %s14962_s25, 0  ;;  %p66_p0 = scmp.ne.s32.totalorder %s14954_s30, %s14950_s4 }
  0x49   : > { %p541_p2 = scmp.eq.s32.totalorder %s15122_s26, 1  ;;  %p547_p10 = scmp.eq.s32.totalorder %s10663_s27, 1 }
  0x4a   : > { %14486 = dma.hbm_to_vmem [thread:$0]  (!%p15136_p6), %s19639_s16, 512, %s15142_s29, [#allocation17], %s19496_s5, %s19496_s5, %s19498_s6  }
  0x4b   : > { %s15204_s21 = scalar_select %p51_p12, %s14958_s24, %s53_s0  }
  0x4c   : > { %p62_p5 = por %p61_p13, %p60_p11  ;;  %p15208_p8 = por %p19508_p1, %p66_p0 }
  0x4d   : > { %19641 = sst [smem:[#allocation33_spill]] %s15204_s21  ;;  %p15212_p9 = por %p541_p2, %p60_p11 }
  0x4e   : > { %s19642_s29 = scalar_select %p15208_p8, 1, 0 }
  0x4f   : > { %s19643_s20 = scalar_select %p15212_p9, 1, 0 }
  0x50   : > { %p14510_p4 = scmp.lt.s32.totalorder %s14962_s25, 2  ;;  %s708_s1 = sand.u32 1, %s14962_s25  }
  0x51   : > { %19644 = sst [smem:[#allocation34_spill]] %s19643_s20  ;;  %p15218_p3 = por %p547_p10, %p66_p0 }
  0x52   : > { %s710_s5 = sand.u32 1, %s14958_s24   ;;  %s10975_s0 = sshll.u32 %s14962_s25, 8 }
  0x53   : > { %s19645_s23 = scalar_select %p15218_p3, 1, 0 }
  0x54   : > { %s10672_s6 = sshll.u32 %s710_s5, 4  ;;  %s19647_s21 = sld [smem:[#allocation89_spill]] }
  0x55   : > { %19646 = sst [smem:[#allocation35_spill]] %s19645_s23  ;;  %p15229_p11 = pnand %p14510_p4, %p62_p5 }
  0x56   : > { %s712_s27 = scalar_lea.vmem [#allocation6], %s10672_s6  ;;  %s15233_s23 = sshll.u32 %s710_s5, 6 }
  0x57   : > { %s719_s22 = sshll.u32 %s712_s27, 4  ;;  %s15237_s24 = scalar_lea.sflag [#allocation7], %s708_s1  ;;  %s15235_s22 = int_to_ptr.vmem [resolvable:$true] %s719_s22 }
  0x58   : > { %p14716_p13 = pneg %p15229_p11 }
  0x5a   : > { %s15227_s28 = scalar_lea.hbm %s19647_s21, %s10975_s0  ;;  %s14719_s20 = scalar_lea.hbm %s19647_s21, 512 }
  0x5b   : > { %s14714_s11 = scalar_lea.hbm %s15227_s28, 256  ;;  %p14720_p2 = scmp.lt.s32.totalorder %s15227_s28, %s19647_s21 }
  0x5c   : > { %p14715_p12 = scmp.ne.s32.totalorder %s15227_s28, %s14714_s11  ;;  %p14721_p5 = scmp.lt.s32.totalorder %s14719_s20, %s14714_s11 }
  0x5e   : > { %p14717_p4 = pnand %p14716_p13, %p14715_p12  ;;  %p14722_p10 = por %p14721_p5, %p14720_p2 }
  0x60   : > { %p14718_p0 = pneg %p14717_p4 }
  0x62   : > { %p14723_p1 = pnand %p14722_p10, %p14718_p0 }
  0x64   : > { %14726 = shalt.err (!%p14723_p1)
}
  0x65   : > { %s14727_s5 = scalar_lea.vmem %s15235_s22, 256  ;;  %s14969_s1 = smov [#allocation6]  }
  0x66   : > { %p14728_p3 = scmp.ne.s32.totalorder %s15235_s22, %s14727_s5  ;;  %s14732_s16 = sshll.u32 %s14969_s1, 4  ;;  %s14733_s16 = int_to_ptr.vmem [resolvable:$false] %s14732_s16 }
  0x67   : > { %s14734_s0 = scalar_lea.vmem %s14733_s16, 512  ;;  %p14735_p9 = scmp.lt.s32.totalorder %s15235_s22, %s14733_s16 }
  0x68   : > { %p14730_p12 = pnand %p14728_p3, %p14716_p13  ;;  %p14736_p8 = scmp.lt.s32.totalorder %s14734_s0, %s14727_s5 }
  0x6a   : > { %p14731_p4 = pneg %p14730_p12  ;;  %p14737_p6 = por %p14736_p8, %p14735_p9 }
  0x6c   : > { %p14738_p2 = pnand %p14737_p6, %p14731_p4 }
  0x6e   : > { %14741 = shalt.err (!%p14738_p2)
}
  0x6f   : > { %s19649_s20 = smov 8   ;;  %s19650_s11 = smov 128  }
  0x70   : > { %14493 = dma.hbm_to_vmem [thread:$0]  (!%p15229_p11), %s15227_s28, 256, %s15235_s22, %s15237_s24, %s19650_s11, %s19650_s11, %s19649_s20  }
  0x71   : > { %s733_s6 = scalar_lea.vmem [#allocation11], %s15233_s23  ;;  %s14970_s1 = smov [#allocation12]  }
  0x72   : > { %s15268_s27 = sshll.u32 %s733_s6, 4  ;;  %s620_s16 = sshll.u32 %s14970_s1, 4  ;;  %s621_s16 = int_to_ptr.vmem [resolvable:$true] %s620_s16  ;;  %s741_s27 = int_to_ptr.vmem [resolvable:$true] %s15268_s27 }
  0x73   : > { %s14753_s5 = scalar_lea.vmem %s621_s16, 1024  ;;  %p14761_p8 = scmp.lt.s32.totalorder %s621_s16, %s621_s16 }
  0x74   : > { %p14754_p1 = scmp.ne.s32.totalorder %s621_s16, %s14753_s5  ;;  %p14762_p9 = scmp.lt.s32.totalorder %s14753_s5, %s14753_s5 }
  0x76   : > { %p14756_p3 = pnand %p14754_p1, %p15146_p7  ;;  %p14763_p0 = por %p14762_p9, %p14761_p8 }
  0x78   : > { %p14757_p6 = pneg %p14756_p3 }
  0x7a   : > { %p14764_p5 = pnand %p14763_p0, %p14757_p6 }
  0x7c   : > { %14767 = shalt.err (!%p14764_p5)
}
  0x7d   : > { %p19651_p10 = scmp.ne.s32.totalorder %s19635_s7, 0  ;;  %s14971_s23 = smov [#allocation15]  }
  0x7e   : > { %s656_s0 = sshll.u32 %s14971_s23, 4  ;;  %s14972_s6 = smov [#allocation18]   ;;  %s657_s0 = int_to_ptr.vmem [resolvable:$true] %s656_s0 }
  0x7f   : > { %14477 = dma.hbm_to_vmem [thread:$0]  (!%p19651_p10), %s19473_s8, 1024, %s621_s16, [#allocation10], %s19650_s11, %s19650_s11, %s19649_s20  }
  0x80   : > { %s688_s1 = sshll.u32 %s14972_s6, 4  ;;  %s14779_s21 = scalar_lea.vmem %s657_s0, 16  ;;  %s689_s1 = int_to_ptr.vmem [resolvable:$true] %s688_s1 }
  0x81   : > { %p14780_p12 = scmp.ne.s32.totalorder %s657_s0, %s14779_s21  ;;  %s14786_s5 = scalar_lea.vmem %s657_s0, 32 }
  0x82   : > { %p14787_p1 = scmp.lt.s32.totalorder %s657_s0, %s657_s0  ;;  %p14788_p3 = scmp.lt.s32.totalorder %s14786_s5, %s14779_s21 }
  0x83   : > { %p14782_p4 = pnand %p14780_p12, %p15146_p7 }
  0x84   : > { %p14789_p6 = por %p14788_p3, %p14787_p1 }
  0x85   : > { %p14783_p2 = pneg %p14782_p4 }
  0x87   : > { %p14790_p8 = pnand %p14789_p6, %p14783_p2 }
  0x89   : > { %14793 = shalt.err (!%p14790_p8)
}
  0x8a   : > { %14483 = dma.hbm_to_vmem [thread:$0]  (!%p19651_p10), %s19478_s13, 16, %s657_s0, [#allocation14]  }
  0x8b   : > { %s10976_s28 = sshll.u32 %s14962_s25, 10  ;;  %s14805_s23 = scalar_lea.vmem %s689_s1, 18432 }
  0x8c   : > { %p14806_p9 = scmp.ne.s32.totalorder %s689_s1, %s14805_s23  ;;  %p14813_p12 = scmp.lt.s32.totalorder %s689_s1, %s689_s1 }
  0x8d   : > { %p14814_p4 = scmp.lt.s32.totalorder %s14805_s23, %s14805_s23 }
  0x8e   : > { %p14808_p0 = pnand %p14806_p9, %p15146_p7 }
  0x8f   : > { %p14815_p1 = por %p14814_p4, %p14813_p12 }
  0x90   : > { %p14809_p5 = pneg %p14808_p0 }
  0x92   : > { %p14816_p2 = pnand %p14815_p1, %p14809_p5 }
  0x94   : > { %14819 = shalt.err (!%p14816_p2)
}
  0x95   : > { %14489 = dma.hbm_to_vmem [thread:$0]  (!%p19651_p10), %s19484_s19, 18432, %s689_s1, [#allocation17], %s19650_s11, %s19650_s11, %s19649_s20  }
  0x96   : > { %s19652_s5 = sld [smem:[#allocation95_spill]] }
  0x9c   : > { %s15301_s22 = scalar_lea.hbm %s19652_s5, %s10976_s28  ;;  %s14825_s21 = scalar_lea.hbm %s19652_s5, 2048 }
  0x9d   : > { %s14820_s16 = scalar_lea.hbm %s15301_s22, 1024  ;;  %p14826_p10 = scmp.lt.s32.totalorder %s15301_s22, %s19652_s5 }
  0x9e   : > { %p14821_p7 = scmp.ne.s32.totalorder %s15301_s22, %s14820_s16  ;;  %p14827_p8 = scmp.lt.s32.totalorder %s14825_s21, %s14820_s16 }
  0xa0   : > { %p14823_p3 = pnand %p14821_p7, %p14716_p13  ;;  %p14828_p9 = por %p14827_p8, %p14826_p10 }
  0xa2   : > { %p14824_p6 = pneg %p14823_p3 }
  0xa4   : > { %p14829_p0 = pnand %p14828_p9, %p14824_p6 }
  0xa6   : > { %14832 = shalt.err (!%p14829_p0)
}
  0xa7   : > { %s14833_s28 = scalar_lea.vmem %s741_s27, 1024  ;;  %s14973_s0 = smov [#allocation11]  }
  0xa8   : > { %p14834_p5 = scmp.ne.s32.totalorder %s741_s27, %s14833_s28  ;;  %s14838_s3 = sshll.u32 %s14973_s0, 4  ;;  %s14839_s3 = int_to_ptr.vmem [resolvable:$false] %s14838_s3 }
  0xa9   : > { %s14840_s7 = scalar_lea.vmem %s14839_s3, 2048  ;;  %p14841_p1 = scmp.lt.s32.totalorder %s741_s27, %s14839_s3 }
  0xaa   : > { %p14836_p12 = pnand %p14834_p5, %p14716_p13  ;;  %p14842_p2 = scmp.lt.s32.totalorder %s14840_s7, %s14833_s28 }
  0xac   : > { %p14837_p4 = pneg %p14836_p12  ;;  %p14843_p7 = por %p14842_p2, %p14841_p1 }
  0xae   : > { %p14844_p3 = pnand %p14843_p7, %p14837_p4 }
  0xb0   : > { %14847 = shalt.err (!%p14844_p3)
}
  0xb1   : > { %14496 = dma.hbm_to_vmem [thread:$0]  (!%p15229_p11), %s15301_s22, 1024, %s741_s27, %s15237_s24, %s19650_s11, %s19650_s11, %s19649_s20  }
  0xb2   : > { %p19653_p13 = scmp.ne.s32.totalorder %s19634_s2, 0 }
  0xb4   : > { %760 = sbr.rel (%p19653_p13) target bundleno = 4754 (0x1292), region = 108 }
  0xb9   : > { %s762_s16 = sand.u32 1, %s15122_s26   ;;  %s15330_s23 = sand.u32 1, %s14954_s30  }
  0xba   : > { %s10679_s21 = sshll.u32 %s15330_s23, 4  ;;  %s763_s1 = scalar_lea.sflag [#allocation7], %s762_s16 }
  0xbb   : > { %s15333_s6 = scalar_lea.vmem [#allocation6], %s10679_s21  ;;  %p19654_p6 = scmp.ne.s32.totalorder %s19642_s29, 0 }
  0xbd   : > { %14917 = dma.done.wait (%p19654_p6), %s763_s1, 256  }
  0xbe   : > { %14919 = vsyncadd (%p19654_p6), %s763_s1, 4294967040  ;;  %p19655_p11 = scmp.eq.s32.totalorder %s15122_s26, 0 }
  0xc0   : > { %14921 = dma.done.wait (%p19655_p11), [#allocation10], 512   ;;  %p19656_p10 = pmov %p19655_p11 }
  0xc1   : > { %s10681_s4 = sshll.u32 %s15330_s23, 6 }
  0xc2   : > { %14923 = vsyncadd (%p19656_p10), [#allocation10], 4294966784  ;;  %s15346_s24 = scalar_lea.vmem [#allocation11], %s10681_s4 }
  0xc3   : > { %14925 = dma.done.wait (%p19654_p6), %s763_s1, 1024  }
  0xc4   : > { %14927 = vsyncadd (%p19654_p6), %s763_s1, 4294966272  ;;  %p19657_p8 = pmov %p19656_p10 }
  0xc6   : > { %14929 = dma.done.wait (%p19657_p8), [#allocation10], 1024   ;;  %p19658_p9 = pmov %p19657_p8 }
  0xc7   : > { %p19659_p0 = pmov %p19657_p8 }
  0xc8   : > { %14931 = vsyncadd (%p19658_p9), [#allocation10], 4294966272 }
  0xc9   : > { %14933 = dma.done.wait (%p19659_p0), [#allocation14], 18448   ;;  %p19660_p5 = pmov %p19659_p0 }
  0xca   : > { %p19661_p12 = pmov %p19659_p0 }
  0xcb   : > { %14935 = vsyncadd (%p19660_p5), [#allocation14], 4294948848 }
  0xcc   : > { %14937 = dma.done.wait (%p19661_p12), [#allocation17], 18944   ;;  %p19662_p4 = pmov %p19659_p0 }
  0xcd   : > { %v14974_v0 = vmov 0.0   ;;  %s19663_s20 = sld [smem:[#allocation90_spill]]  ;;  %v910_v9 = vlaneseq  ;;  %v15421_v17 = vld [vmem:[%s15333_s6] sm:$0xff]  ;;  %v15425_v18 = vld [vmem:[%s15333_s6 + $0x8] sm:$0xff]  ;;  %vm14975_vm4 = vmmov 0   ;;  %vm1822_vm5 = vcmask 130048  }
  0xce   : > { %14939 = vsyncadd (%p19662_p4), [#allocation17], 4294948352  ;;  %904 = vst [vmem:[#allocation2] sm:$0xff] %v14974_v0  ;;  %s19666_s0 = sld [smem:[#allocation93_spill]]  ;;  %vm2115_vm6 = vcmask 261120   ;;  %vm2299_vm7 = vcmask 523264  }
  0xcf   : > { %907 = vst [vmem:[#allocation2 + $0x18] sm:$0xff] %v14974_v0  ;;  %3050 = vst [vmem:[#allocation4] sm:$0xff] %v14974_v0  ;;  %v15412_v14 = vshrl.u32 %v910_v9, 7  ;;  %s19667_s11 = sld [smem:[#allocation91_spill]]  ;;  %p877_p1 = scmp.lt.s32.totalorder %s15122_s26, 1 }
  0xd0   : > { %3051 = vst [vmem:[#allocation4 + $0x8] sm:$0xff] %v14974_v0  ;;  %3060 = vst [vmem:[#allocation4 + $0x50] sm:$0xff] %v14974_v0  ;;  %s19669_s28 = sld [smem:[#allocation92_spill]] }
  0xd1   : > { %3061 = vst [vmem:[#allocation4 + $0x58] sm:$0xff] %v14974_v0  ;;  %6275 = vst [vmem:[#allocation5] sm:$0xff] %v14974_v0  ;;  %v917_v21 = vand.u32 3, %v15412_v14  ;;  %v15450_v26 = vadd.s32 8, %v15412_v14  ;;  %s19670_s6 = sld [smem:[#allocation96_spill]] }
  0xd2   : > { %6276 = vst [vmem:[#allocation5 + $0x8] sm:$0xff] %v14974_v0  ;;  %6277 = vst [vmem:[#allocation5 + $0x10] sm:$0xff] %v14974_v0  ;;  %s878_s21 = scalar_select %p877_p1, %s15122_s26, 1 }
  0xd3   : > { %6310 = vst [vmem:[#allocation5 + $0x118] sm:$0xff] %v14974_v0  ;;  %6311 = vst [vmem:[#allocation5 + $0x120] sm:$0xff] %v14974_v0  ;;  %v10710_v1 = vld [vmem:[%s19663_s20 + $0xf8] sm:$0xff]  ;;  %v10709_v3 = vld [vmem:[%s19663_s20 + $0xf0] sm:$0xff]  ;;  %vm937_vm0 = vcmp.ne.s32.totalorder %v917_v21, 0  ;;  %v924_v33 = vand.u32 3, %v15450_v26 }
  0xd4   : > { %6312 = vst [vmem:[#allocation5 + $0x128] sm:$0xff] %v14974_v0  ;;  %v968_v2 = vld [vmem:[%s19663_s20 + $0x78] sm:$0xff]  ;;  %12294 = vmatprep.subr.mxu0 %v10710_v1  ;;  %v967_v4 = vld [vmem:[%s19663_s20 + $0x70] sm:$0xff]  ;;  %v10708_v5 = vld [vmem:[%s19663_s20 + $0xe8] sm:$0xff]  ;;  %v15459_v29 = vsel %vm937_vm0, 1.0, %v14974_v0  ;;  %vm943_vm2 = vcmp.ne.s32.totalorder %v917_v21, 3 }
  0xd5   : > { %12329 = vmatprep.subr.mxu1 %v968_v2  ;;  %12295 = vmatpush3.msra.mxu0 %v10710_v1  ;;  %v966_v6 = vld [vmem:[%s19663_s20 + $0x68] sm:$0xff]  ;;  %v10707_v7 = vld [vmem:[%s19663_s20 + $0xe0] sm:$0xff]  ;;  %v10706_v10 = vld [vmem:[%s19663_s20 + $0xd8] sm:$0xff]  ;;  %19664 = vst [vmem:[#allocation36_spill] sm:$0xff] %v15412_v14  ;;  %vm938_vm1 = vcmp.ne.s32.totalorder %v924_v33, 0  ;;  %v15526_v55 = vsel %vm943_vm2, 1.0, %v14974_v0 }
  0xd6   : > { %12330 = vmatpush3.msra.mxu1 %v968_v2  ;;  %12296 = vmatprep.subr.mxu0 %v10709_v3  ;;  %v965_v8 = vld [vmem:[%s19663_s20 + $0x60] sm:$0xff]  ;;  %v964_v11 = vld [vmem:[%s19663_s20 + $0x58] sm:$0xff]  ;;  %v10705_v12 = vld [vmem:[%s19663_s20 + $0xd0] sm:$0xff]  ;;  %908 = vst [vmem:[#allocation2 + $0x8] sm:$0xff] %v15421_v17  ;;  %v15492_v42 = vsel %vm938_vm1, 1.0, %v14974_v0  ;;  %vm944_vm3 = vcmp.ne.s32.totalorder %v924_v33, 3 }
  0xd7   : > { %12331 = vmatprep.subr.mxu1 %v967_v4  ;;  %12297 = vmatpush3.msra.mxu0 %v10709_v3  ;;  %v963_v13 = vld [vmem:[%s19663_s20 + $0x50] sm:$0xff]  ;;  %v10704_v15 = vld [vmem:[%s19663_s20 + $0xc8] sm:$0xff]  ;;  %v10703_v19 = vld [vmem:[%s19663_s20 + $0xc0] sm:$0xff]  ;;  %909 = vst [vmem:[#allocation2 + $0x10] sm:$0xff] %v15425_v18  ;;  %s10977_s1 = sshll.u32 %s878_s21, 8  ;;  %s19976_s16 = sld [smem:[#allocation101_spill]] }
  0xd8   : > { %12332 = vmatpush3.msra.mxu1 %v967_v4  ;;  %12298 = vmatprep.subr.mxu0 %v10708_v5  ;;  %v962_v16 = vld [vmem:[%s19663_s20 + $0x48] sm:$0xff]  ;;  %v961_v20 = vld [vmem:[%s19663_s20 + $0x40] sm:$0xff]  ;;  %v10702_v22 = vld [vmem:[%s19663_s20 + $0xb8] sm:$0xff]  ;;  %19665 = vst [vmem:[#allocation37_spill] sm:$0xff] %v15450_v26 }
  0xd9   : > { %12333 = vmatprep.subr.mxu1 %v966_v6  ;;  %12299 = vmatpush3.msra.mxu0 %v10708_v5  ;;  %v960_v23 = vld [vmem:[%s19663_s20 + $0x38] sm:$0xff]  ;;  %v10701_v24 = vld [vmem:[%s19663_s20 + $0xb0] sm:$0xff]  ;;  %v10700_v27 = vld [vmem:[%s19663_s20 + $0xa8] sm:$0xff] }
  0xda   : > { %12334 = vmatpush3.msra.mxu1 %v966_v6  ;;  %12300 = vmatprep.subr.mxu0 %v10707_v7  ;;  %v959_v25 = vld [vmem:[%s19663_s20 + $0x30] sm:$0xff]  ;;  %v958_v28 = vld [vmem:[%s19663_s20 + $0x28] sm:$0xff]  ;;  %v10699_v31 = vld [vmem:[%s19663_s20 + $0xa0] sm:$0xff] }
  0xdb   : > { %12335 = vmatprep.subr.mxu1 %v965_v8  ;;  %12301 = vmatpush3.msra.mxu0 %v10707_v7  ;;  %v957_v32 = vld [vmem:[%s19663_s20 + $0x20] sm:$0xff]  ;;  %v10698_v35 = vld [vmem:[%s19663_s20 + $0x98] sm:$0xff]  ;;  %v10697_v37 = vld [vmem:[%s19663_s20 + $0x90] sm:$0xff] }
  0xdc   : > { %12336 = vmatpush3.msra.mxu1 %v965_v8  ;;  %12302 = vmatprep.subr.mxu0 %v10706_v10  ;;  %v956_v36 = vld [vmem:[%s19663_s20 + $0x18] sm:$0xff]  ;;  %v955_v38 = vld [vmem:[%s19663_s20 + $0x10] sm:$0xff]  ;;  %v10696_v39 = vld [vmem:[%s19663_s20 + $0x88] sm:$0xff] }
  0xdd   : > { %12337 = vmatprep.subr.mxu1 %v964_v11  ;;  %12303 = vmatpush3.msra.mxu0 %v10706_v10  ;;  %v954_v40 = vld [vmem:[%s19663_s20 + $0x8] sm:$0xff]  ;;  %v10695_v43 = vld [vmem:[%s19663_s20 + $0x80] sm:$0xff]  ;;  %v10726_v49 = vld [vmem:[%s19663_s20 + $0x178] sm:$0xff] }
  0xde   : > { %12338 = vmatpush3.msra.mxu1 %v964_v11  ;;  %12304 = vmatprep.subr.mxu0 %v10705_v12  ;;  %v950_v30 = vld [vmem:[#allocation2 + $0xb] sm:$0xff]  ;;  %v949_v41 = vld [vmem:[#allocation2 + $0x3] sm:$0xff]  ;;  %v10742_v50 = vld [vmem:[%s19663_s20 + $0x1f8] sm:$0xff] }
  0xdf   : > { %12339 = vmatprep.subr.mxu1 %v963_v13  ;;  %12305 = vmatpush3.msra.mxu0 %v10705_v12  ;;  %v15469_v34 = vmul.f32 %v15459_v29, %v950_v30  ;;  %v953_v44 = vld [vmem:[%s19663_s20] sm:$0xff]  ;;  %v951_v46 = vmul.f32 %v15459_v29, %v949_v41  ;;  %v952_v47 = vmul.f32 %v15492_v42, %v950_v30  ;;  %v15502_v48 = vld [vmem:[#allocation2 + $0xc] sm:$0xff]  ;;  %v10722_v60 = vld [vmem:[%s19663_s20 + $0x158] sm:$0xff] }
  0xe0   : > { %12340 = vmatpush3.msra.mxu1 %v963_v13  ;;  %12306 = vmatprep.subr.mxu0 %v10704_v15  ;;  %v969_v45 = vld [vmem:[#allocation2 + $0x4] sm:$0xff]  ;;  %v10725_v51 = vld [vmem:[%s19663_s20 + $0x170] sm:$0xff]  ;;  %v10738_v61 = vld [vmem:[%s19663_s20 + $0x1d8] sm:$0xff] }
  0xe1   : > { %12341 = vmatprep.subr.mxu1 %v962_v16  ;;  %12307 = vmatpush3.msra.mxu0 %v10704_v15  ;;  %v10741_v52 = vld [vmem:[%s19663_s20 + $0x1f0] sm:$0xff]  ;;  %v10724_v53 = vld [vmem:[%s19663_s20 + $0x168] sm:$0xff]  ;;  %v10723_v58 = vld [vmem:[%s19663_s20 + $0x160] sm:$0xff] }
  0xe2   : > { %12342 = vmatpush3.msra.mxu1 %v962_v16  ;;  %12308 = vmatprep.subr.mxu0 %v10703_v19  ;;  %v10740_v54 = vld [vmem:[%s19663_s20 + $0x1e8] sm:$0xff]  ;;  %v10739_v59 = vld [vmem:[%s19663_s20 + $0x1e0] sm:$0xff]  ;;  %v10721_v62 = vld [vmem:[%s19663_s20 + $0x150] sm:$0xff] }
  0xe3   : > { %12343 = vmatprep.subr.mxu1 %v961_v20  ;;  %12309 = vmatpush3.msra.mxu0 %v10703_v19  ;;  %v15528_v56 = vld [vmem:[#allocation2 + $0xd] sm:$0xff]  ;;  %v10719_v3 = vld [vmem:[%s19663_s20 + $0x140] sm:$0xff]  ;;  %v10718_v5 = vld [vmem:[%s19663_s20 + $0x138] sm:$0xff] }
  0xe4   : > { %12344 = vmatpush3.msra.mxu1 %v961_v20  ;;  %12310 = vmatprep.subr.mxu0 %v10702_v22  ;;  %v15532_v57 = vmul.f32 %v15526_v55, %v15528_v56  ;;  %v10737_v63 = vld [vmem:[%s19663_s20 + $0x1d0] sm:$0xff]  ;;  %v10720_v1 = vld [vmem:[%s19663_s20 + $0x148] sm:$0xff]  ;;  %v10735_v4 = vld [vmem:[%s19663_s20 + $0x1c0] sm:$0xff] }
  0xe5   : > { %12345 = vmatprep.subr.mxu1 %v960_v23  ;;  %12311 = vmatpush3.msra.mxu0 %v10702_v22  ;;  %v10736_v2 = vld [vmem:[%s19663_s20 + $0x1c8] sm:$0xff]  ;;  %v10734_v6 = vld [vmem:[%s19663_s20 + $0x1b8] sm:$0xff]  ;;  %v10717_v7 = vld [vmem:[%s19663_s20 + $0x130] sm:$0xff] }
  0xe6   : > { %12346 = vmatpush3.msra.mxu1 %v960_v23  ;;  %12312 = vmatprep.subr.mxu0 %v10701_v24  ;;  %v10733_v8 = vld [vmem:[%s19663_s20 + $0x1b0] sm:$0xff]  ;;  %v10716_v9 = vld [vmem:[%s19663_s20 + $0x128] sm:$0xff]  ;;  %v10715_v11 = vld [vmem:[%s19663_s20 + $0x120] sm:$0xff] }
  0xe7   : > { %12347 = vmatprep.subr.mxu1 %v959_v25  ;;  %12313 = vmatpush3.msra.mxu0 %v10701_v24  ;;  %v10732_v10 = vld [vmem:[%s19663_s20 + $0x1a8] sm:$0xff]  ;;  %v10731_v12 = vld [vmem:[%s19663_s20 + $0x1a0] sm:$0xff]  ;;  %v10714_v13 = vld [vmem:[%s19663_s20 + $0x118] sm:$0xff]  ;;  %v15610_v24 = vsel %vm944_vm3, 1.0, %v14974_v0 }
  0xe8   : > { %12348 = vmatpush3.msra.mxu1 %v959_v25  ;;  %12314 = vmatprep.subr.mxu0 %v10700_v27  ;;  %v10730_v15 = vld [vmem:[%s19663_s20 + $0x198] sm:$0xff]  ;;  %v1138_v16 = vld [vmem:[#allocation2 + $0x5] sm:$0xff]  ;;  %v10713_v19 = vld [vmem:[%s19663_s20 + $0x110] sm:$0xff]  ;;  %v1141_v30 = vmul.f32 %v15610_v24, %v15528_v56 }
  0xe9   : > { %12349 = vmatprep.subr.mxu1 %v958_v28  ;;  %12315 = vmatpush3.msra.mxu0 %v10700_v27  ;;  %v10729_v20 = vld [vmem:[%s19663_s20 + $0x190] sm:$0xff]  ;;  %v10712_v21 = vld [vmem:[%s19663_s20 + $0x108] sm:$0xff]  ;;  %v1140_v23 = vmul.f32 %v15526_v55, %v1138_v16  ;;  %v10711_v27 = vld [vmem:[%s19663_s20 + $0x100] sm:$0xff] }
  0xea   : > { %12350 = vmatpush3.msra.mxu1 %v958_v28  ;;  %12316 = vmatprep.subr.mxu0 %v10699_v31  ;;  %v10728_v22 = vld [vmem:[%s19663_s20 + $0x188] sm:$0xff]  ;;  %v10754_v41 = vld [vmem:[%s19663_s20 + $0x258] sm:$0xff] }
  0xeb   : > { %12351 = vmatprep.subr.mxu1 %v957_v32  ;;  %12317 = vmatpush3.msra.mxu0 %v10699_v31  ;;  %v1236_v25 = vld [vmem:[#allocation2 + $0x7] sm:$0xff]  ;;  %v1237_v28 = vld [vmem:[#allocation2 + $0xf] sm:$0xff]  ;;  %v10786_v16 = vld [vmem:[%s19663_s20 + $0x358] sm:$0xff] }
  0xec   : > { %12352 = vmatpush3.msra.mxu1 %v957_v32  ;;  %12318 = vmatprep.subr.mxu0 %v10698_v35  ;;  %v10727_v31 = vld [vmem:[%s19663_s20 + $0x180] sm:$0xff]  ;;  %v10758_v32 = vld [vmem:[%s19663_s20 + $0x278] sm:$0xff]  ;;  %v1238_v33 = vmul.f32 %v15459_v29, %v1236_v25  ;;  %v10756_v29 = vld [vmem:[%s19663_s20 + $0x268] sm:$0xff] }
  0xed   : > { %12353 = vmatprep.subr.mxu1 %v956_v36  ;;  %12319 = vmatpush3.msra.mxu0 %v10698_v35  ;;  %v1239_v35 = vmul.f32 %v15492_v42, %v1237_v28  ;;  %v10748_v56 = vld [vmem:[%s19663_s20 + $0x228] sm:$0xff]  ;;  %v10783_v25 = vld [vmem:[%s19663_s20 + $0x340] sm:$0xff]  ;;  %v10782_v28 = vld [vmem:[%s19663_s20 + $0x338] sm:$0xff] }
  0xee   : > { %12354 = vmatpush3.msra.mxu1 %v956_v36  ;;  %12320 = vmatprep.subr.mxu0 %v10697_v37  ;;  %v10757_v36 = vld [vmem:[%s19663_s20 + $0x270] sm:$0xff] }
  0xef   : > { %12355 = vmatprep.subr.mxu1 %v955_v38  ;;  %12321 = vmatpush3.msra.mxu0 %v10697_v37  ;;  %v10774_v37 = vld [vmem:[%s19663_s20 + $0x2f8] sm:$0xff] }
  0xf0   : > { %12356 = vmatpush3.msra.mxu1 %v955_v38  ;;  %12322 = vmatprep.subr.mxu0 %v10696_v39  ;;  %v10773_v38 = vld [vmem:[%s19663_s20 + $0x2f0] sm:$0xff] }
  0xf1   : > { %12357 = vmatprep.subr.mxu1 %v954_v40  ;;  %12323 = vmatpush3.msra.mxu0 %v10696_v39  ;;  %v10755_v39 = vld [vmem:[%s19663_s20 + $0x260] sm:$0xff] }
  0xf2   : > { %12358 = vmatpush3.msra.mxu1 %v954_v40  ;;  %12324 = vmatprep.subr.mxu0 %v10695_v43  ;;  %v10772_v40 = vld [vmem:[%s19663_s20 + $0x2e8] sm:$0xff] }
  0xf3   : > { %12359 = vmatprep.subr.mxu1 %v953_v44  ;;  %12325 = vmatpush3.msra.mxu0 %v10695_v43  ;;  %v10771_v43 = vld [vmem:[%s19663_s20 + $0x2e0] sm:$0xff] }
  0xf4   : > { %12326 = vmatprep.mubr.f32.mxu0 %v969_v45  ;;  %12360 = vmatpush3.msra.mxu1 %v953_v44  ;;  %v10753_v44 = vld [vmem:[%s19663_s20 + $0x250] sm:$0xff]  ;;  %v10770_v45 = vld [vmem:[%s19663_s20 + $0x2d8] sm:$0xff] }
  0xf5   : > { %12361 = vmatprep.mubr.f32.mxu1 %v951_v46  ;;  %12327 = vmatmul.mubr.f32.vlgmr.msra.gmra.mxu0 %v15502_v48  ;;  %v10752_v46 = vld [vmem:[%s19663_s20 + $0x248] sm:$0xff] }
  0xf6   : > { %12362 = vmatmul.mubr.f32.vlgmr.msra.gmra.mxu1 %v952_v47  ;;  %12364 = vmatprep.subr.mxu0 %v10726_v49  ;;  %v10769_v47 = vld [vmem:[%s19663_s20 + $0x2d0] sm:$0xff] }
  0xf7   : > { %12399 = vmatprep.subr.mxu1 %v10742_v50  ;;  %12365 = vmatpush3.msra.mxu0 %v10726_v49  ;;  %v10751_v49 = vld [vmem:[%s19663_s20 + $0x240] sm:$0xff] }
  0xf8   : > { %12400 = vmatpush3.msra.mxu1 %v10742_v50  ;;  %12366 = vmatprep.subr.mxu0 %v10725_v51  ;;  %v10768_v50 = vld [vmem:[%s19663_s20 + $0x2c8] sm:$0xff] }
  0xf9   : > { %12401 = vmatprep.subr.mxu1 %v10741_v52  ;;  %12367 = vmatpush3.msra.mxu0 %v10725_v51  ;;  %v10750_v51 = vld [vmem:[%s19663_s20 + $0x238] sm:$0xff] }
  0xfa   : > { %12402 = vmatpush3.msra.mxu1 %v10741_v52  ;;  %12368 = vmatprep.subr.mxu0 %v10724_v53  ;;  %v10767_v52 = vld [vmem:[%s19663_s20 + $0x2c0] sm:$0xff] }
  0xfb   : > { %12403 = vmatprep.subr.mxu1 %v10740_v54  ;;  %12369 = vmatpush3.msra.mxu0 %v10724_v53  ;;  %v10749_v53 = vld [vmem:[%s19663_s20 + $0x230] sm:$0xff] }
  0xfc   : > { %12404 = vmatpush3.msra.mxu1 %v10740_v54  ;;  %12370 = vmatprep.subr.mxu0 %v10723_v58  ;;  %v10766_v54 = vld [vmem:[%s19663_s20 + $0x2b8] sm:$0xff] }
  0xfd   : > { %12405 = vmatprep.subr.mxu1 %v10739_v59  ;;  %12371 = vmatpush3.msra.mxu0 %v10723_v58  ;;  %v10765_v58 = vld [vmem:[%s19663_s20 + $0x2b0] sm:$0xff] }
  0xfe   : > { %12406 = vmatpush3.msra.mxu1 %v10739_v59  ;;  %12372 = vmatprep.subr.mxu0 %v10722_v60  ;;  %v10747_v59 = vld [vmem:[%s19663_s20 + $0x220] sm:$0xff] }
  0xff   : > { %12407 = vmatprep.subr.mxu1 %v10738_v61  ;;  %12373 = vmatpush3.msra.mxu0 %v10722_v60  ;;  %v10764_v60 = vld [vmem:[%s19663_s20 + $0x2a8] sm:$0xff] }
 0x100   : > { %12408 = vmatpush3.msra.mxu1 %v10738_v61  ;;  %12374 = vmatprep.subr.mxu0 %v10721_v62  ;;  %v10746_v61 = vld [vmem:[%s19663_s20 + $0x218] sm:$0xff] }
 0x101   : > { %12409 = vmatprep.subr.mxu1 %v10737_v63  ;;  %12375 = vmatpush3.msra.mxu0 %v10721_v62  ;;  %v10763_v62 = vld [vmem:[%s19663_s20 + $0x2a0] sm:$0xff] }
 0x102   : > { %12410 = vmatpush3.msra.mxu1 %v10737_v63  ;;  %12376 = vmatprep.subr.mxu0 %v10720_v1  ;;  %v10745_v63 = vld [vmem:[%s19663_s20 + $0x210] sm:$0xff] }
 0x103   : > { %12411 = vmatprep.subr.mxu1 %v10736_v2  ;;  %12377 = vmatpush3.msra.mxu0 %v10720_v1  ;;  %v10762_v1 = vld [vmem:[%s19663_s20 + $0x298] sm:$0xff] }
 0x104   : > { %12412 = vmatpush3.msra.mxu1 %v10736_v2  ;;  %12378 = vmatprep.subr.mxu0 %v10719_v3  ;;  %v10744_v2 = vld [vmem:[%s19663_s20 + $0x208] sm:$0xff] }
 0x105   : > { %12413 = vmatprep.subr.mxu1 %v10735_v4  ;;  %12379 = vmatpush3.msra.mxu0 %v10719_v3  ;;  %v10761_v3 = vld [vmem:[%s19663_s20 + $0x290] sm:$0xff] }
 0x106   : > { %12414 = vmatpush3.msra.mxu1 %v10735_v4  ;;  %12380 = vmatprep.subr.mxu0 %v10718_v5  ;;  %v10743_v4 = vld [vmem:[%s19663_s20 + $0x200] sm:$0xff] }
 0x107   : > { %12415 = vmatprep.subr.mxu1 %v10734_v6  ;;  %12381 = vmatpush3.msra.mxu0 %v10718_v5  ;;  %v10760_v5 = vld [vmem:[%s19663_s20 + $0x288] sm:$0xff] }
 0x108   : > { %12416 = vmatpush3.msra.mxu1 %v10734_v6  ;;  %12382 = vmatprep.subr.mxu0 %v10717_v7  ;;  %v1430_v6 = vld [vmem:[#allocation2 + $0x9] sm:$0xff] }
 0x109   : > { %12417 = vmatprep.subr.mxu1 %v10733_v8  ;;  %12383 = vmatpush3.msra.mxu0 %v10717_v7  ;;  %v1431_v7 = vld [vmem:[#allocation2 + $0x11] sm:$0xff] }
 0x10a   : > { %12418 = vmatpush3.msra.mxu1 %v10733_v8  ;;  %12384 = vmatprep.subr.mxu0 %v10716_v9  ;;  %v10759_v8 = vld [vmem:[%s19663_s20 + $0x280] sm:$0xff] }
 0x10b   : > { %12419 = vmatprep.subr.mxu1 %v10732_v10  ;;  %12385 = vmatpush3.msra.mxu0 %v10716_v9  ;;  %v10790_v9 = vld [vmem:[%s19663_s20 + $0x378] sm:$0xff] }
 0x10c   : > { %12420 = vmatpush3.msra.mxu1 %v10732_v10  ;;  %12386 = vmatprep.subr.mxu0 %v10715_v11  ;;  %v1432_v10 = vmul.f32 %v15526_v55, %v1430_v6  ;;  %v10787_v55 = vld [vmem:[%s19663_s20 + $0x360] sm:$0xff] }
 0x10d   : > { %12421 = vmatprep.subr.mxu1 %v10731_v12  ;;  %12387 = vmatpush3.msra.mxu0 %v10715_v11  ;;  %v1433_v11 = vmul.f32 %v15610_v24, %v1431_v7  ;;  %v15902_v6 = vld [vmem:[%s19666_s0 + $0x60] sm:$0xff]  ;;  %v15909_v7 = vld [vmem:[%s19666_s0 + $0x58] sm:$0xff] }
 0x10e   : > { %12422 = vmatpush3.msra.mxu1 %v10731_v12  ;;  %12388 = vmatprep.subr.mxu0 %v10714_v13  ;;  %v10789_v12 = vld [vmem:[%s19663_s20 + $0x370] sm:$0xff] }
 0x10f   : > { %12423 = vmatprep.subr.mxu1 %v10730_v15  ;;  %12389 = vmatpush3.msra.mxu0 %v10714_v13  ;;  %v10806_v13 = vld [vmem:[%s19663_s20 + $0x3f8] sm:$0xff] }
 0x110   : > { %12424 = vmatpush3.msra.mxu1 %v10730_v15  ;;  %12390 = vmatprep.subr.mxu0 %v10713_v19  ;;  %v10804_v15 = vld [vmem:[%s19663_s20 + $0x3e8] sm:$0xff] }
 0x111   : > { %12425 = vmatprep.subr.mxu1 %v10729_v20  ;;  %12391 = vmatpush3.msra.mxu0 %v10713_v19  ;;  %v10803_v19 = vld [vmem:[%s19663_s20 + $0x3e0] sm:$0xff] }
 0x112   : > { %12426 = vmatpush3.msra.mxu1 %v10729_v20  ;;  %12392 = vmatprep.subr.mxu0 %v10712_v21  ;;  %v10785_v20 = vld [vmem:[%s19663_s20 + $0x350] sm:$0xff] }
 0x113   : > { %12427 = vmatprep.subr.mxu1 %v10728_v22  ;;  %12393 = vmatpush3.msra.mxu0 %v10712_v21  ;;  %v10802_v21 = vld [vmem:[%s19663_s20 + $0x3d8] sm:$0xff] }
 0x114   : > { %12396 = vmatprep.mubr.f32.mxu0 %v1140_v23  ;;  %12394 = vmatprep.subr.mxu0 %v10711_v27  ;;  %v10801_v23 = vld [vmem:[%s19663_s20 + $0x3d0] sm:$0xff] }
 0x115   : > { %12428 = vmatpush3.msra.mxu1 %v10728_v22  ;;  %12395 = vmatpush3.msra.mxu0 %v10711_v27  ;;  %v10784_v22 = vld [vmem:[%s19663_s20 + $0x348] sm:$0xff] }
 0x116   : > { %12429 = vmatprep.subr.mxu1 %v10727_v31  ;;  %12397 = vmatmul.mubr.f32.vlgmr.msra.gmra.mxu0 %v1141_v30  ;;  %v10800_v27 = vld [vmem:[%s19663_s20 + $0x3c8] sm:$0xff]  ;;  %v10799_v30 = vld [vmem:[%s19663_s20 + $0x3c0] sm:$0xff] }
 0x117   : > { %12434 = vmatprep.subr.mxu0 %v10758_v32  ;;  %12430 = vmatpush3.msra.mxu1 %v10727_v31  ;;  %v10781_v31 = vld [vmem:[%s19663_s20 + $0x330] sm:$0xff] }
 0x118   : > { %12431 = vmatprep.mubr.f32.mxu1 %v1238_v33  ;;  %12435 = vmatpush3.msra.mxu0 %v10758_v32  ;;  %v10798_v32 = vld [vmem:[%s19663_s20 + $0x3b8] sm:$0xff]  ;;  %v10780_v33 = vld [vmem:[%s19663_s20 + $0x328] sm:$0xff] }
 0x119   : > { %12432 = vmatmul.mubr.f32.vlgmr.msra.gmra.mxu1 %v1239_v35  ;;  %12436 = vmatprep.subr.mxu0 %v10757_v36  ;;  %v10797_v35 = vld [vmem:[%s19663_s20 + $0x3b0] sm:$0xff] }
 0x11a   : > { %12469 = vmatprep.subr.mxu1 %v10774_v37  ;;  %12437 = vmatpush3.msra.mxu0 %v10757_v36  ;;  %v10779_v36 = vld [vmem:[%s19663_s20 + $0x320] sm:$0xff] }
 0x11b   : > { %12470 = vmatpush3.msra.mxu1 %v10774_v37  ;;  %12438 = vmatprep.subr.mxu0 %v10756_v29  ;;  %v10796_v37 = vld [vmem:[%s19663_s20 + $0x3a8] sm:$0xff] }
 0x11c   : > { %12471 = vmatprep.subr.mxu1 %v10773_v38  ;;  %12439 = vmatpush3.msra.mxu0 %v10756_v29  ;;  %v10778_v29 = vld [vmem:[%s19663_s20 + $0x318] sm:$0xff] }
 0x11d   : > { %12472 = vmatpush3.msra.mxu1 %v10773_v38  ;;  %12440 = vmatprep.subr.mxu0 %v10755_v39  ;;  %v10795_v38 = vld [vmem:[%s19663_s20 + $0x3a0] sm:$0xff] }
 0x11e   : > { %12473 = vmatprep.subr.mxu1 %v10772_v40  ;;  %12441 = vmatpush3.msra.mxu0 %v10755_v39  ;;  %v10777_v39 = vld [vmem:[%s19663_s20 + $0x310] sm:$0xff] }
 0x11f   : > { %12474 = vmatpush3.msra.mxu1 %v10772_v40  ;;  %12442 = vmatprep.subr.mxu0 %v10754_v41  ;;  %v10794_v40 = vld [vmem:[%s19663_s20 + $0x398] sm:$0xff] }
 0x120   : > { %12475 = vmatprep.subr.mxu1 %v10771_v43  ;;  %12443 = vmatpush3.msra.mxu0 %v10754_v41  ;;  %v10776_v41 = vld [vmem:[%s19663_s20 + $0x308] sm:$0xff] }
 0x121   : > { %12476 = vmatpush3.msra.mxu1 %v10771_v43  ;;  %12444 = vmatprep.subr.mxu0 %v10753_v44  ;;  %v10793_v43 = vld [vmem:[%s19663_s20 + $0x390] sm:$0xff] }
 0x122   : > { %12477 = vmatprep.subr.mxu1 %v10770_v45  ;;  %12445 = vmatpush3.msra.mxu0 %v10753_v44  ;;  %v1529_v44 = vld [vmem:[#allocation2 + $0x13] sm:$0xff] }
 0x123   : > { %12478 = vmatpush3.msra.mxu1 %v10770_v45  ;;  %12446 = vmatprep.subr.mxu0 %v10752_v46  ;;  %v10775_v45 = vld [vmem:[%s19663_s20 + $0x300] sm:$0xff] }
 0x124   : > { %12479 = vmatprep.subr.mxu1 %v10769_v47  ;;  %12447 = vmatpush3.msra.mxu0 %v10752_v46  ;;  %v10792_v46 = vld [vmem:[%s19663_s20 + $0x388] sm:$0xff] }
 0x125   : > { %12480 = vmatpush3.msra.mxu1 %v10769_v47  ;;  %12448 = vmatprep.subr.mxu0 %v10751_v49  ;;  %v1531_v47 = vmul.f32 %v15492_v42, %v1529_v44  ;;  %v10821_v42 = vld [vmem:[%s19663_s20 + $0x470] sm:$0xff] }
 0x126   : > { %12481 = vmatprep.subr.mxu1 %v10768_v50  ;;  %12449 = vmatpush3.msra.mxu0 %v10751_v49  ;;  %v10791_v49 = vld [vmem:[%s19663_s20 + $0x380] sm:$0xff] }
 0x127   : > { %12482 = vmatpush3.msra.mxu1 %v10768_v50  ;;  %12450 = vmatprep.subr.mxu0 %v10750_v51  ;;  %v10822_v50 = vld [vmem:[%s19663_s20 + $0x478] sm:$0xff] }
 0x128   : > { %12483 = vmatprep.subr.mxu1 %v10767_v52  ;;  %12451 = vmatpush3.msra.mxu0 %v10750_v51  ;;  %v1627_v51 = vld [vmem:[#allocation2 + $0x14] sm:$0xff] }
 0x129   : > { %12484 = vmatpush3.msra.mxu1 %v10767_v52  ;;  %12452 = vmatprep.subr.mxu0 %v10749_v53  ;;  %v10820_v52 = vld [vmem:[%s19663_s20 + $0x468] sm:$0xff] }
 0x12a   : > { %12485 = vmatprep.subr.mxu1 %v10766_v54  ;;  %12453 = vmatpush3.msra.mxu0 %v10749_v53  ;;  %v10817_v53 = vld [vmem:[%s19663_s20 + $0x450] sm:$0xff] }
 0x12b   : > { %12486 = vmatpush3.msra.mxu1 %v10766_v54  ;;  %12454 = vmatprep.subr.mxu0 %v10748_v56  ;;  %v10815_v54 = vld [vmem:[%s19663_s20 + $0x440] sm:$0xff] }
 0x12c   : > { %12487 = vmatprep.subr.mxu1 %v10765_v58  ;;  %12455 = vmatpush3.msra.mxu0 %v10748_v56  ;;  %v10814_v56 = vld [vmem:[%s19663_s20 + $0x438] sm:$0xff] }
 0x12d   : > { %12488 = vmatpush3.msra.mxu1 %v10765_v58  ;;  %12456 = vmatprep.subr.mxu0 %v10747_v59  ;;  %v10813_v58 = vld [vmem:[%s19663_s20 + $0x430] sm:$0xff] }
 0x12e   : > { %12489 = vmatprep.subr.mxu1 %v10764_v60  ;;  %12457 = vmatpush3.msra.mxu0 %v10747_v59  ;;  %v10812_v59 = vld [vmem:[%s19663_s20 + $0x428] sm:$0xff] }
 0x12f   : > { %12490 = vmatpush3.msra.mxu1 %v10764_v60  ;;  %12458 = vmatprep.subr.mxu0 %v10746_v61  ;;  %v10811_v60 = vld [vmem:[%s19663_s20 + $0x420] sm:$0xff] }
 0x130   : > { %12491 = vmatprep.subr.mxu1 %v10763_v62  ;;  %12459 = vmatpush3.msra.mxu0 %v10746_v61  ;;  %v10810_v61 = vld [vmem:[%s19663_s20 + $0x418] sm:$0xff] }
 0x131   : > { %12492 = vmatpush3.msra.mxu1 %v10763_v62  ;;  %12460 = vmatprep.subr.mxu0 %v10745_v63  ;;  %v10809_v62 = vld [vmem:[%s19663_s20 + $0x410] sm:$0xff] }
 0x132   : > { %12493 = vmatprep.subr.mxu1 %v10762_v1  ;;  %12461 = vmatpush3.msra.mxu0 %v10745_v63  ;;  %v10808_v63 = vld [vmem:[%s19663_s20 + $0x408] sm:$0xff] }
 0x133   : > { %12494 = vmatpush3.msra.mxu1 %v10762_v1  ;;  %12462 = vmatprep.subr.mxu0 %v10744_v2  ;;  %v1723_v1 = vld [vmem:[#allocation2 + $0x15] sm:$0xff] }
 0x134   : > { %12495 = vmatprep.subr.mxu1 %v10761_v3  ;;  %12463 = vmatpush3.msra.mxu0 %v10744_v2  ;;  %v10807_v2 = vld [vmem:[%s19663_s20 + $0x400] sm:$0xff] }
 0x135   : > { %12496 = vmatpush3.msra.mxu1 %v10761_v3  ;;  %12464 = vmatprep.subr.mxu0 %v10743_v4  ;;  %v1725_v3 = vmul.f32 %v15610_v24, %v1723_v1  ;;  %v15886_v24 = vld [vmem:[%s19666_s0 + $0x70] sm:$0xff] }
 0x136   : > { %12497 = vmatprep.subr.mxu1 %v10760_v5  ;;  %12465 = vmatpush3.msra.mxu0 %v10743_v4  ;;  %v15880_v4 = vld [vmem:[%s19666_s0 + $0x78] sm:$0xff] }
 0x137   : > { %12466 = vmatprep.mubr.f32.mxu0 %v15421_v17  ;;  %12498 = vmatpush3.msra.mxu1 %v10760_v5  ;;  %v10788_v17 = vld [vmem:[%s19663_s20 + $0x368] sm:$0xff]  ;;  %v15888_v5 = vld [vmem:[#allocation2] sm:$0xff] }
 0x138   : > { %12467 = vmatmul.mubr.f32.vlgmr.msra.gmra.mxu0 %v15425_v18  ;;  %12499 = vmatprep.subr.mxu1 %v10759_v8  ;;  %v10805_v18 = vld [vmem:[%s19663_s20 + $0x3f0] sm:$0xff] }
 0x139   : > { %12504 = vmatprep.subr.mxu0 %v10790_v9  ;;  %12500 = vmatpush3.msra.mxu1 %v10759_v8  ;;  %v15916_v8 = vld [vmem:[%s19666_s0 + $0x50] sm:$0xff] }
 0x13a   : > { %12501 = vmatprep.mubr.f32.mxu1 %v1432_v10  ;;  %12505 = vmatpush3.msra.mxu0 %v10790_v9  ;;  %v15923_v9 = vld [vmem:[%s19666_s0 + $0x48] sm:$0xff]  ;;  %v15930_v10 = vld [vmem:[%s19666_s0 + $0x40] sm:$0xff] }
 0x13b   : > { %12502 = vmatmul.mubr.f32.vlgmr.msra.gmra.mxu1 %v1433_v11  ;;  %12506 = vmatprep.subr.mxu0 %v10789_v12  ;;  %v15937_v11 = vld [vmem:[%s19666_s0 + $0x38] sm:$0xff] }
 0x13c   : > { %12539 = vmatprep.subr.mxu1 %v10806_v13  ;;  %12507 = vmatpush3.msra.mxu0 %v10789_v12  ;;  %v15944_v12 = vld [vmem:[%s19666_s0 + $0x30] sm:$0xff] }
 0x13d   : > { %12540 = vmatpush3.msra.mxu1 %v10806_v13  ;;  %12508 = vmatprep.subr.mxu0 %v10788_v17  ;;  %v15951_v13 = vld [vmem:[%s19666_s0 + $0x28] sm:$0xff] }
 0x13e   : > { %12541 = vmatprep.subr.mxu1 %v10805_v18  ;;  %12509 = vmatpush3.msra.mxu0 %v10788_v17  ;;  %v15958_v17 = vld [vmem:[%s19666_s0 + $0x20] sm:$0xff] }
 0x13f   : > { %12542 = vmatpush3.msra.mxu1 %v10805_v18  ;;  %12510 = vmatprep.subr.mxu0 %v10787_v55  ;;  %v15965_v18 = vld [vmem:[%s19666_s0 + $0x18] sm:$0xff] }
 0x140   : > { %12543 = vmatprep.subr.mxu1 %v10804_v15  ;;  %12511 = vmatpush3.msra.mxu0 %v10787_v55  ;;  %v15972_v55 = vld [vmem:[%s19666_s0 + $0x10] sm:$0xff] }
 0x141   : > { %12544 = vmatpush3.msra.mxu1 %v10804_v15  ;;  %12512 = vmatprep.subr.mxu0 %v10786_v16  ;;  %v15979_v15 = vld [vmem:[%s19666_s0 + $0x8] sm:$0xff] }
 0x142   : > { %12545 = vmatprep.subr.mxu1 %v10803_v19  ;;  %12513 = vmatpush3.msra.mxu0 %v10786_v16 }
 0x143   : > { %12546 = vmatpush3.msra.mxu1 %v10803_v19  ;;  %12514 = vmatprep.subr.mxu0 %v10785_v20 }
 0x144   : > { %12547 = vmatprep.subr.mxu1 %v10802_v21  ;;  %12515 = vmatpush3.msra.mxu0 %v10785_v20 }
 0x145   : > { %12548 = vmatpush3.msra.mxu1 %v10802_v21  ;;  %12516 = vmatprep.subr.mxu0 %v10784_v22 }
 0x146   : > { %12549 = vmatprep.subr.mxu1 %v10801_v23  ;;  %12517 = vmatpush3.msra.mxu0 %v10784_v22 }
 0x147   : > { %12550 = vmatpush3.msra.mxu1 %v10801_v23  ;;  %12518 = vmatprep.subr.mxu0 %v10783_v25 }
 0x148   : > { %12551 = vmatprep.subr.mxu1 %v10800_v27  ;;  %12519 = vmatpush3.msra.mxu0 %v10783_v25 }
 0x149   : > { %12552 = vmatpush3.msra.mxu1 %v10800_v27  ;;  %12520 = vmatprep.subr.mxu0 %v10782_v28 }
 0x14a   : > { %12553 = vmatprep.subr.mxu1 %v10799_v30  ;;  %12521 = vmatpush3.msra.mxu0 %v10782_v28 }
 0x14b   : > { %12554 = vmatpush3.msra.mxu1 %v10799_v30  ;;  %12522 = vmatprep.subr.mxu0 %v10781_v31 }
 0x14c   : > { %12555 = vmatprep.subr.mxu1 %v10798_v32  ;;  %12523 = vmatpush3.msra.mxu0 %v10781_v31 }
 0x14d   : > { %12556 = vmatpush3.msra.mxu1 %v10798_v32  ;;  %12524 = vmatprep.subr.mxu0 %v10780_v33 }
 0x14e   : > { %12557 = vmatprep.subr.mxu1 %v10797_v35  ;;  %12525 = vmatpush3.msra.mxu0 %v10780_v33 }
 0x14f   : > { %12558 = vmatpush3.msra.mxu1 %v10797_v35  ;;  %12526 = vmatprep.subr.mxu0 %v10779_v36 }
 0x150   : > { %12559 = vmatprep.subr.mxu1 %v10796_v37  ;;  %12527 = vmatpush3.msra.mxu0 %v10779_v36 }
 0x151   : > { %12560 = vmatpush3.msra.mxu1 %v10796_v37  ;;  %12528 = vmatprep.subr.mxu0 %v10778_v29 }
 0x152   : > { %12561 = vmatprep.subr.mxu1 %v10795_v38  ;;  %12529 = vmatpush3.msra.mxu0 %v10778_v29 }
 0x153   : > { %12562 = vmatpush3.msra.mxu1 %v10795_v38  ;;  %12530 = vmatprep.subr.mxu0 %v10777_v39 }
 0x154   : > { %12563 = vmatprep.subr.mxu1 %v10794_v40  ;;  %12531 = vmatpush3.msra.mxu0 %v10777_v39 }
 0x155   : > { %12564 = vmatpush3.msra.mxu1 %v10794_v40  ;;  %12532 = vmatprep.subr.mxu0 %v10776_v41 }
 0x156   : > { %12565 = vmatprep.subr.mxu1 %v10793_v43  ;;  %12533 = vmatpush3.msra.mxu0 %v10776_v41 }
 0x157   : > { %12566 = vmatpush3.msra.mxu1 %v10793_v43  ;;  %12534 = vmatprep.subr.mxu0 %v10775_v45 }
 0x158   : > { %12567 = vmatprep.subr.mxu1 %v10792_v46  ;;  %12535 = vmatpush3.msra.mxu0 %v10775_v45 }
 0x159   : > { %12536 = vmatprep.mubr.f32.mxu0 %v15469_v34  ;;  %12568 = vmatpush3.msra.mxu1 %v10792_v46  ;;  %v10819_v34 = vld [vmem:[%s19663_s20 + $0x460] sm:$0xff] }
 0x15a   : > { %12537 = vmatmul.mubr.f32.vlgmr.msra.gmra.mxu0 %v1531_v47  ;;  %12569 = vmatprep.subr.mxu1 %v10791_v49 }
 0x15b   : > { %12574 = vmatprep.subr.mxu0 %v10822_v50  ;;  %12570 = vmatpush3.msra.mxu1 %v10791_v49 }
 0x15c   : > { %12571 = vmatprep.mubr.f32.mxu1 %v15502_v48  ;;  %12575 = vmatpush3.msra.mxu0 %v10822_v50  ;;  %v10818_v48 = vld [vmem:[%s19663_s20 + $0x458] sm:$0xff] }
 0x15d   : > { %12572 = vmatmul.mubr.f32.vlgmr.msra.gmra.mxu1 %v1627_v51  ;;  %12576 = vmatprep.subr.mxu0 %v10821_v42 }
 0x15e   : > { %12606 = vmatprep.mubr.f32.mxu0 %v15532_v57  ;;  %12577 = vmatpush3.msra.mxu0 %v10821_v42  ;;  %v10816_v57 = vld [vmem:[%s19663_s20 + $0x448] sm:$0xff] }
 0x15f   : > { %12609 = vmatprep.subr.mxu1 %v14974_v0  ;;  %12578 = vmatprep.subr.mxu0 %v10820_v52 }
 0x160   : > { %12579 = vmatpush3.msra.mxu0 %v10820_v52  ;;  %12613 = vmatprep.mubr.msk.f32.mxu1 %vm14975_vm4, %v14974_v0 }
 0x161   : > { %12580 = vmatprep.subr.mxu0 %v10819_v34 }
 0x162   : > { %12581 = vmatpush3.msra.mxu0 %v10819_v34 }
 0x163   : > { %12582 = vmatprep.subr.mxu0 %v10818_v48 }
 0x164   : > { %12583 = vmatpush3.msra.mxu0 %v10818_v48 }
 0x165   : > { %12584 = vmatprep.subr.mxu0 %v10817_v53 }
 0x166   : > { %12585 = vmatpush3.msra.mxu0 %v10817_v53 }
 0x167   : > { %12586 = vmatprep.subr.mxu0 %v10816_v57 }
 0x168   : > { %12587 = vmatpush3.msra.mxu0 %v10816_v57 }
 0x169   : > { %12588 = vmatprep.subr.mxu0 %v10815_v54 }
 0x16a   : > { %12589 = vmatpush3.msra.mxu0 %v10815_v54  ;;  %v19514_v54 = vmov 1.0  }
 0x16b   : > { %12590 = vmatprep.subr.mxu0 %v10814_v56 }
 0x16c   : > { %12591 = vmatpush3.msra.mxu0 %v10814_v56 }
 0x16d   : > { %12592 = vmatprep.subr.mxu0 %v10813_v58 }
 0x16e   : > { %12593 = vmatpush3.msra.mxu0 %v10813_v58  ;;  %v16039_v58 = vld [vmem:[%s19666_s0] sm:$0xff] }
 0x16f   : > { %12594 = vmatprep.subr.mxu0 %v10812_v59 }
 0x170   : > { %12595 = vmatpush3.msra.mxu0 %v10812_v59  ;;  %v16045_v59 = vld [vmem:[#allocation9 + $0x18] sm:$0xff] }
 0x171   : > { %12596 = vmatprep.subr.mxu0 %v10811_v60 }
 0x172   : > { %12597 = vmatpush3.msra.mxu0 %v10811_v60 }
 0x173   : > { %12598 = vmatprep.subr.mxu0 %v10810_v61 }
 0x174   : > { %12599 = vmatpush3.msra.mxu0 %v10810_v61  ;;  %v16047_v61 = vld [vmem:[#allocation9 + $0x10] sm:$0xff] }
 0x175   : > { %12600 = vmatprep.subr.mxu0 %v10809_v62 }
 0x176   : > { %12601 = vmatpush3.msra.mxu0 %v10809_v62 }
 0x177   : > { %12602 = vmatprep.subr.mxu0 %v10808_v63 }
 0x178   : > { %12603 = vmatpush3.msra.mxu0 %v10808_v63 }
 0x179   : > { %12604 = vmatprep.subr.mxu0 %v10807_v2 }
 0x17a   : > { %12605 = vmatpush3.msra.mxu0 %v10807_v2  ;;  %v16057_v2 = vld [vmem:[#allocation9 + $0x8] sm:$0xff] }
 0x17b   : > { %12607 = vmatmul.mubr.f32.vlgmr.msra.gmra.mxu0 %v1725_v3  ;;  %12658 = vmatprep.subr.mxu0 %v14974_v0  ;;  %v16061_v3 = vld [vmem:[#allocation9] sm:$0xff] }
 0x17c   : > { %12690 = vmatprep.mubr.msk.f32.mxu0 %vm14975_vm4, %v14974_v0  ;;  %12659 = vmatpush3.msra.mxu0 %v15880_v4  ;;  %v15895_v0 = vld [vmem:[%s19666_s0 + $0x68] sm:$0xff] }
 0x17d   : > { %12660 = vmatprep.subr.mxu0 %v15888_v5 }
 0x17e   : > { %12661 = vmatpush3.msra.mxu0 %v15886_v24 }
 0x17f   : > { %12662 = vmatprep.subr.mxu0 %v15888_v5 }
 0x180   : > { %12663 = vmatpush3.msra.mxu0 %v15895_v0 }
 0x181   : > { %12664 = vmatprep.subr.mxu0 %v15888_v5 }
 0x182   : > { %12665 = vmatpush3.msra.mxu0 %v15902_v6 }
 0x183   : > { %12666 = vmatprep.subr.mxu0 %v15888_v5 }
 0x184   : > { %12667 = vmatpush3.msra.mxu0 %v15909_v7 }
 0x185   : > { %12668 = vmatprep.subr.mxu0 %v15888_v5 }
 0x186   : > { %12669 = vmatpush3.msra.mxu0 %v15916_v8 }
 0x187   : > { %12670 = vmatprep.subr.mxu0 %v15888_v5 }
 0x188   : > { %12671 = vmatpush3.msra.mxu0 %v15923_v9 }
 0x189   : > { %12672 = vmatprep.subr.mxu0 %v15888_v5 }
 0x18a   : > { %12673 = vmatpush3.msra.mxu0 %v15930_v10 }
 0x18b   : > { %12674 = vmatprep.subr.mxu0 %v15888_v5 }
 0x18c   : > { %12675 = vmatpush3.msra.mxu0 %v15937_v11 }
 0x18d   : > { %12676 = vmatprep.subr.mxu0 %v15888_v5 }
 0x18e   : > { %12677 = vmatpush3.msra.mxu0 %v15944_v12 }
 0x18f   : > { %12678 = vmatprep.subr.mxu0 %v15888_v5 }
 0x190   : > { %12679 = vmatpush3.msra.mxu0 %v15951_v13 }
 0x191   : > { %12680 = vmatprep.subr.mxu0 %v15888_v5 }
 0x192   : > { %12681 = vmatpush3.msra.mxu0 %v15958_v17 }
 0x193   : > { %12682 = vmatprep.subr.mxu0 %v15888_v5 }
 0x194   : > { %12683 = vmatpush3.msra.mxu0 %v15965_v18 }
 0x195   : > { %12684 = vmatprep.subr.mxu0 %v15888_v5 }
 0x196   : > { %12685 = vmatpush3.msra.mxu0 %v15972_v55 }
 0x197   : > { %12686 = vmatprep.subr.mxu0 %v15888_v5 }
 0x198   : > { %12687 = vmatpush3.msra.mxu0 %v15979_v15 }
 0x199   : > { %12688 = vmatprep.subr.mxu0 %v15888_v5 }
 0x19a   : > { %12689 = vmatpush3.msra.mxu0 %v16039_v58 }
 0x19b   : > { %12743 = vmatprep.subr.mxu0 %v15888_v5 }
 0x1b5   : > { %v12328_v16 = vpop.f32.mrf.mxu0 }
 0x1b6   : > { %v12363_v19 = vpop.f32.mrf.mxu1 }
 0x1b7   : > { %v1054_v20 = vpop.f32.mrf.mxu0  ;;  %v1135_v23 = vadd.f32 %v12363_v19, %v12328_v16 }
 0x1b8   : > { %v1129_v22 = vpop.f32.mrf.mxu1 }
 0x1b9   : > { %v1130_v28 = vadd.f32 %v1129_v22, %v1054_v20 }
 0x1d6   : > { %v12398_v21 = vpop.f32.mrf.mxu0 }
 0x1d7   : > { %v1235_v30 = vadd.f32 %v12398_v21, %v1135_v23 }
 0x1d8   : > { %v1225_v25 = vpop.f32.mrf.mxu0 }
 0x1d9   : > { %v12433_v27 = vpop.f32.mrf.mxu1  ;;  %v1234_v32 = vadd.f32 %v1225_v25, %v1130_v28  ;;  %v2298_v28 = vld [vmem:[#allocation12 + $0x38] sm:$0xff] }
 0x1da   : > { %v1333_v35 = vadd.f32 %v12433_v27, %v1235_v30 }
 0x1db   : > { %v1323_v33 = vpop.f32.mrf.mxu1 }
 0x1dc   : > { %v1332_v29 = vadd.f32 %v1323_v33, %v1234_v32  ;;  %v2283_v32 = vld [vmem:[%s15346_s24] sm:$0xff] }
 0x1f8   : > { %v12468_v31 = vpop.f32.mrf.mxu0 }
 0x1f9   : > { %v1429_v38 = vadd.f32 %v12468_v31, %v1333_v35  ;;  %v2297_v35 = vld [vmem:[#allocation12 + $0x30] sm:$0xff] }
 0x1fa   : > { %v1419_v36 = vpop.f32.mrf.mxu0 }
 0x1fb   : > { %v12503_v37 = vpop.f32.mrf.mxu1  ;;  %v1428_v40 = vadd.f32 %v1419_v36, %v1332_v29  ;;  %v2296_v36 = vld [vmem:[#allocation12 + $0x28] sm:$0xff]  ;;  %v2294_v29 = vld [vmem:[#allocation12 + $0x18] sm:$0xff] }
 0x1fc   : > { %v1527_v43 = vadd.f32 %v12503_v37, %v1429_v38  ;;  %v2295_v37 = vld [vmem:[#allocation12 + $0x20] sm:$0xff]  ;;  %v2293_v38 = vld [vmem:[#allocation12 + $0x10] sm:$0xff] }
 0x1fd   : > { %v1517_v41 = vpop.f32.mrf.mxu1 }
 0x1fe   : > { %v1526_v46 = vadd.f32 %v1517_v41, %v1428_v40  ;;  %v2291_v40 = vld [vmem:[#allocation12] sm:$0xff]  ;;  %v2284_v41 = vld [vmem:[%s15346_s24 + $0x8] sm:$0xff] }
 0x21a   : > { %v12538_v39 = vpop.f32.mrf.mxu0 }
 0x21b   : > { %v1625_v47 = vadd.f32 %v12538_v39, %v1527_v43  ;;  %v2292_v39 = vld [vmem:[#allocation12 + $0x8] sm:$0xff]  ;;  %v2285_v43 = vld [vmem:[%s15346_s24 + $0x10] sm:$0xff] }
 0x21c   : > { %v1615_v44 = vpop.f32.mrf.mxu0 }
 0x21d   : > { %v12573_v45 = vpop.f32.mrf.mxu1  ;;  %v1624_v49 = vadd.f32 %v1615_v44, %v1526_v46  ;;  %v2286_v44 = vld [vmem:[%s15346_s24 + $0x18] sm:$0xff]  ;;  %v2288_v46 = vld [vmem:[%s15346_s24 + $0x28] sm:$0xff] }
 0x21e   : > { %v1721_v51 = vadd.f32 %v12573_v45, %v1625_v47  ;;  %v2287_v45 = vld [vmem:[%s15346_s24 + $0x20] sm:$0xff]  ;;  %v2289_v47 = vld [vmem:[%s15346_s24 + $0x30] sm:$0xff] }
 0x21f   : > { %v1711_v50 = vpop.f32.mrf.mxu1 }
 0x220   : > { %v1720_v52 = vadd.f32 %v1711_v50, %v1624_v49  ;;  %v2290_v49 = vld [vmem:[%s15346_s24 + $0x38] sm:$0xff]  ;;  %s10978_s24 = sshll.u32 %s15122_s26, 10 }
 0x221   : > { %s19266_s21 = scalar_lea.hbm %s19976_s16, %s10978_s24 }
 0x23b   : > { %v12608_v42 = vpop.f32.mrf.mxu0 }
 0x23c   : > { %v15984_v34 = vadd.f32 %v12608_v42, %v1721_v51  ;;  %v1820_v42 = vld [vmem:[%s19667_s11] sm:$0x1]  ;;  %s17020_s11 = scalar_lea.vmem %s19479_s14, %s10977_s1 }
 0x23d   : > { %v1809_v48 = vpop.f32.mrf.mxu0 }
 0x23e   : > { %v15986_v53 = vadd.f32 %v1809_v48, %v1720_v52  ;;  %12610 = vmatpush3.msra.mxu1 %v15984_v34  ;;  %v1897_v57 = vmul.f32 %v15984_v34, %v15984_v34  ;;  %v16099_v52 = vsub.s32 0, %v15412_v14 }
 0x23f   : > { %12611 = vmatprep.subr.mxu1 %v15888_v5 }
 0x240   : > { %12612 = vmatpush3.msra.mxu1 %v15986_v53  ;;  %v1896_v56 = vmul.f32 %v15986_v53, %v15986_v53  ;;  %19668 = vst [vmem:[#allocation38_spill] sm:$0xff] %v16099_v52 }
 0x241   : > { %12614 = vmatmul.mubr.msk.f32.vlgmr.msra.gmra.mxu1 %vm1822_vm5, %v19514_v54  ;;  %12616 = vmatprep.subr.mxu1 %v15888_v5 }
 0x242   : > { %12617 = vmatpush3.msra.mxu1 %v1897_v57  ;;  %12620 = vmatprep.mubr.msk.f32.mxu1 %vm14975_vm4, %v15888_v5 }
 0x243   : > { %12618 = vmatprep.subr.mxu1 %v15888_v5 }
 0x244   : > { %12619 = vmatpush3.msra.mxu1 %v1896_v56  ;;  %v1821_v56 = vld [vmem:[%s19669_s28] sm:$0x1]  ;;  %s17197_s28 = scalar_lea.vmem [#allocation19], %s10681_s4  ;;  %s19975_s4 = sld [smem:[#allocation34_spill]] }
 0x245   : > { %12621 = vmatmul.mubr.msk.f32.vlgmr.msra.gmra.mxu1 %vm1822_vm5, %v19514_v54  ;;  %12623 = vmatprep.subr.mxu1 %v15888_v5  ;;  %s10453_s1 = sshll.u32 %s17197_s28, 4  ;;  %s19269_s1 = int_to_ptr.vmem [resolvable:$true] %s10453_s1 }
 0x246   : > { %12624 = vmatpush3.msra.mxu1 %v15880_v4  ;;  %12655 = vmatprep.mubr.msk.f32.mxu1 %vm14975_vm4, %v15888_v5  ;;  %s14848_s29 = scalar_lea.vmem %s19269_s1, 1024 }
 0x247   : > { %12625 = vmatprep.subr.mxu1 %v15888_v5  ;;  %p14849_p2 = scmp.ne.s32.totalorder %s19269_s1, %s14848_s29 }
 0x248   : > { %12626 = vmatpush3.msra.mxu1 %v15886_v24 }
 0x249   : > { %12627 = vmatprep.subr.mxu1 %v15888_v5 }
 0x24a   : > { %12628 = vmatpush3.msra.mxu1 %v15895_v0  ;;  %p19977_p7 = scmp.ne.s32.totalorder %s19975_s4, 0 }
 0x24b   : > { %12629 = vmatprep.subr.mxu1 %v15888_v5 }
 0x24c   : > { %12630 = vmatpush3.msra.mxu1 %v15902_v6  ;;  %p14850_p3 = pnand %p14849_p2, %p19977_p7 }
 0x24d   : > { %12631 = vmatprep.subr.mxu1 %v15888_v5 }
 0x24e   : > { %12632 = vmatpush3.msra.mxu1 %v15909_v7  ;;  %p14851_p13 = pneg %p14850_p3 }
 0x24f   : > { %12633 = vmatprep.subr.mxu1 %v15888_v5 }
 0x250   : > { %12634 = vmatpush3.msra.mxu1 %v15916_v8 }
 0x251   : > { %12635 = vmatprep.subr.mxu1 %v15888_v5 }
 0x252   : > { %12636 = vmatpush3.msra.mxu1 %v15923_v9 }
 0x253   : > { %12637 = vmatprep.subr.mxu1 %v15888_v5 }
 0x254   : > { %12638 = vmatpush3.msra.mxu1 %v15930_v10 }
 0x255   : > { %12639 = vmatprep.subr.mxu1 %v15888_v5 }
 0x256   : > { %12640 = vmatpush3.msra.mxu1 %v15937_v11 }
 0x257   : > { %12641 = vmatprep.subr.mxu1 %v15888_v5 }
 0x258   : > { %12642 = vmatpush3.msra.mxu1 %v15944_v12 }
 0x259   : > { %12643 = vmatprep.subr.mxu1 %v15888_v5 }
 0x25a   : > { %12644 = vmatpush3.msra.mxu1 %v15951_v13 }
 0x25b   : > { %12645 = vmatprep.subr.mxu1 %v15888_v5 }
 0x25c   : > { %12646 = vmatpush3.msra.mxu1 %v15958_v17 }
 0x25d   : > { %12647 = vmatprep.subr.mxu1 %v15888_v5 }
 0x25e   : > { %12648 = vmatpush3.msra.mxu1 %v15965_v18 }
 0x25f   : > { %12649 = vmatprep.subr.mxu1 %v15888_v5 }
 0x260   : > { %12650 = vmatpush3.msra.mxu1 %v15972_v55 }
 0x261   : > { %12651 = vmatprep.subr.mxu1 %v15888_v5 }
 0x262   : > { %12652 = vmatpush3.msra.mxu1 %v15979_v15 }
 0x263   : > { %12653 = vmatprep.subr.mxu1 %v15888_v5 }
 0x264   : > { %12654 = vmatpush3.msra.mxu1 %v16039_v58 }
 0x265   : > { %12693 = vmatprep.subr.mxu1 %v15888_v5 }
 0x301   : > { %v1892_v60 = vpop.f32.mrf.mxu1 }
 0x302   : > { %12656 = vmatmul.mubr.f32.vlgmr.msra.gmra.mxu1 %v1892_v60 }
 0x303   : > { %v12615_v62 = vpop.f32.mrf.mxu1  ;;  %12694 = vmatpush3.msra.mxu1 %v16045_v59  ;;  %12701 = vmatprep.mubr.msk.f32.mxu1 %vm14975_vm4, %v15888_v5 }
 0x304   : > { %12695 = vmatprep.subr.mxu1 %v15888_v5 }
 0x305   : > { %v1964_v63 = vpop.f32.mrf.mxu1  ;;  %12696 = vmatpush3.msra.mxu1 %v16047_v61 }
 0x306   : > { %12691 = vmatmul.mubr.f32.vlgmr.msra.gmra.mxu0 %v1964_v63  ;;  %12697 = vmatprep.subr.mxu1 %v15888_v5 }
 0x307   : > { %v12622_v1 = vpop.f32.mrf.mxu1  ;;  %12759 = vmatprep.mubr.msk.f32.mxu0 %vm14975_vm4, %v15888_v5  ;;  %12698 = vmatpush3.msra.mxu1 %v16057_v2 }
 0x308   : > { %12699 = vmatprep.subr.mxu1 %v15888_v5 }
 0x309   : > { %12700 = vmatpush3.msra.mxu1 %v16061_v3 }
 0x30a   : > { %12704 = vmatprep.subr.mxu1 %v15888_v5 }
 0x3c2   : > { %v2034_v16 = vpop.f32.mrf.mxu1 }
 0x3c3   : > { %v2108_v19 = vmul.f32 0.03125, %v2034_v16 }
 0x3c4   : > { %v12657_v20 = vpop.f32.mrf.mxu1 }
 0x3c5   : > { %12702 = vmatmul.mubr.msk.f32.vlgmr.msra.gmra.mxu1 %vm2115_vm6, %v2108_v19  ;;  %v2110_v22 = vmul.f32 %v2108_v19, %v2108_v19 }
 0x3c6   : > { %v2104_v21 = vpop.f32.mrf.mxu0  ;;  %12705 = vmatpush3.msra.mxu1 %v16045_v59  ;;  %12712 = vmatprep.mubr.msk.f32.mxu1 %vm14975_vm4, %v15888_v5 }
 0x3c7   : > { %v2109_v23 = vmul.f32 0.03125, %v2104_v21  ;;  %12706 = vmatprep.subr.mxu1 %v15888_v5 }
 0x3c8   : > { %v12692_v25 = vpop.f32.mrf.mxu0  ;;  %12707 = vmatpush3.msra.mxu1 %v16047_v61 }
 0x3c9   : > { %v2111_v27 = vsub.f32 %v2109_v23, %v2110_v22  ;;  %12708 = vmatprep.subr.mxu1 %v15888_v5 }
 0x3ca   : > { %12709 = vmatpush3.msra.mxu1 %v16057_v2 }
 0x3cb   : > { %v2112_v30 = vmax.f32 %v2111_v27, 0.0  ;;  %12710 = vmatprep.subr.mxu1 %v15888_v5 }
 0x3cc   : > { %12711 = vmatpush3.msra.mxu1 %v16061_v3 }
 0x3cd   : > { %v2113_v31 = vadd.f32 1e-05, %v2112_v30  ;;  %12715 = vmatprep.subr.mxu1 %v2298_v28 }
 0x3cf   : > { %14563 = vrsqrt.f32 %v2113_v31 }
 0x3dc   : > { %v14564_v33 = vpop.eup %14563 }
 0x3dd   : > { %12713 = vmatmul.mubr.msk.f32.vlgmr.msra.gmra.mxu1 %vm2115_vm6, %v14564_v33 }
 0x3de   : > { %12716 = vmatpush3.msra.mxu1 %v2298_v28  ;;  %12731 = vmatprep.mubr.msk.f32.mxu1 %vm2299_vm7, %v2283_v32 }
 0x3df   : > { %12717 = vmatprep.subr.mxu1 %v2297_v35 }
 0x3e0   : > { %12718 = vmatpush3.msra.mxu1 %v2297_v35 }
 0x3e1   : > { %12719 = vmatprep.subr.mxu1 %v2296_v36 }
 0x3e2   : > { %12720 = vmatpush3.msra.mxu1 %v2296_v36 }
 0x3e3   : > { %12721 = vmatprep.subr.mxu1 %v2295_v37 }
 0x3e4   : > { %12722 = vmatpush3.msra.mxu1 %v2295_v37 }
 0x3e5   : > { %12723 = vmatprep.subr.mxu1 %v2294_v29 }
 0x3e6   : > { %12724 = vmatpush3.msra.mxu1 %v2294_v29 }
 0x3e7   : > { %12725 = vmatprep.subr.mxu1 %v2293_v38 }
 0x3e8   : > { %12726 = vmatpush3.msra.mxu1 %v2293_v38 }
 0x3e9   : > { %12727 = vmatprep.subr.mxu1 %v2292_v39 }
 0x3ea   : > { %12728 = vmatpush3.msra.mxu1 %v2292_v39 }
 0x3eb   : > { %12729 = vmatprep.subr.mxu1 %v2291_v40 }
 0x3ec   : > { %12730 = vmatpush3.msra.mxu1 %v2291_v40  ;;  %v2907_v40 = vld [vmem:[%s19670_s6 + $0x20] sm:$0xff] }
 0x3ed   : > { %12732 = vmatmul.mubr.msk.f32.vlgmr.msra.gmra.mxu1 %vm2299_vm7, %v2284_v41  ;;  %12762 = vmatprep.subr.mxu1 %v15888_v5  ;;  %v2908_v41 = vld [vmem:[%s19670_s6 + $0x28] sm:$0xff] }
 0x3ee   : > { %12734 = vmatprep.mubr.msk.f32.mxu1 %vm2299_vm7, %v2285_v43  ;;  %v2909_v43 = vld [vmem:[%s19670_s6 + $0x30] sm:$0xff] }
 0x3f1   : > { %12735 = vmatmul.mubr.msk.f32.gmra.mxu1 %vm2299_vm7, %v2286_v44  ;;  %v2910_v44 = vld [vmem:[%s19670_s6 + $0x38] sm:$0xff] }
 0x3f2   : > { %12737 = vmatprep.mubr.msk.f32.mxu1 %vm2299_vm7, %v2287_v45 }
 0x3f5   : > { %12738 = vmatmul.mubr.msk.f32.gmra.mxu1 %vm2299_vm7, %v2288_v46  ;;  %v3276_v46 = vld [vmem:[#allocation13 + $0xf8] sm:$0xff] }
 0x3f6   : > { %12740 = vmatprep.mubr.msk.f32.mxu1 %vm2299_vm7, %v2289_v47  ;;  %v3275_v47 = vld [vmem:[#allocation13 + $0xf0] sm:$0xff] }
 0x3f9   : > { %12741 = vmatmul.mubr.msk.f32.gmra.mxu1 %vm2299_vm7, %v2290_v49  ;;  %v3251_v49 = vld [vmem:[#allocation13 + $0x78] sm:$0xff] }
 0x3fa   : > { %12778 = vmatprep.mubr.msk.f32.mxu1 %vm14975_vm4, %v15888_v5 }
 0x485   : > { %v2185_v50 = vpop.f32.mrf.mxu1 }
 0x487   : > { %v12703_v51 = vpop.f32.mrf.mxu1 }
 0x488   : > { %v3274_v51 = vld [vmem:[#allocation13 + $0xe8] sm:$0xff] }
 0x49d   : > { %v2258_v48 = vpop.f32.mrf.mxu1 }
 0x49e   : > { %v2262_v57 = vmul.f32 %v2258_v48, %v1820_v42  ;;  %v3249_v42 = vld [vmem:[#allocation13 + $0x68] sm:$0xff]  ;;  %v3273_v48 = vld [vmem:[#allocation13 + $0xe0] sm:$0xff] }
 0x49f   : > { %v12714_v60 = vpop.f32.mrf.mxu1 }
 0x4a0   : > { %v2263_v62 = vmul.f32 %v2262_v57, %v2185_v50  ;;  %v2268_v63 = vrot.slane %v2262_v57, %v16099_v52  ;;  %v3250_v50 = vld [vmem:[#allocation13 + $0x70] sm:$0xff]  ;;  %v3248_v57 = vld [vmem:[#allocation13 + $0x60] sm:$0xff]  ;;  %v3247_v60 = vld [vmem:[#allocation13 + $0x58] sm:$0xff] }
 0x4a2   : > { %v2264_v1 = vsub.f32 %v1821_v56, %v2263_v62  ;;  %v2269_v16 = vmul.f32 %v2268_v63, %v15986_v53  ;;  %v2270_v19 = vmul.f32 %v2268_v63, %v15984_v34  ;;  %v3272_v56 = vld [vmem:[#allocation13 + $0xd8] sm:$0xff]  ;;  %v3271_v62 = vld [vmem:[#allocation13 + $0xd0] sm:$0xff]  ;;  %v3270_v63 = vld [vmem:[#allocation13 + $0xc8] sm:$0xff] }
 0x4a4   : > { %v2275_v20 = vrot.slane %v2264_v1, %v16099_v52  ;;  %v3269_v1 = vld [vmem:[#allocation13 + $0xc0] sm:$0xff] }
 0x4a6   : > { %v16108_v21 = vadd.f32 %v2275_v20, %v2270_v19  ;;  %v16110_v22 = vadd.f32 %v2275_v20, %v2269_v16  ;;  %v3268_v16 = vld [vmem:[#allocation13 + $0xb8] sm:$0xff]  ;;  %v3267_v19 = vld [vmem:[#allocation13 + $0xb0] sm:$0xff] }
 0x4a7   : > { %v3246_v20 = vld [vmem:[#allocation13 + $0x50] sm:$0xff] }
 0x4ad   : > { %v16112_v23 = vpop.f32.mrf.mxu1 }
 0x4ae   : > { %v2504_v38 = vmul.f32 %v16112_v23, %v16112_v23 }
 0x4af   : > { %v16114_v25 = vpop.f32.mrf.mxu1 }
 0x4b0   : > { %v2503_v39 = vmul.f32 %v16114_v25, %v16114_v25 }
 0x4b1   : > { %v16116_v27 = vpop.f32.mrf.mxu1 }
 0x4b2   : > { %v2506_v37 = vmul.f32 %v16116_v27, %v16116_v27 }
 0x4b3   : > { %v16118_v28 = vpop.f32.mrf.mxu1 }
 0x4b4   : > { %v2505_v29 = vmul.f32 %v16118_v28, %v16118_v28 }
 0x4b5   : > { %v16120_v30 = vpop.f32.mrf.mxu1 }
 0x4b6   : > { %v2508_v35 = vmul.f32 %v16120_v30, %v16120_v30 }
 0x4b7   : > { %v16122_v31 = vpop.f32.mrf.mxu1 }
 0x4b8   : > { %v2507_v36 = vmul.f32 %v16122_v31, %v16122_v31 }
 0x4b9   : > { %v16124_v53 = vpop.f32.mrf.mxu1 }
 0x4ba   : > { %v2510_v34 = vmul.f32 %v16124_v53, %v16124_v53  ;;  %12744 = vmatpush3.msra.mxu0 %v16124_v53 }
 0x4bb   : > { %v16129_v32 = vpop.f32.mrf.mxu1  ;;  %12745 = vmatprep.subr.mxu0 %v15888_v5 }
 0x4bc   : > { %v2509_v33 = vmul.f32 %v16129_v32, %v16129_v32  ;;  %12746 = vmatpush3.msra.mxu0 %v16129_v32  ;;  %12763 = vmatpush3.msra.mxu1 %v2510_v34  ;;  %v3265_v34 = vld [vmem:[#allocation13 + $0xa0] sm:$0xff] }
 0x4bd   : > { %12747 = vmatprep.subr.mxu0 %v15888_v5  ;;  %12764 = vmatprep.subr.mxu1 %v15888_v5 }
 0x4be   : > { %12748 = vmatpush3.msra.mxu0 %v16120_v30  ;;  %12765 = vmatpush3.msra.mxu1 %v2509_v33  ;;  %v3244_v33 = vld [vmem:[#allocation13 + $0x40] sm:$0xff] }
 0x4bf   : > { %12749 = vmatprep.subr.mxu0 %v15888_v5  ;;  %12766 = vmatprep.subr.mxu1 %v15888_v5 }
 0x4c0   : > { %12750 = vmatpush3.msra.mxu0 %v16122_v31  ;;  %12767 = vmatpush3.msra.mxu1 %v2508_v35  ;;  %v3264_v35 = vld [vmem:[#allocation13 + $0x98] sm:$0xff] }
 0x4c1   : > { %12751 = vmatprep.subr.mxu0 %v15888_v5  ;;  %12768 = vmatprep.subr.mxu1 %v15888_v5 }
 0x4c2   : > { %12752 = vmatpush3.msra.mxu0 %v16116_v27  ;;  %12769 = vmatpush3.msra.mxu1 %v2507_v36  ;;  %v3243_v36 = vld [vmem:[#allocation13 + $0x38] sm:$0xff] }
 0x4c3   : > { %12753 = vmatprep.subr.mxu0 %v15888_v5  ;;  %12770 = vmatprep.subr.mxu1 %v15888_v5 }
 0x4c4   : > { %12754 = vmatpush3.msra.mxu0 %v16118_v28  ;;  %12771 = vmatpush3.msra.mxu1 %v2506_v37  ;;  %v3263_v37 = vld [vmem:[#allocation13 + $0x90] sm:$0xff] }
 0x4c5   : > { %12755 = vmatprep.subr.mxu0 %v15888_v5  ;;  %12772 = vmatprep.subr.mxu1 %v15888_v5 }
 0x4c6   : > { %12756 = vmatpush3.msra.mxu0 %v16112_v23  ;;  %12773 = vmatpush3.msra.mxu1 %v2505_v29  ;;  %v3242_v29 = vld [vmem:[#allocation13 + $0x30] sm:$0xff] }
 0x4c7   : > { %12757 = vmatprep.subr.mxu0 %v15888_v5  ;;  %12774 = vmatprep.subr.mxu1 %v15888_v5 }
 0x4c8   : > { %12758 = vmatpush3.msra.mxu0 %v16114_v25  ;;  %12775 = vmatpush3.msra.mxu1 %v2504_v38  ;;  %v3262_v38 = vld [vmem:[#allocation13 + $0x88] sm:$0xff] }
 0x4c9   : > { %12760 = vmatmul.mubr.msk.f32.vlgmr.msra.gmra.mxu0 %vm2299_vm7, %v19514_v54  ;;  %12776 = vmatprep.subr.mxu1 %v15888_v5 }
 0x4ca   : > { %12777 = vmatpush3.msra.mxu1 %v2503_v39  ;;  %12781 = vmatprep.subr.mxu0 %v15888_v5  ;;  %v3241_v39 = vld [vmem:[#allocation13 + $0x28] sm:$0xff] }
 0x4cb   : > { %12779 = vmatmul.mubr.msk.f32.vlgmr.msra.gmra.mxu1 %vm2299_vm7, %v19514_v54  ;;  %12782 = vmatpush3.msra.mxu0 %v15880_v4 }
 0x4cc   : > { %12816 = vmatprep.subr.mxu1 %v15888_v5  ;;  %12783 = vmatprep.subr.mxu0 %v15888_v5 }
 0x4cd   : > { %12817 = vmatpush3.msra.mxu1 %v15880_v4  ;;  %12784 = vmatpush3.msra.mxu0 %v15886_v24 }
 0x4ce   : > { %12818 = vmatprep.subr.mxu1 %v15888_v5  ;;  %12785 = vmatprep.subr.mxu0 %v15888_v5 }
 0x4cf   : > { %12819 = vmatpush3.msra.mxu1 %v15886_v24  ;;  %12786 = vmatpush3.msra.mxu0 %v15895_v0 }
 0x4d0   : > { %12820 = vmatprep.subr.mxu1 %v15888_v5  ;;  %12787 = vmatprep.subr.mxu0 %v15888_v5 }
 0x4d1   : > { %12821 = vmatpush3.msra.mxu1 %v15895_v0  ;;  %12788 = vmatpush3.msra.mxu0 %v15902_v6 }
 0x4d2   : > { %12822 = vmatprep.subr.mxu1 %v15888_v5  ;;  %12789 = vmatprep.subr.mxu0 %v15888_v5 }
 0x4d3   : > { %12823 = vmatpush3.msra.mxu1 %v15902_v6  ;;  %12790 = vmatpush3.msra.mxu0 %v15909_v7 }
 0x4d4   : > { %12824 = vmatprep.subr.mxu1 %v15888_v5  ;;  %12791 = vmatprep.subr.mxu0 %v15888_v5 }
 0x4d5   : > { %12825 = vmatpush3.msra.mxu1 %v15909_v7  ;;  %12792 = vmatpush3.msra.mxu0 %v15916_v8  ;;  %v2280_v7 = vmax.f32 %v16108_v21, 0.0  ;;  %v3266_v21 = vld [vmem:[#allocation13 + $0xa8] sm:$0xff] }
 0x4d6   : > { %12826 = vmatprep.subr.mxu1 %v15888_v5  ;;  %12793 = vmatprep.subr.mxu0 %v15888_v5 }
 0x4d7   : > { %12827 = vmatpush3.msra.mxu1 %v15916_v8  ;;  %12794 = vmatpush3.msra.mxu0 %v15923_v9 }
 0x4d8   : > { %12828 = vmatprep.subr.mxu1 %v15888_v5  ;;  %12795 = vmatprep.subr.mxu0 %v15888_v5 }
 0x4d9   : > { %12829 = vmatpush3.msra.mxu1 %v15923_v9  ;;  %12796 = vmatpush3.msra.mxu0 %v15930_v10 }
 0x4da   : > { %12830 = vmatprep.subr.mxu1 %v15888_v5  ;;  %12797 = vmatprep.subr.mxu0 %v15888_v5 }
 0x4db   : > { %12831 = vmatpush3.msra.mxu1 %v15930_v10  ;;  %12798 = vmatpush3.msra.mxu0 %v15937_v11  ;;  %v2903_v10 = vld [vmem:[%s19670_s6] sm:$0xff] }
 0x4dc   : > { %12832 = vmatprep.subr.mxu1 %v15888_v5  ;;  %12799 = vmatprep.subr.mxu0 %v15888_v5 }
 0x4dd   : > { %12833 = vmatpush3.msra.mxu1 %v15937_v11  ;;  %12800 = vmatpush3.msra.mxu0 %v15944_v12 }
 0x4de   : > { %12834 = vmatprep.subr.mxu1 %v15888_v5  ;;  %12801 = vmatprep.subr.mxu0 %v15888_v5 }
 0x4df   : > { %12835 = vmatpush3.msra.mxu1 %v15944_v12  ;;  %12802 = vmatpush3.msra.mxu0 %v15951_v13 }
 0x4e0   : > { %12836 = vmatprep.subr.mxu1 %v15888_v5  ;;  %12803 = vmatprep.subr.mxu0 %v15888_v5 }
 0x4e1   : > { %12837 = vmatpush3.msra.mxu1 %v15951_v13  ;;  %12804 = vmatpush3.msra.mxu0 %v15958_v17 }
 0x4e2   : > { %12838 = vmatprep.subr.mxu1 %v15888_v5  ;;  %12805 = vmatprep.subr.mxu0 %v15888_v5 }
 0x4e3   : > { %12839 = vmatpush3.msra.mxu1 %v15958_v17  ;;  %12806 = vmatpush3.msra.mxu0 %v15965_v18 }
 0x4e4   : > { %12840 = vmatprep.subr.mxu1 %v15888_v5  ;;  %12807 = vmatprep.subr.mxu0 %v15888_v5 }
 0x4e5   : > { %12841 = vmatpush3.msra.mxu1 %v15965_v18  ;;  %12808 = vmatpush3.msra.mxu0 %v15972_v55  ;;  %v2279_v18 = vmax.f32 %v16110_v22, 0.0  ;;  %v3245_v22 = vld [vmem:[#allocation13 + $0x48] sm:$0xff] }
 0x4e6   : > { %12842 = vmatprep.subr.mxu1 %v15888_v5  ;;  %12809 = vmatprep.subr.mxu0 %v15888_v5 }
 0x4e7   : > { %12843 = vmatpush3.msra.mxu1 %v15972_v55  ;;  %12810 = vmatpush3.msra.mxu0 %v15979_v15 }
 0x4e8   : > { %12844 = vmatprep.subr.mxu1 %v15888_v5  ;;  %12811 = vmatprep.subr.mxu0 %v15888_v5 }
 0x4e9   : > { %12845 = vmatpush3.msra.mxu1 %v15979_v15  ;;  %12812 = vmatpush3.msra.mxu0 %v16039_v58  ;;  %v2904_v15 = vld [vmem:[%s19670_s6 + $0x8] sm:$0xff] }
 0x4ea   : > { %12813 = vmatprep.mubr.msk.f32.mxu0 %vm14975_vm4, %v15888_v5  ;;  %12846 = vmatprep.subr.mxu1 %v15888_v5 }
 0x4eb   : > { %12847 = vmatpush3.msra.mxu1 %v16039_v58  ;;  %12848 = vmatprep.mubr.msk.f32.mxu1 %vm14975_vm4, %v15888_v5 }
 0x4ec   : > { %12851 = vmatprep.subr.mxu1 %v15888_v5  ;;  %12862 = vmatprep.subr.mxu0 %v15888_v5 }
 0x589   : > { %v2499_v4 = vpop.f32.mrf.mxu0 }
 0x58a   : > { %12814 = vmatmul.mubr.f32.vlgmr.msra.gmra.mxu0 %v2499_v4  ;;  %v3261_v4 = vld [vmem:[#allocation13 + $0x80] sm:$0xff] }
 0x58b   : > { %v12761_v24 = vpop.f32.mrf.mxu0  ;;  %v2577_v0 = vpop.f32.mrf.mxu1  ;;  %12863 = vmatpush3.msra.mxu0 %v16045_v59  ;;  %12870 = vmatprep.mubr.msk.f32.mxu0 %vm14975_vm4, %v15888_v5 }
 0x58c   : > { %12849 = vmatmul.mubr.f32.vlgmr.msra.gmra.mxu1 %v2577_v0  ;;  %12864 = vmatprep.subr.mxu0 %v15888_v5  ;;  %v3240_v24 = vld [vmem:[#allocation13 + $0x20] sm:$0xff]  ;;  %v16295_v0 = vld [vmem:[#allocation13 + $0x178] sm:$0xff] }
 0x58d   : > { %12852 = vmatpush3.msra.mxu1 %v16045_v59  ;;  %v12780_v6 = vpop.f32.mrf.mxu1  ;;  %12859 = vmatprep.mubr.msk.f32.mxu1 %vm14975_vm4, %v15888_v5  ;;  %v2905_v59 = vld [vmem:[%s19670_s6 + $0x10] sm:$0xff] }
 0x58e   : > { %12853 = vmatprep.subr.mxu1 %v15888_v5  ;;  %12865 = vmatpush3.msra.mxu0 %v16047_v61  ;;  %v3239_v6 = vld [vmem:[#allocation13 + $0x18] sm:$0xff] }
 0x58f   : > { %12854 = vmatpush3.msra.mxu1 %v16047_v61  ;;  %12866 = vmatprep.subr.mxu0 %v15888_v5 }
 0x590   : > { %12855 = vmatprep.subr.mxu1 %v15888_v5  ;;  %12867 = vmatpush3.msra.mxu0 %v16057_v2 }
 0x591   : > { %12856 = vmatpush3.msra.mxu1 %v16057_v2  ;;  %12868 = vmatprep.subr.mxu0 %v15888_v5  ;;  %v2906_v2 = vld [vmem:[%s19670_s6 + $0x18] sm:$0xff] }
 0x592   : > { %12857 = vmatprep.subr.mxu1 %v15888_v5  ;;  %12869 = vmatpush3.msra.mxu0 %v16061_v3 }
 0x593   : > { %12858 = vmatpush3.msra.mxu1 %v16061_v3  ;;  %12933 = vmatprep.subr.mxu0 %v3251_v49 }
 0x594   : > { %12873 = vmatprep.subr.mxu1 %v2280_v7 }
 0x64a   : > { %v2647_v8 = vpop.f32.mrf.mxu0 }
 0x64b   : > { %v2721_v9 = vmul.f32 0.0078125, %v2647_v8  ;;  %v3238_v8 = vld [vmem:[#allocation13 + $0x10] sm:$0xff] }
 0x64c   : > { %v12815_v11 = vpop.f32.mrf.mxu0  ;;  %v2717_v12 = vpop.f32.mrf.mxu1 }
 0x64d   : > { %v2723_v13 = vmul.f32 %v2721_v9, %v2721_v9  ;;  %v2722_v17 = vmul.f32 0.0078125, %v2717_v12  ;;  %12860 = vmatmul.mubr.msk.f32.vlgmr.msra.gmra.mxu1 %vm2115_vm6, %v2721_v9  ;;  %v3220_v9 = vld [vmem:[#allocation4 + $0x7] sm:$0xff] }
 0x64e   : > { %12874 = vmatpush3.msra.mxu1 %v2280_v7  ;;  %v12850_v55 = vpop.f32.mrf.mxu1  ;;  %12877 = vmatprep.mubr.msk.f32.mxu1 %vm1822_vm5, %v2903_v10  ;;  %v3080_v7 = vand.u32 7, %v15412_v14  ;;  %v3237_v10 = vld [vmem:[#allocation13 + $0x8] sm:$0xff] }
 0x64f   : > { %v2724_v58 = vsub.f32 %v2722_v17, %v2723_v13  ;;  %12875 = vmatprep.subr.mxu1 %v2279_v18  ;;  %v3236_v13 = vld [vmem:[#allocation13] sm:$0xff]  ;;  %v16305_v17 = vld [vmem:[#allocation13 + $0x1f8] sm:$0xff] }
 0x650   : > { %12876 = vmatpush3.msra.mxu1 %v2279_v18  ;;  %vm3172_vm8 = vcmp.ne.s32.totalorder %v3080_v7, 0  ;;  %vm16419_vm15 = vcmp.ne.s32.totalorder %v3080_v7, 7 }
 0x651   : > { %v2725_v61 = vmax.f32 %v2724_v58, 0.0  ;;  %12878 = vmatmul.mubr.msk.f32.vlgmr.msra.gmra.mxu1 %vm1822_vm5, %v2904_v15  ;;  %12889 = vmatprep.subr.mxu1 %v3276_v46  ;;  %v16302_v11 = vsel %vm3172_vm8, 1.0, %v15888_v5 }
 0x652   : > { %12880 = vmatprep.mubr.msk.f32.mxu1 %vm1822_vm5, %v2905_v59  ;;  %12890 = vmatpush3.msra.mxu1 %v3276_v46  ;;  %v3228_v12 = vmul.f32 %v16302_v11, %v3220_v9  ;;  %v3516_v9 = vld [vmem:[#allocation13 + $0x160] sm:$0xff] }
 0x653   : > { %v2726_v3 = vadd.f32 1e-05, %v2725_v61  ;;  %12891 = vmatprep.subr.mxu1 %v3275_v47 }
 0x654   : > { %12892 = vmatpush3.msra.mxu1 %v3275_v47 }
 0x655   : > { %14565 = vrsqrt.f32 %v2726_v3  ;;  %12881 = vmatmul.mubr.msk.f32.gmra.mxu1 %vm1822_vm5, %v2906_v2  ;;  %12893 = vmatprep.subr.mxu1 %v3274_v51  ;;  %v2429_v2 = vld [vmem:[%s19474_s9] sm:$0x1] }
 0x656   : > { %12883 = vmatprep.mubr.msk.f32.mxu1 %vm1822_vm5, %v2907_v40  ;;  %12894 = vmatpush3.msra.mxu1 %v3274_v51  ;;  %v3087_v51 = vand.u32 7, %v15450_v26  ;;  %v3656_v26 = vld [vmem:[#allocation13 + $0x1b0] sm:$0xff] }
 0x657   : > { %12895 = vmatprep.subr.mxu1 %v3273_v48 }
 0x658   : > { %12896 = vmatpush3.msra.mxu1 %v3273_v48  ;;  %vm3173_vm9 = vcmp.ne.s32.totalorder %v3087_v51, 0  ;;  %vm16432_vm0 = vcmp.ne.s32.totalorder %v3087_v51, 7 }
 0x659   : > { %12884 = vmatmul.mubr.msk.f32.gmra.mxu1 %vm1822_vm5, %v2908_v41  ;;  %12897 = vmatprep.subr.mxu1 %v3272_v56 }
 0x65a   : > { %12886 = vmatprep.mubr.msk.f32.mxu1 %vm1822_vm5, %v2909_v43  ;;  %12898 = vmatpush3.msra.mxu1 %v3272_v56  ;;  %v2430_v43 = vld [vmem:[%s19475_s10] sm:$0x1]  ;;  %v16325_v56 = vadd.s32 32, %v15412_v14 }
 0x65b   : > { %12899 = vmatprep.subr.mxu1 %v3271_v62 }
 0x65c   : > { %12900 = vmatpush3.msra.mxu1 %v3271_v62  ;;  %19673 = vst [vmem:[#allocation41_spill] sm:$0xff] %v16325_v56 }
 0x65d   : > { %12887 = vmatmul.mubr.msk.f32.gmra.mxu1 %vm1822_vm5, %v2910_v44  ;;  %12901 = vmatprep.subr.mxu1 %v3270_v63 }
 0x65e   : > { %12921 = vmatprep.mubr.f32.mxu1 %v15888_v5  ;;  %12902 = vmatpush3.msra.mxu1 %v3270_v63 }
 0x65f   : > { %12903 = vmatprep.subr.mxu1 %v3269_v1 }
 0x660   : > { %12904 = vmatpush3.msra.mxu1 %v3269_v1 }
 0x661   : > { %12905 = vmatprep.subr.mxu1 %v3268_v16 }
 0x662   : > { %v14566_v45 = vpop.eup %14565  ;;  %12906 = vmatpush3.msra.mxu1 %v3268_v16 }
 0x663   : > { %12871 = vmatmul.mubr.msk.f32.vlgmr.msra.gmra.mxu0 %vm2115_vm6, %v14566_v45  ;;  %12907 = vmatprep.subr.mxu1 %v3267_v19  ;;  %v16315_v45 = vadd.s32 16, %v15412_v14 }
 0x664   : > { %12934 = vmatpush3.msra.mxu0 %v3251_v49  ;;  %12908 = vmatpush3.msra.mxu1 %v3267_v19 }
 0x665   : > { %12935 = vmatprep.subr.mxu0 %v3250_v50  ;;  %12909 = vmatprep.subr.mxu1 %v3266_v21  ;;  %19671 = vst [vmem:[#allocation39_spill] sm:$0xff] %v16315_v45  ;;  %v3094_v48 = vand.u32 7, %v16315_v45 }
 0x666   : > { %12936 = vmatpush3.msra.mxu0 %v3250_v50  ;;  %12910 = vmatpush3.msra.mxu1 %v3266_v21 }
 0x667   : > { %12937 = vmatprep.subr.mxu0 %v3249_v42  ;;  %12911 = vmatprep.subr.mxu1 %v3265_v34  ;;  %vm3174_vm10 = vcmp.ne.s32.totalorder %v3094_v48, 0  ;;  %vm16449_vm2 = vcmp.ne.s32.totalorder %v3094_v48, 7  ;;  %v3511_v48 = vld [vmem:[#allocation13 + $0x138] sm:$0xff] }
 0x668   : > { %12938 = vmatpush3.msra.mxu0 %v3249_v42  ;;  %12912 = vmatpush3.msra.mxu1 %v3265_v34 }
 0x669   : > { %12939 = vmatprep.subr.mxu0 %v3248_v57  ;;  %12913 = vmatprep.subr.mxu1 %v3264_v35 }
 0x66a   : > { %12940 = vmatpush3.msra.mxu0 %v3248_v57  ;;  %12914 = vmatpush3.msra.mxu1 %v3264_v35  ;;  %v16322_v57 = vadd.s32 24, %v15412_v14 }
 0x66b   : > { %12941 = vmatprep.subr.mxu0 %v3247_v60  ;;  %12915 = vmatprep.subr.mxu1 %v3263_v37 }
 0x66c   : > { %12942 = vmatpush3.msra.mxu0 %v3247_v60  ;;  %12916 = vmatpush3.msra.mxu1 %v3263_v37  ;;  %19672 = vst [vmem:[#allocation40_spill] sm:$0xff] %v16322_v57 }
 0x66d   : > { %12943 = vmatprep.subr.mxu0 %v3246_v20  ;;  %12917 = vmatprep.subr.mxu1 %v3262_v38 }
 0x66e   : > { %12944 = vmatpush3.msra.mxu0 %v3246_v20  ;;  %12918 = vmatpush3.msra.mxu1 %v3262_v38 }
 0x66f   : > { %12945 = vmatprep.subr.mxu0 %v3245_v22  ;;  %12919 = vmatprep.subr.mxu1 %v3261_v4 }
 0x670   : > { %12946 = vmatpush3.msra.mxu0 %v3245_v22  ;;  %12920 = vmatpush3.msra.mxu1 %v3261_v4  ;;  %v3518_v4 = vld [vmem:[#allocation13 + $0x170] sm:$0xff] }
 0x671   : > { %12947 = vmatprep.subr.mxu0 %v3244_v33  ;;  %12977 = vmatprep.subr.mxu1 %v16295_v0 }
 0x672   : > { %12948 = vmatpush3.msra.mxu0 %v3244_v33  ;;  %12965 = vmatprep.mubr.f32.mxu0 %v3228_v12  ;;  %v16375_v12 = vld [vmem:[#allocation2] sm:$0xff] }
 0x673   : > { %12949 = vmatprep.subr.mxu0 %v3243_v36 }
 0x674   : > { %12950 = vmatpush3.msra.mxu0 %v3243_v36 }
 0x675   : > { %12951 = vmatprep.subr.mxu0 %v3242_v29 }
 0x676   : > { %12952 = vmatpush3.msra.mxu0 %v3242_v29 }
 0x677   : > { %12953 = vmatprep.subr.mxu0 %v3241_v39 }
 0x678   : > { %12954 = vmatpush3.msra.mxu0 %v3241_v39 }
 0x679   : > { %12955 = vmatprep.subr.mxu0 %v3240_v24 }
 0x67a   : > { %12956 = vmatpush3.msra.mxu0 %v3240_v24  ;;  %v3517_v24 = vld [vmem:[#allocation13 + $0x168] sm:$0xff] }
 0x67b   : > { %12957 = vmatprep.subr.mxu0 %v3239_v6 }
 0x67c   : > { %12958 = vmatpush3.msra.mxu0 %v3239_v6  ;;  %v3101_v6 = vand.u32 7, %v16322_v57  ;;  %v3509_v57 = vld [vmem:[#allocation13 + $0x128] sm:$0xff] }
 0x67d   : > { %12959 = vmatprep.subr.mxu0 %v3238_v8 }
 0x67e   : > { %12960 = vmatpush3.msra.mxu0 %v3238_v8  ;;  %v16368_v8 = vadd.s32 40, %v15412_v14  ;;  %vm3175_vm11 = vcmp.ne.s32.totalorder %v3101_v6, 0  ;;  %vm16460_vm3 = vcmp.ne.s32.totalorder %v3101_v6, 7 }
 0x67f   : > { %12961 = vmatprep.subr.mxu0 %v3237_v10 }
 0x680   : > { %12962 = vmatpush3.msra.mxu0 %v3237_v10  ;;  %19674 = vst [vmem:[#allocation42_spill] sm:$0xff] %v16368_v8  ;;  %v3108_v10 = vand.u32 7, %v16325_v56  ;;  %v3508_v56 = vld [vmem:[#allocation13 + $0x120] sm:$0xff] }
 0x681   : > { %12963 = vmatprep.subr.mxu0 %v3236_v13 }
 0x682   : > { %12964 = vmatpush3.msra.mxu0 %v3236_v13  ;;  %v16378_v13 = vsel %vm3173_vm9, 1.0, %v16375_v12  ;;  %vm3176_vm12 = vcmp.ne.s32.totalorder %v3108_v10, 0  ;;  %vm16464_vm5 = vcmp.ne.s32.totalorder %v3108_v10, 7  ;;  %v16492_v10 = vsel %vm16449_vm2, 1.0, %v16375_v12 }
 0x683   : > { %13021 = vmatprep.subr.mxu0 %v16305_v17 }
 0x70d   : > { %v2797_v18 = vpop.f32.mrf.mxu1 }
 0x70f   : > { %v12861_v55 = vpop.f32.mrf.mxu1 }
 0x710   : > { %v3515_v55 = vld [vmem:[#allocation13 + $0x158] sm:$0xff] }
 0x711   : > { %v12879_v15 = vpop.f32.mrf.mxu1 }
 0x713   : > { %v3003_v58 = vpop.f32.mrf.mxu1 }
 0x715   : > { %v12882_v5 = vpop.f32.mrf.mxu1 }
 0x717   : > { %v3013_v59 = vpop.f32.mrf.mxu1 }
 0x719   : > { %v12885_v61 = vpop.f32.mrf.mxu1 }
 0x71b   : > { %v3023_v41 = vpop.f32.mrf.mxu1 }
 0x71d   : > { %v12888_v50 = vpop.f32.mrf.mxu1 }
 0x71f   : > { %v3033_v35 = vpop.f32.mrf.mxu1 }
 0x723   : > { %v2870_v3 = vpop.f32.mrf.mxu0 }
 0x724   : > { %v2874_v40 = vmul.f32 %v2870_v3, %v2429_v2 }
 0x725   : > { %v12872_v44 = vpop.f32.mrf.mxu0 }
 0x726   : > { %v2875_v46 = vmul.f32 %v2874_v40, %v2797_v18  ;;  %v2880_v47 = vrot.slane %v2874_v40, %v16099_v52  ;;  %v16381_v18 = vsel %vm3174_vm10, 1.0, %v16375_v12 }
 0x728   : > { %v2876_v49 = vsub.f32 %v2430_v43, %v2875_v46  ;;  %v2881_v42 = vmul.f32 %v2880_v47, %v16114_v25  ;;  %v2882_v60 = vmul.f32 %v16112_v23, %v2880_v47  ;;  %v2884_v63 = vmul.f32 %v16116_v27, %v2880_v47 }
 0x729   : > { %v2883_v1 = vmul.f32 %v2880_v47, %v16118_v28  ;;  %v2886_v16 = vmul.f32 %v16120_v30, %v2880_v47  ;;  %v2885_v25 = vmul.f32 %v2880_v47, %v16122_v31  ;;  %v2888_v19 = vmul.f32 %v16124_v53, %v2880_v47 }
 0x72a   : > { %v2893_v62 = vrot.slane %v2876_v49, %v16099_v52  ;;  %v2887_v20 = vmul.f32 %v2880_v47, %v16129_v32  ;;  %v16401_v43 = vsel %vm3175_vm11, 1.0, %v16375_v12  ;;  %v16407_v46 = vsel %vm3176_vm12, 1.0, %v16375_v12  ;;  %v3513_v49 = vld [vmem:[#allocation13 + $0x148] sm:$0xff] }
 0x72c   : > { %v2895_v21 = vadd.f32 %v2893_v62, %v2881_v42  ;;  %v2896_v22 = vadd.f32 %v2893_v62, %v2882_v60  ;;  %v2898_v34 = vadd.f32 %v2893_v62, %v2884_v63  ;;  %v2897_v33 = vadd.f32 %v2893_v62, %v2883_v1  ;;  %v3663_v42 = vld [vmem:[#allocation13 + $0x1e8] sm:$0xff]  ;;  %v3662_v63 = vld [vmem:[#allocation13 + $0x1e0] sm:$0xff] }
 0x72d   : > { %v2900_v23 = vadd.f32 %v2893_v62, %v2886_v16  ;;  %v2899_v36 = vadd.f32 %v2893_v62, %v2885_v25  ;;  %v2902_v37 = vadd.f32 %v2893_v62, %v2888_v19  ;;  %v2901_v29 = vadd.f32 %v2893_v62, %v2887_v20 }
 0x72e   : > { %v16335_v27 = vadd.f32 %v3003_v58, %v2895_v21  ;;  %v16337_v28 = vadd.f32 %v12882_v5, %v2898_v34  ;;  %v16339_v30 = vadd.f32 %v3013_v59, %v2897_v33  ;;  %v16341_v31 = vadd.f32 %v12879_v15, %v2896_v22  ;;  %v3661_v21 = vld [vmem:[#allocation13 + $0x1d8] sm:$0xff] }
 0x72f   : > { %v16343_v53 = vadd.f32 %v12885_v61, %v2900_v23  ;;  %v16345_v32 = vadd.f32 %v3023_v41, %v2899_v36  ;;  %v16347_v38 = vadd.f32 %v12888_v50, %v2902_v37  ;;  %v16349_v39 = vadd.f32 %v3033_v35, %v2901_v29  ;;  %v3514_v61 = vld [vmem:[#allocation13 + $0x150] sm:$0xff]  ;;  %v3512_v36 = vld [vmem:[#allocation13 + $0x140] sm:$0xff] }
 0x730   : > { %3062 = vst [vmem:[#allocation4 + $0x10] sm:$0xff] %v16335_v27  ;;  %3065 = vst [vmem:[#allocation4 + $0x28] sm:$0xff] %v16337_v28  ;;  %12922 = vmatmul.mubr.f32.vlgmr.msra.gmra.mxu1 %v16335_v27  ;;  %v3115_v15 = vand.u32 7, %v16368_v8  ;;  %v16388_v58 = vadd.s32 56, %v15412_v14  ;;  %v3664_v41 = vld [vmem:[#allocation13 + $0x1f0] sm:$0xff]  ;;  %v16456_v22 = vsel %vm16419_vm15, 1.0, %v16375_v12 }
 0x731   : > { %3064 = vst [vmem:[#allocation4 + $0x20] sm:$0xff] %v16339_v30  ;;  %3063 = vst [vmem:[#allocation4 + $0x18] sm:$0xff] %v16341_v31  ;;  %12978 = vmatpush3.msra.mxu1 %v16295_v0  ;;  %12924 = vmatprep.mubr.f32.mxu1 %v16341_v31  ;;  %v16372_v0 = vadd.s32 48, %v15412_v14  ;;  %v3660_v23 = vld [vmem:[#allocation13 + $0x1d0] sm:$0xff] }
 0x732   : > { %3067 = vst [vmem:[#allocation4 + $0x38] sm:$0xff] %v16343_v53  ;;  %3066 = vst [vmem:[#allocation4 + $0x30] sm:$0xff] %v16345_v32  ;;  %12979 = vmatprep.subr.mxu1 %v3518_v4  ;;  %vm3177_vm13 = vcmp.ne.s32.totalorder %v3115_v15, 0  ;;  %v19516_v50 = vand.u32 7, %v16388_v58  ;;  %vm16471_vm8 = vcmp.ne.s32.totalorder %v3115_v15, 7  ;;  %v3510_v8 = vld [vmem:[#allocation13 + $0x130] sm:$0xff] }
 0x733   : > { %3069 = vst [vmem:[#allocation4 + $0x48] sm:$0xff] %v16347_v38  ;;  %3068 = vst [vmem:[#allocation4 + $0x40] sm:$0xff] %v16349_v39  ;;  %12980 = vmatpush3.msra.mxu1 %v3518_v4  ;;  %v19517_v2 = vand.u32 7, %v16372_v0  ;;  %v16426_v1 = vsel %vm3177_vm13, 1.0, %v16375_v12  ;;  %v3659_v4 = vld [vmem:[#allocation13 + $0x1c8] sm:$0xff] }
 0x734   : > { %19675 = vst [vmem:[#allocation43_spill] sm:$0xff] %v16372_v0  ;;  %12981 = vmatprep.subr.mxu1 %v3517_v24  ;;  %12925 = vmatmul.mubr.f32.gmra.mxu1 %v16339_v30  ;;  %19676 = vst [vmem:[#allocation44_spill] sm:$0xff] %v16388_v58  ;;  %vm16443_vm1 = vcmp.ne.s32.totalorder %v19516_v50, 0 }
 0x735   : > { %12982 = vmatpush3.msra.mxu1 %v3517_v24  ;;  %12927 = vmatprep.mubr.f32.mxu1 %v16337_v28  ;;  %vm3178_vm14 = vcmp.ne.s32.totalorder %v19517_v2, 0  ;;  %v16480_v24 = vsel %vm16443_vm1, 1.0, %v16375_v12 }
 0x736   : > { %12983 = vmatprep.subr.mxu1 %v3516_v9  ;;  %v16437_v7 = vsel %vm3178_vm14, 1.0, %v16375_v12 }
 0x737   : > { %v16390_v5 = vld [vmem:[#allocation4 + $0xf] sm:$0xff]  ;;  %12984 = vmatpush3.msra.mxu1 %v3516_v9  ;;  %v16487_v9 = vsel %vm16432_vm0, 1.0, %v16375_v12 }
 0x738   : > { %v16392_v59 = vld [vmem:[#allocation4 + $0x17] sm:$0xff]  ;;  %v3229_v3 = vmul.f32 %v16378_v13, %v16390_v5  ;;  %12985 = vmatprep.subr.mxu1 %v3515_v55  ;;  %12928 = vmatmul.mubr.f32.gmra.mxu1 %v16345_v32  ;;  %v16403_v44 = vld [vmem:[#allocation4 + $0x1f] sm:$0xff]  ;;  %v16409_v47 = vld [vmem:[#allocation4 + $0x27] sm:$0xff]  ;;  %v3641_v2 = vmul.f32 %v16302_v11, %v16390_v5 }
 0x739   : > { %v3230_v40 = vmul.f32 %v16381_v18, %v16392_v59  ;;  %12986 = vmatpush3.msra.mxu1 %v3515_v55  ;;  %12930 = vmatprep.mubr.f32.mxu1 %v16343_v53  ;;  %v3231_v60 = vmul.f32 %v16401_v43, %v16403_v44  ;;  %v16428_v16 = vld [vmem:[#allocation4 + $0x2f] sm:$0xff]  ;;  %v16439_v19 = vld [vmem:[#allocation4 + $0x37] sm:$0xff]  ;;  %v16530_v25 = vmul.f32 %v16381_v18, %v16409_v47 }
 0x73a   : > { %12966 = vmatmul.mubr.f32.vlgmr.msra.gmra.mxu0 %v3229_v3  ;;  %12987 = vmatprep.subr.mxu1 %v3514_v61  ;;  %v3487_v34 = vld [vmem:[#allocation4 + $0x9] sm:$0xff]  ;;  %v3233_v35 = vmul.f32 %v16426_v1, %v16428_v16  ;;  %v3234_v29 = vmul.f32 %v16437_v7, %v16439_v19  ;;  %v16482_v6 = vld [vmem:[#allocation4 + $0x3f] sm:$0xff]  ;;  %v16502_v3 = vsel %vm16460_vm3, 1.0, %v16375_v12  ;;  %v16522_v62 = vld [vmem:[#allocation4 + $0x31] sm:$0xff]  ;;  %v16534_v20 = vmul.f32 %v16401_v43, %v16428_v16 }
 0x73b   : > { %13022 = vmatpush3.msra.mxu0 %v16305_v17  ;;  %12968 = vmatprep.mubr.f32.mxu0 %v3230_v40  ;;  %v3232_v17 = vmul.f32 %v16407_v46, %v16409_v47  ;;  %v16494_v55 = vld [vmem:[#allocation4 + $0x47] sm:$0xff]  ;;  %v3495_v15 = vmul.f32 %v16456_v22, %v3487_v34  ;;  %v16538_v51 = vmul.f32 %v16407_v46, %v16439_v19  ;;  %v3654_v5 = vld [vmem:[#allocation13 + $0x1a0] sm:$0xff] }
 0x73c   : > { %13023 = vmatprep.subr.mxu0 %v3664_v41  ;;  %12988 = vmatpush3.msra.mxu1 %v3514_v61  ;;  %v16497_v61 = vld [vmem:[#allocation4 + $0x19] sm:$0xff]  ;;  %v16504_v40 = vld [vmem:[#allocation4 + $0x21] sm:$0xff]  ;;  %v16544_v34 = vmul.f32 %v16426_v1, %v16482_v6  ;;  %v16548_v33 = vmul.f32 %v16437_v7, %v16494_v55 }
 0x73d   : > { %13024 = vmatpush3.msra.mxu0 %v3664_v41  ;;  %12989 = vmatprep.subr.mxu1 %v3513_v49  ;;  %v16509_v41 = vsel %vm16464_vm5, 1.0, %v16375_v12  ;;  %v16552_v37 = vmul.f32 %v16456_v22, %v16497_v61 }
 0x73e   : > { %13025 = vmatprep.subr.mxu0 %v3663_v42  ;;  %12969 = vmatmul.mubr.f32.gmra.mxu0 %v3231_v60  ;;  %v16520_v60 = vsel %vm16471_vm8, 1.0, %v16375_v12 }
 0x73f   : > { %13026 = vmatpush3.msra.mxu0 %v3663_v42  ;;  %12971 = vmatprep.mubr.f32.mxu0 %v3232_v17  ;;  %v16515_v42 = vmul.f32 %v16378_v13, %v16403_v44  ;;  %v16524_v17 = vld [vmem:[#allocation4 + $0x39] sm:$0xff] }
 0x740   : > { %13027 = vmatprep.subr.mxu0 %v3662_v63  ;;  %12931 = vmatmul.mubr.f32.gmra.mxu1 %v16349_v39 }
 0x741   : > { %13028 = vmatpush3.msra.mxu0 %v3662_v63  ;;  %12990 = vmatpush3.msra.mxu1 %v3513_v49  ;;  %v16511_v49 = vld [vmem:[#allocation4 + $0x29] sm:$0xff]  ;;  %v16526_v63 = vld [vmem:[#allocation4 + $0x41] sm:$0xff] }
 0x742   : > { %13029 = vmatprep.subr.mxu0 %v3661_v21  ;;  %12972 = vmatmul.mubr.f32.gmra.mxu0 %v3233_v35  ;;  %v3658_v35 = vld [vmem:[#allocation13 + $0x1c0] sm:$0xff]  ;;  %v16560_v54 = vmul.f32 %v16492_v10, %v16511_v49  ;;  %v16572_v50 = vmul.f32 %v16520_v60, %v16526_v63 }
 0x743   : > { %13030 = vmatpush3.msra.mxu0 %v3661_v21  ;;  %12974 = vmatprep.mubr.f32.mxu0 %v3234_v29  ;;  %v3235_v21 = vmul.f32 %v16480_v24, %v16482_v6  ;;  %v16556_v29 = vmul.f32 %v16487_v9, %v16504_v40 }
 0x744   : > { %13031 = vmatprep.subr.mxu0 %v3660_v23  ;;  %12991 = vmatprep.subr.mxu1 %v3512_v36 }
 0x745   : > { %13032 = vmatpush3.msra.mxu0 %v3660_v23  ;;  %13009 = vmatprep.mubr.f32.mxu1 %v3495_v15  ;;  %v16564_v23 = vmul.f32 %v16502_v3, %v16522_v62  ;;  %v16568_v15 = vmul.f32 %v16509_v41, %v16524_v17 }
 0x746   : > { %13033 = vmatprep.subr.mxu0 %v3659_v4  ;;  %12975 = vmatmul.mubr.f32.gmra.mxu0 %v3235_v21  ;;  %v3657_v21 = vld [vmem:[#allocation13 + $0x1b8] sm:$0xff] }
 0x747   : > { %12992 = vmatpush3.msra.mxu1 %v3512_v36  ;;  %13034 = vmatpush3.msra.mxu0 %v3659_v4  ;;  %v3655_v36 = vld [vmem:[#allocation13 + $0x1a8] sm:$0xff]  ;;  %v3507_v4 = vld [vmem:[#allocation13 + $0x118] sm:$0xff] }
 0x748   : > { %12993 = vmatprep.subr.mxu1 %v3511_v48  ;;  %13035 = vmatprep.subr.mxu0 %v3658_v35 }
 0x749   : > { %13053 = vmatprep.mubr.f32.mxu0 %v3641_v2  ;;  %12994 = vmatpush3.msra.mxu1 %v3511_v48  ;;  %v3506_v2 = vld [vmem:[#allocation13 + $0x110] sm:$0xff]  ;;  %v3653_v48 = vld [vmem:[#allocation13 + $0x198] sm:$0xff] }
 0x74a   : > { %13036 = vmatpush3.msra.mxu0 %v3658_v35  ;;  %12995 = vmatprep.subr.mxu1 %v3510_v8  ;;  %v3505_v35 = vld [vmem:[#allocation13 + $0x108] sm:$0xff] }
 0x74b   : > { %13037 = vmatprep.subr.mxu0 %v3657_v21  ;;  %12996 = vmatpush3.msra.mxu1 %v3510_v8  ;;  %v3652_v8 = vld [vmem:[#allocation13 + $0x190] sm:$0xff] }
 0x74c   : > { %13038 = vmatpush3.msra.mxu0 %v3657_v21  ;;  %12997 = vmatprep.subr.mxu1 %v3509_v57  ;;  %v3504_v21 = vld [vmem:[#allocation13 + $0x100] sm:$0xff] }
 0x74d   : > { %13039 = vmatprep.subr.mxu0 %v3656_v26  ;;  %12998 = vmatpush3.msra.mxu1 %v3509_v57  ;;  %v16576_v57 = vld [vmem:[#allocation4 + $0x11] sm:$0xff] }
 0x74e   : > { %13040 = vmatpush3.msra.mxu0 %v3656_v26  ;;  %12999 = vmatprep.subr.mxu1 %v3508_v56  ;;  %v3651_v26 = vld [vmem:[#allocation13 + $0x188] sm:$0xff] }
 0x74f   : > { %13041 = vmatprep.subr.mxu0 %v3655_v36  ;;  %13000 = vmatpush3.msra.mxu1 %v3508_v56  ;;  %v3496_v56 = vmul.f32 %v16487_v9, %v16576_v57 }
 0x750   : > { %13042 = vmatpush3.msra.mxu0 %v3655_v36  ;;  %13001 = vmatprep.subr.mxu1 %v3507_v4  ;;  %v3650_v36 = vld [vmem:[#allocation13 + $0x180] sm:$0xff] }
 0x751   : > { %13043 = vmatprep.subr.mxu0 %v3654_v5  ;;  %13002 = vmatpush3.msra.mxu1 %v3507_v4  ;;  %v3803_v4 = vld [vmem:[#allocation13 + $0x278] sm:$0xff] }
 0x752   : > { %13044 = vmatpush3.msra.mxu0 %v3654_v5  ;;  %13003 = vmatprep.subr.mxu1 %v3506_v2  ;;  %v3497_v5 = vmul.f32 %v16492_v10, %v16497_v61 }
 0x753   : > { %13045 = vmatprep.subr.mxu0 %v3653_v48  ;;  %13004 = vmatpush3.msra.mxu1 %v3506_v2  ;;  %v3642_v2 = vmul.f32 %v16378_v13, %v16392_v59  ;;  %v3499_v13 = vmul.f32 %v16509_v41, %v16511_v49 }
 0x754   : > { %13046 = vmatpush3.msra.mxu0 %v3653_v48  ;;  %13005 = vmatprep.subr.mxu1 %v3505_v35  ;;  %v3802_v48 = vld [vmem:[#allocation13 + $0x270] sm:$0xff] }
 0x755   : > { %13047 = vmatprep.subr.mxu0 %v3652_v8  ;;  %13006 = vmatpush3.msra.mxu1 %v3505_v35  ;;  %v3949_v35 = vld [vmem:[#allocation13 + $0x2f8] sm:$0xff] }
 0x756   : > { %13048 = vmatpush3.msra.mxu0 %v3652_v8  ;;  %13007 = vmatprep.subr.mxu1 %v3504_v21  ;;  %v3643_v8 = vmul.f32 %v16381_v18, %v16403_v44  ;;  %v3947_v18 = vld [vmem:[#allocation13 + $0x2e8] sm:$0xff]  ;;  %v3644_v44 = vmul.f32 %v16401_v43, %v16409_v47  ;;  %v3945_v47 = vld [vmem:[#allocation13 + $0x2d8] sm:$0xff] }
 0x757   : > { %13049 = vmatprep.subr.mxu0 %v3651_v26  ;;  %13008 = vmatpush3.msra.mxu1 %v3504_v21  ;;  %v3498_v21 = vmul.f32 %v16502_v3, %v16504_v40 }
 0x758   : > { %13050 = vmatpush3.msra.mxu0 %v3651_v26  ;;  %13010 = vmatmul.mubr.f32.vlgmr.msra.gmra.mxu1 %v3496_v56  ;;  %v3801_v26 = vld [vmem:[#allocation13 + $0x268] sm:$0xff]  ;;  %v3948_v56 = vld [vmem:[#allocation13 + $0x2f0] sm:$0xff] }
 0x759   : > { %13051 = vmatprep.subr.mxu0 %v3650_v36  ;;  %13065 = vmatprep.subr.mxu1 %v3803_v4 }
 0x75a   : > { %13012 = vmatprep.mubr.f32.mxu1 %v3497_v5  ;;  %13052 = vmatpush3.msra.mxu0 %v3650_v36  ;;  %v3800_v36 = vld [vmem:[#allocation13 + $0x260] sm:$0xff]  ;;  %v3645_v5 = vmul.f32 %v16407_v46, %v16428_v16  ;;  %v3798_v46 = vld [vmem:[#allocation13 + $0x250] sm:$0xff] }
 0x75b   : > { %13066 = vmatpush3.msra.mxu1 %v3803_v4  ;;  %13054 = vmatmul.mubr.f32.vlgmr.msra.gmra.mxu0 %v3642_v2  ;;  %v19691_v4 = vand.u32 7, %v16372_v0 }
 0x75c   : > { %13067 = vmatprep.subr.mxu1 %v3802_v48  ;;  %13109 = vmatprep.subr.mxu0 %v3949_v35 }
 0x75d   : > { %13056 = vmatprep.mubr.f32.mxu0 %v3643_v8  ;;  %13068 = vmatpush3.msra.mxu1 %v3802_v48  ;;  %vm3202_vm9 = vcmp.ne.s32.totalorder %v19691_v4, 7  ;;  %v3500_v48 = vmul.f32 %v16520_v60, %v16522_v62  ;;  %v3946_v8 = vld [vmem:[#allocation13 + $0x2e0] sm:$0xff]  ;;  %v3944_v4 = vld [vmem:[#allocation13 + $0x2d0] sm:$0xff] }
 0x75e   : > { %13110 = vmatpush3.msra.mxu0 %v3949_v35  ;;  %13013 = vmatmul.mubr.f32.gmra.mxu1 %v3498_v21  ;;  %v16597_v2 = vsel %vm3202_vm9, 1.0, %v16375_v12  ;;  %v3799_v35 = vld [vmem:[#allocation13 + $0x258] sm:$0xff]  ;;  %v19692_v21 = vand.u32 7, %v16388_v58 }
 0x75f   : > { %13069 = vmatprep.subr.mxu1 %v3801_v26  ;;  %13111 = vmatprep.subr.mxu0 %v3948_v56  ;;  %v3501_v43 = vmul.f32 %v16597_v2, %v16524_v17 }
 0x760   : > { %13015 = vmatprep.mubr.f32.mxu1 %v3499_v13  ;;  %13070 = vmatpush3.msra.mxu1 %v3801_v26  ;;  %vm3203_vm10 = vcmp.ne.s32.totalorder %v19692_v21, 7  ;;  %v3646_v26 = vmul.f32 %v16426_v1, %v16439_v19  ;;  %v3943_v1 = vld [vmem:[#allocation13 + $0x2c8] sm:$0xff]  ;;  %v3795_v19 = vld [vmem:[#allocation13 + $0x238] sm:$0xff]  ;;  %v3790_v21 = vld [vmem:[#allocation13 + $0x210] sm:$0xff] }
 0x761   : > { %13112 = vmatpush3.msra.mxu0 %v3948_v56  ;;  %13071 = vmatprep.subr.mxu1 %v3800_v36  ;;  %v16606_v16 = vsel %vm3203_vm10, 1.0, %v16375_v12  ;;  %v3647_v56 = vmul.f32 %v16437_v7, %v16482_v6  ;;  %v3648_v7 = vmul.f32 %v16480_v24, %v16494_v55  ;;  %v3925_v6 = vmul.f32 %v16456_v22, %v16576_v57  ;;  %v3940_v55 = vld [vmem:[#allocation13 + $0x2b0] sm:$0xff]  ;;  %v3791_v22 = vld [vmem:[#allocation13 + $0x218] sm:$0xff]  ;;  %v3938_v57 = vld [vmem:[#allocation13 + $0x2a0] sm:$0xff] }
 0x762   : > { %13057 = vmatmul.mubr.f32.gmra.mxu0 %v3644_v44  ;;  %13113 = vmatprep.subr.mxu0 %v3947_v18  ;;  %v3502_v13 = vmul.f32 %v16606_v16, %v16526_v63  ;;  %v3942_v44 = vld [vmem:[#allocation13 + $0x2c0] sm:$0xff] }
 0x763   : > { %13059 = vmatprep.mubr.f32.mxu0 %v3645_v5  ;;  %13072 = vmatpush3.msra.mxu1 %v3800_v36  ;;  %v3797_v36 = vld [vmem:[#allocation13 + $0x248] sm:$0xff]  ;;  %v3794_v5 = vld [vmem:[#allocation13 + $0x230] sm:$0xff] }
 0x764   : > { %13114 = vmatpush3.msra.mxu0 %v3947_v18  ;;  %13016 = vmatmul.mubr.f32.gmra.mxu1 %v3500_v48  ;;  %v3796_v18 = vld [vmem:[#allocation13 + $0x240] sm:$0xff]  ;;  %v3941_v48 = vld [vmem:[#allocation13 + $0x2b8] sm:$0xff] }
 0x765   : > { %13073 = vmatprep.subr.mxu1 %v3799_v35  ;;  %13115 = vmatprep.subr.mxu0 %v3946_v8 }
 0x766   : > { %13018 = vmatprep.mubr.f32.mxu1 %v3501_v43  ;;  %13074 = vmatpush3.msra.mxu1 %v3799_v35  ;;  %v3792_v35 = vld [vmem:[#allocation13 + $0x220] sm:$0xff]  ;;  %v3937_v43 = vld [vmem:[#allocation13 + $0x298] sm:$0xff] }
 0x767   : > { %13116 = vmatpush3.msra.mxu0 %v3946_v8  ;;  %13075 = vmatprep.subr.mxu1 %v3798_v46  ;;  %v3939_v8 = vld [vmem:[#allocation13 + $0x2a8] sm:$0xff] }
 0x768   : > { %13060 = vmatmul.mubr.f32.gmra.mxu0 %v3646_v26  ;;  %13117 = vmatprep.subr.mxu0 %v3945_v47  ;;  %v3788_v26 = vld [vmem:[#allocation13 + $0x200] sm:$0xff] }
 0x769   : > { %13062 = vmatprep.mubr.f32.mxu0 %v3647_v56  ;;  %13076 = vmatpush3.msra.mxu1 %v3798_v46  ;;  %v3789_v46 = vld [vmem:[#allocation13 + $0x208] sm:$0xff] }
 0x76a   : > { %13118 = vmatpush3.msra.mxu0 %v3945_v47  ;;  %13019 = vmatmul.mubr.f32.gmra.mxu1 %v3502_v13  ;;  %v3936_v47 = vld [vmem:[#allocation13 + $0x290] sm:$0xff]  ;;  %v3935_v56 = vld [vmem:[#allocation13 + $0x288] sm:$0xff]  ;;  %v3934_v13 = vld [vmem:[#allocation13 + $0x280] sm:$0xff] }
 0x76b   : > { %13077 = vmatprep.subr.mxu1 %v3797_v36  ;;  %13119 = vmatprep.subr.mxu0 %v3944_v4 }
 0x76c   : > { %13078 = vmatpush3.msra.mxu1 %v3797_v36  ;;  %13097 = vmatprep.mubr.f32.mxu1 %v16335_v27  ;;  %v3793_v27 = vld [vmem:[#allocation13 + $0x228] sm:$0xff]  ;;  %v4095_v36 = vld [vmem:[#allocation13 + $0x378] sm:$0xff] }
 0x76d   : > { %13120 = vmatpush3.msra.mxu0 %v3944_v4  ;;  %13079 = vmatprep.subr.mxu1 %v3796_v18  ;;  %v3926_v4 = vmul.f32 %v16487_v9, %v16497_v61  ;;  %v4092_v9 = vld [vmem:[#allocation13 + $0x360] sm:$0xff]  ;;  %v4231_v61 = vld [vmem:[#allocation13 + $0x3e8] sm:$0xff] }
 0x76e   : > { %13063 = vmatmul.mubr.f32.gmra.mxu0 %v3648_v7  ;;  %13121 = vmatprep.subr.mxu0 %v3943_v1  ;;  %v3927_v7 = vmul.f32 %v16492_v10, %v16504_v40  ;;  %v3929_v10 = vmul.f32 %v16509_v41, %v16522_v62  ;;  %v4091_v40 = vld [vmem:[#allocation13 + $0x358] sm:$0xff]  ;;  %v3931_v41 = vmul.f32 %v16597_v2, %v16526_v63  ;;  %v4228_v62 = vld [vmem:[#allocation13 + $0x3d0] sm:$0xff] }
 0x76f   : > { %13080 = vmatpush3.msra.mxu1 %v3796_v18  ;;  %13122 = vmatpush3.msra.mxu0 %v3943_v1  ;;  %v4094_v18 = vld [vmem:[#allocation13 + $0x370] sm:$0xff]  ;;  %v4233_v1 = vld [vmem:[#allocation13 + $0x3f8] sm:$0xff] }
 0x770   : > { %13141 = vmatprep.mubr.f32.mxu0 %v3925_v6  ;;  %13081 = vmatprep.subr.mxu1 %v3795_v19  ;;  %v4232_v6 = vld [vmem:[#allocation13 + $0x3f0] sm:$0xff] }
 0x771   : > { %13123 = vmatprep.subr.mxu0 %v3942_v44  ;;  %13082 = vmatpush3.msra.mxu1 %v3795_v19  ;;  %v4093_v19 = vld [vmem:[#allocation13 + $0x368] sm:$0xff] }
 0x772   : > { %13124 = vmatpush3.msra.mxu0 %v3942_v44  ;;  %13083 = vmatprep.subr.mxu1 %v3794_v5  ;;  %v4230_v44 = vld [vmem:[#allocation13 + $0x3e0] sm:$0xff] }
 0x773   : > { %13125 = vmatprep.subr.mxu0 %v3941_v48  ;;  %13084 = vmatpush3.msra.mxu1 %v3794_v5  ;;  %v4087_v5 = vld [vmem:[#allocation13 + $0x338] sm:$0xff] }
 0x774   : > { %13126 = vmatpush3.msra.mxu0 %v3941_v48  ;;  %13085 = vmatprep.subr.mxu1 %v3793_v27  ;;  %v4226_v48 = vld [vmem:[#allocation13 + $0x3c0] sm:$0xff] }
 0x775   : > { %13127 = vmatprep.subr.mxu0 %v3940_v55  ;;  %13086 = vmatpush3.msra.mxu1 %v3793_v27  ;;  %v4224_v27 = vld [vmem:[#allocation13 + $0x3b0] sm:$0xff] }
 0x776   : > { %13128 = vmatpush3.msra.mxu0 %v3940_v55  ;;  %13087 = vmatprep.subr.mxu1 %v3792_v35  ;;  %v4084_v55 = vld [vmem:[#allocation13 + $0x320] sm:$0xff] }
 0x777   : > { %13129 = vmatprep.subr.mxu0 %v3939_v8  ;;  %13088 = vmatpush3.msra.mxu1 %v3792_v35  ;;  %v4223_v35 = vld [vmem:[#allocation13 + $0x3a8] sm:$0xff] }
 0x778   : > { %13130 = vmatpush3.msra.mxu0 %v3939_v8  ;;  %13089 = vmatprep.subr.mxu1 %v3791_v22  ;;  %v4083_v8 = vld [vmem:[#allocation13 + $0x318] sm:$0xff] }
 0x779   : > { %13131 = vmatprep.subr.mxu0 %v3938_v57  ;;  %13090 = vmatpush3.msra.mxu1 %v3791_v22  ;;  %v4082_v22 = vld [vmem:[#allocation13 + $0x310] sm:$0xff] }
 0x77a   : > { %13132 = vmatpush3.msra.mxu0 %v3938_v57  ;;  %13091 = vmatprep.subr.mxu1 %v3790_v21  ;;  %v4221_v57 = vld [vmem:[#allocation13 + $0x398] sm:$0xff] }
 0x77b   : > { %13133 = vmatprep.subr.mxu0 %v3937_v43  ;;  %13092 = vmatpush3.msra.mxu1 %v3790_v21  ;;  %v4081_v21 = vld [vmem:[#allocation13 + $0x308] sm:$0xff] }
 0x77c   : > { %13134 = vmatpush3.msra.mxu0 %v3937_v43  ;;  %13093 = vmatprep.subr.mxu1 %v3789_v46  ;;  %v4220_v43 = vld [vmem:[#allocation13 + $0x390] sm:$0xff] }
 0x77d   : > { %13135 = vmatprep.subr.mxu0 %v3936_v47  ;;  %13094 = vmatpush3.msra.mxu1 %v3789_v46  ;;  %v4080_v46 = vld [vmem:[#allocation13 + $0x300] sm:$0xff] }
 0x77e   : > { %13136 = vmatpush3.msra.mxu0 %v3936_v47  ;;  %13095 = vmatprep.subr.mxu1 %v3788_v26  ;;  %v4219_v47 = vld [vmem:[#allocation13 + $0x388] sm:$0xff] }
 0x77f   : > { %13137 = vmatprep.subr.mxu0 %v3935_v56  ;;  %13096 = vmatpush3.msra.mxu1 %v3788_v26  ;;  %v4218_v26 = vld [vmem:[#allocation13 + $0x380] sm:$0xff] }
 0x780   : > { %13138 = vmatpush3.msra.mxu0 %v3935_v56  ;;  %13098 = vmatmul.mubr.f32.vlgmr.msra.gmra.mxu1 %v16341_v31  ;;  %v4379_v56 = vld [vmem:[#allocation13 + $0x478] sm:$0xff] }
 0x781   : > { %13139 = vmatprep.subr.mxu0 %v3934_v13  ;;  %13153 = vmatprep.subr.mxu1 %v4095_v36 }
 0x782   : > { %13100 = vmatprep.mubr.f32.mxu1 %v16339_v30  ;;  %13140 = vmatpush3.msra.mxu0 %v3934_v13  ;;  %v3928_v30 = vmul.f32 %v16502_v3, %v16511_v49  ;;  %v3930_v3 = vmul.f32 %v16520_v60, %v16524_v17  ;;  %v4089_v49 = vld [vmem:[#allocation13 + $0x348] sm:$0xff]  ;;  %v4088_v60 = vld [vmem:[#allocation13 + $0x340] sm:$0xff]  ;;  %v4378_v13 = vld [vmem:[#allocation13 + $0x470] sm:$0xff] }
 0x783   : > { %13154 = vmatpush3.msra.mxu1 %v4095_v36  ;;  %13142 = vmatmul.mubr.f32.vlgmr.msra.gmra.mxu0 %v3926_v4  ;;  %v4227_v17 = vld [vmem:[#allocation13 + $0x3c8] sm:$0xff]  ;;  %v4210_v36 = vld [vmem:[#allocation4 + $0x20] sm:$0xff]  ;;  %v4211_v4 = vld [vmem:[#allocation4 + $0x28] sm:$0xff] }
 0x784   : > { %13155 = vmatprep.subr.mxu1 %v4094_v18  ;;  %13197 = vmatprep.subr.mxu0 %v4233_v1 }
 0x785   : > { %13144 = vmatprep.mubr.f32.mxu0 %v3927_v7  ;;  %13156 = vmatpush3.msra.mxu1 %v4094_v18  ;;  %v4377_v18 = vld [vmem:[#allocation13 + $0x468] sm:$0xff] }
 0x786   : > { %13198 = vmatpush3.msra.mxu0 %v4233_v1  ;;  %13101 = vmatmul.mubr.f32.gmra.mxu1 %v16337_v28  ;;  %v4090_v28 = vld [vmem:[#allocation13 + $0x350] sm:$0xff]  ;;  %v4376_v1 = vld [vmem:[#allocation13 + $0x460] sm:$0xff]  ;;  %v4213_v7 = vld [vmem:[#allocation4 + $0x38] sm:$0xff] }
 0x787   : > { %13157 = vmatprep.subr.mxu1 %v4093_v19  ;;  %13199 = vmatprep.subr.mxu0 %v4232_v6 }
 0x788   : > { %13103 = vmatprep.mubr.f32.mxu1 %v16345_v32  ;;  %13158 = vmatpush3.msra.mxu1 %v4093_v19  ;;  %v4229_v32 = vld [vmem:[#allocation13 + $0x3d8] sm:$0xff]  ;;  %v4374_v19 = vld [vmem:[#allocation13 + $0x450] sm:$0xff] }
 0x789   : > { %13200 = vmatpush3.msra.mxu0 %v4232_v6  ;;  %13159 = vmatprep.subr.mxu1 %v4092_v9  ;;  %v4070_v6 = vld [vmem:[#allocation4 + $0x4f] sm:$0xff] }
 0x78a   : > { %13145 = vmatmul.mubr.f32.gmra.mxu0 %v3928_v30  ;;  %13201 = vmatprep.subr.mxu0 %v4231_v61  ;;  %v4372_v30 = vld [vmem:[#allocation13 + $0x440] sm:$0xff] }
 0x78b   : > { %13147 = vmatprep.mubr.f32.mxu0 %v3929_v10  ;;  %13160 = vmatpush3.msra.mxu1 %v4092_v9  ;;  %v4373_v9 = vld [vmem:[#allocation13 + $0x448] sm:$0xff]  ;;  %v4368_v10 = vld [vmem:[#allocation13 + $0x420] sm:$0xff] }
 0x78c   : > { %13202 = vmatpush3.msra.mxu0 %v4231_v61  ;;  %13104 = vmatmul.mubr.f32.gmra.mxu1 %v16343_v53  ;;  %v16637_v53 = vld [vmem:[#allocation4 + $0x49] sm:$0xff]  ;;  %v4078_v61 = vmul.f32 %v16480_v24, %v4070_v6  ;;  %v4369_v24 = vld [vmem:[#allocation13 + $0x428] sm:$0xff] }
 0x78d   : > { %13161 = vmatprep.subr.mxu1 %v4091_v40  ;;  %13203 = vmatprep.subr.mxu0 %v4230_v44  ;;  %v3932_v63 = vmul.f32 %v16606_v16, %v16637_v53 }
 0x78e   : > { %13106 = vmatprep.mubr.f32.mxu1 %v16349_v39  ;;  %13162 = vmatpush3.msra.mxu1 %v4091_v40  ;;  %v4071_v39 = vmul.f32 %v16302_v11, %v16392_v59  ;;  %v4225_v11 = vld [vmem:[#allocation13 + $0x3b8] sm:$0xff]  ;;  %v4085_v59 = vld [vmem:[#allocation13 + $0x328] sm:$0xff] }
 0x78f   : > { %13204 = vmatpush3.msra.mxu0 %v4230_v44  ;;  %13163 = vmatprep.subr.mxu1 %v4090_v28  ;;  %v4367_v40 = vld [vmem:[#allocation13 + $0x418] sm:$0xff]  ;;  %v4365_v44 = vld [vmem:[#allocation13 + $0x408] sm:$0xff] }
 0x790   : > { %13148 = vmatmul.mubr.f32.gmra.mxu0 %v3930_v3  ;;  %13205 = vmatprep.subr.mxu0 %v4229_v32  ;;  %v16670_v3 = vld [vmem:[%s19666_s0 + $0x70] sm:$0xff] }
 0x791   : > { %13150 = vmatprep.mubr.f32.mxu0 %v3931_v41  ;;  %13164 = vmatpush3.msra.mxu1 %v4090_v28  ;;  %v4364_v28 = vld [vmem:[#allocation13 + $0x400] sm:$0xff]  ;;  %19694 = vst [vmem:[#allocation46_spill] sm:$0xff] %v16670_v3  ;;  %v4361_v41 = vmul.f32 %v16597_v2, %v16637_v53 }
 0x792   : > { %13206 = vmatpush3.msra.mxu0 %v4229_v32  ;;  %13107 = vmatmul.mubr.f32.gmra.mxu1 %v16347_v38  ;;  %v4086_v38 = vld [vmem:[#allocation13 + $0x330] sm:$0xff]  ;;  %v16663_v32 = vld [vmem:[%s19666_s0 + $0x78] sm:$0xff]  ;;  %v16704_v2 = vld [vmem:[%s19666_s0 + $0x50] sm:$0xff] }
 0x793   : > { %13165 = vmatprep.subr.mxu1 %v4089_v49  ;;  %13207 = vmatprep.subr.mxu0 %v4228_v62  ;;  %19693 = vst [vmem:[#allocation45_spill] sm:$0xff] %v16663_v32  ;;  %19698 = vst [vmem:[#allocation50_spill] sm:$0xff] %v16704_v2  ;;  %v16736_v53 = vld [vmem:[%s19666_s0 + $0x30] sm:$0xff] }
 0x794   : > { %13166 = vmatpush3.msra.mxu1 %v4089_v49  ;;  %13185 = vmatprep.mubr.f32.mxu1 %v4071_v39  ;;  %v16697_v49 = vld [vmem:[%s19666_s0 + $0x58] sm:$0xff]  ;;  %19702 = vst [vmem:[#allocation54_spill] sm:$0xff] %v16736_v53  ;;  %v16743_v39 = vld [vmem:[%s19666_s0 + $0x28] sm:$0xff] }
 0x795   : > { %13208 = vmatpush3.msra.mxu0 %v4228_v62  ;;  %13167 = vmatprep.subr.mxu1 %v4088_v60  ;;  %19697 = vst [vmem:[#allocation49_spill] sm:$0xff] %v16697_v49  ;;  %v16722_v62 = vld [vmem:[%s19666_s0 + $0x40] sm:$0xff]  ;;  %19703 = vst [vmem:[#allocation55_spill] sm:$0xff] %v16743_v39 }
 0x796   : > { %13151 = vmatmul.mubr.f32.gmra.mxu0 %v3932_v63  ;;  %13209 = vmatprep.subr.mxu0 %v4227_v17  ;;  %19700 = vst [vmem:[#allocation52_spill] sm:$0xff] %v16722_v62  ;;  %v16764_v63 = vld [vmem:[%s19666_s0 + $0x10] sm:$0xff] }
 0x797   : > { %13168 = vmatpush3.msra.mxu1 %v4088_v60  ;;  %13210 = vmatpush3.msra.mxu0 %v4227_v17  ;;  %v16750_v60 = vld [vmem:[%s19666_s0 + $0x20] sm:$0xff]  ;;  %v16757_v17 = vld [vmem:[%s19666_s0 + $0x18] sm:$0xff]  ;;  %19706 = vst [vmem:[#allocation58_spill] sm:$0xff] %v16764_v63 }
 0x798   : > { %13229 = vmatprep.mubr.f32.mxu0 %v16341_v31  ;;  %13169 = vmatprep.subr.mxu1 %v4087_v5  ;;  %v4222_v31 = vld [vmem:[#allocation13 + $0x3a0] sm:$0xff]  ;;  %19704 = vst [vmem:[#allocation56_spill] sm:$0xff] %v16750_v60  ;;  %19705 = vst [vmem:[#allocation57_spill] sm:$0xff] %v16757_v17 }
 0x799   : > { %13211 = vmatprep.subr.mxu0 %v4226_v48  ;;  %13170 = vmatpush3.msra.mxu1 %v4087_v5  ;;  %v16771_v5 = vld [vmem:[%s19666_s0 + $0x8] sm:$0xff] }
 0x79a   : > { %13212 = vmatpush3.msra.mxu0 %v4226_v48  ;;  %13171 = vmatprep.subr.mxu1 %v4086_v38  ;;  %19707 = vst [vmem:[#allocation59_spill] sm:$0xff] %v16771_v5  ;;  %v16778_v48 = vld [vmem:[%s19666_s0] sm:$0xff] }
 0x79b   : > { %13213 = vmatprep.subr.mxu0 %v4225_v11  ;;  %13172 = vmatpush3.msra.mxu1 %v4086_v38  ;;  %19708 = vst [vmem:[#allocation60_spill] sm:$0xff] %v16778_v48 }
 0x79c   : > { %13214 = vmatpush3.msra.mxu0 %v4225_v11  ;;  %13173 = vmatprep.subr.mxu1 %v4085_v59 }
 0x79d   : > { %13215 = vmatprep.subr.mxu0 %v4224_v27  ;;  %13174 = vmatpush3.msra.mxu1 %v4085_v59 }
 0x79e   : > { %13216 = vmatpush3.msra.mxu0 %v4224_v27  ;;  %13175 = vmatprep.subr.mxu1 %v4084_v55 }
 0x79f   : > { %13217 = vmatprep.subr.mxu0 %v4223_v35  ;;  %13176 = vmatpush3.msra.mxu1 %v4084_v55 }
 0x7a0   : > { %13218 = vmatpush3.msra.mxu0 %v4223_v35  ;;  %13177 = vmatprep.subr.mxu1 %v4083_v8 }
 0x7a1   : > { %13219 = vmatprep.subr.mxu0 %v4222_v31  ;;  %13178 = vmatpush3.msra.mxu1 %v4083_v8 }
 0x7a2   : > { %13220 = vmatpush3.msra.mxu0 %v4222_v31  ;;  %13179 = vmatprep.subr.mxu1 %v4082_v22 }
 0x7a3   : > { %13221 = vmatprep.subr.mxu0 %v4221_v57  ;;  %13180 = vmatpush3.msra.mxu1 %v4082_v22 }
 0x7a4   : > { %13222 = vmatpush3.msra.mxu0 %v4221_v57  ;;  %13181 = vmatprep.subr.mxu1 %v4081_v21 }
 0x7a5   : > { %13223 = vmatprep.subr.mxu0 %v4220_v43  ;;  %13182 = vmatpush3.msra.mxu1 %v4081_v21 }
 0x7a6   : > { %13224 = vmatpush3.msra.mxu0 %v4220_v43  ;;  %13183 = vmatprep.subr.mxu1 %v4080_v46 }
 0x7a7   : > { %13225 = vmatprep.subr.mxu0 %v4219_v47  ;;  %13184 = vmatpush3.msra.mxu1 %v4080_v46 }
 0x7a8   : > { %13226 = vmatpush3.msra.mxu0 %v4219_v47  ;;  %13186 = vmatmul.mubr.f32.vlgmr.msra.gmra.mxu1 %v16515_v42  ;;  %v4212_v42 = vld [vmem:[#allocation4 + $0x30] sm:$0xff] }
 0x7a9   : > { %13227 = vmatprep.subr.mxu0 %v4218_v26  ;;  %13241 = vmatprep.subr.mxu1 %v4379_v56 }
 0x7aa   : > { %13188 = vmatprep.mubr.f32.mxu1 %v16530_v25  ;;  %13228 = vmatpush3.msra.mxu0 %v4218_v26  ;;  %v4375_v25 = vld [vmem:[#allocation13 + $0x458] sm:$0xff] }
 0x7ab   : > { %13242 = vmatpush3.msra.mxu1 %v4379_v56  ;;  %13230 = vmatmul.mubr.f32.vlgmr.msra.gmra.mxu0 %v4210_v36 }
 0x7ac   : > { %13243 = vmatprep.subr.mxu1 %v4378_v13  ;;  %13232 = vmatprep.mubr.f32.mxu0 %v4211_v4 }
 0x7ad   : > { %13244 = vmatpush3.msra.mxu1 %v4378_v13  ;;  %13285 = vmatprep.subr.mxu0 %v16375_v12 }
 0x7ae   : > { %13189 = vmatmul.mubr.f32.gmra.mxu1 %v16534_v20  ;;  %13245 = vmatprep.subr.mxu1 %v4377_v18  ;;  %v4214_v20 = vld [vmem:[#allocation4 + $0x40] sm:$0xff] }
 0x7af   : > { %13191 = vmatprep.mubr.f32.mxu1 %v16538_v51  ;;  %13246 = vmatpush3.msra.mxu1 %v4377_v18  ;;  %v4215_v51 = vld [vmem:[#allocation4 + $0x48] sm:$0xff] }
 0x7b0   : > { %13233 = vmatmul.mubr.f32.gmra.mxu0 %v4212_v42  ;;  %13247 = vmatprep.subr.mxu1 %v4376_v1 }
 0x7b1   : > { %13235 = vmatprep.mubr.f32.mxu0 %v4213_v7  ;;  %13248 = vmatpush3.msra.mxu1 %v4376_v1 }
 0x7b2   : > { %13192 = vmatmul.mubr.f32.gmra.mxu1 %v16544_v34  ;;  %13249 = vmatprep.subr.mxu1 %v4375_v25  ;;  %v4371_v34 = vld [vmem:[#allocation13 + $0x438] sm:$0xff] }
 0x7b3   : > { %13194 = vmatprep.mubr.f32.mxu1 %v16548_v33  ;;  %13250 = vmatpush3.msra.mxu1 %v4375_v25  ;;  %v4370_v33 = vld [vmem:[#allocation13 + $0x430] sm:$0xff] }
 0x7b4   : > { %13236 = vmatmul.mubr.f32.gmra.mxu0 %v4214_v20  ;;  %13251 = vmatprep.subr.mxu1 %v4374_v19 }
 0x7b5   : > { %13238 = vmatprep.mubr.f32.mxu0 %v4215_v51  ;;  %13252 = vmatpush3.msra.mxu1 %v4374_v19 }
 0x7b6   : > { %13195 = vmatmul.mubr.f32.gmra.mxu1 %v4078_v61  ;;  %13253 = vmatprep.subr.mxu1 %v4373_v9 }
 0x7b7   : > { %13254 = vmatpush3.msra.mxu1 %v4373_v9  ;;  %13273 = vmatprep.mubr.f32.mxu1 %v16552_v37  ;;  %v4366_v37 = vld [vmem:[#allocation13 + $0x410] sm:$0xff] }
 0x7b8   : > { %13239 = vmatmul.mubr.f32.gmra.mxu0 %v16375_v12  ;;  %13255 = vmatprep.subr.mxu1 %v4372_v30 }
 0x7b9   : > { %13256 = vmatpush3.msra.mxu1 %v4372_v30  ;;  %13301 = vmatprep.mubr.msk.f32.mxu0 %vm14975_vm4, %v16375_v12 }
 0x7ba   : > { %13257 = vmatprep.subr.mxu1 %v4371_v34 }
 0x7bb   : > { %13258 = vmatpush3.msra.mxu1 %v4371_v34 }
 0x7bc   : > { %13259 = vmatprep.subr.mxu1 %v4370_v33 }
 0x7bd   : > { %13260 = vmatpush3.msra.mxu1 %v4370_v33 }
 0x7be   : > { %13261 = vmatprep.subr.mxu1 %v4369_v24 }
 0x7bf   : > { %13262 = vmatpush3.msra.mxu1 %v4369_v24 }
 0x7c0   : > { %13263 = vmatprep.subr.mxu1 %v4368_v10 }
 0x7c1   : > { %13264 = vmatpush3.msra.mxu1 %v4368_v10 }
 0x7c2   : > { %13265 = vmatprep.subr.mxu1 %v4367_v40 }
 0x7c3   : > { %13266 = vmatpush3.msra.mxu1 %v4367_v40 }
 0x7c4   : > { %13267 = vmatprep.subr.mxu1 %v4366_v37 }
 0x7c5   : > { %13268 = vmatpush3.msra.mxu1 %v4366_v37 }
 0x7c6   : > { %13269 = vmatprep.subr.mxu1 %v4365_v44 }
 0x7c7   : > { %13270 = vmatpush3.msra.mxu1 %v4365_v44 }
 0x7c8   : > { %13271 = vmatprep.subr.mxu1 %v4364_v28 }
 0x7c9   : > { %13272 = vmatpush3.msra.mxu1 %v4364_v28 }
 0x7ca   : > { %13274 = vmatmul.mubr.f32.vlgmr.msra.gmra.mxu1 %v16556_v29  ;;  %13323 = vmatprep.subr.mxu1 %v16375_v12  ;;  %v16679_v29 = vld [vmem:[%s19666_s0 + $0x68] sm:$0xff] }
 0x7cb   : > { %13276 = vmatprep.mubr.f32.mxu1 %v16560_v54  ;;  %13324 = vmatpush3.msra.mxu1 %v16663_v32  ;;  %v4354_v54 = vld [vmem:[#allocation4 + $0x51] sm:$0xff]  ;;  %19695 = vst [vmem:[#allocation47_spill] sm:$0xff] %v16679_v29 }
 0x7cc   : > { %13325 = vmatprep.subr.mxu1 %v16375_v12 }
 0x7cd   : > { %13326 = vmatpush3.msra.mxu1 %v16670_v3 }
 0x7ce   : > { %13277 = vmatmul.mubr.f32.gmra.mxu1 %v16564_v23  ;;  %13327 = vmatprep.subr.mxu1 %v16375_v12  ;;  %v16688_v23 = vld [vmem:[%s19666_s0 + $0x60] sm:$0xff] }
 0x7cf   : > { %13279 = vmatprep.mubr.f32.mxu1 %v16568_v15  ;;  %13328 = vmatpush3.msra.mxu1 %v16679_v29  ;;  %19696 = vst [vmem:[#allocation48_spill] sm:$0xff] %v16688_v23  ;;  %v4362_v15 = vmul.f32 %v16606_v16, %v4354_v54  ;;  %v16714_v16 = vld [vmem:[#allocation2] sm:$0xff] }
 0x7d0   : > { %13329 = vmatprep.subr.mxu1 %v16375_v12 }
 0x7d1   : > { %13330 = vmatpush3.msra.mxu1 %v16688_v23 }
 0x7d2   : > { %13280 = vmatmul.mubr.f32.gmra.mxu1 %v16572_v50  ;;  %13331 = vmatprep.subr.mxu1 %v16375_v12  ;;  %v16711_v50 = vld [vmem:[%s19666_s0 + $0x48] sm:$0xff] }
 0x7d3   : > { %13282 = vmatprep.mubr.f32.mxu1 %v4361_v41  ;;  %13332 = vmatpush3.msra.mxu1 %v16697_v49  ;;  %19699 = vst [vmem:[#allocation51_spill] sm:$0xff] %v16711_v50 }
 0x7d4   : > { %13333 = vmatprep.subr.mxu1 %v16375_v12 }
 0x7d5   : > { %13334 = vmatpush3.msra.mxu1 %v16704_v2 }
 0x7d6   : > { %13283 = vmatmul.mubr.f32.gmra.mxu1 %v4362_v15  ;;  %13335 = vmatprep.subr.mxu1 %v16375_v12  ;;  %v16729_v12 = vld [vmem:[%s19666_s0 + $0x38] sm:$0xff] }
 0x7d7   : > { %13336 = vmatpush3.msra.mxu1 %v16711_v50  ;;  %13355 = vmatprep.mubr.msk.f32.mxu1 %vm14975_vm4, %v16714_v16  ;;  %19701 = vst [vmem:[#allocation53_spill] sm:$0xff] %v16729_v12 }
 0x7d8   : > { %13337 = vmatprep.subr.mxu1 %v16714_v16 }
 0x7d9   : > { %13338 = vmatpush3.msra.mxu1 %v16722_v62 }
 0x7da   : > { %13339 = vmatprep.subr.mxu1 %v16714_v16 }
 0x7db   : > { %13340 = vmatpush3.msra.mxu1 %v16729_v12 }
 0x7dc   : > { %13341 = vmatprep.subr.mxu1 %v16714_v16 }
 0x7dd   : > { %13342 = vmatpush3.msra.mxu1 %v16736_v53 }
 0x7de   : > { %13343 = vmatprep.subr.mxu1 %v16714_v16 }
 0x7df   : > { %13344 = vmatpush3.msra.mxu1 %v16743_v39 }
 0x7e0   : > { %13345 = vmatprep.subr.mxu1 %v16714_v16 }
 0x7e1   : > { %13346 = vmatpush3.msra.mxu1 %v16750_v60 }
 0x7e2   : > { %13347 = vmatprep.subr.mxu1 %v16714_v16 }
 0x7e3   : > { %13348 = vmatpush3.msra.mxu1 %v16757_v17 }
 0x7e4   : > { %13349 = vmatprep.subr.mxu1 %v16714_v16 }
 0x7e5   : > { %13350 = vmatpush3.msra.mxu1 %v16764_v63 }
 0x7e6   : > { %13351 = vmatprep.subr.mxu1 %v16714_v16 }
 0x7e7   : > { %13352 = vmatpush3.msra.mxu1 %v16771_v5 }
 0x7e8   : > { %13353 = vmatprep.subr.mxu1 %v16714_v16 }
 0x7e9   : > { %13354 = vmatpush3.msra.mxu1 %v16778_v48 }
 0x7ea   : > { %13393 = vmatprep.subr.mxu1 %v16714_v16 }
 0x7f0   : > { %v16782_v38 = vpop.f32.mrf.mxu1 }
 0x7f2   : > { %v16784_v11 = vpop.f32.mrf.mxu1 }
 0x7f4   : > { %v16786_v59 = vpop.f32.mrf.mxu1 }
 0x7f6   : > { %v16790_v55 = vpop.f32.mrf.mxu1 }
 0x7f8   : > { %v12929_v8 = vpop.f32.mrf.mxu1 }
 0x7fa   : > { %v16788_v27 = vpop.f32.mrf.mxu0  ;;  %v16796_v22 = vpop.f32.mrf.mxu1 }
 0x7fc   : > { %v16792_v35 = vpop.f32.mrf.mxu0 }
 0x7fe   : > { %v16794_v31 = vpop.f32.mrf.mxu0 }
 0x800   : > { %v16798_v57 = vpop.f32.mrf.mxu0  ;;  %v12932_v21 = vpop.f32.mrf.mxu1 }
 0x802   : > { %v12973_v43 = vpop.f32.mrf.mxu0  ;;  %v3373_v46 = vpop.f32.mrf.mxu1 }
 0x804   : > { %v3468_v26 = vpop.f32.mrf.mxu0 }
 0x806   : > { %v12976_v13 = vpop.f32.mrf.mxu0 }
 0x807   : > { %v3484_v3 = vadd.f32 %v12976_v13, %v12932_v21  ;;  %v3464_v21 = vadd.f32 %v16794_v31, %v16786_v59 }
 0x808   : > { %v3478_v4 = vpop.f32.mrf.mxu0 }
 0x818   : > { %v16800_v47 = vpop.f32.mrf.mxu1 }
 0x81a   : > { %v16802_v56 = vpop.f32.mrf.mxu1 }
 0x81b   : > { %v16806_v18 = vpop.f32.mrf.mxu0 }
 0x81d   : > { %v16810_v42 = vpop.f32.mrf.mxu0 }
 0x81e   : > { %v16804_v36 = vpop.f32.mrf.mxu1 }
 0x820   : > { %v16808_v1 = vpop.f32.mrf.mxu1 }
 0x822   : > { %v16812_v7 = vpop.f32.mrf.mxu0 }
 0x824   : > { %v13017_v25 = vpop.f32.mrf.mxu1  ;;  %v16814_v6 = vpop.f32.mrf.mxu0 }
 0x826   : > { %v3606_v19 = vpop.f32.mrf.mxu1 }
 0x828   : > { %v13061_v9 = vpop.f32.mrf.mxu0 }
 0x82a   : > { %v13020_v20 = vpop.f32.mrf.mxu1  ;;  %v3752_v30 = vpop.f32.mrf.mxu0 }
 0x82c   : > { %v3616_v51 = vpop.f32.mrf.mxu1 }
 0x82e   : > { %v13064_v33 = vpop.f32.mrf.mxu0 }
 0x830   : > { %v3762_v10 = vpop.f32.mrf.mxu0 }
 0x840   : > { %v16816_v61 = vpop.f32.mrf.mxu1 }
 0x842   : > { %v16818_v34 = vpop.f32.mrf.mxu1 }
 0x843   : > { %19709 = vst [vmem:[#allocation61_spill] sm:$0xff] %v16818_v34  ;;  %v16822_v40 = vpop.f32.mrf.mxu0 }
 0x844   : > { %19710 = vst [vmem:[#allocation62_spill] sm:$0xff] %v16822_v40 }
 0x845   : > { %v16826_v44 = vpop.f32.mrf.mxu0 }
 0x846   : > { %v16820_v24 = vpop.f32.mrf.mxu1  ;;  %19711 = vst [vmem:[#allocation63_spill] sm:$0xff] %v16826_v44 }
 0x848   : > { %v16824_v37 = vpop.f32.mrf.mxu1 }
 0x84a   : > { %v16828_v54 = vpop.f32.mrf.mxu0 }
 0x84c   : > { %v13105_v28 = vpop.f32.mrf.mxu1  ;;  %v16830_v15 = vpop.f32.mrf.mxu0 }
 0x84d   : > { %19712 = vst [vmem:[#allocation64_spill] sm:$0xff] %v16830_v15 }
 0x84e   : > { %v3890_v41 = vpop.f32.mrf.mxu1 }
 0x850   : > { %v13149_v0 = vpop.f32.mrf.mxu0 }
 0x852   : > { %v13108_v58 = vpop.f32.mrf.mxu1  ;;  %v4036_v52 = vpop.f32.mrf.mxu0 }
 0x854   : > { %v3900_v45 = vpop.f32.mrf.mxu1 }
 0x856   : > { %v13152_v5 = vpop.f32.mrf.mxu0 }
 0x858   : > { %v4046_v17 = vpop.f32.mrf.mxu0 }
 0x868   : > { %v16832_v14 = vpop.f32.mrf.mxu1 }
 0x869   : > { %19713 = vst [vmem:[#allocation65_spill] sm:$0xff] %v16832_v14  ;;  %v3632_v14 = vadd.f32 %v13020_v20, %v3484_v3 }
 0x86a   : > { %v16834_v48 = vpop.f32.mrf.mxu1 }
 0x86b   : > { %19714 = vst [vmem:[#allocation66_spill] sm:$0xff] %v16834_v48  ;;  %v16838_v60 = vpop.f32.mrf.mxu0  ;;  %v3479_v48 = vadd.f32 %v3478_v4, %v3373_v46 }
 0x86c   : > { %19716 = vst [vmem:[#allocation68_spill] sm:$0xff] %v16838_v60 }
 0x86d   : > { %v16842_v53 = vpop.f32.mrf.mxu0  ;;  %v3631_v40 = vadd.f32 %v3616_v51, %v3479_v48  ;;  %v3628_v48 = vadd.f32 %v16804_v36, %v3464_v21 }
 0x86e   : > { %v16836_v63 = vpop.f32.mrf.mxu1  ;;  %19718 = vst [vmem:[#allocation70_spill] sm:$0xff] %v16842_v53  ;;  %v3778_v53 = vadd.f32 %v13064_v33, %v3632_v14  ;;  %v3459_v14 = vadd.f32 %v16798_v57, %v16790_v55  ;;  %v3449_v57 = vadd.f32 %v16792_v35, %v16784_v11 }
 0x86f   : > { %19715 = vst [vmem:[#allocation67_spill] sm:$0xff] %v16836_v63 }
 0x870   : > { %v16840_v39 = vpop.f32.mrf.mxu1  ;;  %v16844_v62 = vpop.f32.mrf.mxu0  ;;  %v3916_v15 = vadd.f32 %v13108_v58, %v3778_v53  ;;  %v3454_v53 = vadd.f32 %v16788_v27, %v16782_v38  ;;  %v3627_v59 = vadd.f32 %v16808_v1, %v3459_v14 }
 0x871   : > { %19717 = vst [vmem:[#allocation69_spill] sm:$0xff] %v16840_v39  ;;  %19719 = vst [vmem:[#allocation71_spill] sm:$0xff] %v16844_v62  ;;  %v3474_v39 = vadd.f32 %v12973_v43, %v12929_v8  ;;  %v3469_v62 = vadd.f32 %v3468_v26, %v16796_v22 }
 0x872   : > { %v13193_v12 = vpop.f32.mrf.mxu1  ;;  %v16846_v2 = vpop.f32.mrf.mxu0  ;;  %v4062_v20 = vadd.f32 %v13152_v5, %v3916_v15  ;;  %v3626_v26 = vadd.f32 %v16800_v47, %v3454_v53 }
 0x873   : > { %19720 = vst [vmem:[#allocation72_spill] sm:$0xff] %v16846_v2  ;;  %v3630_v63 = vadd.f32 %v13017_v25, %v3474_v39  ;;  %v3777_v2 = vadd.f32 %v3762_v10, %v3631_v40  ;;  %v3629_v3 = vadd.f32 %v3606_v19, %v3469_v62  ;;  %v3774_v62 = vadd.f32 %v16812_v7, %v3628_v48 }
 0x874   : > { %v4182_v50 = vpop.f32.mrf.mxu1  ;;  %v13237_v23 = vpop.f32.mrf.mxu0  ;;  %v3625_v7 = vadd.f32 %v16802_v56, %v3449_v57  ;;  %v19722_v56 = vld [vmem:[#allocation64_spill] sm:$0xff] }
 0x875   : > { %v3776_v46 = vadd.f32 %v13061_v9, %v3630_v63  ;;  %v3915_v4 = vadd.f32 %v3900_v45, %v3777_v2  ;;  %v3775_v22 = vadd.f32 %v3752_v30, %v3629_v3  ;;  %v19739_v57 = vld [vmem:[#allocation48_spill] sm:$0xff] }
 0x876   : > { %v13196_v49 = vpop.f32.mrf.mxu1  ;;  %v4320_v44 = vpop.f32.mrf.mxu0 }
 0x877   : > { %v3914_v39 = vadd.f32 %v13105_v28, %v3776_v46  ;;  %v4061_v43 = vadd.f32 %v4046_v17, %v3915_v4  ;;  %v4208_v58 = vadd.f32 %v13196_v49, %v4062_v20  ;;  %v3913_v2 = vadd.f32 %v3890_v41, %v3775_v22  ;;  %v19729_v41 = vld [vmem:[#allocation65_spill] sm:$0xff]  ;;  %v19731_v46 = vld [vmem:[#allocation66_spill] sm:$0xff]  ;;  %v19732_v20 = vld [vmem:[#allocation68_spill] sm:$0xff] }
 0x878   : > { %v4192_v29 = vpop.f32.mrf.mxu1  ;;  %v13240_v13 = vpop.f32.mrf.mxu0  ;;  %v3773_v49 = vadd.f32 %v16814_v6, %v3627_v59  ;;  %v3912_v17 = vadd.f32 %v16820_v24, %v3774_v62  ;;  %v19725_v24 = vld [vmem:[#allocation62_spill] sm:$0xff] }
 0x879   : > { %v4060_v5 = vadd.f32 %v13149_v0, %v3914_v39  ;;  %v4207_v31 = vadd.f32 %v4192_v29, %v4061_v43  ;;  %v4346_v55 = vadd.f32 %v13240_v13, %v4208_v58  ;;  %v4059_v27 = vadd.f32 %v4036_v52, %v3913_v2 }
 0x87a   : > { %v4330_v63 = vpop.f32.mrf.mxu0  ;;  %v3772_v0 = vadd.f32 %v16806_v18, %v3626_v26  ;;  %v3911_v29 = vadd.f32 %v16824_v37, %v3773_v49  ;;  %v4058_v11 = vadd.f32 %v16828_v54, %v3912_v17  ;;  %v3771_v52 = vadd.f32 %v16810_v42, %v3625_v7  ;;  %v19723_v18 = vld [vmem:[#allocation67_spill] sm:$0xff]  ;;  %v19726_v42 = vld [vmem:[#allocation69_spill] sm:$0xff]  ;;  %v19730_v21 = vld [vmem:[#allocation72_spill] sm:$0xff] }
 0x87b   : > { %v4206_v36 = vadd.f32 %v13193_v12, %v4060_v5  ;;  %v4345_v1 = vadd.f32 %v4330_v63, %v4207_v31  ;;  %v4205_v35 = vadd.f32 %v4182_v50, %v4059_v27  ;;  %v19735_v58 = vmov 1.0   ;;  %v19736_v5 = vld [vmem:[#allocation45_spill] sm:$0xff]  ;;  %v19737_v31 = vld [vmem:[#allocation46_spill] sm:$0xff]  ;;  %v19742_v17 = vld [vmem:[#allocation51_spill] sm:$0xff] }
 0x87c   : > { %v3910_v12 = vadd.f32 %v16816_v61, %v3772_v0  ;;  %v4057_v9 = vadd.f32 %v19722_v56, %v3911_v29  ;;  %v4204_v51 = vadd.f32 %v19723_v18, %v4058_v11  ;;  %v19727_v61 = vld [vmem:[#allocation71_spill] sm:$0xff]  ;;  %v19740_v26 = vld [vmem:[#allocation49_spill] sm:$0xff]  ;;  %v19741_v49 = vld [vmem:[#allocation50_spill] sm:$0xff] }
 0x87d   : > { %v4344_v47 = vadd.f32 %v13237_v23, %v4206_v36  ;;  %v4343_v30 = vadd.f32 %v4320_v44, %v4205_v35  ;;  %v19724_v23 = vld [vmem:[#allocation61_spill] sm:$0xff]  ;;  %v19728_v44 = vld [vmem:[#allocation63_spill] sm:$0xff]  ;;  %v19745_v36 = vld [vmem:[#allocation54_spill] sm:$0xff] }
 0x87e   : > { %v3909_v50 = vadd.f32 %v19724_v23, %v3771_v52  ;;  %v4056_v10 = vadd.f32 %v19725_v24, %v3910_v12  ;;  %v4203_v40 = vadd.f32 %v19726_v42, %v4057_v9  ;;  %v4342_v37 = vadd.f32 %v19727_v61, %v4204_v51  ;;  %v19744_v27 = vld [vmem:[#allocation53_spill] sm:$0xff]  ;;  %v19747_v7 = vld [vmem:[#allocation56_spill] sm:$0xff]  ;;  %v19749_v29 = vld [vmem:[#allocation58_spill] sm:$0xff] }
 0x87f   : > { %v19748_v0 = vld [vmem:[#allocation57_spill] sm:$0xff]  ;;  %v19751_v11 = vld [vmem:[#allocation60_spill] sm:$0xff]  ;;  %v16989_v52 = vld [vmem:[#allocation9 + $0x18] sm:$0xff] }
 0x880   : > { %v4055_v54 = vadd.f32 %v19728_v44, %v3909_v50  ;;  %v4202_v15 = vadd.f32 %v19729_v41, %v4056_v10  ;;  %v4341_v13 = vadd.f32 %v19730_v21, %v4203_v40  ;;  %v16995_v12 = vld [vmem:[#allocation9 + $0x10] sm:$0xff]  ;;  %v16999_v56 = vld [vmem:[#allocation9 + $0x8] sm:$0xff]  ;;  %v17003_v9 = vld [vmem:[#allocation9] sm:$0xff] }
 0x881   : > { %v4981_v24 = vld [vmem:[%s17020_s11] sm:$0xff]  ;;  %v5013_v61 = vld [vmem:[#allocation16] sm:$0xff]  ;;  %v4986_v21 = vld [vmem:[%s17020_s11 + $0x28] sm:$0xff] }
 0x882   : > { %v4201_v4 = vadd.f32 %v19731_v46, %v4055_v54  ;;  %v4340_v14 = vadd.f32 %v19732_v20, %v4202_v15  ;;  %v5015_v42 = vld [vmem:[#allocation16 + $0x10] sm:$0xff]  ;;  %v5014_v40 = vld [vmem:[#allocation16 + $0x8] sm:$0xff]  ;;  %v4983_v44 = vld [vmem:[%s17020_s11 + $0x10] sm:$0xff] }
 0x883   : > { %v4984_v54 = vld [vmem:[%s17020_s11 + $0x18] sm:$0xff]  ;;  %v4985_v41 = vld [vmem:[%s17020_s11 + $0x20] sm:$0xff] }
 0x88a   : > { %v16848_v32 = vpop.f32.mrf.mxu1 }
 0x88b   : > { %19721 = vst [vmem:[#allocation73_spill] sm:$0xff] %v16848_v32 }
 0x88c   : > { %v16850_v60 = vpop.f32.mrf.mxu1 }
 0x88e   : > { %v16852_v34 = vpop.f32.mrf.mxu1 }
 0x88f   : > { %v16901_v3 = vadd.f32 %v16852_v34, %v4342_v37  ;;  %v4982_v37 = vld [vmem:[%s17020_s11 + $0x8] sm:$0xff] }
 0x890   : > { %v16857_v32 = vpop.f32.mrf.mxu1 }
 0x891   : > { %v16908_v48 = vadd.f32 %v16857_v32, %v4341_v13  ;;  %v4568_v62 = vmul.f32 %v16901_v3, %v16901_v3 }
 0x892   : > { %v13281_v8 = vpop.f32.mrf.mxu1  ;;  %v19734_v39 = vld [vmem:[#allocation73_spill] sm:$0xff] }
 0x893   : > { %v16885_v33 = vadd.f32 %v13281_v8, %v4344_v47  ;;  %v19733_v8 = vld [vmem:[#allocation70_spill] sm:$0xff]  ;;  %v16914_v34 = vadd.f32 %v19734_v39, %v4340_v14  ;;  %v4567_v63 = vmul.f32 %v16908_v48, %v16908_v48 }
 0x894   : > { %v4466_v45 = vpop.f32.mrf.mxu1  ;;  %v4339_v22 = vadd.f32 %v19733_v8, %v4201_v4  ;;  %v4987_v4 = vld [vmem:[%s17020_s11 + $0x30] sm:$0xff]  ;;  %v4988_v8 = vld [vmem:[%s17020_s11 + $0x38] sm:$0xff]  ;;  %v4989_v39 = vld [vmem:[%s17020_s11 + $0x40] sm:$0xff] }
 0x895   : > { %v16893_v28 = vadd.f32 %v4466_v45, %v4343_v30  ;;  %v4566_v45 = vmul.f32 %v16914_v34, %v16914_v34  ;;  %v5016_v30 = vld [vmem:[#allocation16 + $0x18] sm:$0xff] }
 0x896   : > { %v13284_v38 = vpop.f32.mrf.mxu1  ;;  %v16919_v43 = vadd.f32 %v16850_v60, %v4339_v22  ;;  %v4570_v60 = vmul.f32 %v16885_v33, %v16885_v33 }
 0x897   : > { %v16871_v25 = vadd.f32 %v13284_v38, %v4346_v55  ;;  %v4569_v59 = vmul.f32 %v16893_v28, %v16893_v28  ;;  %v19738_v55 = vld [vmem:[#allocation47_spill] sm:$0xff]  ;;  %v19743_v38 = vld [vmem:[#allocation52_spill] sm:$0xff] }
 0x898   : > { %v4476_v19 = vpop.f32.mrf.mxu1  ;;  %v4565_v2 = vmul.f32 %v16919_v43, %v16919_v43 }
 0x899   : > { %v16877_v6 = vadd.f32 %v4476_v19, %v4345_v1  ;;  %13286 = vmatpush3.msra.mxu0 %v16871_v25  ;;  %v4572_v32 = vmul.f32 %v16871_v25, %v16871_v25  ;;  %v19746_v1 = vld [vmem:[#allocation55_spill] sm:$0xff] }
 0x89a   : > { %13287 = vmatprep.subr.mxu0 %v16714_v16  ;;  %v19750_v19 = vld [vmem:[#allocation59_spill] sm:$0xff] }
 0x89b   : > { %13288 = vmatpush3.msra.mxu0 %v16877_v6  ;;  %v4571_v53 = vmul.f32 %v16877_v6, %v16877_v6 }
 0x89c   : > { %13289 = vmatprep.subr.mxu0 %v16714_v16 }
 0x89d   : > { %13290 = vmatpush3.msra.mxu0 %v16885_v33 }
 0x89e   : > { %13291 = vmatprep.subr.mxu0 %v16714_v16 }
 0x89f   : > { %13292 = vmatpush3.msra.mxu0 %v16893_v28 }
 0x8a0   : > { %13293 = vmatprep.subr.mxu0 %v16714_v16 }
 0x8a1   : > { %13294 = vmatpush3.msra.mxu0 %v16901_v3 }
 0x8a2   : > { %13295 = vmatprep.subr.mxu0 %v16714_v16 }
 0x8a3   : > { %13296 = vmatpush3.msra.mxu0 %v16908_v48 }
 0x8a4   : > { %13297 = vmatprep.subr.mxu0 %v16714_v16 }
 0x8a5   : > { %13298 = vmatpush3.msra.mxu0 %v16914_v34 }
 0x8a6   : > { %13299 = vmatprep.subr.mxu0 %v16714_v16 }
 0x8a7   : > { %13300 = vmatpush3.msra.mxu0 %v16919_v43 }
 0x8a8   : > { %13302 = vmatmul.mubr.msk.f32.vlgmr.msra.gmra.mxu0 %vm2299_vm7, %v19735_v58  ;;  %13304 = vmatprep.subr.mxu0 %v16714_v16 }
 0x8a9   : > { %13305 = vmatpush3.msra.mxu0 %v4572_v32  ;;  %13320 = vmatprep.mubr.msk.f32.mxu0 %vm14975_vm4, %v16714_v16 }
 0x8aa   : > { %13306 = vmatprep.subr.mxu0 %v16714_v16 }
 0x8ab   : > { %13307 = vmatpush3.msra.mxu0 %v4571_v53  ;;  %v4990_v53 = vld [vmem:[%s17020_s11 + $0x48] sm:$0xff] }
 0x8ac   : > { %13308 = vmatprep.subr.mxu0 %v16714_v16 }
 0x8ad   : > { %13309 = vmatpush3.msra.mxu0 %v4570_v60  ;;  %v4991_v60 = vld [vmem:[%s17020_s11 + $0x50] sm:$0xff] }
 0x8ae   : > { %13310 = vmatprep.subr.mxu0 %v16714_v16 }
 0x8af   : > { %13311 = vmatpush3.msra.mxu0 %v4569_v59  ;;  %v4992_v59 = vld [vmem:[%s17020_s11 + $0x58] sm:$0xff] }
 0x8b0   : > { %13312 = vmatprep.subr.mxu0 %v16714_v16 }
 0x8b1   : > { %13313 = vmatpush3.msra.mxu0 %v4568_v62  ;;  %v4993_v62 = vld [vmem:[%s17020_s11 + $0x60] sm:$0xff] }
 0x8b2   : > { %13314 = vmatprep.subr.mxu0 %v16714_v16 }
 0x8b3   : > { %13315 = vmatpush3.msra.mxu0 %v4567_v63  ;;  %v4994_v63 = vld [vmem:[%s17020_s11 + $0x68] sm:$0xff] }
 0x8b4   : > { %13316 = vmatprep.subr.mxu0 %v16714_v16 }
 0x8b5   : > { %13317 = vmatpush3.msra.mxu0 %v4566_v45  ;;  %v4995_v45 = vld [vmem:[%s17020_s11 + $0x70] sm:$0xff] }
 0x8b6   : > { %13318 = vmatprep.subr.mxu0 %v16714_v16 }
 0x8b7   : > { %13319 = vmatpush3.msra.mxu0 %v4565_v2  ;;  %v4996_v2 = vld [vmem:[%s17020_s11 + $0x78] sm:$0xff] }
 0x8b8   : > { %13321 = vmatmul.mubr.msk.f32.vlgmr.msra.gmra.mxu0 %vm2299_vm7, %v19735_v58  ;;  %13358 = vmatprep.subr.mxu0 %v16714_v16 }
 0x8b9   : > { %13359 = vmatpush3.msra.mxu0 %v19736_v5  ;;  %13390 = vmatprep.mubr.msk.f32.mxu0 %vm14975_vm4, %v16714_v16 }
 0x8ba   : > { %13360 = vmatprep.subr.mxu0 %v16714_v16 }
 0x8bb   : > { %13361 = vmatpush3.msra.mxu0 %v19737_v31 }
 0x8bc   : > { %13362 = vmatprep.subr.mxu0 %v16714_v16 }
 0x8bd   : > { %13363 = vmatpush3.msra.mxu0 %v19738_v55 }
 0x8be   : > { %13364 = vmatprep.subr.mxu0 %v16714_v16 }
 0x8bf   : > { %13365 = vmatpush3.msra.mxu0 %v19739_v57 }
 0x8c0   : > { %13366 = vmatprep.subr.mxu0 %v16714_v16 }
 0x8c1   : > { %13367 = vmatpush3.msra.mxu0 %v19740_v26 }
 0x8c2   : > { %13368 = vmatprep.subr.mxu0 %v16714_v16 }
 0x8c3   : > { %13369 = vmatpush3.msra.mxu0 %v19741_v49 }
 0x8c4   : > { %13370 = vmatprep.subr.mxu0 %v16714_v16 }
 0x8c5   : > { %13371 = vmatpush3.msra.mxu0 %v19742_v17 }
 0x8c6   : > { %13372 = vmatprep.subr.mxu0 %v16714_v16 }
 0x8c7   : > { %13373 = vmatpush3.msra.mxu0 %v19743_v38 }
 0x8c8   : > { %13374 = vmatprep.subr.mxu0 %v16714_v16 }
 0x8c9   : > { %13375 = vmatpush3.msra.mxu0 %v19744_v27 }
 0x8ca   : > { %13376 = vmatprep.subr.mxu0 %v16714_v16 }
 0x8cb   : > { %13377 = vmatpush3.msra.mxu0 %v19745_v36 }
 0x8cc   : > { %13378 = vmatprep.subr.mxu0 %v16714_v16 }
 0x8cd   : > { %13379 = vmatpush3.msra.mxu0 %v19746_v1 }
 0x8ce   : > { %13380 = vmatprep.subr.mxu0 %v16714_v16 }
 0x8cf   : > { %13381 = vmatpush3.msra.mxu0 %v19747_v7 }
 0x8d0   : > { %13382 = vmatprep.subr.mxu0 %v16714_v16 }
 0x8d1   : > { %13383 = vmatpush3.msra.mxu0 %v19748_v0 }
 0x8d2   : > { %13384 = vmatprep.subr.mxu0 %v16714_v16 }
 0x8d3   : > { %13385 = vmatpush3.msra.mxu0 %v19749_v29 }
 0x8d4   : > { %13386 = vmatprep.subr.mxu0 %v16714_v16 }
 0x8d5   : > { %13387 = vmatpush3.msra.mxu0 %v19750_v19 }
 0x8d6   : > { %13388 = vmatprep.subr.mxu0 %v16714_v16 }
 0x8d7   : > { %13389 = vmatpush3.msra.mxu0 %v19751_v11 }
 0x8d8   : > { %13404 = vmatprep.subr.mxu0 %v16714_v16 }
 0x968   : > { %v4561_v35 = vpop.f32.mrf.mxu0 }
 0x969   : > { %13356 = vmatmul.mubr.f32.vlgmr.msra.gmra.mxu1 %v4561_v35  ;;  %v5012_v35 = vld [vmem:[%s17020_s11 + $0xf8] sm:$0xff] }
 0x96a   : > { %v13303_v47 = vpop.f32.mrf.mxu0  ;;  %13394 = vmatpush3.msra.mxu1 %v16989_v52  ;;  %13401 = vmatprep.mubr.msk.f32.mxu1 %vm14975_vm4, %v16714_v16 }
 0x96b   : > { %13395 = vmatprep.subr.mxu1 %v16714_v16 }
 0x96c   : > { %13396 = vmatpush3.msra.mxu1 %v16995_v12 }
 0x96d   : > { %13397 = vmatprep.subr.mxu1 %v16714_v16 }
 0x96e   : > { %13398 = vmatpush3.msra.mxu1 %v16999_v56 }
 0x96f   : > { %13399 = vmatprep.subr.mxu1 %v16714_v16 }
 0x970   : > { %13400 = vmatpush3.msra.mxu1 %v17003_v9 }
 0x971   : > { %13415 = vmatprep.subr.mxu1 %v5016_v30 }
 0x978   : > { %v4639_v18 = vpop.f32.mrf.mxu0 }
 0x979   : > { %13391 = vmatmul.mubr.f32.vlgmr.msra.gmra.mxu0 %v4639_v18 }
 0x97a   : > { %v13322_v51 = vpop.f32.mrf.mxu0  ;;  %13405 = vmatpush3.msra.mxu0 %v16989_v52  ;;  %13412 = vmatprep.mubr.msk.f32.mxu0 %vm14975_vm4, %v16714_v16 }
 0x97b   : > { %13406 = vmatprep.subr.mxu0 %v16714_v16 }
 0x97c   : > { %13407 = vmatpush3.msra.mxu0 %v16995_v12 }
 0x97d   : > { %13408 = vmatprep.subr.mxu0 %v16714_v16 }
 0x97e   : > { %13409 = vmatpush3.msra.mxu0 %v16999_v56 }
 0x97f   : > { %13410 = vmatprep.subr.mxu0 %v16714_v16 }
 0x980   : > { %13411 = vmatpush3.msra.mxu0 %v17003_v9 }
 0xa29   : > { %v4709_v23 = vpop.f32.mrf.mxu1 }
 0xa2a   : > { %v4783_v50 = vmul.f32 0.0078125, %v4709_v23 }
 0xa2b   : > { %v13357_v10 = vpop.f32.mrf.mxu1 }
 0xa2c   : > { %13402 = vmatmul.mubr.msk.f32.vlgmr.msra.gmra.mxu1 %vm2115_vm6, %v4783_v50  ;;  %v4785_v13 = vmul.f32 %v4783_v50, %v4783_v50 }
 0xa2d   : > { %13416 = vmatpush3.msra.mxu1 %v5016_v30  ;;  %13423 = vmatprep.mubr.msk.f32.mxu1 %vm2115_vm6, %v4981_v24 }
 0xa2e   : > { %13417 = vmatprep.subr.mxu1 %v5015_v42 }
 0xa2f   : > { %13418 = vmatpush3.msra.mxu1 %v5015_v42 }
 0xa30   : > { %13419 = vmatprep.subr.mxu1 %v5014_v40 }
 0xa31   : > { %13420 = vmatpush3.msra.mxu1 %v5014_v40 }
 0xa32   : > { %13421 = vmatprep.subr.mxu1 %v5013_v61 }
 0xa33   : > { %13422 = vmatpush3.msra.mxu1 %v5013_v61 }
 0xa34   : > { %13424 = vmatmul.mubr.msk.f32.vlgmr.msra.gmra.mxu1 %vm2115_vm6, %v4982_v37  ;;  %13471 = vmatprep.subr.mxu1 %v16714_v16 }
 0xa35   : > { %13426 = vmatprep.mubr.msk.f32.mxu1 %vm2115_vm6, %v4983_v44  ;;  %13472 = vmatpush3.msra.mxu1 %v19736_v5  ;;  %v4997_v5 = vld [vmem:[%s17020_s11 + $0x80] sm:$0xff] }
 0xa36   : > { %13473 = vmatprep.subr.mxu1 %v16714_v16 }
 0xa37   : > { %13474 = vmatpush3.msra.mxu1 %v19737_v31 }
 0xa38   : > { %13427 = vmatmul.mubr.msk.f32.gmra.mxu1 %vm2115_vm6, %v4984_v54  ;;  %13475 = vmatprep.subr.mxu1 %v16714_v16 }
 0xa39   : > { %v4779_v15 = vpop.f32.mrf.mxu0  ;;  %13429 = vmatprep.mubr.msk.f32.mxu1 %vm2115_vm6, %v4985_v41  ;;  %13476 = vmatpush3.msra.mxu1 %v19738_v55  ;;  %v4998_v55 = vld [vmem:[%s17020_s11 + $0x88] sm:$0xff] }
 0xa3a   : > { %v4784_v46 = vmul.f32 0.0078125, %v4779_v15  ;;  %13477 = vmatprep.subr.mxu1 %v16714_v16  ;;  %v4493_v15 = vld [vmem:[%s19477_s12] sm:$0x1] }
 0xa3b   : > { %v13392_v20 = vpop.f32.mrf.mxu0  ;;  %13478 = vmatpush3.msra.mxu1 %v19739_v57  ;;  %v4999_v57 = vld [vmem:[%s17020_s11 + $0x90] sm:$0xff] }
 0xa3c   : > { %v4786_v14 = vsub.f32 %v4784_v46, %v4785_v13  ;;  %13430 = vmatmul.mubr.msk.f32.gmra.mxu1 %vm2115_vm6, %v4986_v21  ;;  %13479 = vmatprep.subr.mxu1 %v16714_v16 }
 0xa3d   : > { %13432 = vmatprep.mubr.msk.f32.mxu1 %vm2115_vm6, %v4987_v4  ;;  %13480 = vmatpush3.msra.mxu1 %v19740_v26  ;;  %v5000_v26 = vld [vmem:[%s17020_s11 + $0x98] sm:$0xff]  ;;  %v4494_v4 = vld [vmem:[#allocation15] sm:$0x1] }
 0xa3e   : > { %v4787_v22 = vmax.f32 %v4786_v14, 0.0  ;;  %13481 = vmatprep.subr.mxu1 %v16714_v16 }
 0xa3f   : > { %13482 = vmatpush3.msra.mxu1 %v19741_v49  ;;  %v5001_v49 = vld [vmem:[%s17020_s11 + $0xa0] sm:$0xff] }
 0xa40   : > { %v4788_v32 = vadd.f32 1e-05, %v4787_v22  ;;  %13433 = vmatmul.mubr.msk.f32.gmra.mxu1 %vm2115_vm6, %v4988_v8  ;;  %13483 = vmatprep.subr.mxu1 %v16714_v16  ;;  %v19752_v22 = vld [vmem:[#allocation38_spill] sm:$0xff] }
 0xa41   : > { %13435 = vmatprep.mubr.msk.f32.mxu1 %vm2115_vm6, %v4989_v39  ;;  %13484 = vmatpush3.msra.mxu1 %v19742_v17  ;;  %v5002_v17 = vld [vmem:[%s17020_s11 + $0xa8] sm:$0xff] }
 0xa42   : > { %14567 = vrsqrt.f32 %v4788_v32  ;;  %13485 = vmatprep.subr.mxu1 %v16714_v16 }
 0xa43   : > { %13486 = vmatpush3.msra.mxu1 %v19743_v38  ;;  %v5003_v38 = vld [vmem:[%s17020_s11 + $0xb0] sm:$0xff] }
 0xa44   : > { %13436 = vmatmul.mubr.msk.f32.gmra.mxu1 %vm2115_vm6, %v4990_v53  ;;  %13487 = vmatprep.subr.mxu1 %v16714_v16 }
 0xa45   : > { %13438 = vmatprep.mubr.msk.f32.mxu1 %vm2115_vm6, %v4991_v60  ;;  %13488 = vmatpush3.msra.mxu1 %v19744_v27  ;;  %v5004_v27 = vld [vmem:[%s17020_s11 + $0xb8] sm:$0xff] }
 0xa46   : > { %13489 = vmatprep.subr.mxu1 %v16714_v16 }
 0xa47   : > { %13490 = vmatpush3.msra.mxu1 %v19745_v36  ;;  %v5005_v36 = vld [vmem:[%s17020_s11 + $0xc0] sm:$0xff] }
 0xa48   : > { %13439 = vmatmul.mubr.msk.f32.gmra.mxu1 %vm2115_vm6, %v4992_v59  ;;  %13491 = vmatprep.subr.mxu1 %v16714_v16 }
 0xa49   : > { %13441 = vmatprep.mubr.msk.f32.mxu1 %vm2115_vm6, %v4993_v62  ;;  %13492 = vmatpush3.msra.mxu1 %v19746_v1  ;;  %v5006_v1 = vld [vmem:[%s17020_s11 + $0xc8] sm:$0xff] }
 0xa4a   : > { %13493 = vmatprep.subr.mxu1 %v16714_v16 }
 0xa4b   : > { %13494 = vmatpush3.msra.mxu1 %v19747_v7  ;;  %v5007_v7 = vld [vmem:[%s17020_s11 + $0xd0] sm:$0xff] }
 0xa4c   : > { %13442 = vmatmul.mubr.msk.f32.gmra.mxu1 %vm2115_vm6, %v4994_v63  ;;  %13495 = vmatprep.subr.mxu1 %v16714_v16 }
 0xa4d   : > { %13444 = vmatprep.mubr.msk.f32.mxu1 %vm2115_vm6, %v4995_v45  ;;  %13496 = vmatpush3.msra.mxu1 %v19748_v0  ;;  %v5008_v0 = vld [vmem:[%s17020_s11 + $0xd8] sm:$0xff] }
 0xa4e   : > { %13497 = vmatprep.subr.mxu1 %v16714_v16 }
 0xa4f   : > { %v14568_v31 = vpop.eup %14567  ;;  %13498 = vmatpush3.msra.mxu1 %v19749_v29  ;;  %v5009_v29 = vld [vmem:[%s17020_s11 + $0xe0] sm:$0xff] }
 0xa50   : > { %13445 = vmatmul.mubr.msk.f32.gmra.mxu1 %vm2115_vm6, %v4996_v2  ;;  %13413 = vmatmul.mubr.msk.f32.vlgmr.msra.gmra.mxu0 %vm2115_vm6, %v14568_v31 }
 0xa51   : > { %13447 = vmatprep.mubr.msk.f32.mxu1 %vm2115_vm6, %v4997_v5  ;;  %5404 = vmatprep.mubr.f32.mxu0 %v19735_v58 }
 0xa52   : > { %13499 = vmatprep.subr.mxu1 %v16714_v16 }
 0xa53   : > { %13500 = vmatpush3.msra.mxu1 %v19750_v19  ;;  %v5010_v19 = vld [vmem:[%s17020_s11 + $0xe8] sm:$0xff] }
 0xa54   : > { %13448 = vmatmul.mubr.msk.f32.gmra.mxu1 %vm2115_vm6, %v4998_v55  ;;  %13501 = vmatprep.subr.mxu1 %v16714_v16 }
 0xa55   : > { %13450 = vmatprep.mubr.msk.f32.mxu1 %vm2115_vm6, %v4999_v57  ;;  %13502 = vmatpush3.msra.mxu1 %v19751_v11  ;;  %v5011_v11 = vld [vmem:[%s17020_s11 + $0xf0] sm:$0xff]  ;;  %s14977_s11 = smov [#allocation19]  }
 0xa56   : > { %13541 = vmatprep.subr.mxu1 %v16714_v16  ;;  %s14852_s27 = sshll.u32 %s14977_s11, 4  ;;  %s14853_s27 = int_to_ptr.vmem [resolvable:$false] %s14852_s27 }
 0xa57   : > { %s14854_s22 = scalar_lea.vmem %s14853_s27, 2048  ;;  %p14855_p6 = scmp.lt.s32.totalorder %s19269_s1, %s14853_s27 }
 0xa58   : > { %13451 = vmatmul.mubr.msk.f32.gmra.mxu1 %vm2115_vm6, %v5000_v26  ;;  %p14856_p11 = scmp.lt.s32.totalorder %s14854_s22, %s14848_s29 }
 0xa59   : > { %13453 = vmatprep.mubr.msk.f32.mxu1 %vm2115_vm6, %v5001_v49 }
 0xa5a   : > { %p14857_p10 = por %p14856_p11, %p14855_p6 }
 0xa5c   : > { %13454 = vmatmul.mubr.msk.f32.gmra.mxu1 %vm2115_vm6, %v5002_v17  ;;  %p14858_p8 = pnand %p14857_p10, %p14851_p13 }
 0xa5d   : > { %13456 = vmatprep.mubr.msk.f32.mxu1 %vm2115_vm6, %v5003_v38 }
 0xa60   : > { %13457 = vmatmul.mubr.msk.f32.gmra.mxu1 %vm2115_vm6, %v5004_v27 }
 0xa61   : > { %13459 = vmatprep.mubr.msk.f32.mxu1 %vm2115_vm6, %v5005_v36 }
 0xa64   : > { %13460 = vmatmul.mubr.msk.f32.gmra.mxu1 %vm2115_vm6, %v5006_v1 }
 0xa65   : > { %13462 = vmatprep.mubr.msk.f32.mxu1 %vm2115_vm6, %v5007_v7 }
 0xa68   : > { %13463 = vmatmul.mubr.msk.f32.gmra.mxu1 %vm2115_vm6, %v5008_v0 }
 0xa69   : > { %13465 = vmatprep.mubr.msk.f32.mxu1 %vm2115_vm6, %v5009_v29 }
 0xa6c   : > { %13466 = vmatmul.mubr.msk.f32.gmra.mxu1 %vm2115_vm6, %v5010_v19 }
 0xa6d   : > { %13468 = vmatprep.mubr.msk.f32.mxu1 %vm2115_vm6, %v5011_v11 }
 0xa70   : > { %13469 = vmatmul.mubr.msk.f32.gmra.mxu1 %vm2115_vm6, %v5012_v35 }
 0xa71   : > { %13503 = vmatprep.mubr.msk.f32.mxu1 %vm14975_vm4, %v16714_v16 }
 0xaec   : > { %v4859_v47 = vpop.f32.mrf.mxu1 }
 0xaee   : > { %v13403_v18 = vpop.f32.mrf.mxu1 }
 0xaf4   : > { %v17124_v51 = vpop.f32.mrf.mxu1 }
 0xaf6   : > { %v17126_v30 = vpop.f32.mrf.mxu1 }
 0xaf8   : > { %v17128_v23 = vpop.f32.mrf.mxu1 }
 0xafa   : > { %v17130_v50 = vpop.f32.mrf.mxu1 }
 0xafc   : > { %v17132_v24 = vpop.f32.mrf.mxu1 }
 0xafe   : > { %v17134_v10 = vpop.f32.mrf.mxu1 }
 0xb00   : > { %v17136_v42 = vpop.f32.mrf.mxu1 }
 0xb02   : > { %v17138_v40 = vpop.f32.mrf.mxu1 }
 0xb04   : > { %v17140_v61 = vpop.f32.mrf.mxu1 }
 0xb06   : > { %v17142_v16 = vpop.f32.mrf.mxu1 }
 0xb08   : > { %v17144_v37 = vpop.f32.mrf.mxu1 }
 0xb0a   : > { %v17146_v44 = vpop.f32.mrf.mxu1 }
 0xb0c   : > { %v17148_v54 = vpop.f32.mrf.mxu1 }
 0xb0e   : > { %v17150_v41 = vpop.f32.mrf.mxu1 }
 0xb10   : > { %v17155_v21 = vpop.f32.mrf.mxu1  ;;  %v4932_v13 = vpop.f32.mrf.mxu0 }
 0xb11   : > { %v4936_v46 = vmul.f32 %v4932_v13, %v4493_v15 }
 0xb12   : > { %v17157_v20 = vpop.f32.mrf.mxu1  ;;  %v13414_v14 = vpop.f32.mrf.mxu0 }
 0xb13   : > { %v4937_v8 = vmul.f32 %v4936_v46, %v4859_v47  ;;  %v4942_v39 = vrot.slane %v4936_v46, %v19752_v22 }
 0xb14   : > { %v17160_v32 = vpop.f32.mrf.mxu1 }
 0xb15   : > { %v4938_v53 = vsub.f32 %v4494_v4, %v4937_v8  ;;  %v4943_v60 = vmul.f32 %v4942_v39, %v16919_v43  ;;  %v4944_v62 = vmul.f32 %v4942_v39, %v16914_v34  ;;  %v4945_v63 = vmul.f32 %v4942_v39, %v16908_v48 }
 0xb16   : > { %v17163_v59 = vpop.f32.mrf.mxu1  ;;  %v4946_v45 = vmul.f32 %v4942_v39, %v16901_v3  ;;  %v4947_v5 = vmul.f32 %v4942_v39, %v16893_v28  ;;  %v4948_v31 = vmul.f32 %v4942_v39, %v16885_v33  ;;  %v4949_v55 = vmul.f32 %v4942_v39, %v16877_v6 }
 0xb17   : > { %v4955_v2 = vrot.slane %v4938_v53, %v19752_v22  ;;  %v4950_v57 = vmul.f32 %v4942_v39, %v16871_v25 }
 0xb18   : > { %v17173_v26 = vpop.f32.mrf.mxu1 }
 0xb19   : > { %v4957_v43 = vadd.f32 %v4955_v2, %v4943_v60  ;;  %v4958_v49 = vadd.f32 %v4955_v2, %v4944_v62  ;;  %v4959_v17 = vadd.f32 %v4955_v2, %v4945_v63  ;;  %v4960_v34 = vadd.f32 %v4955_v2, %v4946_v45 }
 0xb1a   : > { %v4961_v48 = vadd.f32 %v4955_v2, %v4947_v5  ;;  %v4962_v38 = vadd.f32 %v4955_v2, %v4948_v31  ;;  %v4963_v3 = vadd.f32 %v4955_v2, %v4949_v55  ;;  %v4964_v27 = vadd.f32 %v4955_v2, %v4950_v57  ;;  %v17175_v36 = vpop.f32.mrf.mxu1 }
 0xb1b   : > { %v17177_v28 = vmax.f32 %v4957_v43, 0.0  ;;  %v17179_v33 = vmax.f32 %v4958_v49, 0.0  ;;  %v17181_v6 = vmax.f32 %v4959_v17, 0.0  ;;  %v17183_v25 = vmax.f32 %v4960_v34, 0.0 }
 0xb1c   : > { %v17185_v1 = vmax.f32 %v4961_v48, 0.0  ;;  %v17187_v7 = vmax.f32 %v4962_v38, 0.0  ;;  %v17189_v0 = vmax.f32 %v4963_v3, 0.0  ;;  %v17191_v29 = vmax.f32 %v4964_v27, 0.0  ;;  %v17193_v19 = vpop.f32.mrf.mxu1 }
 0xb1d   : > { %4973 = vst [vmem:[%s17197_s28] sm:$0xff] %v17177_v28  ;;  %4974 = vst [vmem:[%s17197_s28 + $0x8] sm:$0xff] %v17179_v33  ;;  %v5425_v60 = vmul.f32 %v17155_v21, %v17155_v21  ;;  %v5424_v63 = vmul.f32 %v17157_v20, %v17157_v20  ;;  %v5423_v2 = vmul.f32 %v17148_v54, %v17148_v54 }
 0xb1e   : > { %4975 = vst [vmem:[%s17197_s28 + $0x10] sm:$0xff] %v17181_v6  ;;  %4976 = vst [vmem:[%s17197_s28 + $0x18] sm:$0xff] %v17183_v25  ;;  %v17207_v11 = vpop.f32.mrf.mxu1  ;;  %v5422_v31 = vmul.f32 %v17150_v41, %v17150_v41  ;;  %v5421_v57 = vmul.f32 %v17144_v37, %v17144_v37  ;;  %v5420_v49 = vmul.f32 %v17146_v44, %v17146_v44 }
 0xb1f   : > { %4980 = vst [vmem:[%s17197_s28 + $0x38] sm:$0xff] %v17191_v29  ;;  %4977 = vst [vmem:[%s17197_s28 + $0x20] sm:$0xff] %v17185_v1  ;;  %v5419_v34 = vmul.f32 %v17140_v61, %v17140_v61  ;;  %v5418_v38 = vmul.f32 %v17142_v16, %v17142_v16  ;;  %v5417_v27 = vmul.f32 %v17136_v42, %v17136_v42 }
 0xb20   : > { %4978 = vst [vmem:[%s17197_s28 + $0x28] sm:$0xff] %v17187_v7  ;;  %4979 = vst [vmem:[%s17197_s28 + $0x30] sm:$0xff] %v17189_v0  ;;  %v17217_v35 = vpop.f32.mrf.mxu1 }
 0xb21   : > { %v5433_v3 = vmul.f32 %v17217_v35, %v17217_v35 }
 0xb22   : > { %v17219_v47 = vpop.f32.mrf.mxu1 }
 0xb24   : > { %v17221_v18 = vpop.f32.mrf.mxu1 }
 0xb25   : > { %v5435_v17 = vmul.f32 %v17221_v18, %v17221_v18 }
 0xb26   : > { %v17223_v15 = vpop.f32.mrf.mxu1 }
 0xb27   : > { %v5434_v48 = vmul.f32 %v17223_v15, %v17223_v15 }
 0xb28   : > { %v17225_v13 = vpop.f32.mrf.mxu1 }
 0xb29   : > { %v5437_v55 = vmul.f32 %v17225_v13, %v17225_v13 }
 0xb2a   : > { %v17227_v46 = vpop.f32.mrf.mxu1 }
 0xb2b   : > { %v5436_v43 = vmul.f32 %v17227_v46, %v17227_v46 }
 0xb2c   : > { %v17229_v4 = vpop.f32.mrf.mxu1 }
 0xb2d   : > { %v5439_v45 = vmul.f32 %v17229_v4, %v17229_v4 }
 0xb2e   : > { %v17231_v14 = vpop.f32.mrf.mxu1 }
 0xb2f   : > { %v5438_v5 = vmul.f32 %v17231_v14, %v17231_v14 }
 0xb30   : > { %v17233_v8 = vpop.f32.mrf.mxu1 }
 0xb31   : > { %11594 = vmatprep.subr.mxu0 %v17233_v8  ;;  %v5441_v53 = vmul.f32 %v17233_v8, %v17233_v8 }
 0xb32   : > { %v17236_v39 = vpop.f32.mrf.mxu1  ;;  %11595 = vmatpush3.msra.mxu0 %v17155_v21 }
 0xb33   : > { %11596 = vmatprep.subr.mxu0 %v17236_v39  ;;  %v5440_v62 = vmul.f32 %v17236_v39, %v17236_v39 }
 0xb34   : > { %11597 = vmatpush3.msra.mxu0 %v17157_v20 }
 0xb35   : > { %11598 = vmatprep.subr.mxu0 %v17229_v4 }
 0xb36   : > { %11599 = vmatpush3.msra.mxu0 %v17148_v54 }
 0xb37   : > { %11600 = vmatprep.subr.mxu0 %v17231_v14 }
 0xb38   : > { %11601 = vmatpush3.msra.mxu0 %v17150_v41 }
 0xb39   : > { %11602 = vmatprep.subr.mxu0 %v17225_v13 }
 0xb3a   : > { %11603 = vmatpush3.msra.mxu0 %v17144_v37 }
 0xb3b   : > { %11604 = vmatprep.subr.mxu0 %v17227_v46 }
 0xb3c   : > { %11605 = vmatpush3.msra.mxu0 %v17146_v44 }
 0xb3d   : > { %11606 = vmatprep.subr.mxu0 %v17221_v18 }
 0xb3e   : > { %11607 = vmatpush3.msra.mxu0 %v17140_v61 }
 0xb3f   : > { %11608 = vmatprep.subr.mxu0 %v17223_v15 }
 0xb40   : > { %11609 = vmatpush3.msra.mxu0 %v17142_v16 }
 0xb41   : > { %11610 = vmatprep.subr.mxu0 %v17217_v35 }
 0xb42   : > { %11611 = vmatpush3.msra.mxu0 %v17136_v42 }
 0xb43   : > { %11612 = vmatprep.subr.mxu0 %v17219_v47 }
 0xb44   : > { %11613 = vmatpush3.msra.mxu0 %v17138_v40 }
 0xb45   : > { %11614 = vmatprep.subr.mxu0 %v17193_v19 }
 0xb46   : > { %11615 = vmatpush3.msra.mxu0 %v17132_v24 }
 0xb47   : > { %11616 = vmatprep.subr.mxu0 %v17207_v11 }
 0xb48   : > { %11617 = vmatpush3.msra.mxu0 %v17134_v10 }
 0xb49   : > { %11618 = vmatprep.subr.mxu0 %v17173_v26 }
 0xb4a   : > { %11619 = vmatpush3.msra.mxu0 %v17128_v23 }
 0xb4b   : > { %11620 = vmatprep.subr.mxu0 %v17175_v36 }
 0xb4c   : > { %11621 = vmatpush3.msra.mxu0 %v17130_v50 }
 0xb4d   : > { %11622 = vmatprep.subr.mxu0 %v17160_v32 }
 0xb4e   : > { %11623 = vmatpush3.msra.mxu0 %v17124_v51 }
 0xb4f   : > { %11624 = vmatprep.subr.mxu0 %v17163_v59 }
 0xb50   : > { %11625 = vmatpush3.msra.mxu0 %v17126_v30 }
 0xb51   : > { %5405 = vmatmul.mubr.f32.vlgmr.msra.gmra.mxu0 %v19735_v58  ;;  %11629 = vmatprep.subr.mxu0 %v5441_v53  ;;  %v5432_v53 = vmul.f32 %v17219_v47, %v17219_v47 }
 0xb52   : > { %11630 = vmatpush3.msra.mxu0 %v5425_v60  ;;  %5506 = vmatprep.mubr.f32.mxu0 %v19735_v58  ;;  %v5416_v60 = vmul.f32 %v17138_v40, %v17138_v40 }
 0xb53   : > { %11631 = vmatprep.subr.mxu0 %v5440_v62  ;;  %v5431_v62 = vmul.f32 %v17193_v19, %v17193_v19 }
 0xb54   : > { %11632 = vmatpush3.msra.mxu0 %v5424_v63  ;;  %v5415_v63 = vmul.f32 %v17132_v24, %v17132_v24 }
 0xb55   : > { %11633 = vmatprep.subr.mxu0 %v5439_v45  ;;  %v5430_v45 = vmul.f32 %v17207_v11, %v17207_v11 }
 0xb56   : > { %11634 = vmatpush3.msra.mxu0 %v5423_v2  ;;  %v5414_v2 = vmul.f32 %v17134_v10, %v17134_v10 }
 0xb57   : > { %11635 = vmatprep.subr.mxu0 %v5438_v5  ;;  %v5429_v5 = vmul.f32 %v17173_v26, %v17173_v26 }
 0xb58   : > { %11636 = vmatpush3.msra.mxu0 %v5422_v31  ;;  %v5413_v31 = vmul.f32 %v17128_v23, %v17128_v23 }
 0xb59   : > { %11637 = vmatprep.subr.mxu0 %v5437_v55  ;;  %v5428_v55 = vmul.f32 %v17175_v36, %v17175_v36 }
 0xb5a   : > { %11638 = vmatpush3.msra.mxu0 %v5421_v57  ;;  %v5412_v57 = vmul.f32 %v17130_v50, %v17130_v50 }
 0xb5b   : > { %11639 = vmatprep.subr.mxu0 %v5436_v43  ;;  %v5427_v43 = vmul.f32 %v17160_v32, %v17160_v32 }
 0xb5c   : > { %11640 = vmatpush3.msra.mxu0 %v5420_v49  ;;  %v5411_v49 = vmul.f32 %v17124_v51, %v17124_v51 }
 0xb5d   : > { %11641 = vmatprep.subr.mxu0 %v5435_v17  ;;  %v5426_v17 = vmul.f32 %v17163_v59, %v17163_v59 }
 0xb5e   : > { %11642 = vmatpush3.msra.mxu0 %v5419_v34  ;;  %v5410_v34 = vmul.f32 %v17126_v30, %v17126_v30 }
 0xb5f   : > { %11643 = vmatprep.subr.mxu0 %v5434_v48  ;;  %v17336_v48 = vld [vmem:[#allocation2] sm:$0xff] }
 0xb60   : > { %11644 = vmatpush3.msra.mxu0 %v5418_v38  ;;  %v14597_v38 = vld [vmem:[%s19666_s0 + $0x78] sm:$0xff] }
 0xb61   : > { %11645 = vmatprep.subr.mxu0 %v5433_v3  ;;  %v14598_v3 = vld [vmem:[%s19666_s0 + $0x70] sm:$0xff] }
 0xb62   : > { %11646 = vmatpush3.msra.mxu0 %v5417_v27  ;;  %v14599_v27 = vld [vmem:[%s19666_s0 + $0x68] sm:$0xff] }
 0xb63   : > { %11647 = vmatprep.subr.mxu0 %v5432_v53  ;;  %v14600_v53 = vld [vmem:[%s19666_s0 + $0x60] sm:$0xff] }
 0xb64   : > { %11648 = vmatpush3.msra.mxu0 %v5416_v60  ;;  %v14601_v60 = vld [vmem:[%s19666_s0 + $0x58] sm:$0xff] }
 0xb65   : > { %11649 = vmatprep.subr.mxu0 %v5431_v62  ;;  %v14602_v62 = vld [vmem:[%s19666_s0 + $0x50] sm:$0xff] }
 0xb66   : > { %11650 = vmatpush3.msra.mxu0 %v5415_v63  ;;  %v14603_v63 = vld [vmem:[%s19666_s0 + $0x48] sm:$0xff] }
 0xb67   : > { %11651 = vmatprep.subr.mxu0 %v5430_v45  ;;  %v14604_v45 = vld [vmem:[%s19666_s0 + $0x40] sm:$0xff] }
 0xb68   : > { %11652 = vmatpush3.msra.mxu0 %v5414_v2  ;;  %v14605_v2 = vld [vmem:[%s19666_s0 + $0x38] sm:$0xff] }
 0xb69   : > { %11653 = vmatprep.subr.mxu0 %v5429_v5  ;;  %v14606_v5 = vld [vmem:[%s19666_s0 + $0x30] sm:$0xff] }
 0xb6a   : > { %11654 = vmatpush3.msra.mxu0 %v5413_v31  ;;  %v14607_v31 = vld [vmem:[%s19666_s0 + $0x28] sm:$0xff] }
 0xb6b   : > { %11655 = vmatprep.subr.mxu0 %v5428_v55  ;;  %v14608_v55 = vld [vmem:[%s19666_s0 + $0x20] sm:$0xff] }
 0xb6c   : > { %11656 = vmatpush3.msra.mxu0 %v5412_v57  ;;  %v14609_v57 = vld [vmem:[%s19666_s0 + $0x18] sm:$0xff] }
 0xb6d   : > { %11657 = vmatprep.subr.mxu0 %v5427_v43  ;;  %v14610_v43 = vld [vmem:[%s19666_s0 + $0x10] sm:$0xff] }
 0xb6e   : > { %11658 = vmatpush3.msra.mxu0 %v5411_v49  ;;  %v14611_v49 = vld [vmem:[%s19666_s0 + $0x8] sm:$0xff] }
 0xb6f   : > { %11659 = vmatprep.subr.mxu0 %v5426_v17  ;;  %v14612_v17 = vld [vmem:[%s19666_s0] sm:$0xff] }
 0xb70   : > { %11660 = vmatpush3.msra.mxu0 %v5410_v34 }
 0xb71   : > { %5507 = vmatmul.mubr.f32.vlgmr.msra.gmra.mxu0 %v19735_v58  ;;  %13506 = vmatprep.subr.mxu0 %v17336_v48  ;;  %v17784_v58 = vld [vmem:[#allocation2] sm:$0xff] }
 0xb72   : > { %13507 = vmatpush3.msra.mxu0 %v14597_v38  ;;  %13538 = vmatprep.mubr.msk.f32.mxu0 %vm14975_vm4, %v17336_v48 }
 0xb73   : > { %13508 = vmatprep.subr.mxu0 %v17336_v48 }
 0xb74   : > { %13509 = vmatpush3.msra.mxu0 %v14598_v3 }
 0xb75   : > { %13510 = vmatprep.subr.mxu0 %v17336_v48 }
 0xb76   : > { %13511 = vmatpush3.msra.mxu0 %v14599_v27 }
 0xb77   : > { %13512 = vmatprep.subr.mxu0 %v17336_v48 }
 0xb78   : > { %13513 = vmatpush3.msra.mxu0 %v14600_v53 }
 0xb79   : > { %13514 = vmatprep.subr.mxu0 %v17336_v48 }
 0xb7a   : > { %13515 = vmatpush3.msra.mxu0 %v14601_v60 }
 0xb7b   : > { %13516 = vmatprep.subr.mxu0 %v17336_v48 }
 0xb7c   : > { %13517 = vmatpush3.msra.mxu0 %v14602_v62 }
 0xb7d   : > { %13518 = vmatprep.subr.mxu0 %v17336_v48 }
 0xb7e   : > { %13519 = vmatpush3.msra.mxu0 %v14603_v63 }
 0xb7f   : > { %13520 = vmatprep.subr.mxu0 %v17336_v48 }
 0xb80   : > { %13521 = vmatpush3.msra.mxu0 %v14604_v45 }
 0xb81   : > { %13522 = vmatprep.subr.mxu0 %v17336_v48 }
 0xb82   : > { %13523 = vmatpush3.msra.mxu0 %v14605_v2 }
 0xb83   : > { %13524 = vmatprep.subr.mxu0 %v17336_v48 }
 0xb84   : > { %13525 = vmatpush3.msra.mxu0 %v14606_v5 }
 0xb85   : > { %13526 = vmatprep.subr.mxu0 %v17336_v48 }
 0xb86   : > { %13527 = vmatpush3.msra.mxu0 %v14607_v31 }
 0xb87   : > { %13528 = vmatprep.subr.mxu0 %v17336_v48 }
 0xb88   : > { %13529 = vmatpush3.msra.mxu0 %v14608_v55 }
 0xb89   : > { %13530 = vmatprep.subr.mxu0 %v17336_v48 }
 0xb8a   : > { %13531 = vmatpush3.msra.mxu0 %v14609_v57 }
 0xb8b   : > { %13532 = vmatprep.subr.mxu0 %v17336_v48 }
 0xb8c   : > { %13533 = vmatpush3.msra.mxu0 %v14610_v43 }
 0xb8d   : > { %13534 = vmatprep.subr.mxu0 %v17336_v48 }
 0xb8e   : > { %13535 = vmatpush3.msra.mxu0 %v14611_v49 }
 0xb8f   : > { %13536 = vmatprep.subr.mxu0 %v17336_v48 }
 0xb90   : > { %13537 = vmatpush3.msra.mxu0 %v14612_v17  ;;  %v7070_v17 = vld [vmem:[#allocation18 + $0xe0] sm:$0xff] }
 0xc11   : > { %v11626_v34 = vpop.f32.mrf.mxu0 }
 0xc13   : > { %v11627_v38 = vpop.f32.mrf.mxu0 }
 0xc14   : > { %v11628_v3 = vadd.f32 %v11627_v38, %v11626_v34  ;;  %v5887_v34 = vld [vmem:[%s19480_s15 + $0x28] sm:$0xff]  ;;  %v7021_v38 = vld [vmem:[#allocation18 + $0x60] sm:$0xff] }
 0xc16   : > { %13504 = vmatmul.mubr.f32.vlgmr.msra.gmra.mxu1 %v11628_v3  ;;  %v5888_v3 = vld [vmem:[%s19480_s15 + $0x30] sm:$0xff] }
 0xc17   : > { %13542 = vmatpush3.msra.mxu1 %v16989_v52  ;;  %13549 = vmatprep.mubr.msk.f32.mxu1 %vm14975_vm4, %v17336_v48 }
 0xc18   : > { %13543 = vmatprep.subr.mxu1 %v17336_v48 }
 0xc19   : > { %13544 = vmatpush3.msra.mxu1 %v16995_v12 }
 0xc1a   : > { %13545 = vmatprep.subr.mxu1 %v17336_v48 }
 0xc1b   : > { %13546 = vmatpush3.msra.mxu1 %v16999_v56 }
 0xc1c   : > { %13547 = vmatprep.subr.mxu1 %v17336_v48 }
 0xc1d   : > { %13548 = vmatpush3.msra.mxu1 %v17003_v9 }
 0xc1e   : > { %13552 = vmatprep.subr.mxu1 %v17336_v48 }
 0xc31   : > { %v11661_v27 = vpop.f32.mrf.mxu0 }
 0xc33   : > { %v11662_v53 = vpop.f32.mrf.mxu0 }
 0xc34   : > { %v11663_v60 = vadd.f32 %v11662_v53, %v11661_v27  ;;  %v7069_v27 = vld [vmem:[#allocation18 + $0xd8] sm:$0xff] }
 0xc35   : > { %v7020_v53 = vld [vmem:[#allocation18 + $0x58] sm:$0xff] }
 0xc36   : > { %13539 = vmatmul.mubr.f32.vlgmr.msra.gmra.mxu0 %v11663_v60  ;;  %v5889_v60 = vld [vmem:[%s19480_s15 + $0x38] sm:$0xff] }
 0xc37   : > { %13659 = vmatprep.mubr.f32.mxu0 %v17336_v48 }
 0xcd6   : > { %v5578_v62 = vpop.f32.mrf.mxu1 }
 0xcd7   : > { %v5652_v63 = vmul.f32 0.001953125, %v5578_v62  ;;  %v5890_v62 = vld [vmem:[%s19480_s15 + $0x40] sm:$0xff] }
 0xcd8   : > { %v13505_v45 = vpop.f32.mrf.mxu1 }
 0xcd9   : > { %13550 = vmatmul.mubr.msk.f32.vlgmr.msra.gmra.mxu1 %vm2115_vm6, %v5652_v63  ;;  %v5654_v5 = vmul.f32 %v5652_v63, %v5652_v63  ;;  %v5891_v63 = vld [vmem:[%s19480_s15 + $0x48] sm:$0xff]  ;;  %v5892_v45 = vld [vmem:[%s19480_s15 + $0x50] sm:$0xff] }
 0xcda   : > { %13553 = vmatpush3.msra.mxu1 %v16989_v52  ;;  %13560 = vmatprep.mubr.msk.f32.mxu1 %vm14975_vm4, %v17336_v48 }
 0xcdb   : > { %13554 = vmatprep.subr.mxu1 %v17336_v48 }
 0xcdc   : > { %13555 = vmatpush3.msra.mxu1 %v16995_v12  ;;  %v5882_v12 = vld [vmem:[%s19480_s15] sm:$0xff] }
 0xcdd   : > { %13556 = vmatprep.subr.mxu1 %v17336_v48 }
 0xcde   : > { %13557 = vmatpush3.msra.mxu1 %v16999_v56  ;;  %v5883_v56 = vld [vmem:[%s19480_s15 + $0x8] sm:$0xff] }
 0xcdf   : > { %13558 = vmatprep.subr.mxu1 %v17336_v48 }
 0xce0   : > { %13559 = vmatpush3.msra.mxu1 %v17003_v9  ;;  %v5884_v9 = vld [vmem:[%s19480_s15 + $0x10] sm:$0xff] }
 0xce1   : > { %13563 = vmatprep.subr.mxu1 %v17191_v29 }
 0xcf6   : > { %v5648_v2 = vpop.f32.mrf.mxu0 }
 0xcf7   : > { %v5653_v52 = vmul.f32 0.001953125, %v5648_v2  ;;  %v5893_v2 = vld [vmem:[%s19480_s15 + $0x58] sm:$0xff] }
 0xcf8   : > { %v13540_v31 = vpop.f32.mrf.mxu0 }
 0xcf9   : > { %v5655_v55 = vsub.f32 %v5653_v52, %v5654_v5  ;;  %v5894_v5 = vld [vmem:[%s19480_s15 + $0x60] sm:$0xff]  ;;  %v5895_v52 = vld [vmem:[%s19480_s15 + $0x68] sm:$0xff]  ;;  %v5896_v31 = vld [vmem:[%s19480_s15 + $0x70] sm:$0xff] }
 0xcfb   : > { %v5656_v57 = vmax.f32 %v5655_v55, 0.0  ;;  %v5897_v55 = vld [vmem:[%s19480_s15 + $0x78] sm:$0xff] }
 0xcfd   : > { %v5657_v43 = vadd.f32 1e-05, %v5656_v57  ;;  %v5898_v57 = vld [vmem:[%s19480_s15 + $0x80] sm:$0xff] }
 0xcff   : > { %14569 = vrsqrt.f32 %v5657_v43  ;;  %v5899_v43 = vld [vmem:[%s19480_s15 + $0x88] sm:$0xff] }
 0xd0c   : > { %v14570_v49 = vpop.eup %14569 }
 0xd0d   : > { %13561 = vmatmul.mubr.msk.f32.vlgmr.msra.gmra.mxu1 %vm2115_vm6, %v14570_v49  ;;  %v5901_v49 = vld [vmem:[%s19480_s15 + $0x98] sm:$0xff] }
 0xd0e   : > { %13564 = vmatpush3.msra.mxu1 %v17191_v29  ;;  %13579 = vmatprep.mubr.msk.f32.mxu1 %vm2299_vm7, %v5882_v12  ;;  %v5886_v29 = vld [vmem:[%s19480_s15 + $0x20] sm:$0xff]  ;;  %v5900_v12 = vld [vmem:[%s19480_s15 + $0x90] sm:$0xff] }
 0xd0f   : > { %13565 = vmatprep.subr.mxu1 %v17189_v0 }
 0xd10   : > { %13566 = vmatpush3.msra.mxu1 %v17189_v0  ;;  %v7071_v0 = vld [vmem:[#allocation18 + $0xe8] sm:$0xff] }
 0xd11   : > { %13567 = vmatprep.subr.mxu1 %v17187_v7 }
 0xd12   : > { %13568 = vmatpush3.msra.mxu1 %v17187_v7  ;;  %v5885_v7 = vld [vmem:[%s19480_s15 + $0x18] sm:$0xff] }
 0xd13   : > { %13569 = vmatprep.subr.mxu1 %v17185_v1 }
 0xd14   : > { %13570 = vmatpush3.msra.mxu1 %v17185_v1  ;;  %v7073_v1 = vld [vmem:[#allocation18 + $0xf8] sm:$0xff] }
 0xd15   : > { %13571 = vmatprep.subr.mxu1 %v17183_v25  ;;  %13627 = vmatprep.subr.mxu0 %v7073_v1 }
 0xd16   : > { %13572 = vmatpush3.msra.mxu1 %v17183_v25  ;;  %v7024_v25 = vld [vmem:[#allocation18 + $0x78] sm:$0xff]  ;;  %13628 = vmatpush3.msra.mxu0 %v7073_v1 }
 0xd17   : > { %13573 = vmatprep.subr.mxu1 %v17181_v6  ;;  %v5904_v1 = vld [vmem:[%s19480_s15 + $0xb0] sm:$0xff] }
 0xd18   : > { %13574 = vmatpush3.msra.mxu1 %v17181_v6  ;;  %v7072_v6 = vld [vmem:[#allocation18 + $0xf0] sm:$0xff] }
 0xd19   : > { %13575 = vmatprep.subr.mxu1 %v17179_v33  ;;  %13629 = vmatprep.subr.mxu0 %v7072_v6 }
 0xd1a   : > { %13576 = vmatpush3.msra.mxu1 %v17179_v33  ;;  %v7023_v33 = vld [vmem:[#allocation18 + $0x70] sm:$0xff]  ;;  %13630 = vmatpush3.msra.mxu0 %v7072_v6 }
 0xd1b   : > { %13577 = vmatprep.subr.mxu1 %v17177_v28  ;;  %13631 = vmatprep.subr.mxu0 %v7071_v0  ;;  %v5906_v6 = vld [vmem:[%s19480_s15 + $0xc0] sm:$0xff] }
 0xd1c   : > { %13578 = vmatpush3.msra.mxu1 %v17177_v28  ;;  %v7022_v28 = vld [vmem:[#allocation18 + $0x68] sm:$0xff]  ;;  %13632 = vmatpush3.msra.mxu0 %v7071_v0  ;;  %v5907_v0 = vld [vmem:[%s19480_s15 + $0xc8] sm:$0xff] }
 0xd1d   : > { %13580 = vmatmul.mubr.msk.f32.vlgmr.msra.gmra.mxu1 %vm2299_vm7, %v5883_v56  ;;  %13707 = vmatprep.subr.mxu1 %v7024_v25  ;;  %v5902_v56 = vld [vmem:[%s19480_s15 + $0xa0] sm:$0xff] }
 0xd1e   : > { %13582 = vmatprep.mubr.msk.f32.mxu1 %vm2299_vm7, %v5884_v9  ;;  %13708 = vmatpush3.msra.mxu1 %v7024_v25  ;;  %v5903_v9 = vld [vmem:[%s19480_s15 + $0xa8] sm:$0xff]  ;;  %v5905_v25 = vld [vmem:[%s19480_s15 + $0xb8] sm:$0xff] }
 0xd1f   : > { %13709 = vmatprep.subr.mxu1 %v7023_v33  ;;  %13633 = vmatprep.subr.mxu0 %v7070_v17 }
 0xd20   : > { %13710 = vmatpush3.msra.mxu1 %v7023_v33  ;;  %13634 = vmatpush3.msra.mxu0 %v7070_v17  ;;  %v7068_v33 = vld [vmem:[#allocation18 + $0xd0] sm:$0xff]  ;;  %v7018_v17 = vld [vmem:[#allocation18 + $0x48] sm:$0xff] }
 0xd21   : > { %13583 = vmatmul.mubr.msk.f32.gmra.mxu1 %vm2299_vm7, %v5885_v7  ;;  %13711 = vmatprep.subr.mxu1 %v7022_v28  ;;  %v7019_v7 = vld [vmem:[#allocation18 + $0x50] sm:$0xff] }
 0xd22   : > { %13585 = vmatprep.mubr.msk.f32.mxu1 %vm2299_vm7, %v5886_v29  ;;  %13712 = vmatpush3.msra.mxu1 %v7022_v28  ;;  %v5908_v29 = vld [vmem:[%s19480_s15 + $0xd0] sm:$0xff]  ;;  %v7067_v28 = vld [vmem:[#allocation18 + $0xc8] sm:$0xff] }
 0xd23   : > { %13713 = vmatprep.subr.mxu1 %v7021_v38  ;;  %13635 = vmatprep.subr.mxu0 %v7069_v27 }
 0xd24   : > { %13714 = vmatpush3.msra.mxu1 %v7021_v38  ;;  %13636 = vmatpush3.msra.mxu0 %v7069_v27  ;;  %v7017_v38 = vld [vmem:[#allocation18 + $0x40] sm:$0xff]  ;;  %v5910_v27 = vld [vmem:[%s19480_s15 + $0xe0] sm:$0xff] }
 0xd25   : > { %13586 = vmatmul.mubr.msk.f32.gmra.mxu1 %vm2299_vm7, %v5887_v34  ;;  %13715 = vmatprep.subr.mxu1 %v7020_v53  ;;  %v7066_v34 = vld [vmem:[#allocation18 + $0xc0] sm:$0xff] }
 0xd26   : > { %13588 = vmatprep.mubr.msk.f32.mxu1 %vm2299_vm7, %v5888_v3  ;;  %13716 = vmatpush3.msra.mxu1 %v7020_v53  ;;  %v5909_v3 = vld [vmem:[%s19480_s15 + $0xd8] sm:$0xff]  ;;  %v7065_v53 = vld [vmem:[#allocation18 + $0xb8] sm:$0xff] }
 0xd27   : > { %13637 = vmatprep.subr.mxu0 %v7068_v33  ;;  %13717 = vmatprep.subr.mxu1 %v7019_v7 }
 0xd28   : > { %13638 = vmatpush3.msra.mxu0 %v7068_v33  ;;  %13718 = vmatpush3.msra.mxu1 %v7019_v7  ;;  %v6945_v33 = vld [vmem:[#allocation5 + $0x7] sm:$0xff]  ;;  %v7010_v7 = vld [vmem:[#allocation18 + $0x8] sm:$0xff] }
 0xd29   : > { %13589 = vmatmul.mubr.msk.f32.gmra.mxu1 %vm2299_vm7, %v5889_v60  ;;  %13639 = vmatprep.subr.mxu0 %v7067_v28  ;;  %v7016_v60 = vld [vmem:[#allocation18 + $0x38] sm:$0xff] }
 0xd2a   : > { %13591 = vmatprep.mubr.msk.f32.mxu1 %vm2299_vm7, %v5890_v62  ;;  %13719 = vmatprep.subr.mxu1 %v7018_v17  ;;  %v7064_v62 = vld [vmem:[#allocation18 + $0xb0] sm:$0xff] }
 0xd2b   : > { %13640 = vmatpush3.msra.mxu0 %v7067_v28  ;;  %13720 = vmatpush3.msra.mxu1 %v7018_v17  ;;  %v7009_v28 = vld [vmem:[#allocation18] sm:$0xff] }
 0xd2c   : > { %13641 = vmatprep.subr.mxu0 %v7066_v34  ;;  %13721 = vmatprep.subr.mxu1 %v7017_v38  ;;  %v6946_v17 = vld [vmem:[#allocation5 + $0xf] sm:$0xff] }
 0xd2d   : > { %13592 = vmatmul.mubr.msk.f32.gmra.mxu1 %vm2299_vm7, %v5891_v63  ;;  %13642 = vmatpush3.msra.mxu0 %v7066_v34  ;;  %v5911_v63 = vld [vmem:[%s19480_s15 + $0xe8] sm:$0xff] }
 0xd2e   : > { %13594 = vmatprep.mubr.msk.f32.mxu1 %vm2299_vm7, %v5892_v45  ;;  %13643 = vmatprep.subr.mxu0 %v7065_v53  ;;  %v7015_v45 = vld [vmem:[#allocation18 + $0x30] sm:$0xff]  ;;  %v7604_v34 = vld [vmem:[#allocation18 + $0x178] sm:$0xff] }
 0xd2f   : > { %13722 = vmatpush3.msra.mxu1 %v7017_v38  ;;  %13644 = vmatpush3.msra.mxu0 %v7065_v53  ;;  %v7603_v38 = vld [vmem:[#allocation18 + $0x170] sm:$0xff] }
 0xd30   : > { %13723 = vmatprep.subr.mxu1 %v7016_v60  ;;  %13645 = vmatprep.subr.mxu0 %v7064_v62  ;;  %v7941_v53 = vld [vmem:[#allocation18 + $0x1f0] sm:$0xff] }
 0xd31   : > { %13595 = vmatmul.mubr.msk.f32.gmra.mxu1 %vm2299_vm7, %v5893_v2  ;;  %v5912_v2 = vld [vmem:[%s19480_s15 + $0xf0] sm:$0xff]  ;;  %13646 = vmatpush3.msra.mxu0 %v7064_v62  ;;  %v7940_v62 = vld [vmem:[#allocation18 + $0x1e8] sm:$0xff] }
 0xd32   : > { %13597 = vmatprep.mubr.msk.f32.mxu1 %vm2299_vm7, %v5894_v5  ;;  %13724 = vmatpush3.msra.mxu1 %v7016_v60  ;;  %v7063_v5 = vld [vmem:[#allocation18 + $0xa8] sm:$0xff]  ;;  %v7601_v60 = vld [vmem:[#allocation18 + $0x160] sm:$0xff] }
 0xd33   : > { %13725 = vmatprep.subr.mxu1 %v7015_v45  ;;  %13647 = vmatprep.subr.mxu0 %v7063_v5 }
 0xd34   : > { %13726 = vmatpush3.msra.mxu1 %v7015_v45  ;;  %13648 = vmatpush3.msra.mxu0 %v7063_v5  ;;  %v7939_v45 = vld [vmem:[#allocation18 + $0x1e0] sm:$0xff]  ;;  %v7938_v5 = vld [vmem:[#allocation18 + $0x1d8] sm:$0xff] }
 0xd35   : > { %13598 = vmatmul.mubr.msk.f32.gmra.mxu1 %vm2299_vm7, %v5895_v52  ;;  %v7014_v52 = vld [vmem:[#allocation18 + $0x28] sm:$0xff] }
 0xd36   : > { %13600 = vmatprep.mubr.msk.f32.mxu1 %vm2299_vm7, %v5896_v31  ;;  %v5913_v31 = vld [vmem:[%s19480_s15 + $0xf8] sm:$0xff]  ;;  %13727 = vmatprep.subr.mxu1 %v7014_v52 }
 0xd37   : > { %13728 = vmatpush3.msra.mxu1 %v7014_v52  ;;  %v7598_v52 = vld [vmem:[#allocation18 + $0x148] sm:$0xff] }
 0xd39   : > { %13601 = vmatmul.mubr.msk.f32.gmra.mxu1 %vm2299_vm7, %v5897_v55  ;;  %v7062_v55 = vld [vmem:[#allocation18 + $0xa0] sm:$0xff] }
 0xd3a   : > { %13603 = vmatprep.mubr.msk.f32.mxu1 %vm2299_vm7, %v5898_v57  ;;  %v7013_v57 = vld [vmem:[#allocation18 + $0x20] sm:$0xff]  ;;  %13649 = vmatprep.subr.mxu0 %v7062_v55 }
 0xd3b   : > { %13650 = vmatpush3.msra.mxu0 %v7062_v55  ;;  %13729 = vmatprep.subr.mxu1 %v7013_v57  ;;  %v7597_v55 = vld [vmem:[#allocation18 + $0x140] sm:$0xff] }
 0xd3c   : > { %13730 = vmatpush3.msra.mxu1 %v7013_v57  ;;  %v7936_v57 = vld [vmem:[#allocation18 + $0x1c8] sm:$0xff] }
 0xd3d   : > { %13604 = vmatmul.mubr.msk.f32.gmra.mxu1 %vm2299_vm7, %v5899_v43  ;;  %v7061_v43 = vld [vmem:[#allocation18 + $0x98] sm:$0xff] }
 0xd3e   : > { %13606 = vmatprep.mubr.msk.f32.mxu1 %vm2299_vm7, %v5900_v12  ;;  %v7012_v12 = vld [vmem:[#allocation18 + $0x18] sm:$0xff]  ;;  %13651 = vmatprep.subr.mxu0 %v7061_v43 }
 0xd3f   : > { %13652 = vmatpush3.msra.mxu0 %v7061_v43  ;;  %13731 = vmatprep.subr.mxu1 %v7012_v12 }
 0xd40   : > { %13732 = vmatpush3.msra.mxu1 %v7012_v12  ;;  %v7596_v12 = vld [vmem:[#allocation18 + $0x138] sm:$0xff] }
 0xd41   : > { %13607 = vmatmul.mubr.msk.f32.gmra.mxu1 %vm2299_vm7, %v5901_v49  ;;  %v7060_v49 = vld [vmem:[#allocation18 + $0x90] sm:$0xff] }
 0xd42   : > { %13609 = vmatprep.mubr.msk.f32.mxu1 %vm2299_vm7, %v5902_v56  ;;  %v19753_v56 = vld [vmem:[#allocation36_spill] sm:$0xff]  ;;  %13653 = vmatprep.subr.mxu0 %v7060_v49 }
 0xd43   : > { %13654 = vmatpush3.msra.mxu0 %v7060_v49  ;;  %v7935_v49 = vld [vmem:[#allocation18 + $0x1c0] sm:$0xff] }
 0xd45   : > { %13610 = vmatmul.mubr.msk.f32.gmra.mxu1 %vm2299_vm7, %v5903_v9  ;;  %v6373_v9 = vand.u32 15, %v19753_v56 }
 0xd46   : > { %13612 = vmatprep.mubr.msk.f32.mxu1 %vm2299_vm7, %v5904_v1  ;;  %v7011_v1 = vld [vmem:[#allocation18 + $0x10] sm:$0xff] }
 0xd47   : > { %vm6753_vm11 = vcmp.ne.s32.totalorder %v6373_v9, 0  ;;  %13733 = vmatprep.subr.mxu1 %v7011_v1 }
 0xd48   : > { %13734 = vmatpush3.msra.mxu1 %v7011_v1  ;;  %v7595_v1 = vld [vmem:[#allocation18 + $0x130] sm:$0xff] }
 0xd49   : > { %13613 = vmatmul.mubr.msk.f32.gmra.mxu1 %vm2299_vm7, %v5905_v25  ;;  %v7059_v25 = vld [vmem:[#allocation18 + $0x88] sm:$0xff]  ;;  %13735 = vmatprep.subr.mxu1 %v7010_v7 }
 0xd4a   : > { %13615 = vmatprep.mubr.msk.f32.mxu1 %vm2299_vm7, %v5906_v6  ;;  %v17572_v6 = vsel %vm6753_vm11, 1.0, %v17336_v48  ;;  %13655 = vmatprep.subr.mxu0 %v7059_v25 }
 0xd4b   : > { %19754 = vst [vmem:[#allocation64_spill] sm:$0xff] %v17572_v6  ;;  %13656 = vmatpush3.msra.mxu0 %v7059_v25  ;;  %13736 = vmatpush3.msra.mxu1 %v7010_v7  ;;  %v7934_v25 = vld [vmem:[#allocation18 + $0x1b8] sm:$0xff]  ;;  %v7933_v7 = vld [vmem:[#allocation18 + $0x1b0] sm:$0xff] }
 0xd4c   : > { %13737 = vmatprep.subr.mxu1 %v7009_v28 }
 0xd4d   : > { %13616 = vmatmul.mubr.msk.f32.gmra.mxu1 %vm2299_vm7, %v5907_v0  ;;  %v7058_v0 = vld [vmem:[#allocation18 + $0x80] sm:$0xff] }
 0xd4e   : > { %13618 = vmatprep.mubr.msk.f32.mxu1 %vm2299_vm7, %v5908_v29  ;;  %v6977_v29 = vmul.f32 %v17572_v6, %v6945_v33  ;;  %13657 = vmatprep.subr.mxu0 %v7058_v0  ;;  %v7594_v33 = vld [vmem:[#allocation18 + $0x128] sm:$0xff] }
 0xd4f   : > { %13658 = vmatpush3.msra.mxu0 %v7058_v0  ;;  %13738 = vmatpush3.msra.mxu1 %v7009_v28  ;;  %v7593_v0 = vld [vmem:[#allocation18 + $0x120] sm:$0xff]  ;;  %v7592_v28 = vld [vmem:[#allocation18 + $0x118] sm:$0xff] }
 0xd50   : > { %13660 = vmatmul.mubr.f32.vlgmr.msra.gmra.mxu0 %v17336_v48  ;;  %13787 = vmatprep.subr.mxu0 %v7604_v34 }
 0xd51   : > { %13619 = vmatmul.mubr.msk.f32.gmra.mxu1 %vm2299_vm7, %v5909_v3  ;;  %13788 = vmatpush3.msra.mxu0 %v7604_v34  ;;  %v7942_v3 = vld [vmem:[#allocation18 + $0x1f8] sm:$0xff]  ;;  %v7591_v34 = vld [vmem:[#allocation18 + $0x110] sm:$0xff] }
 0xd52   : > { %13621 = vmatprep.mubr.msk.f32.mxu1 %vm2299_vm7, %v5910_v27  ;;  %13789 = vmatprep.subr.mxu0 %v7603_v38  ;;  %v7602_v27 = vld [vmem:[#allocation18 + $0x168] sm:$0xff] }
 0xd53   : > { %13790 = vmatpush3.msra.mxu0 %v7603_v38  ;;  %13867 = vmatprep.subr.mxu1 %v7942_v3  ;;  %v7930_v38 = vld [vmem:[#allocation18 + $0x198] sm:$0xff] }
 0xd54   : > { %13791 = vmatprep.subr.mxu0 %v7602_v27 }
 0xd55   : > { %13622 = vmatmul.mubr.msk.f32.gmra.mxu1 %vm2299_vm7, %v5911_v63  ;;  %13792 = vmatpush3.msra.mxu0 %v7602_v27  ;;  %v7600_v63 = vld [vmem:[#allocation18 + $0x158] sm:$0xff]  ;;  %v7929_v27 = vld [vmem:[#allocation18 + $0x190] sm:$0xff] }
 0xd56   : > { %13624 = vmatprep.mubr.msk.f32.mxu1 %vm2299_vm7, %v5912_v2  ;;  %13793 = vmatprep.subr.mxu0 %v7601_v60  ;;  %v7599_v2 = vld [vmem:[#allocation18 + $0x150] sm:$0xff] }
 0xd57   : > { %13794 = vmatpush3.msra.mxu0 %v7601_v60  ;;  %v7928_v60 = vld [vmem:[#allocation18 + $0x188] sm:$0xff] }
 0xd58   : > { %13795 = vmatprep.subr.mxu0 %v7600_v63 }
 0xd59   : > { %13625 = vmatmul.mubr.msk.f32.gmra.mxu1 %vm2299_vm7, %v5913_v31  ;;  %13796 = vmatpush3.msra.mxu0 %v7600_v63  ;;  %v7937_v31 = vld [vmem:[#allocation18 + $0x1d0] sm:$0xff]  ;;  %v17578_v63 = vld [vmem:[#allocation18 + $0x278] sm:$0xff] }
 0xd5a   : > { %13739 = vmatprep.mubr.f32.mxu1 %v6977_v29  ;;  %13797 = vmatprep.subr.mxu0 %v7599_v2  ;;  %v7932_v29 = vld [vmem:[#allocation18 + $0x1a8] sm:$0xff] }
 0xd5b   : > { %13798 = vmatpush3.msra.mxu0 %v7599_v2  ;;  %v5338_v2 = vld [vmem:[%s19482_s17] sm:$0x1] }
 0xd5c   : > { %13799 = vmatprep.subr.mxu0 %v7598_v52 }
 0xd5d   : > { %13740 = vmatmul.mubr.f32.vlgmr.msra.gmra.mxu1 %v6946_v17  ;;  %13800 = vmatpush3.msra.mxu0 %v7598_v52  ;;  %v7931_v17 = vld [vmem:[#allocation18 + $0x1a0] sm:$0xff] }
 0xd5e   : > { %13868 = vmatpush3.msra.mxu1 %v7942_v3  ;;  %13801 = vmatprep.subr.mxu0 %v7597_v55  ;;  %v7590_v3 = vld [vmem:[#allocation18 + $0x108] sm:$0xff] }
 0xd5f   : > { %13869 = vmatprep.subr.mxu1 %v7941_v53  ;;  %13802 = vmatpush3.msra.mxu0 %v7597_v55 }
 0xd60   : > { %13870 = vmatpush3.msra.mxu1 %v7941_v53  ;;  %13803 = vmatprep.subr.mxu0 %v7596_v12  ;;  %v7589_v53 = vld [vmem:[#allocation18 + $0x100] sm:$0xff] }
 0xd61   : > { %13871 = vmatprep.subr.mxu1 %v7940_v62  ;;  %13804 = vmatpush3.msra.mxu0 %v7596_v12 }
 0xd62   : > { %13872 = vmatpush3.msra.mxu1 %v7940_v62  ;;  %13805 = vmatprep.subr.mxu0 %v7595_v1  ;;  %v7927_v62 = vld [vmem:[#allocation18 + $0x180] sm:$0xff] }
 0xd63   : > { %13873 = vmatprep.subr.mxu1 %v7939_v45  ;;  %13806 = vmatpush3.msra.mxu0 %v7595_v1 }
 0xd64   : > { %13874 = vmatpush3.msra.mxu1 %v7939_v45  ;;  %13807 = vmatprep.subr.mxu0 %v7594_v33  ;;  %v17581_v45 = vld [vmem:[#allocation18 + $0x2f8] sm:$0xff] }
 0xd65   : > { %13875 = vmatprep.subr.mxu1 %v7938_v5  ;;  %13808 = vmatpush3.msra.mxu0 %v7594_v33 }
 0xd66   : > { %13876 = vmatpush3.msra.mxu1 %v7938_v5  ;;  %13809 = vmatprep.subr.mxu0 %v7593_v0 }
 0xd67   : > { %13877 = vmatprep.subr.mxu1 %v7937_v31  ;;  %13810 = vmatpush3.msra.mxu0 %v7593_v0 }
 0xd68   : > { %13878 = vmatpush3.msra.mxu1 %v7937_v31  ;;  %13811 = vmatprep.subr.mxu0 %v7592_v28 }
 0xd69   : > { %13879 = vmatprep.subr.mxu1 %v7936_v57  ;;  %13812 = vmatpush3.msra.mxu0 %v7592_v28 }
 0xd6a   : > { %13880 = vmatpush3.msra.mxu1 %v7936_v57  ;;  %13813 = vmatprep.subr.mxu0 %v7591_v34  ;;  %v5339_v57 = vld [vmem:[%s19483_s18] sm:$0x1] }
 0xd6b   : > { %13881 = vmatprep.subr.mxu1 %v7935_v49  ;;  %13814 = vmatpush3.msra.mxu0 %v7591_v34 }
 0xd6c   : > { %13882 = vmatpush3.msra.mxu1 %v7935_v49  ;;  %13815 = vmatprep.subr.mxu0 %v7590_v3 }
 0xd6d   : > { %13883 = vmatprep.subr.mxu1 %v7934_v25  ;;  %13816 = vmatpush3.msra.mxu0 %v7590_v3 }
 0xd6e   : > { %13884 = vmatpush3.msra.mxu1 %v7934_v25  ;;  %13817 = vmatprep.subr.mxu0 %v7589_v53 }
 0xd6f   : > { %13885 = vmatprep.subr.mxu1 %v7933_v7  ;;  %13818 = vmatpush3.msra.mxu0 %v7589_v53 }
 0xd70   : > { %13886 = vmatpush3.msra.mxu1 %v7933_v7  ;;  %13947 = vmatprep.subr.mxu0 %v17578_v63 }
 0xd71   : > { %13887 = vmatprep.subr.mxu1 %v7932_v29 }
 0xd72   : > { %13888 = vmatpush3.msra.mxu1 %v7932_v29 }
 0xd73   : > { %13889 = vmatprep.subr.mxu1 %v7931_v17 }
 0xd74   : > { %13890 = vmatpush3.msra.mxu1 %v7931_v17 }
 0xd75   : > { %13891 = vmatprep.subr.mxu1 %v7930_v38 }
 0xd76   : > { %13892 = vmatpush3.msra.mxu1 %v7930_v38  ;;  %v19755_v38 = vld [vmem:[#allocation39_spill] sm:$0xff] }
 0xd77   : > { %13893 = vmatprep.subr.mxu1 %v7929_v27  ;;  %v6387_v3 = vand.u32 15, %v19755_v38  ;;  %v19763_v38 = vld [vmem:[#allocation40_spill] sm:$0xff] }
 0xd78   : > { %13894 = vmatpush3.msra.mxu1 %v7929_v27 }
 0xd79   : > { %13895 = vmatprep.subr.mxu1 %v7928_v60  ;;  %vm6755_vm7 = vcmp.ne.s32.totalorder %v6387_v3, 0  ;;  %v6394_v3 = vand.u32 15, %v19763_v38 }
 0xd7a   : > { %13896 = vmatpush3.msra.mxu1 %v7928_v60 }
 0xd7b   : > { %13897 = vmatprep.subr.mxu1 %v7927_v62  ;;  %vm17671_vm15 = vcmp.ne.s32.totalorder %v6394_v3, 15 }
 0xd7c   : > { %13898 = vmatpush3.msra.mxu1 %v7927_v62  ;;  %v19756_v62 = vld [vmem:[#allocation41_spill] sm:$0xff] }
 0xd7d   : > { %14027 = vmatprep.subr.mxu1 %v17581_v45 }
 0xd99   : > { %v17576_v43 = vpop.f32.mrf.mxu1 }
 0xd9b   : > { %v13551_v9 = vpop.f32.mrf.mxu1 }
 0xdcd   : > { %v5801_v5 = vpop.f32.mrf.mxu1 }
 0xdce   : > { %v5805_v52 = vmul.f32 %v5801_v5, %v5338_v2  ;;  %v6401_v2 = vand.u32 15, %v19756_v62 }
 0xdcf   : > { %v13562_v31 = vpop.f32.mrf.mxu1 }
 0xdd0   : > { %v5806_v55 = vmul.f32 %v5805_v52, %v17576_v43  ;;  %v17592_v49 = vrot.slane %v5805_v52, %v19752_v22  ;;  %vm17623_vm12 = vcmp.ne.s32.totalorder %v6401_v2, 0  ;;  %v6347_v2 = vadd.s32 80, %v19753_v56 }
 0xdd2   : > { %v5807_v12 = vsub.f32 %v5339_v57, %v5806_v55  ;;  %v5813_v1 = vmul.f32 %v17124_v51, %v17592_v49  ;;  %v5812_v33 = vmul.f32 %v17592_v49, %v17126_v30  ;;  %v5815_v7 = vmul.f32 %v17128_v23, %v17592_v49  ;;  %v19757_v55 = vld [vmem:[#allocation37_spill] sm:$0xff] }
 0xdd3   : > { %v5814_v51 = vmul.f32 %v17592_v49, %v17130_v50  ;;  %v5817_v30 = vmul.f32 %v17132_v24, %v17592_v49  ;;  %v5816_v50 = vmul.f32 %v17592_v49, %v17134_v10  ;;  %v6380_v24 = vand.u32 15, %v19757_v55 }
 0xdd4   : > { %v17595_v9 = vrot.slane %v5807_v12, %v19752_v22  ;;  %v5819_v57 = vmul.f32 %v17136_v42, %v17592_v49  ;;  %v6345_v10 = vadd.s32 64, %v19753_v56  ;;  %v5823_v55 = vmul.f32 %v17144_v37, %v17592_v49 }
 0xdd5   : > { %vm17634_vm13 = vcmp.ne.s32.totalorder %v6380_v24, 15 }
 0xdd6   : > { %v5851_v25 = vadd.f32 %v17595_v9, %v5813_v1  ;;  %v5850_v29 = vadd.f32 %v17595_v9, %v5812_v33  ;;  %v5853_v34 = vadd.f32 %v17595_v9, %v5815_v7  ;;  %v5852_v23 = vadd.f32 %v17595_v9, %v5814_v51 }
 0xdd7   : > { %v5855_v52 = vadd.f32 %v17595_v9, %v5817_v30  ;;  %v5854_v1 = vadd.f32 %v17595_v9, %v5816_v50  ;;  %v17621_v33 = vsel %vm6755_vm7, 1.0, %v17336_v48  ;;  %v5857_v42 = vadd.f32 %v17595_v9, %v5819_v57 }
 0xdd8   : > { %v6429_v62 = vand.u32 15, %v6345_v10  ;;  %v5820_v50 = vmul.f32 %v17592_v49, %v17142_v16  ;;  %v6349_v51 = vadd.s32 96, %v19753_v56  ;;  %v5861_v3 = vadd.f32 %v17595_v9, %v5823_v55 }
 0xdda   : > { %v5858_v10 = vadd.f32 %v17595_v9, %v5820_v50  ;;  %vm17688_vm0 = vcmp.ne.s32.totalorder %v6429_v62, 0  ;;  %v6346_v50 = vadd.s32 72, %v19753_v56 }
 0xddd   : > { %v13581_v43 = vpop.f32.mrf.mxu1 }
 0xdde   : > { %v6244_v0 = vadd.f32 %v13581_v43, %v5851_v25 }
 0xddf   : > { %v6084_v28 = vpop.f32.mrf.mxu1 }
 0xde0   : > { %6314 = vst [vmem:[#allocation5 + $0x20] sm:$0xff] %v6244_v0  ;;  %v6243_v17 = vadd.f32 %v6084_v28, %v5850_v29  ;;  %v19760_v29 = vld [vmem:[#allocation43_spill] sm:$0xff] }
 0xde1   : > { %v13584_v27 = vpop.f32.mrf.mxu1  ;;  %v6415_v28 = vand.u32 15, %v19760_v29 }
 0xde2   : > { %6313 = vst [vmem:[#allocation5 + $0x18] sm:$0xff] %v6243_v17  ;;  %v6246_v53 = vadd.f32 %v13584_v27, %v5853_v34  ;;  %13662 = vmatprep.mubr.f32.mxu0 %v6243_v17  ;;  %v5821_v27 = vmul.f32 %v17140_v61, %v17592_v49 }
 0xde3   : > { %v6094_v60 = vpop.f32.mrf.mxu1  ;;  %13663 = vmatmul.mubr.f32.gmra.mxu0 %v6244_v0  ;;  %v5818_v0 = vmul.f32 %v17592_v49, %v17138_v40  ;;  %vm17655_vm14 = vcmp.ne.s32.totalorder %v6415_v28, 0  ;;  %v5824_v28 = vmul.f32 %v17592_v49, %v17150_v41  ;;  %v6348_v41 = vadd.s32 88, %v19753_v56 }
 0xde4   : > { %6316 = vst [vmem:[#allocation5 + $0x30] sm:$0xff] %v6246_v53  ;;  %v6245_v5 = vadd.f32 %v6094_v60, %v5852_v23  ;;  %v17647_v60 = vsel %vm17623_vm12, 1.0, %v17336_v48  ;;  %v17686_v29 = vsel %vm17655_vm14, 1.0, %v17336_v48 }
 0xde5   : > { %v13587_v31 = vpop.f32.mrf.mxu1 }
 0xde6   : > { %6315 = vst [vmem:[#allocation5 + $0x28] sm:$0xff] %v6245_v5  ;;  %v6248_v12 = vadd.f32 %v13587_v31, %v5855_v52  ;;  %13665 = vmatprep.mubr.f32.mxu0 %v6245_v5  ;;  %v5859_v5 = vadd.f32 %v17595_v9, %v5821_v27 }
 0xde7   : > { %v6104_v25 = vpop.f32.mrf.mxu1  ;;  %13666 = vmatmul.mubr.f32.gmra.mxu0 %v6246_v53  ;;  %v5856_v53 = vadd.f32 %v17595_v9, %v5818_v0 }
 0xde8   : > { %6318 = vst [vmem:[#allocation5 + $0x40] sm:$0xff] %v6248_v12  ;;  %v6247_v7 = vadd.f32 %v6104_v25, %v5854_v1  ;;  %v19768_v25 = vld [vmem:[#allocation42_spill] sm:$0xff] }
 0xde9   : > { %v13590_v17 = vpop.f32.mrf.mxu1  ;;  %v17632_v34 = vld [vmem:[#allocation5 + $0x17] sm:$0xff]  ;;  %v17651_v52 = vld [vmem:[#allocation5 + $0x1f] sm:$0xff]  ;;  %v6408_v43 = vand.u32 15, %v19768_v25  ;;  %v17726_v25 = vsel %vm17688_vm0, 1.0, %v17336_v48 }
 0xdea   : > { %6317 = vst [vmem:[#allocation5 + $0x38] sm:$0xff] %v6247_v7  ;;  %v6250_v30 = vadd.f32 %v13590_v17, %v5857_v42  ;;  %v6979_v40 = vmul.f32 %v17621_v33, %v17632_v34  ;;  %13668 = vmatprep.mubr.f32.mxu0 %v6247_v7  ;;  %v6443_v17 = vand.u32 15, %v6347_v2 }
 0xdeb   : > { %v6114_v23 = vpop.f32.mrf.mxu1  ;;  %13669 = vmatmul.mubr.f32.gmra.mxu0 %v6248_v12  ;;  %v17667_v12 = vsel %vm17634_vm13, 1.0, %v17336_v48  ;;  %vm17710_vm1 = vcmp.ne.s32.totalorder %v6408_v43, 15 }
 0xdec   : > { %6320 = vst [vmem:[#allocation5 + $0x50] sm:$0xff] %v6250_v30  ;;  %v6249_v61 = vadd.f32 %v6114_v23, %v5856_v53  ;;  %13742 = vmatprep.mubr.f32.mxu1 %v6979_v40  ;;  %v5822_v53 = vmul.f32 %v17592_v49, %v17146_v44  ;;  %v5825_v40 = vmul.f32 %v17148_v54, %v17592_v49  ;;  %v19775_v44 = vld [vmem:[#allocation44_spill] sm:$0xff]  ;;  %vm17728_vm2 = vcmp.ne.s32.totalorder %v6443_v17, 0 }
 0xded   : > { %v13593_v24 = vpop.f32.mrf.mxu1  ;;  %13743 = vmatmul.mubr.f32.gmra.mxu1 %v17651_v52  ;;  %v17662_v57 = vld [vmem:[#allocation5 + $0x27] sm:$0xff]  ;;  %v17694_v27 = vld [vmem:[#allocation5 + $0x2f] sm:$0xff]  ;;  %v17765_v22 = vsel %vm17728_vm2, 1.0, %v17336_v48 }
 0xdee   : > { %v17669_v1 = vld [vmem:[#allocation5 + $0x21] sm:$0xff]  ;;  %6319 = vst [vmem:[#allocation5 + $0x48] sm:$0xff] %v6249_v61  ;;  %v6252_v37 = vadd.f32 %v13593_v24, %v5859_v5  ;;  %v6981_v7 = vmul.f32 %v17647_v60, %v17662_v57  ;;  %13671 = vmatprep.mubr.f32.mxu0 %v6249_v61  ;;  %v6422_v5 = vand.u32 15, %v19775_v44  ;;  %v5860_v55 = vadd.f32 %v17595_v9, %v5822_v53 }
 0xdef   : > { %v17681_v42 = vmul.f32 %v17667_v12, %v17669_v1  ;;  %v6124_v0 = vpop.f32.mrf.mxu1  ;;  %13672 = vmatmul.mubr.f32.gmra.mxu0 %v6250_v30  ;;  %v17701_v30 = vsel %vm17671_vm15, 1.0, %v17336_v48  ;;  %v17748_v53 = vsel %vm17710_vm1, 1.0, %v17336_v48  ;;  %v6436_v44 = vand.u32 15, %v6346_v50  ;;  %19783 = vst [vmem:[#allocation63_spill] sm:$0xff] %v17765_v22 }
 0xdf0   : > { %6322 = vst [vmem:[#allocation5 + $0x60] sm:$0xff] %v6252_v37  ;;  %v6251_v38 = vadd.f32 %v6124_v0, %v5858_v10  ;;  %13745 = vmatprep.mubr.f32.mxu1 %v6981_v7  ;;  %19772 = vst [vmem:[#allocation61_spill] sm:$0xff] %v17701_v30  ;;  %v6457_v10 = vand.u32 15, %v6349_v51  ;;  %vm17750_vm3 = vcmp.ne.s32.totalorder %v6422_v5, 15  ;;  %v5826_v48 = vmul.f32 %v17592_v49, %v17157_v20 }
 0xdf1   : > { %19769 = vst [vmem:[#allocation67_spill] sm:$0xff] %v17681_v42  ;;  %v13596_v23 = vpop.f32.mrf.mxu1  ;;  %13746 = vmatmul.mubr.f32.gmra.mxu1 %v17694_v27  ;;  %v17706_v62 = vld [vmem:[#allocation5 + $0x37] sm:$0xff]  ;;  %19780 = vst [vmem:[#allocation71_spill] sm:$0xff] %v17748_v53  ;;  %vm17791_vm8 = vcmp.ne.s32.totalorder %v6436_v44, 15  ;;  %v6450_v20 = vand.u32 15, %v6348_v41  ;;  %v6355_v42 = vadd.s32 144, %v19753_v56  ;;  %v5828_v50 = vmul.f32 %v17592_v49, %v17163_v59 }
 0xdf2   : > { %v17708_v2 = vld [vmem:[#allocation5 + $0x31] sm:$0xff]  ;;  %6321 = vst [vmem:[#allocation5 + $0x58] sm:$0xff] %v6251_v38  ;;  %v6254_v31 = vadd.f32 %v13596_v23, %v5861_v3  ;;  %v6983_v54 = vmul.f32 %v17686_v29, %v17706_v62  ;;  %13674 = vmatprep.mubr.f32.mxu0 %v6251_v38  ;;  %v5863_v38 = vadd.f32 %v17595_v9, %v5825_v40  ;;  %v17737_v3 = vld [vmem:[#allocation5 + $0x3f] sm:$0xff]  ;;  %vm17767_vm5 = vcmp.ne.s32.totalorder %v6457_v10, 0 }
 0xdf3   : > { %v17721_v24 = vmul.f32 %v17667_v12, %v17708_v2  ;;  %v6134_v16 = vpop.f32.mrf.mxu1  ;;  %13675 = vmatmul.mubr.f32.gmra.mxu0 %v6252_v37  ;;  %v17734_v7 = vmul.f32 %v17701_v30, %v17708_v2  ;;  %v6351_v37 = vadd.s32 112, %v19753_v56  ;;  %vm17830_vm10 = vcmp.ne.s32.totalorder %v6450_v20, 15 }
 0xdf4   : > { %6324 = vst [vmem:[#allocation5 + $0x70] sm:$0xff] %v6254_v31  ;;  %v6253_v0 = vadd.f32 %v6134_v16, %v5860_v55  ;;  %13748 = vmatprep.mubr.f32.mxu1 %v6983_v54  ;;  %v5827_v55 = vmul.f32 %v17155_v21, %v17592_v49  ;;  %v5862_v16 = vadd.f32 %v17595_v9, %v5824_v28  ;;  %v6353_v21 = vadd.s32 128, %v19753_v56 }
 0xdf5   : > { %19776 = vst [vmem:[#allocation62_spill] sm:$0xff] %v17721_v24  ;;  %19779 = vst [vmem:[#allocation69_spill] sm:$0xff] %v17734_v7  ;;  %v13599_v17 = vpop.f32.mrf.mxu1  ;;  %13749 = vmatmul.mubr.f32.gmra.mxu1 %v17737_v3  ;;  %v17743_v51 = vld [vmem:[#allocation5 + $0x47] sm:$0xff]  ;;  %v17806_v7 = vsel %vm17767_vm5, 1.0, %v17784_v58 }
 0xdf6   : > { %v17754_v40 = vld [vmem:[#allocation5 + $0x41] sm:$0xff]  ;;  %6323 = vst [vmem:[#allocation5 + $0x68] sm:$0xff] %v6253_v0  ;;  %v6256_v54 = vadd.f32 %v13599_v17, %v5863_v38  ;;  %v6985_v61 = vmul.f32 %v17726_v25, %v17743_v51  ;;  %13677 = vmatprep.mubr.f32.mxu0 %v6253_v0  ;;  %v5865_v0 = vadd.f32 %v17595_v9, %v5827_v55  ;;  %v17777_v17 = vld [vmem:[#allocation5 + $0x4f] sm:$0xff]  ;;  %19789 = vst [vmem:[#allocation72_spill] sm:$0xff] %v17806_v7 }
 0xdf7   : > { %v6144_v5 = vpop.f32.mrf.mxu1  ;;  %13678 = vmatmul.mubr.f32.gmra.mxu0 %v6254_v31  ;;  %v17774_v38 = vmul.f32 %v17748_v53, %v17754_v40  ;;  %v6471_v31 = vand.u32 15, %v6351_v37  ;;  %v6350_v37 = vadd.s32 104, %v19753_v56  ;;  %v6485_v41 = vand.u32 15, %v6353_v21 }
 0xdf8   : > { %6326 = vst [vmem:[#allocation5 + $0x80] sm:$0xff] %v6256_v54  ;;  %v6255_v28 = vadd.f32 %v6144_v5, %v5862_v16  ;;  %13751 = vmatprep.mubr.f32.mxu1 %v6985_v61  ;;  %v17789_v16 = vsel %vm17750_vm3, 1.0, %v17784_v58  ;;  %v5829_v5 = vmul.f32 %v17160_v32, %v17592_v49 }
 0xdf9   : > { %19786 = vst [vmem:[#allocation65_spill] sm:$0xff] %v17774_v38  ;;  %v13602_v43 = vpop.f32.mrf.mxu1  ;;  %13752 = vmatmul.mubr.f32.gmra.mxu1 %v17777_v17  ;;  %v17782_v10 = vld [vmem:[#allocation5 + $0x57] sm:$0xff]  ;;  %v5864_v38 = vadd.f32 %v17595_v9, %v5826_v48  ;;  %vm17818_vm9 = vcmp.ne.s32.totalorder %v6471_v31, 0  ;;  %v6464_v59 = vand.u32 15, %v6350_v37  ;;  %v6352_v31 = vadd.s32 120, %v19753_v56 }
 0xdfa   : > { %v17795_v61 = vld [vmem:[#allocation5 + $0x51] sm:$0xff]  ;;  %6325 = vst [vmem:[#allocation5 + $0x78] sm:$0xff] %v6255_v28  ;;  %v6258_v24 = vadd.f32 %v13602_v43, %v5865_v0  ;;  %v6987_v23 = vmul.f32 %v17765_v22, %v17782_v10  ;;  %13680 = vmatprep.mubr.f32.mxu0 %v6255_v28  ;;  %v5867_v48 = vadd.f32 %v17595_v9, %v5829_v5  ;;  %v17814_v28 = vld [vmem:[#allocation5 + $0x5f] sm:$0xff]  ;;  %v17845_v22 = vsel %vm17818_vm9, 1.0, %v17784_v58 }
 0xdfb   : > { %v6154_v44 = vpop.f32.mrf.mxu1  ;;  %13681 = vmatmul.mubr.f32.gmra.mxu0 %v6256_v54  ;;  %v17811_v32 = vmul.f32 %v17789_v16, %v17795_v61  ;;  %19791 = vst [vmem:[#allocation68_spill] sm:$0xff] %v17814_v28  ;;  %19798 = vst [vmem:[#allocation45_spill] sm:$0xff] %v17845_v22  ;;  %vm17847_vm11 = vcmp.ne.s32.totalorder %v6485_v41, 0  ;;  %v5830_v43 = vmul.f32 %v17592_v49, %v17175_v36  ;;  %vm17869_vm7 = vcmp.ne.s32.totalorder %v6464_v59, 15 }
 0xdfc   : > { %6328 = vst [vmem:[#allocation5 + $0x90] sm:$0xff] %v6258_v24  ;;  %v6257_v0 = vadd.f32 %v6154_v44, %v5864_v38  ;;  %13754 = vmatprep.mubr.f32.mxu1 %v6987_v23  ;;  %v17828_v38 = vsel %vm17791_vm8, 1.0, %v17784_v58  ;;  %v5831_v44 = vmul.f32 %v17173_v26, %v17592_v49  ;;  %v6499_v26 = vand.u32 15, %v6355_v42 }
 0xdfd   : > { %19790 = vst [vmem:[#allocation66_spill] sm:$0xff] %v17811_v32  ;;  %v13605_v54 = vpop.f32.mrf.mxu1  ;;  %13755 = vmatmul.mubr.f32.gmra.mxu1 %v17814_v28  ;;  %v17823_v21 = vld [vmem:[#allocation5 + $0x67] sm:$0xff]  ;;  %19795 = vst [vmem:[#allocation73_spill] sm:$0xff] %v17828_v38  ;;  %v5866_v28 = vadd.f32 %v17595_v9, %v5828_v50  ;;  %v6354_v36 = vadd.s32 136, %v19753_v56 }
 0xdfe   : > { %19794 = vst [vmem:[#allocation70_spill] sm:$0xff] %v17823_v21  ;;  %v17834_v23 = vld [vmem:[#allocation5 + $0x61] sm:$0xff]  ;;  %6327 = vst [vmem:[#allocation5 + $0x88] sm:$0xff] %v6257_v0  ;;  %v6260_v32 = vadd.f32 %v13605_v54, %v5867_v48  ;;  %v6989_v55 = vmul.f32 %v17806_v7, %v17823_v21  ;;  %13683 = vmatprep.mubr.f32.mxu0 %v6257_v0  ;;  %v5869_v0 = vadd.f32 %v17595_v9, %v5831_v44  ;;  %v17856_v54 = vld [vmem:[#allocation5 + $0x6f] sm:$0xff] }
 0xdff   : > { %v6164_v20 = vpop.f32.mrf.mxu1  ;;  %13684 = vmatmul.mubr.f32.gmra.mxu0 %v6258_v24  ;;  %v17853_v48 = vmul.f32 %v17828_v38, %v17834_v23  ;;  %19802 = vst [vmem:[#allocation47_spill] sm:$0xff] %v17856_v54  ;;  %v6357_v24 = vadd.s32 160, %v19753_v56  ;;  %v5868_v7 = vadd.f32 %v17595_v9, %v5830_v43  ;;  %v17884_v21 = vsel %vm17847_vm11, 1.0, %v17784_v58 }
 0xe00   : > { %6330 = vst [vmem:[#allocation5 + $0xa0] sm:$0xff] %v6260_v32  ;;  %v6259_v50 = vadd.f32 %v6164_v20, %v5866_v28  ;;  %13757 = vmatprep.mubr.f32.mxu1 %v6989_v55  ;;  %v6478_v55 = vand.u32 15, %v6352_v31  ;;  %v5833_v20 = vmul.f32 %v17193_v19, %v17592_v49  ;;  %19808 = vst [vmem:[#allocation51_spill] sm:$0xff] %v17884_v21  ;;  %vm17886_vm12 = vcmp.ne.s32.totalorder %v6499_v26, 0 }
 0xe01   : > { %19801 = vst [vmem:[#allocation46_spill] sm:$0xff] %v17853_v48  ;;  %v13608_v41 = vpop.f32.mrf.mxu1  ;;  %13758 = vmatmul.mubr.f32.gmra.mxu1 %v17856_v54  ;;  %v17862_v42 = vld [vmem:[#allocation5 + $0x77] sm:$0xff]  ;;  %v17867_v48 = vsel %vm17830_vm10, 1.0, %v17784_v58  ;;  %v6359_v19 = vadd.s32 176, %v19753_v56  ;;  %v6513_v37 = vand.u32 15, %v6357_v24  ;;  %v5835_v24 = vmul.f32 %v17217_v35, %v17592_v49 }
 0xe02   : > { %19803 = vst [vmem:[#allocation48_spill] sm:$0xff] %v17862_v42  ;;  %19804 = vst [vmem:[#allocation49_spill] sm:$0xff] %v17867_v48  ;;  %v17873_v44 = vld [vmem:[#allocation5 + $0x71] sm:$0xff]  ;;  %v6262_v54 = vadd.f32 %v13608_v41, %v5869_v0  ;;  %v6991_v5 = vmul.f32 %v17845_v22, %v17862_v42  ;;  %13686 = vmatprep.mubr.f32.mxu0 %v6259_v50  ;;  %v17896_v41 = vld [vmem:[#allocation5 + $0x7f] sm:$0xff]  ;;  %vm17908_vm13 = vcmp.ne.s32.totalorder %v6478_v55, 15  ;;  %v17923_v42 = vsel %vm17886_vm12, 1.0, %v17784_v58 }
 0xe03   : > { %19807 = vst [vmem:[#allocation50_spill] sm:$0xff] %v17873_v44  ;;  %6329 = vst [vmem:[#allocation5 + $0x98] sm:$0xff] %v6259_v50  ;;  %v6174_v59 = vpop.f32.mrf.mxu1  ;;  %13687 = vmatmul.mubr.f32.gmra.mxu0 %v6260_v32  ;;  %v17893_v0 = vmul.f32 %v17867_v48, %v17873_v44  ;;  %v5871_v50 = vadd.f32 %v17595_v9, %v5833_v20  ;;  %v5832_v32 = vmul.f32 %v17592_v49, %v17207_v11 }
 0xe04   : > { %6332 = vst [vmem:[#allocation5 + $0xb0] sm:$0xff] %v6262_v54  ;;  %v6261_v43 = vadd.f32 %v6174_v59, %v5868_v7  ;;  %13760 = vmatprep.mubr.f32.mxu1 %v6991_v5  ;;  %19812 = vst [vmem:[#allocation53_spill] sm:$0xff] %v17896_v41  ;;  %v6492_v5 = vand.u32 15, %v6354_v36  ;;  %v6356_v11 = vadd.s32 152, %v19753_v56  ;;  %v6527_v36 = vand.u32 15, %v6359_v19 }
 0xe05   : > { %19811 = vst [vmem:[#allocation52_spill] sm:$0xff] %v17893_v0  ;;  %v13611_v26 = vpop.f32.mrf.mxu1  ;;  %13761 = vmatmul.mubr.f32.gmra.mxu1 %v17896_v41  ;;  %v17901_v22 = vld [vmem:[#allocation5 + $0x87] sm:$0xff]  ;;  %v17906_v0 = vsel %vm17869_vm7, 1.0, %v17784_v58  ;;  %v5870_v41 = vadd.f32 %v17595_v9, %v5832_v32  ;;  %19816 = vst [vmem:[#allocation55_spill] sm:$0xff] %v17923_v42  ;;  %v6361_v44 = vadd.s32 192, %v19753_v56  ;;  %v5873_v32 = vadd.f32 %v17595_v9, %v5835_v24 }
 0xe06   : > { %19813 = vst [vmem:[#allocation54_spill] sm:$0xff] %v17906_v0  ;;  %v17912_v20 = vld [vmem:[#allocation5 + $0x81] sm:$0xff]  ;;  %6331 = vst [vmem:[#allocation5 + $0xa8] sm:$0xff] %v6261_v43  ;;  %v6264_v59 = vadd.f32 %v13611_v26, %v5871_v50  ;;  %v6993_v28 = vmul.f32 %v17884_v21, %v17901_v22  ;;  %13689 = vmatprep.mubr.f32.mxu0 %v6261_v43  ;;  %v17931_v43 = vld [vmem:[#allocation5 + $0x8f] sm:$0xff]  ;;  %v5834_v31 = vmul.f32 %v17592_v49, %v17219_v47 }
 0xe07   : > { %v6184_v55 = vpop.f32.mrf.mxu1  ;;  %13690 = vmatmul.mubr.f32.gmra.mxu0 %v6262_v54  ;;  %v17928_v35 = vmul.f32 %v17906_v0, %v17912_v20  ;;  %19818 = vst [vmem:[#allocation57_spill] sm:$0xff] %v17931_v43  ;;  %vm17935_vm14 = vcmp.ne.s32.totalorder %v6513_v37, 0  ;;  %vm17947_vm15 = vcmp.ne.s32.totalorder %v6492_v5, 15  ;;  %v6506_v47 = vand.u32 15, %v6356_v11 }
 0xe08   : > { %6334 = vst [vmem:[#allocation5 + $0xc0] sm:$0xff] %v6264_v59  ;;  %v6263_v50 = vadd.f32 %v6184_v55, %v5870_v41  ;;  %13763 = vmatprep.mubr.f32.mxu1 %v6993_v28  ;;  %v17945_v41 = vsel %vm17908_vm13, 1.0, %v17784_v58  ;;  %v6358_v37 = vadd.s32 168, %v19753_v56  ;;  %v5837_v55 = vmul.f32 %v17221_v18, %v17592_v49 }
 0xe09   : > { %19817 = vst [vmem:[#allocation56_spill] sm:$0xff] %v17928_v35  ;;  %v13614_v54 = vpop.f32.mrf.mxu1  ;;  %13764 = vmatmul.mubr.f32.gmra.mxu1 %v17931_v43  ;;  %19822 = vst [vmem:[#allocation59_spill] sm:$0xff] %v17945_v41  ;;  %v5872_v43 = vadd.f32 %v17595_v9, %v5834_v31  ;;  %v17962_v21 = vsel %vm17935_vm14, 1.0, %v17784_v58  ;;  %vm17964_vm0 = vcmp.ne.s32.totalorder %v6527_v36, 0  ;;  %v6541_v18 = vand.u32 15, %v6361_v44 }
 0xe0a   : > { %v17940_v19 = vld [vmem:[#allocation5 + $0x97] sm:$0xff]  ;;  %6333 = vst [vmem:[#allocation5 + $0xb8] sm:$0xff] %v6263_v50  ;;  %v6266_v35 = vadd.f32 %v13614_v54, %v5873_v32  ;;  %13692 = vmatprep.mubr.f32.mxu0 %v6263_v50  ;;  %19825 = vst [vmem:[#allocation60_spill] sm:$0xff] %v17962_v21  ;;  %v5875_v50 = vadd.f32 %v17595_v9, %v5837_v55  ;;  %v17973_v54 = vld [vmem:[#allocation5 + $0x9f] sm:$0xff]  ;;  %v5836_v26 = vmul.f32 %v17592_v49, %v17223_v15 }
 0xe0b   : > { %19821 = vst [vmem:[#allocation58_spill] sm:$0xff] %v17940_v19  ;;  %v17951_v28 = vld [vmem:[#allocation5 + $0x91] sm:$0xff]  ;;  %v6995_v7 = vmul.f32 %v17923_v42, %v17940_v19  ;;  %v6194_v5 = vpop.f32.mrf.mxu1  ;;  %13693 = vmatmul.mubr.f32.gmra.mxu0 %v6264_v59  ;;  %19829 = vst [vmem:[#allocation39_spill] sm:$0xff] %v17973_v54  ;;  %v6363_v59 = vadd.s32 208, %v19753_v56  ;;  %vm17986_vm1 = vcmp.ne.s32.totalorder %v6506_v47, 15  ;;  %v6360_v15 = vadd.s32 184, %v19753_v56 }
 0xe0c   : > { %v17970_v32 = vmul.f32 %v17945_v41, %v17951_v28  ;;  %6336 = vst [vmem:[#allocation5 + $0xd0] sm:$0xff] %v6266_v35  ;;  %v6265_v31 = vadd.f32 %v6194_v5, %v5872_v43  ;;  %v5839_v5 = vmul.f32 %v17225_v13, %v17592_v49  ;;  %v5874_v42 = vadd.f32 %v17595_v9, %v5836_v26 }
 0xe0d   : > { %13766 = vmatprep.mubr.f32.mxu1 %v6995_v7  ;;  %v13617_v36 = vpop.f32.mrf.mxu1  ;;  %v17979_v44 = vld [vmem:[#allocation5 + $0xa7] sm:$0xff]  ;;  %v6520_v7 = vand.u32 15, %v6358_v37  ;;  %v18001_v19 = vsel %vm17964_vm0, 1.0, %v17784_v58  ;;  %vm18003_vm2 = vcmp.ne.s32.totalorder %v6541_v18, 0  ;;  %v6365_v13 = vadd.s32 224, %v19753_v56 }
 0xe0e   : > { %19828 = vst [vmem:[#allocation36_spill] sm:$0xff] %v17970_v32  ;;  %13767 = vmatmul.mubr.f32.gmra.mxu1 %v17973_v54  ;;  %19830 = vst [vmem:[#allocation41_spill] sm:$0xff] %v17979_v44  ;;  %v17984_v32 = vsel %vm17947_vm15, 1.0, %v17784_v58  ;;  %v17990_v55 = vld [vmem:[#allocation5 + $0xa1] sm:$0xff]  ;;  %v6268_v54 = vadd.f32 %v13617_v36, %v5875_v50  ;;  %v6997_v24 = vmul.f32 %v17962_v21, %v17979_v44  ;;  %13695 = vmatprep.mubr.f32.mxu0 %v6265_v31  ;;  %v18013_v36 = vld [vmem:[#allocation5 + $0xaf] sm:$0xff] }
 0xe0f   : > { %19831 = vst [vmem:[#allocation37_spill] sm:$0xff] %v17984_v32  ;;  %19834 = vst [vmem:[#allocation43_spill] sm:$0xff] %v17990_v55  ;;  %v6204_v47 = vpop.f32.mrf.mxu1  ;;  %13696 = vmatmul.mubr.f32.gmra.mxu0 %v6266_v35  ;;  %v18010_v50 = vmul.f32 %v17984_v32, %v17990_v55  ;;  %v5838_v35 = vmul.f32 %v17592_v49, %v17227_v46  ;;  %v6555_v11 = vand.u32 15, %v6363_v59  ;;  %vm18025_vm3 = vcmp.ne.s32.totalorder %v6520_v7, 15 }
 0xe10   : > { %6335 = vst [vmem:[#allocation5 + $0xc8] sm:$0xff] %v6265_v31  ;;  %19835 = vst [vmem:[#allocation40_spill] sm:$0xff] %v18001_v19  ;;  %v6267_v26 = vadd.f32 %v6204_v47, %v5874_v42  ;;  %13769 = vmatprep.mubr.f32.mxu1 %v6997_v24  ;;  %v5877_v31 = vadd.f32 %v17595_v9, %v5839_v5  ;;  %v6534_v24 = vand.u32 15, %v6360_v15  ;;  %v6362_v46 = vadd.s32 200, %v19753_v56 }
 0xe11   : > { %19838 = vst [vmem:[#allocation42_spill] sm:$0xff] %v18010_v50  ;;  %6338 = vst [vmem:[#allocation5 + $0xe0] sm:$0xff] %v6268_v54  ;;  %v13620_v18 = vpop.f32.mrf.mxu1  ;;  %v18018_v21 = vld [vmem:[#allocation5 + $0xb7] sm:$0xff]  ;;  %v18023_v50 = vsel %vm17986_vm1, 1.0, %v17784_v58  ;;  %v5841_v59 = vmul.f32 %v17229_v4, %v17592_v49  ;;  %v18040_v44 = vsel %vm18003_vm2, 1.0, %v17784_v58  ;;  %v6569_v15 = vand.u32 15, %v6365_v13 }
 0xe12   : > { %19839 = vst [vmem:[#allocation44_spill] sm:$0xff] %v18013_v36  ;;  %13770 = vmatmul.mubr.f32.gmra.mxu1 %v18013_v36  ;;  %19840 = vst [vmem:[#allocation74_spill] sm:$0xff] %v18023_v50  ;;  %v18029_v5 = vld [vmem:[#allocation5 + $0xb1] sm:$0xff]  ;;  %v6270_v47 = vadd.f32 %v13620_v18, %v5877_v31  ;;  %v5876_v36 = vadd.f32 %v17595_v9, %v5838_v35  ;;  %v6999_v43 = vmul.f32 %v18001_v19, %v18018_v21 }
 0xe13   : > { %6337 = vst [vmem:[#allocation5 + $0xd8] sm:$0xff] %v6267_v26  ;;  %13698 = vmatprep.mubr.f32.mxu0 %v6267_v26  ;;  %v6214_v7 = vpop.f32.mrf.mxu1  ;;  %19843 = vst [vmem:[#allocation75_spill] sm:$0xff] %v18040_v44  ;;  %v6367_v55 = vadd.s32 240, %v19753_v56  ;;  %v18045_v4 = vmul.f32 %v18023_v50, %v18029_v5  ;;  %v5879_v35 = vadd.f32 %v17595_v9, %v5841_v59  ;;  %v18048_v26 = vld [vmem:[#allocation5 + $0xbf] sm:$0xff]  ;;  %vm18052_vm5 = vcmp.ne.s32.totalorder %v6555_v11, 0 }
 0xe14   : > { %13699 = vmatmul.mubr.f32.gmra.mxu0 %v6268_v54  ;;  %6340 = vst [vmem:[#allocation5 + $0xf0] sm:$0xff] %v6270_v47  ;;  %v6269_v31 = vadd.f32 %v6214_v7, %v5876_v36  ;;  %13772 = vmatprep.mubr.f32.mxu1 %v6999_v43  ;;  %19845 = vst [vmem:[#allocation77_spill] sm:$0xff] %v18048_v26  ;;  %v5840_v37 = vmul.f32 %v17592_v49, %v17231_v14  ;;  %v18062_v36 = vsel %vm18025_vm3, 1.0, %v17784_v58 }
 0xe15   : > { %19844 = vst [vmem:[#allocation76_spill] sm:$0xff] %v18045_v4  ;;  %v13623_v54 = vpop.f32.mrf.mxu1  ;;  %19849 = vst [vmem:[#allocation79_spill] sm:$0xff] %v18062_v36  ;;  %vm18064_vm8 = vcmp.ne.s32.totalorder %v6534_v24, 15  ;;  %v6548_v14 = vand.u32 15, %v6362_v46  ;;  %v6364_v11 = vadd.s32 216, %v19753_v56  ;;  %v5843_v7 = vmul.f32 %v17233_v8, %v17592_v49 }
 0xe16   : > { %13773 = vmatmul.mubr.f32.gmra.mxu1 %v18048_v26  ;;  %6339 = vst [vmem:[#allocation5 + $0xe8] sm:$0xff] %v6269_v31  ;;  %v6272_v4 = vadd.f32 %v13623_v54, %v5879_v35  ;;  %v5878_v26 = vadd.f32 %v17595_v9, %v5840_v37  ;;  %13701 = vmatprep.mubr.f32.mxu0 %v6269_v31  ;;  %v18079_v19 = vsel %vm18052_vm5, 1.0, %v17784_v58  ;;  %vm18081_vm9 = vcmp.ne.s32.totalorder %v6569_v15, 0 }
 0xe17   : > { %v18057_v13 = vld [vmem:[#allocation5 + $0xc7] sm:$0xff]  ;;  %v6224_v24 = vpop.f32.mrf.mxu1  ;;  %v5881_v31 = vadd.f32 %v17595_v9, %v5843_v7  ;;  %v18090_v37 = vld [vmem:[#allocation5 + $0xcf] sm:$0xff]  ;;  %v5842_v18 = vmul.f32 %v17592_v49, %v17236_v39  ;;  %v6583_v54 = vand.u32 15, %v6367_v55  ;;  %vm18102_vm10 = vcmp.ne.s32.totalorder %v6548_v14, 15 }
 0xe18   : > { %19848 = vst [vmem:[#allocation78_spill] sm:$0xff] %v18057_v13  ;;  %v18068_v43 = vld [vmem:[#allocation5 + $0xc1] sm:$0xff]  ;;  %v7001_v42 = vmul.f32 %v18040_v44, %v18057_v13  ;;  %13702 = vmatmul.mubr.f32.gmra.mxu0 %v6270_v47  ;;  %6342 = vst [vmem:[#allocation5 + $0x100] sm:$0xff] %v6272_v4  ;;  %v6271_v35 = vadd.f32 %v6224_v24, %v5878_v26  ;;  %v7524_v44 = vld [vmem:[#allocation5 + $0x9] sm:$0xff]  ;;  %v6366_v39 = vadd.s32 232, %v19753_v56  ;;  %v6562_v59 = vand.u32 15, %v6364_v11 }
 0xe19   : > { %v18087_v8 = vmul.f32 %v18062_v36, %v18068_v43  ;;  %19855 = vst [vmem:[#allocation81_spill] sm:$0xff] %v18090_v37  ;;  %v13626_v47 = vpop.f32.mrf.mxu1  ;;  %v5880_v55 = vadd.f32 %v17595_v9, %v5842_v18  ;;  %v7525_v24 = vld [vmem:[#allocation5 + $0x11] sm:$0xff]  ;;  %v18115_v14 = vsel %vm18081_vm9, 1.0, %v17784_v58  ;;  %vm6783_vm11 = vcmp.ne.s32.totalorder %v6583_v54, 0 }
 0xe1a   : > { %13775 = vmatprep.mubr.f32.mxu1 %v7001_v42  ;;  %v18095_v15 = vld [vmem:[#allocation5 + $0xd7] sm:$0xff]  ;;  %6341 = vst [vmem:[#allocation5 + $0xf8] sm:$0xff] %v6271_v35  ;;  %v6274_v49 = vadd.f32 %v13626_v47, %v5881_v31  ;;  %13704 = vmatprep.mubr.f32.mxu0 %v6271_v35  ;;  %v18121_v9 = vld [vmem:[#allocation5 + $0xdf] sm:$0xff]  ;;  %v7557_v46 = vmul.f32 %v17667_v12, %v7525_v24  ;;  %v6576_v18 = vand.u32 15, %v6366_v39  ;;  %vm6876_vm7 = vcmp.ne.s32.totalorder %v6562_v59, 15 }
 0xe1b   : > { %19854 = vst [vmem:[#allocation80_spill] sm:$0xff] %v18087_v8  ;;  %13776 = vmatmul.mubr.f32.gmra.mxu1 %v18090_v37  ;;  %v18100_v8 = vsel %vm18064_vm8, 1.0, %v17784_v58  ;;  %v18106_v7 = vld [vmem:[#allocation5 + $0xd1] sm:$0xff]  ;;  %v7003_v42 = vmul.f32 %v18079_v19, %v18095_v15  ;;  %v6234_v37 = vpop.f32.mrf.mxu1  ;;  %v18141_v54 = vsel %vm6783_vm11, 1.0, %v17784_v58  ;;  %v18143_v12 = vld [vmem:[#allocation5 + $0x19] sm:$0xff]  ;;  %v8247_v47 = vld [vmem:[#allocation18 + $0x270] sm:$0xff] }
 0xe1c   : > { %19856 = vst [vmem:[#allocation82_spill] sm:$0xff] %v18100_v8  ;;  %13705 = vmatmul.mubr.f32.gmra.mxu0 %v6272_v4  ;;  %v18119_v13 = vmul.f32 %v18100_v8, %v18106_v7  ;;  %6344 = vst [vmem:[#allocation5 + $0x110] sm:$0xff] %v6274_v49  ;;  %v6273_v31 = vadd.f32 %v6234_v37, %v5880_v55  ;;  %v18130_v4 = vsel %vm18102_vm10, 1.0, %v17784_v58  ;;  %v18155_v55 = vsel %vm6876_vm7, 1.0, %v17784_v58 }
 0xe1d   : > { %13778 = vmatprep.mubr.f32.mxu1 %v7003_v42  ;;  %13819 = vmatprep.mubr.f32.mxu0 %v7524_v44  ;;  %v18124_v11 = vld [vmem:[#allocation5 + $0xe7] sm:$0xff]  ;;  %19860 = vst [vmem:[#allocation84_spill] sm:$0xff] %v18130_v4  ;;  %v18145_v26 = vld [vmem:[#allocation5 + $0xef] sm:$0xff]  ;;  %v7559_v49 = vmul.f32 %v17701_v30, %v17669_v1  ;;  %19862 = vst [vmem:[#allocation86_spill] sm:$0xff] %v18155_v55  ;;  %vm6878_vm12 = vcmp.ne.s32.totalorder %v6576_v18, 15 }
 0xe1e   : > { %19859 = vst [vmem:[#allocation83_spill] sm:$0xff] %v18119_v13  ;;  %v18132_v35 = vld [vmem:[#allocation5 + $0xe1] sm:$0xff]  ;;  %6343 = vst [vmem:[#allocation5 + $0x108] sm:$0xff] %v6273_v31  ;;  %v7005_v37 = vmul.f32 %v18115_v14, %v18124_v11  ;;  %v18165_v31 = vld [vmem:[#allocation5 + $0x29] sm:$0xff]  ;;  %v18173_v18 = vsel %vm6878_vm12, 1.0, %v17784_v58  ;;  %v13741_v13 = vpop.f32.mrf.mxu1 }
 0xe1f   : > { %13779 = vmatmul.mubr.f32.gmra.mxu1 %v18121_v9  ;;  %v18138_v44 = vmul.f32 %v18130_v4, %v18132_v35  ;;  %v8246_v1 = vld [vmem:[#allocation18 + $0x268] sm:$0xff] }
 0xe20   : > { %13820 = vmatmul.mubr.f32.vlgmr.msra.gmra.mxu0 %v7557_v46  ;;  %13781 = vmatprep.mubr.f32.mxu1 %v7005_v37  ;;  %v7894_v46 = vmul.f32 %v17572_v6, %v17632_v34 }
 0xe21   : > { %19861 = vst [vmem:[#allocation85_spill] sm:$0xff] %v18138_v44  ;;  %13822 = vmatprep.mubr.f32.mxu0 %v18143_v12  ;;  %v18149_v39 = vld [vmem:[#allocation5 + $0xf7] sm:$0xff]  ;;  %13948 = vmatpush3.msra.mxu0 %v17578_v63  ;;  %v18167_v63 = vld [vmem:[#allocation5 + $0xff] sm:$0xff]  ;;  %v13661_v44 = vpop.f32.mrf.mxu0 }
 0xe22   : > { %v18157_v42 = vld [vmem:[#allocation5 + $0xf1] sm:$0xff]  ;;  %v7007_v24 = vmul.f32 %v18141_v54, %v18149_v39  ;;  %13949 = vmatprep.subr.mxu0 %v8247_v47 }
 0xe23   : > { %13782 = vmatmul.mubr.f32.gmra.mxu1 %v18145_v26  ;;  %v18163_v59 = vmul.f32 %v18155_v55, %v18157_v42  ;;  %v18175_v37 = vld [vmem:[#allocation5 + $0x111] sm:$0xff]  ;;  %13950 = vmatpush3.msra.mxu0 %v8247_v47  ;;  %v18194_v47 = vadd.f32 %v13741_v13, %v13661_v44  ;;  %v8584_v13 = vld [vmem:[#allocation18 + $0x2e8] sm:$0xff]  ;;  %v18207_v44 = vld [vmem:[#allocation5 + $0x49] sm:$0xff] }
 0xe24   : > { %13823 = vmatmul.mubr.f32.gmra.mxu0 %v7559_v49  ;;  %13784 = vmatprep.mubr.f32.mxu1 %v7007_v24  ;;  %v7561_v49 = vmul.f32 %v17748_v53, %v17708_v2  ;;  %v18186_v34 = vmul.f32 %v18173_v18, %v18175_v37  ;;  %v18192_v2 = vld [vmem:[#allocation5 + $0x39] sm:$0xff] }
 0xe25   : > { %19863 = vst [vmem:[#allocation87_spill] sm:$0xff] %v18163_v59  ;;  %13825 = vmatprep.mubr.f32.mxu0 %v18165_v31  ;;  %v18180_v30 = vld [vmem:[#allocation5 + $0x107] sm:$0xff]  ;;  %13951 = vmatprep.subr.mxu0 %v8246_v1  ;;  %v8245_v59 = vld [vmem:[#allocation18 + $0x260] sm:$0xff] }
 0xe26   : > { %v18182_v24 = vld [vmem:[#allocation5 + $0x101] sm:$0xff]  ;;  %19864 = vst [vmem:[#allocation88_spill] sm:$0xff] %v18186_v34  ;;  %v18198_v53 = vmul.f32 %v18115_v14, %v18180_v30  ;;  %13952 = vmatpush3.msra.mxu0 %v8246_v1  ;;  %v18215_v1 = vld [vmem:[#allocation5 + $0x59] sm:$0xff] }
 0xe27   : > { %13785 = vmatmul.mubr.f32.gmra.mxu1 %v18167_v63  ;;  %v18190_v6 = vmul.f32 %v18173_v18, %v18182_v24  ;;  %v8585_v34 = vld [vmem:[#allocation18 + $0x2f0] sm:$0xff]  ;;  %13953 = vmatprep.subr.mxu0 %v8245_v59 }
 0xe28   : > { %13899 = vmatprep.mubr.f32.mxu1 %v7894_v46  ;;  %13826 = vmatmul.mubr.f32.gmra.mxu0 %v7561_v49  ;;  %v7896_v46 = vmul.f32 %v17621_v33, %v17662_v57  ;;  %v7563_v49 = vmul.f32 %v17789_v16, %v17754_v40  ;;  %v7898_v57 = vmul.f32 %v17647_v60, %v17706_v62  ;;  %v8244_v40 = vld [vmem:[#allocation18 + $0x258] sm:$0xff] }
 0xe29   : > { %13828 = vmatprep.mubr.f32.mxu0 %v18192_v2  ;;  %13954 = vmatpush3.msra.mxu0 %v8245_v59  ;;  %v7900_v62 = vmul.f32 %v17686_v29, %v17743_v51  ;;  %v8582_v59 = vld [vmem:[#allocation18 + $0x2d8] sm:$0xff]  ;;  %v7902_v51 = vmul.f32 %v17726_v25, %v17782_v10 }
 0xe2a   : > { %13955 = vmatprep.subr.mxu0 %v8244_v40 }
 0xe2b   : > { %13900 = vmatmul.mubr.f32.vlgmr.msra.gmra.mxu1 %v17651_v52  ;;  %v7565_v52 = vmul.f32 %v17828_v38, %v17795_v61  ;;  %v8243_v61 = vld [vmem:[#allocation18 + $0x250] sm:$0xff]  ;;  %13956 = vmatpush3.msra.mxu0 %v8244_v40  ;;  %v19868_v40 = vld [vmem:[#allocation68_spill] sm:$0xff] }
 0xe2c   : > { %13902 = vmatprep.mubr.f32.mxu1 %v7896_v46  ;;  %14028 = vmatpush3.msra.mxu1 %v17581_v45  ;;  %v8583_v45 = vld [vmem:[#allocation18 + $0x2e0] sm:$0xff]  ;;  %v8242_v46 = vld [vmem:[#allocation18 + $0x248] sm:$0xff] }
 0xe2d   : > { %13829 = vmatmul.mubr.f32.gmra.mxu0 %v7563_v49  ;;  %14029 = vmatprep.subr.mxu1 %v8585_v34  ;;  %v8581_v49 = vld [vmem:[#allocation18 + $0x2d0] sm:$0xff] }
 0xe2e   : > { %13831 = vmatprep.mubr.f32.mxu0 %v18207_v44  ;;  %14030 = vmatpush3.msra.mxu1 %v8585_v34  ;;  %v18223_v34 = vld [vmem:[#allocation5 + $0x69] sm:$0xff] }
 0xe2f   : > { %13903 = vmatmul.mubr.f32.gmra.mxu1 %v17694_v27  ;;  %14031 = vmatprep.subr.mxu1 %v8584_v13  ;;  %v7567_v27 = vmul.f32 %v17867_v48, %v17834_v23  ;;  %v19902_v48 = vld [vmem:[#allocation87_spill] sm:$0xff] }
 0xe30   : > { %13905 = vmatprep.mubr.f32.mxu1 %v7898_v57  ;;  %14032 = vmatpush3.msra.mxu1 %v8584_v13  ;;  %v18231_v13 = vld [vmem:[#allocation5 + $0x79] sm:$0xff]  ;;  %v19866_v57 = vld [vmem:[#allocation70_spill] sm:$0xff] }
 0xe31   : > { %13832 = vmatmul.mubr.f32.gmra.mxu0 %v7565_v52  ;;  %14033 = vmatprep.subr.mxu1 %v8583_v45  ;;  %v19867_v52 = vld [vmem:[#allocation63_spill] sm:$0xff] }
 0xe32   : > { %13834 = vmatprep.mubr.f32.mxu0 %v18215_v1  ;;  %14034 = vmatpush3.msra.mxu1 %v8583_v45  ;;  %v7904_v10 = vmul.f32 %v19867_v52, %v19866_v57  ;;  %v8241_v45 = vld [vmem:[#allocation18 + $0x240] sm:$0xff] }
 0xe33   : > { %13906 = vmatmul.mubr.f32.gmra.mxu1 %v17737_v3  ;;  %13957 = vmatprep.subr.mxu0 %v8243_v61  ;;  %v19865_v3 = vld [vmem:[#allocation50_spill] sm:$0xff]  ;;  %v18247_v57 = vld [vmem:[#allocation5 + $0x99] sm:$0xff] }
 0xe34   : > { %13908 = vmatprep.mubr.f32.mxu1 %v7900_v62  ;;  %v7569_v23 = vmul.f32 %v17906_v0, %v19865_v3  ;;  %14035 = vmatprep.subr.mxu1 %v8582_v59  ;;  %v8580_v62 = vld [vmem:[#allocation18 + $0x2c8] sm:$0xff]  ;;  %v19871_v3 = vld [vmem:[#allocation47_spill] sm:$0xff] }
 0xe35   : > { %13835 = vmatmul.mubr.f32.gmra.mxu0 %v7567_v27  ;;  %14036 = vmatpush3.msra.mxu1 %v8582_v59  ;;  %v18239_v27 = vld [vmem:[#allocation5 + $0x89] sm:$0xff]  ;;  %v19870_v59 = vld [vmem:[#allocation72_spill] sm:$0xff]  ;;  %v9216_v0 = vld [vmem:[#allocation18 + $0x388] sm:$0xff] }
 0xe36   : > { %13837 = vmatprep.mubr.f32.mxu0 %v18223_v34  ;;  %13958 = vmatpush3.msra.mxu0 %v8243_v61  ;;  %v19869_v61 = vld [vmem:[#allocation48_spill] sm:$0xff] }
 0xe37   : > { %13909 = vmatmul.mubr.f32.gmra.mxu1 %v17777_v17  ;;  %13959 = vmatprep.subr.mxu0 %v8242_v46  ;;  %v7571_v17 = vmul.f32 %v17945_v41, %v17912_v20  ;;  %v7573_v20 = vmul.f32 %v17984_v32, %v17951_v28  ;;  %v8844_v32 = vld [vmem:[#allocation5 + $0x27] sm:$0xff] }
 0xe38   : > { %13911 = vmatprep.mubr.f32.mxu1 %v7902_v51  ;;  %14037 = vmatprep.subr.mxu1 %v8581_v49  ;;  %v7906_v51 = vmul.f32 %v19870_v59, %v19869_v61  ;;  %v8239_v61 = vld [vmem:[#allocation18 + $0x230] sm:$0xff] }
 0xe39   : > { %13838 = vmatmul.mubr.f32.gmra.mxu0 %v7569_v23  ;;  %14038 = vmatpush3.msra.mxu1 %v8581_v49  ;;  %v8240_v23 = vld [vmem:[#allocation18 + $0x238] sm:$0xff]  ;;  %v19872_v49 = vld [vmem:[#allocation45_spill] sm:$0xff] }
 0xe3a   : > { %13840 = vmatprep.mubr.f32.mxu0 %v18231_v13  ;;  %13960 = vmatpush3.msra.mxu0 %v8242_v46  ;;  %v8579_v46 = vld [vmem:[#allocation18 + $0x2c0] sm:$0xff] }
 0xe3b   : > { %13912 = vmatmul.mubr.f32.gmra.mxu1 %v19868_v40  ;;  %13961 = vmatprep.subr.mxu0 %v8241_v45  ;;  %v19873_v40 = vld [vmem:[#allocation53_spill] sm:$0xff] }
 0xe3c   : > { %13914 = vmatprep.mubr.f32.mxu1 %v7904_v10  ;;  %14039 = vmatprep.subr.mxu1 %v8580_v62  ;;  %v7908_v10 = vmul.f32 %v19872_v49, %v17901_v22 }
 0xe3d   : > { %13841 = vmatmul.mubr.f32.gmra.mxu0 %v7571_v17  ;;  %14040 = vmatpush3.msra.mxu1 %v8580_v62  ;;  %v19874_v17 = vld [vmem:[#allocation43_spill] sm:$0xff]  ;;  %v19875_v62 = vld [vmem:[#allocation58_spill] sm:$0xff] }
 0xe3e   : > { %13843 = vmatprep.mubr.f32.mxu0 %v18239_v27  ;;  %13962 = vmatpush3.msra.mxu0 %v8241_v45  ;;  %v7575_v28 = vmul.f32 %v18023_v50, %v19874_v17  ;;  %v8578_v45 = vld [vmem:[#allocation18 + $0x2b8] sm:$0xff]  ;;  %v8238_v17 = vld [vmem:[#allocation18 + $0x228] sm:$0xff] }
 0xe3f   : > { %13915 = vmatmul.mubr.f32.gmra.mxu1 %v19871_v3  ;;  %13963 = vmatprep.subr.mxu0 %v8240_v23  ;;  %v19876_v3 = vld [vmem:[#allocation51_spill] sm:$0xff] }
 0xe40   : > { %13917 = vmatprep.mubr.f32.mxu1 %v7906_v51  ;;  %14041 = vmatprep.subr.mxu1 %v8579_v46  ;;  %v18255_v51 = vld [vmem:[#allocation5 + $0xa9] sm:$0xff]  ;;  %v7910_v22 = vmul.f32 %v19876_v3, %v19875_v62 }
 0xe41   : > { %13844 = vmatmul.mubr.f32.gmra.mxu0 %v7573_v20  ;;  %14042 = vmatpush3.msra.mxu1 %v8579_v46  ;;  %v19877_v20 = vld [vmem:[#allocation57_spill] sm:$0xff]  ;;  %v19880_v50 = vld [vmem:[#allocation39_spill] sm:$0xff] }
 0xe42   : > { %13846 = vmatprep.mubr.f32.mxu0 %v18247_v57  ;;  %13964 = vmatpush3.msra.mxu0 %v8240_v23  ;;  %v8577_v23 = vld [vmem:[#allocation18 + $0x2b0] sm:$0xff]  ;;  %v19878_v46 = vld [vmem:[#allocation41_spill] sm:$0xff] }
 0xe43   : > { %13918 = vmatmul.mubr.f32.gmra.mxu1 %v19873_v40  ;;  %13965 = vmatprep.subr.mxu0 %v8239_v61  ;;  %v7577_v40 = vmul.f32 %v18062_v36, %v18029_v5  ;;  %v7579_v5 = vmul.f32 %v18100_v8, %v18068_v43  ;;  %v8236_v43 = vld [vmem:[#allocation18 + $0x218] sm:$0xff]  ;;  %v18422_v36 = vld [vmem:[#allocation5 + $0x100] sm:$0xff] }
 0xe44   : > { %13920 = vmatprep.mubr.f32.mxu1 %v7908_v10  ;;  %14043 = vmatprep.subr.mxu1 %v8578_v45  ;;  %v18263_v10 = vld [vmem:[#allocation5 + $0xb9] sm:$0xff] }
 0xe45   : > { %13847 = vmatmul.mubr.f32.gmra.mxu0 %v7575_v28  ;;  %14044 = vmatpush3.msra.mxu1 %v8578_v45  ;;  %v19879_v28 = vld [vmem:[#allocation55_spill] sm:$0xff]  ;;  %v19881_v45 = vld [vmem:[#allocation60_spill] sm:$0xff] }
 0xe46   : > { %13849 = vmatprep.mubr.f32.mxu0 %v18255_v51  ;;  %13966 = vmatpush3.msra.mxu0 %v8239_v61  ;;  %v7912_v62 = vmul.f32 %v19879_v28, %v19878_v46  ;;  %v8576_v61 = vld [vmem:[#allocation18 + $0x2a8] sm:$0xff]  ;;  %v19882_v46 = vld [vmem:[#allocation44_spill] sm:$0xff] }
 0xe47   : > { %13921 = vmatmul.mubr.f32.gmra.mxu1 %v19877_v20  ;;  %13967 = vmatprep.subr.mxu0 %v8238_v17  ;;  %v8237_v20 = vld [vmem:[#allocation18 + $0x220] sm:$0xff] }
 0xe48   : > { %13923 = vmatprep.mubr.f32.mxu1 %v7910_v22  ;;  %14045 = vmatprep.subr.mxu1 %v8577_v23  ;;  %v18271_v22 = vld [vmem:[#allocation5 + $0xc9] sm:$0xff] }
 0xe49   : > { %13850 = vmatmul.mubr.f32.gmra.mxu0 %v7577_v40  ;;  %14046 = vmatpush3.msra.mxu1 %v8577_v23  ;;  %v7914_v40 = vmul.f32 %v19881_v45, %v18018_v21  ;;  %v18280_v23 = vld [vmem:[#allocation5 + $0xd9] sm:$0xff]  ;;  %v19883_v21 = vld [vmem:[#allocation78_spill] sm:$0xff] }
 0xe4a   : > { %13852 = vmatprep.mubr.f32.mxu0 %v18263_v10  ;;  %13968 = vmatpush3.msra.mxu0 %v8238_v17  ;;  %v6368_v17 = vadd.s32 248, %v19753_v56  ;;  %v8235_v56 = vld [vmem:[#allocation18 + $0x210] sm:$0xff] }
 0xe4b   : > { %13924 = vmatmul.mubr.f32.gmra.mxu1 %v19880_v50  ;;  %13969 = vmatprep.subr.mxu0 %v8237_v20  ;;  %v7581_v50 = vmul.f32 %v18130_v4, %v18106_v7  ;;  %v7583_v7 = vmul.f32 %v18155_v55, %v18132_v35  ;;  %v7585_v35 = vmul.f32 %v18173_v18, %v18157_v42  ;;  %v8233_v18 = vld [vmem:[#allocation18 + $0x200] sm:$0xff]  ;;  %v18406_v55 = vld [vmem:[#allocation5 + $0xe0] sm:$0xff] }
 0xe4c   : > { %13926 = vmatprep.mubr.f32.mxu1 %v7912_v62  ;;  %14047 = vmatprep.subr.mxu1 %v8576_v61  ;;  %v8575_v62 = vld [vmem:[#allocation18 + $0x2a0] sm:$0xff] }
 0xe4d   : > { %13853 = vmatmul.mubr.f32.gmra.mxu0 %v7579_v5  ;;  %14048 = vmatpush3.msra.mxu1 %v8576_v61  ;;  %v19884_v5 = vld [vmem:[#allocation40_spill] sm:$0xff]  ;;  %v19886_v61 = vld [vmem:[#allocation75_spill] sm:$0xff] }
 0xe4e   : > { %13855 = vmatprep.mubr.f32.mxu0 %v18271_v22  ;;  %13970 = vmatpush3.msra.mxu0 %v8237_v20  ;;  %v7916_v8 = vmul.f32 %v19884_v5, %v19883_v21  ;;  %v8574_v20 = vld [vmem:[#allocation18 + $0x298] sm:$0xff]  ;;  %v7918_v21 = vmul.f32 %v19886_v61, %v18095_v15  ;;  %v7920_v15 = vmul.f32 %v18079_v19, %v18124_v11 }
 0xe4f   : > { %13927 = vmatmul.mubr.f32.gmra.mxu1 %v19882_v46  ;;  %13971 = vmatprep.subr.mxu0 %v8236_v43  ;;  %v19885_v46 = vld [vmem:[#allocation77_spill] sm:$0xff]  ;;  %v7922_v11 = vmul.f32 %v18115_v14, %v18149_v39  ;;  %v9230_v14 = vld [vmem:[#allocation18 + $0x3f8] sm:$0xff]  ;;  %v8923_v39 = vld [vmem:[#allocation18 + $0x370] sm:$0xff] }
 0xe50   : > { %13929 = vmatprep.mubr.f32.mxu1 %v7914_v40  ;;  %14049 = vmatprep.subr.mxu1 %v8575_v62  ;;  %v6590_v40 = vand.u32 15, %v6368_v17  ;;  %v18296_v17 = vld [vmem:[#allocation5 + $0xf9] sm:$0xff]  ;;  %v18414_v4 = vld [vmem:[#allocation5 + $0xf0] sm:$0xff] }
 0xe51   : > { %13856 = vmatmul.mubr.f32.gmra.mxu0 %v7581_v50  ;;  %v18288_v50 = vld [vmem:[#allocation5 + $0xe9] sm:$0xff]  ;;  %14050 = vmatpush3.msra.mxu1 %v8575_v62 }
 0xe52   : > { %13858 = vmatprep.mubr.f32.mxu0 %v18280_v23  ;;  %13972 = vmatpush3.msra.mxu0 %v8236_v43  ;;  %vm6880_vm13 = vcmp.ne.s32.totalorder %v6590_v40, 15  ;;  %v8573_v43 = vld [vmem:[#allocation18 + $0x290] sm:$0xff] }
 0xe53   : > { %13930 = vmatmul.mubr.f32.gmra.mxu1 %v19885_v46  ;;  %13973 = vmatprep.subr.mxu0 %v8235_v56  ;;  %v19887_v46 = vld [vmem:[#allocation81_spill] sm:$0xff]  ;;  %v18302_v62 = vsel %vm6880_vm13, 1.0, %v17784_v58  ;;  %v8571_v58 = vld [vmem:[#allocation18 + $0x280] sm:$0xff]  ;;  %v18310_v40 = vld [vmem:[#allocation5 + $0x28] sm:$0xff] }
 0xe54   : > { %13932 = vmatprep.mubr.f32.mxu1 %v7916_v8  ;;  %14051 = vmatprep.subr.mxu1 %v8574_v20  ;;  %v8234_v8 = vld [vmem:[#allocation18 + $0x208] sm:$0xff]  ;;  %v7587_v42 = vmul.f32 %v18302_v62, %v18182_v24  ;;  %v8924_v24 = vld [vmem:[#allocation18 + $0x378] sm:$0xff] }
 0xe55   : > { %13859 = vmatmul.mubr.f32.gmra.mxu0 %v7583_v7  ;;  %14052 = vmatpush3.msra.mxu1 %v8574_v20  ;;  %v8572_v7 = vld [vmem:[#allocation18 + $0x288] sm:$0xff]  ;;  %v7924_v20 = vmul.f32 %v18141_v54, %v18180_v30 }
 0xe56   : > { %13861 = vmatprep.mubr.f32.mxu0 %v18288_v50  ;;  %13974 = vmatpush3.msra.mxu0 %v8235_v56  ;;  %v8200_v56 = vld [vmem:[#allocation5 + $0x18] sm:$0xff] }
 0xe57   : > { %13933 = vmatmul.mubr.f32.gmra.mxu1 %v19887_v46  ;;  %13975 = vmatprep.subr.mxu0 %v8234_v8  ;;  %v18321_v46 = vld [vmem:[#allocation5 + $0x10f] sm:$0xff]  ;;  %v8922_v30 = vld [vmem:[#allocation18 + $0x368] sm:$0xff] }
 0xe58   : > { %13935 = vmatprep.mubr.f32.mxu1 %v7918_v21  ;;  %14053 = vmatprep.subr.mxu1 %v8573_v43  ;;  %v18319_v21 = vld [vmem:[#allocation5 + $0x38] sm:$0xff] }
 0xe59   : > { %13862 = vmatmul.mubr.f32.gmra.mxu0 %v7585_v35  ;;  %14054 = vmatpush3.msra.mxu1 %v8573_v43  ;;  %v8921_v35 = vld [vmem:[#allocation18 + $0x360] sm:$0xff]  ;;  %v9229_v43 = vld [vmem:[#allocation18 + $0x3f0] sm:$0xff] }
 0xe5a   : > { %13864 = vmatprep.mubr.f32.mxu0 %v18296_v17  ;;  %13976 = vmatpush3.msra.mxu0 %v8234_v8  ;;  %v18329_v8 = vld [vmem:[#allocation5 + $0x48] sm:$0xff] }
 0xe5b   : > { %13936 = vmatmul.mubr.f32.gmra.mxu1 %v18121_v9  ;;  %13977 = vmatprep.subr.mxu0 %v8233_v18  ;;  %v8201_v9 = vld [vmem:[#allocation5 + $0x20] sm:$0xff] }
 0xe5c   : > { %13938 = vmatprep.mubr.f32.mxu1 %v7920_v15  ;;  %14055 = vmatprep.subr.mxu1 %v8572_v7  ;;  %v19888_v15 = vld [vmem:[#allocation67_spill] sm:$0xff] }
 0xe5d   : > { %13865 = vmatmul.mubr.f32.gmra.mxu0 %v7587_v42  ;;  %14056 = vmatpush3.msra.mxu1 %v8572_v7  ;;  %v18334_v42 = vld [vmem:[#allocation5 + $0x50] sm:$0xff]  ;;  %v19889_v7 = vld [vmem:[#allocation69_spill] sm:$0xff] }
 0xe5e   : > { %13979 = vmatprep.mubr.f32.mxu0 %v8200_v56  ;;  %13978 = vmatpush3.msra.mxu0 %v8233_v18  ;;  %v18337_v18 = vld [vmem:[#allocation5 + $0x58] sm:$0xff]  ;;  %v8920_v56 = vld [vmem:[#allocation18 + $0x358] sm:$0xff] }
 0xe5f   : > { %13939 = vmatmul.mubr.f32.gmra.mxu1 %v18145_v26  ;;  %14057 = vmatprep.subr.mxu1 %v8571_v58  ;;  %v18316_v26 = vld [vmem:[#allocation5 + $0x30] sm:$0xff] }
 0xe60   : > { %13941 = vmatprep.mubr.f32.mxu1 %v7922_v11  ;;  %14107 = vmatprep.subr.mxu0 %v8924_v24  ;;  %v18342_v11 = vld [vmem:[#allocation5 + $0x60] sm:$0xff] }
 0xe61   : > { %13980 = vmatmul.mubr.f32.vlgmr.msra.gmra.mxu0 %v8201_v9  ;;  %14058 = vmatpush3.msra.mxu1 %v8571_v58  ;;  %v18345_v58 = vld [vmem:[#allocation5 + $0x68] sm:$0xff]  ;;  %v19890_v9 = vld [vmem:[#allocation65_spill] sm:$0xff] }
 0xe62   : > { %13982 = vmatprep.mubr.f32.mxu0 %v18310_v40  ;;  %14187 = vmatprep.subr.mxu1 %v9230_v14 }
 0xe63   : > { %13942 = vmatmul.mubr.f32.gmra.mxu1 %v18167_v63  ;;  %14108 = vmatpush3.msra.mxu0 %v8924_v24  ;;  %v18326_v63 = vld [vmem:[#allocation5 + $0x40] sm:$0xff] }
 0xe64   : > { %13944 = vmatprep.mubr.f32.mxu1 %v7924_v20  ;;  %14109 = vmatprep.subr.mxu0 %v8923_v39  ;;  %v8919_v24 = vld [vmem:[#allocation18 + $0x350] sm:$0xff]  ;;  %v18350_v20 = vld [vmem:[#allocation5 + $0x70] sm:$0xff] }
 0xe65   : > { %13983 = vmatmul.mubr.f32.gmra.mxu0 %v18316_v26 }
 0xe66   : > { %13985 = vmatprep.mubr.f32.mxu0 %v18319_v21  ;;  %14110 = vmatpush3.msra.mxu0 %v8923_v39  ;;  %v19891_v39 = vld [vmem:[#allocation66_spill] sm:$0xff] }
 0xe67   : > { %13945 = vmatmul.mubr.f32.gmra.mxu1 %v18321_v46  ;;  %14111 = vmatprep.subr.mxu0 %v8922_v30 }
 0xe68   : > { %14059 = vmatprep.mubr.f32.mxu1 %v18143_v12  ;;  %14112 = vmatpush3.msra.mxu0 %v8922_v30  ;;  %v9228_v12 = vld [vmem:[#allocation18 + $0x3e8] sm:$0xff] }
 0xe69   : > { %13986 = vmatmul.mubr.f32.gmra.mxu0 %v18326_v63  ;;  %14113 = vmatprep.subr.mxu0 %v8921_v35  ;;  %v8918_v30 = vld [vmem:[#allocation18 + $0x348] sm:$0xff] }
 0xe6a   : > { %13988 = vmatprep.mubr.f32.mxu0 %v18329_v8  ;;  %14114 = vmatpush3.msra.mxu0 %v8921_v35  ;;  %v18358_v35 = vld [vmem:[#allocation5 + $0x80] sm:$0xff] }
 0xe6b   : > { %14060 = vmatmul.mubr.f32.vlgmr.msra.gmra.mxu1 %v19888_v15  ;;  %14115 = vmatprep.subr.mxu0 %v8920_v56  ;;  %v19892_v15 = vld [vmem:[#allocation46_spill] sm:$0xff] }
 0xe6c   : > { %14062 = vmatprep.mubr.f32.mxu1 %v18165_v31  ;;  %14188 = vmatpush3.msra.mxu1 %v9230_v14  ;;  %v9227_v31 = vld [vmem:[#allocation18 + $0x3e0] sm:$0xff] }
 0xe6d   : > { %13989 = vmatmul.mubr.f32.gmra.mxu0 %v18334_v42  ;;  %14189 = vmatprep.subr.mxu1 %v9229_v43  ;;  %v18353_v14 = vld [vmem:[#allocation5 + $0x78] sm:$0xff] }
 0xe6e   : > { %13991 = vmatprep.mubr.f32.mxu0 %v18337_v18  ;;  %14190 = vmatpush3.msra.mxu1 %v9229_v43  ;;  %v18361_v43 = vld [vmem:[#allocation5 + $0x88] sm:$0xff] }
 0xe6f   : > { %14063 = vmatmul.mubr.f32.gmra.mxu1 %v19889_v7  ;;  %14191 = vmatprep.subr.mxu1 %v9228_v12  ;;  %v18366_v7 = vld [vmem:[#allocation5 + $0x90] sm:$0xff] }
 0xe70   : > { %14065 = vmatprep.mubr.f32.mxu1 %v18192_v2  ;;  %14192 = vmatpush3.msra.mxu1 %v9228_v12  ;;  %v9226_v2 = vld [vmem:[#allocation18 + $0x3d8] sm:$0xff]  ;;  %v8917_v12 = vld [vmem:[#allocation18 + $0x340] sm:$0xff] }
 0xe71   : > { %13992 = vmatmul.mubr.f32.gmra.mxu0 %v18342_v11  ;;  %14193 = vmatprep.subr.mxu1 %v9227_v31 }
 0xe72   : > { %13994 = vmatprep.mubr.f32.mxu0 %v18345_v58  ;;  %14116 = vmatpush3.msra.mxu0 %v8920_v56  ;;  %v18369_v56 = vld [vmem:[#allocation5 + $0x98] sm:$0xff] }
 0xe73   : > { %14066 = vmatmul.mubr.f32.gmra.mxu1 %v19890_v9  ;;  %14117 = vmatprep.subr.mxu0 %v8919_v24  ;;  %v8916_v9 = vld [vmem:[#allocation18 + $0x338] sm:$0xff] }
 0xe74   : > { %14068 = vmatprep.mubr.f32.mxu1 %v18207_v44  ;;  %14194 = vmatpush3.msra.mxu1 %v9227_v31  ;;  %v9225_v44 = vld [vmem:[#allocation18 + $0x3d0] sm:$0xff]  ;;  %v19893_v31 = vld [vmem:[#allocation52_spill] sm:$0xff] }
 0xe75   : > { %13995 = vmatmul.mubr.f32.gmra.mxu0 %v18350_v20  ;;  %14195 = vmatprep.subr.mxu1 %v9226_v2 }
 0xe76   : > { %13997 = vmatprep.mubr.f32.mxu0 %v18353_v14  ;;  %14118 = vmatpush3.msra.mxu0 %v8919_v24  ;;  %v18374_v24 = vld [vmem:[#allocation5 + $0xa0] sm:$0xff] }
 0xe77   : > { %14069 = vmatmul.mubr.f32.gmra.mxu1 %v19891_v39  ;;  %14119 = vmatprep.subr.mxu0 %v8918_v30  ;;  %v19894_v39 = vld [vmem:[#allocation56_spill] sm:$0xff] }
 0xe78   : > { %14071 = vmatprep.mubr.f32.mxu1 %v18215_v1  ;;  %14196 = vmatpush3.msra.mxu1 %v9226_v2  ;;  %v9224_v1 = vld [vmem:[#allocation18 + $0x3c8] sm:$0xff]  ;;  %v18377_v2 = vld [vmem:[#allocation5 + $0xa8] sm:$0xff] }
 0xe79   : > { %13998 = vmatmul.mubr.f32.gmra.mxu0 %v18358_v35  ;;  %14197 = vmatprep.subr.mxu1 %v9225_v44 }
 0xe7a   : > { %14000 = vmatprep.mubr.f32.mxu0 %v18361_v43  ;;  %14120 = vmatpush3.msra.mxu0 %v8918_v30  ;;  %v8915_v30 = vld [vmem:[#allocation18 + $0x330] sm:$0xff] }
 0xe7b   : > { %14072 = vmatmul.mubr.f32.gmra.mxu1 %v19892_v15  ;;  %14121 = vmatprep.subr.mxu0 %v8917_v12  ;;  %v18385_v15 = vld [vmem:[#allocation5 + $0xb8] sm:$0xff] }
 0xe7c   : > { %14074 = vmatprep.mubr.f32.mxu1 %v18223_v34  ;;  %14198 = vmatpush3.msra.mxu1 %v9225_v44  ;;  %v9223_v34 = vld [vmem:[#allocation18 + $0x3c0] sm:$0xff] }
 0xe7d   : > { %14001 = vmatmul.mubr.f32.gmra.mxu0 %v18366_v7  ;;  %14199 = vmatprep.subr.mxu1 %v9224_v1  ;;  %v18382_v44 = vld [vmem:[#allocation5 + $0xb0] sm:$0xff] }
 0xe7e   : > { %14003 = vmatprep.mubr.f32.mxu0 %v18369_v56  ;;  %14122 = vmatpush3.msra.mxu0 %v8917_v12  ;;  %v19895_v12 = vld [vmem:[#allocation36_spill] sm:$0xff] }
 0xe7f   : > { %14075 = vmatmul.mubr.f32.gmra.mxu1 %v19893_v31  ;;  %14123 = vmatprep.subr.mxu0 %v8916_v9  ;;  %v18390_v31 = vld [vmem:[#allocation5 + $0xc0] sm:$0xff] }
 0xe80   : > { %14077 = vmatprep.mubr.f32.mxu1 %v18231_v13  ;;  %14200 = vmatpush3.msra.mxu1 %v9224_v1  ;;  %v9222_v13 = vld [vmem:[#allocation18 + $0x3b8] sm:$0xff]  ;;  %v8914_v1 = vld [vmem:[#allocation18 + $0x328] sm:$0xff] }
 0xe81   : > { %14004 = vmatmul.mubr.f32.gmra.mxu0 %v18374_v24  ;;  %14201 = vmatprep.subr.mxu1 %v9223_v34 }
 0xe82   : > { %14006 = vmatprep.mubr.f32.mxu0 %v18377_v2  ;;  %14124 = vmatpush3.msra.mxu0 %v8916_v9  ;;  %v18393_v9 = vld [vmem:[#allocation5 + $0xc8] sm:$0xff] }
 0xe83   : > { %14078 = vmatmul.mubr.f32.gmra.mxu1 %v19894_v39  ;;  %14125 = vmatprep.subr.mxu0 %v8915_v30  ;;  %v8913_v39 = vld [vmem:[#allocation18 + $0x320] sm:$0xff] }
 0xe84   : > { %14080 = vmatprep.mubr.f32.mxu1 %v18239_v27  ;;  %14202 = vmatpush3.msra.mxu1 %v9223_v34  ;;  %v9221_v27 = vld [vmem:[#allocation18 + $0x3b0] sm:$0xff] }
 0xe85   : > { %14007 = vmatmul.mubr.f32.gmra.mxu0 %v18382_v44  ;;  %14203 = vmatprep.subr.mxu1 %v9222_v13  ;;  %v19896_v34 = vld [vmem:[#allocation42_spill] sm:$0xff] }
 0xe86   : > { %14009 = vmatprep.mubr.f32.mxu0 %v18385_v15  ;;  %14126 = vmatpush3.msra.mxu0 %v8915_v30  ;;  %v18401_v30 = vld [vmem:[#allocation5 + $0xd8] sm:$0xff] }
 0xe87   : > { %14081 = vmatmul.mubr.f32.gmra.mxu1 %v19895_v12  ;;  %14127 = vmatprep.subr.mxu0 %v8914_v1  ;;  %v18398_v12 = vld [vmem:[#allocation5 + $0xd0] sm:$0xff] }
 0xe88   : > { %14083 = vmatprep.mubr.f32.mxu1 %v18247_v57  ;;  %14204 = vmatpush3.msra.mxu1 %v9222_v13  ;;  %v9220_v57 = vld [vmem:[#allocation18 + $0x3a8] sm:$0xff]  ;;  %v19897_v13 = vld [vmem:[#allocation76_spill] sm:$0xff] }
 0xe89   : > { %14010 = vmatmul.mubr.f32.gmra.mxu0 %v18390_v31  ;;  %14205 = vmatprep.subr.mxu1 %v9221_v27 }
 0xe8a   : > { %14012 = vmatprep.mubr.f32.mxu0 %v18393_v9  ;;  %14128 = vmatpush3.msra.mxu0 %v8914_v1  ;;  %v18409_v1 = vld [vmem:[#allocation5 + $0xe8] sm:$0xff] }
 0xe8b   : > { %14084 = vmatmul.mubr.f32.gmra.mxu1 %v19896_v34  ;;  %14129 = vmatprep.subr.mxu0 %v8913_v39  ;;  %v8912_v34 = vld [vmem:[#allocation18 + $0x318] sm:$0xff] }
 0xe8c   : > { %14086 = vmatprep.mubr.f32.mxu1 %v18255_v51  ;;  %14206 = vmatpush3.msra.mxu1 %v9221_v27  ;;  %v9219_v51 = vld [vmem:[#allocation18 + $0x3a0] sm:$0xff] }
 0xe8d   : > { %14013 = vmatmul.mubr.f32.gmra.mxu0 %v18398_v12  ;;  %14207 = vmatprep.subr.mxu1 %v9220_v57  ;;  %v19898_v27 = vld [vmem:[#allocation80_spill] sm:$0xff] }
 0xe8e   : > { %14015 = vmatprep.mubr.f32.mxu0 %v18401_v30  ;;  %14130 = vmatpush3.msra.mxu0 %v8913_v39  ;;  %v18417_v39 = vld [vmem:[#allocation5 + $0xf8] sm:$0xff] }
 0xe8f   : > { %14087 = vmatmul.mubr.f32.gmra.mxu1 %v19897_v13  ;;  %14131 = vmatprep.subr.mxu0 %v8912_v34  ;;  %v8911_v13 = vld [vmem:[#allocation18 + $0x310] sm:$0xff] }
 0xe90   : > { %14089 = vmatprep.mubr.f32.mxu1 %v18263_v10  ;;  %14208 = vmatpush3.msra.mxu1 %v9220_v57  ;;  %v9218_v10 = vld [vmem:[#allocation18 + $0x398] sm:$0xff] }
 0xe91   : > { %14016 = vmatmul.mubr.f32.gmra.mxu0 %v18406_v55  ;;  %14209 = vmatprep.subr.mxu1 %v9219_v51  ;;  %v19899_v57 = vld [vmem:[#allocation83_spill] sm:$0xff] }
 0xe92   : > { %14018 = vmatprep.mubr.f32.mxu0 %v18409_v1  ;;  %14132 = vmatpush3.msra.mxu0 %v8912_v34  ;;  %v18425_v34 = vld [vmem:[#allocation5 + $0x108] sm:$0xff] }
 0xe93   : > { %14090 = vmatmul.mubr.f32.gmra.mxu1 %v19898_v27  ;;  %14133 = vmatprep.subr.mxu0 %v8911_v13  ;;  %v8910_v27 = vld [vmem:[#allocation18 + $0x308] sm:$0xff] }
 0xe94   : > { %14092 = vmatprep.mubr.f32.mxu1 %v18271_v22  ;;  %14210 = vmatpush3.msra.mxu1 %v9219_v51  ;;  %v9217_v22 = vld [vmem:[#allocation18 + $0x390] sm:$0xff]  ;;  %v19900_v51 = vld [vmem:[#allocation85_spill] sm:$0xff] }
 0xe95   : > { %14019 = vmatmul.mubr.f32.gmra.mxu0 %v18414_v4  ;;  %14211 = vmatprep.subr.mxu1 %v9218_v10 }
 0xe96   : > { %14021 = vmatprep.mubr.f32.mxu0 %v18417_v39  ;;  %14134 = vmatpush3.msra.mxu0 %v8911_v13  ;;  %v19901_v13 = vld [vmem:[#allocation64_spill] sm:$0xff] }
 0xe97   : > { %14093 = vmatmul.mubr.f32.gmra.mxu1 %v19899_v57  ;;  %14135 = vmatprep.subr.mxu0 %v8910_v27  ;;  %v8909_v57 = vld [vmem:[#allocation18 + $0x300] sm:$0xff]  ;;  %v8876_v41 = vmul.f32 %v19901_v13, %v8844_v32  ;;  %v8848_v32 = vld [vmem:[#allocation5 + $0x47] sm:$0xff] }
 0xe98   : > { %14095 = vmatprep.mubr.f32.mxu1 %v18280_v23  ;;  %14212 = vmatpush3.msra.mxu1 %v9218_v10  ;;  %v18430_v23 = vld [vmem:[#allocation5 + $0x110] sm:$0xff] }
 0xe99   : > { %14022 = vmatmul.mubr.f32.gmra.mxu0 %v18422_v36  ;;  %14213 = vmatprep.subr.mxu1 %v9217_v22  ;;  %v8846_v10 = vld [vmem:[#allocation5 + $0x37] sm:$0xff] }
 0xe9a   : > { %14024 = vmatprep.mubr.f32.mxu0 %v18425_v34  ;;  %14136 = vmatpush3.msra.mxu0 %v8910_v27  ;;  %v8878_v38 = vmul.f32 %v17621_v33, %v8846_v10  ;;  %v9568_v27 = vld [vmem:[#allocation18 + $0x478] sm:$0xff]  ;;  %v9567_v33 = vld [vmem:[#allocation18 + $0x470] sm:$0xff] }
 0xe9b   : > { %14096 = vmatmul.mubr.f32.gmra.mxu1 %v19900_v51  ;;  %14137 = vmatprep.subr.mxu0 %v8909_v57  ;;  %v9215_v51 = vld [vmem:[#allocation18 + $0x380] sm:$0xff] }
 0xe9c   : > { %14098 = vmatprep.mubr.f32.mxu1 %v18288_v50  ;;  %14214 = vmatpush3.msra.mxu1 %v9217_v22  ;;  %v8845_v50 = vld [vmem:[#allocation5 + $0x2f] sm:$0xff]  ;;  %v18440_v22 = vpop.f32.mrf.mxu0 }
 0xe9d   : > { %14025 = vmatmul.mubr.f32.gmra.mxu0 %v18430_v23  ;;  %14215 = vmatprep.subr.mxu1 %v9216_v0  ;;  %v8849_v10 = vld [vmem:[#allocation5 + $0x4f] sm:$0xff] }
 0xe9e   : > { %14139 = vmatprep.mubr.f32.mxu0 %v8876_v41  ;;  %14138 = vmatpush3.msra.mxu0 %v8909_v57  ;;  %v18438_v41 = vld [vmem:[#allocation5 + $0x109] sm:$0xff] }
 0xe9f   : > { %14099 = vmatmul.mubr.f32.gmra.mxu1 %v19902_v48  ;;  %14267 = vmatprep.subr.mxu0 %v9568_v27  ;;  %v8847_v48 = vld [vmem:[#allocation5 + $0x3f] sm:$0xff] }
 0xea0   : > { %14101 = vmatprep.mubr.f32.mxu1 %v18296_v17  ;;  %14216 = vmatpush3.msra.mxu1 %v9216_v0  ;;  %v8880_v17 = vmul.f32 %v17647_v60, %v8848_v32  ;;  %v8569_v0 = vmul.f32 %v18302_v62, %v18175_v37  ;;  %v9565_v60 = vld [vmem:[#allocation18 + $0x460] sm:$0xff]  ;;  %v8852_v32 = vld [vmem:[#allocation5 + $0x67] sm:$0xff] }
 0xea1   : > { %14140 = vmatmul.mubr.f32.vlgmr.msra.gmra.mxu0 %v8845_v50  ;;  %14217 = vmatprep.subr.mxu1 %v9215_v51  ;;  %v9564_v37 = vld [vmem:[#allocation18 + $0x458] sm:$0xff] }
 0xea2   : > { %14142 = vmatprep.mubr.f32.mxu0 %v8878_v38  ;;  %14218 = vmatpush3.msra.mxu1 %v9215_v51  ;;  %v8850_v38 = vld [vmem:[#allocation5 + $0x57] sm:$0xff] }
 0xea3   : > { %14102 = vmatmul.mubr.f32.gmra.mxu1 %v18190_v6  ;;  %v13664_v57 = vpop.f32.mrf.mxu0  ;;  %14268 = vmatpush3.msra.mxu0 %v9568_v27  ;;  %v9566_v6 = vld [vmem:[#allocation18 + $0x468] sm:$0xff]  ;;  %v8882_v51 = vmul.f32 %v17686_v29, %v8850_v38  ;;  %v9563_v29 = vld [vmem:[#allocation18 + $0x450] sm:$0xff] }
 0xea4   : > { %14104 = vmatprep.mubr.f32.mxu1 %v18438_v41  ;;  %14269 = vmatprep.subr.mxu0 %v9567_v33  ;;  %v9562_v38 = vld [vmem:[#allocation18 + $0x448] sm:$0xff] }
 0xea5   : > { %14143 = vmatmul.mubr.f32.gmra.mxu0 %v8847_v48  ;;  %v7150_v13 = vpop.f32.mrf.mxu0  ;;  %v8851_v48 = vld [vmem:[#allocation5 + $0x5f] sm:$0xff] }
 0xea6   : > { %14145 = vmatprep.mubr.f32.mxu0 %v8880_v17  ;;  %14270 = vmatpush3.msra.mxu0 %v9567_v33  ;;  %v18451_v17 = vpop.f32.mrf.mxu1 }
 0xea7   : > { %14105 = vmatmul.mubr.f32.gmra.mxu1 %v8569_v0  ;;  %v13667_v50 = vpop.f32.mrf.mxu0  ;;  %14271 = vmatprep.subr.mxu0 %v9566_v6  ;;  %v8854_v0 = vld [vmem:[#allocation5 + $0x77] sm:$0xff] }
 0xea8   : > { %14219 = vmatprep.mubr.f32.mxu1 %v18310_v40  ;;  %14272 = vmatpush3.msra.mxu0 %v9566_v6  ;;  %v8884_v40 = vmul.f32 %v17726_v25, %v8852_v32  ;;  %v8853_v25 = vld [vmem:[#allocation5 + $0x6f] sm:$0xff] }
 0xea9   : > { %14146 = vmatmul.mubr.f32.gmra.mxu0 %v8849_v10  ;;  %v7160_v27 = vpop.f32.mrf.mxu0  ;;  %14273 = vmatprep.subr.mxu0 %v9565_v60  ;;  %v8886_v10 = vmul.f32 %v19867_v52, %v8854_v0  ;;  %v8855_v52 = vld [vmem:[#allocation5 + $0x7f] sm:$0xff] }
 0xeaa   : > { %14148 = vmatprep.mubr.f32.mxu0 %v8882_v51  ;;  %14274 = vmatpush3.msra.mxu0 %v9565_v60  ;;  %v9561_v51 = vld [vmem:[#allocation18 + $0x440] sm:$0xff]  ;;  %v9559_v0 = vld [vmem:[#allocation18 + $0x430] sm:$0xff] }
 0xeab   : > { %14220 = vmatmul.mubr.f32.vlgmr.msra.gmra.mxu1 %v18316_v26  ;;  %v13670_v33 = vpop.f32.mrf.mxu0  ;;  %14275 = vmatprep.subr.mxu0 %v9564_v37 }
 0xeac   : > { %14222 = vmatprep.mubr.f32.mxu1 %v18319_v21  ;;  %14276 = vmatpush3.msra.mxu0 %v9564_v37 }
 0xead   : > { %14149 = vmatmul.mubr.f32.gmra.mxu0 %v8851_v48  ;;  %v13744_v6 = vpop.f32.mrf.mxu1  ;;  %v7170_v26 = vpop.f32.mrf.mxu0  ;;  %14277 = vmatprep.subr.mxu0 %v9563_v29  ;;  %v8856_v48 = vld [vmem:[#allocation5 + $0x87] sm:$0xff] }
 0xeae   : > { %14151 = vmatprep.mubr.f32.mxu0 %v8884_v40  ;;  %v18454_v21 = vadd.f32 %v13744_v6, %v13664_v57  ;;  %14278 = vmatpush3.msra.mxu0 %v9563_v29  ;;  %v8888_v29 = vmul.f32 %v19870_v59, %v8856_v48  ;;  %v8857_v59 = vld [vmem:[#allocation5 + $0x8f] sm:$0xff] }
 0xeaf   : > { %14223 = vmatmul.mubr.f32.gmra.mxu1 %v18326_v63  ;;  %v7375_v60 = vpop.f32.mrf.mxu1  ;;  %v13673_v32 = vpop.f32.mrf.mxu0  ;;  %14279 = vmatprep.subr.mxu0 %v9562_v38  ;;  %v9560_v63 = vld [vmem:[#allocation18 + $0x438] sm:$0xff] }
 0xeb0   : > { %14225 = vmatprep.mubr.f32.mxu1 %v18329_v8  ;;  %v18458_v37 = vadd.f32 %v7375_v60, %v7150_v13  ;;  %14280 = vmatpush3.msra.mxu0 %v9562_v38  ;;  %v9557_v60 = vld [vmem:[#allocation18 + $0x420] sm:$0xff] }
 0xeb1   : > { %14152 = vmatmul.mubr.f32.gmra.mxu0 %v8853_v25  ;;  %v13747_v40 = vpop.f32.mrf.mxu1  ;;  %v7180_v57 = vpop.f32.mrf.mxu0  ;;  %14281 = vmatprep.subr.mxu0 %v9561_v51  ;;  %v8858_v25 = vld [vmem:[#allocation5 + $0x97] sm:$0xff] }
 0xeb2   : > { %14154 = vmatprep.mubr.f32.mxu0 %v8886_v10  ;;  %v18461_v8 = vadd.f32 %v13747_v40, %v13667_v50  ;;  %14282 = vmatpush3.msra.mxu0 %v9561_v51  ;;  %v8890_v51 = vmul.f32 %v19872_v49, %v8858_v25  ;;  %v8860_v40 = vld [vmem:[#allocation5 + $0xa7] sm:$0xff]  ;;  %v8859_v49 = vld [vmem:[#allocation5 + $0x9f] sm:$0xff]  ;;  %v8862_v25 = vld [vmem:[#allocation5 + $0xb7] sm:$0xff] }
 0xeb3   : > { %14226 = vmatmul.mubr.f32.gmra.mxu1 %v18334_v42  ;;  %v7385_v6 = vpop.f32.mrf.mxu1  ;;  %v13676_v13 = vpop.f32.mrf.mxu0  ;;  %14283 = vmatprep.subr.mxu0 %v9560_v63  ;;  %v9558_v42 = vld [vmem:[#allocation18 + $0x428] sm:$0xff] }
 0xeb4   : > { %14228 = vmatprep.mubr.f32.mxu1 %v18337_v18  ;;  %v18465_v38 = vadd.f32 %v7385_v6, %v7160_v27  ;;  %14284 = vmatpush3.msra.mxu0 %v9560_v63 }
 0xeb5   : > { %14155 = vmatmul.mubr.f32.gmra.mxu0 %v8855_v52  ;;  %v13750_v10 = vpop.f32.mrf.mxu1  ;;  %v7190_v50 = vpop.f32.mrf.mxu0  ;;  %14285 = vmatprep.subr.mxu0 %v9559_v0 }
 0xeb6   : > { %14157 = vmatprep.mubr.f32.mxu0 %v8888_v29  ;;  %v18468_v18 = vadd.f32 %v13750_v10, %v13670_v33  ;;  %14286 = vmatpush3.msra.mxu0 %v9559_v0  ;;  %v8892_v29 = vmul.f32 %v19876_v3, %v8860_v40  ;;  %v9555_v0 = vld [vmem:[#allocation18 + $0x410] sm:$0xff]  ;;  %v8861_v3 = vld [vmem:[#allocation5 + $0xaf] sm:$0xff] }
 0xeb7   : > { %14229 = vmatmul.mubr.f32.gmra.mxu1 %v18342_v11  ;;  %v7395_v48 = vpop.f32.mrf.mxu1  ;;  %v13679_v27 = vpop.f32.mrf.mxu0  ;;  %14287 = vmatprep.subr.mxu0 %v9558_v42  ;;  %v9556_v11 = vld [vmem:[#allocation18 + $0x418] sm:$0xff] }
 0xeb8   : > { %14231 = vmatprep.mubr.f32.mxu1 %v18345_v58  ;;  %v18472_v63 = vadd.f32 %v7395_v48, %v7170_v26  ;;  %14288 = vmatpush3.msra.mxu0 %v9558_v42  ;;  %v8864_v48 = vld [vmem:[#allocation5 + $0xc7] sm:$0xff] }
 0xeb9   : > { %14158 = vmatmul.mubr.f32.gmra.mxu0 %v8857_v59  ;;  %v13753_v52 = vpop.f32.mrf.mxu1  ;;  %v7200_v33 = vpop.f32.mrf.mxu0  ;;  %14289 = vmatprep.subr.mxu0 %v9557_v60  ;;  %v8894_v59 = vmul.f32 %v19879_v28, %v8862_v25  ;;  %v8863_v28 = vld [vmem:[#allocation5 + $0xbf] sm:$0xff] }
 0xeba   : > { %14160 = vmatprep.mubr.f32.mxu0 %v8890_v51  ;;  %v18475_v58 = vadd.f32 %v13753_v52, %v13673_v32  ;;  %14290 = vmatpush3.msra.mxu0 %v9557_v60  ;;  %v9553_v51 = vld [vmem:[#allocation18 + $0x400] sm:$0xff] }
 0xebb   : > { %14232 = vmatmul.mubr.f32.gmra.mxu1 %v18350_v20  ;;  %v7405_v6 = vpop.f32.mrf.mxu1  ;;  %v13682_v26 = vpop.f32.mrf.mxu0  ;;  %14291 = vmatprep.subr.mxu0 %v9556_v11  ;;  %v9554_v20 = vld [vmem:[#allocation18 + $0x408] sm:$0xff] }
 0xebc   : > { %14234 = vmatprep.mubr.f32.mxu1 %v18353_v14  ;;  %v18479_v42 = vadd.f32 %v7405_v6, %v7180_v57  ;;  %14292 = vmatpush3.msra.mxu0 %v9556_v11  ;;  %v8896_v11 = vmul.f32 %v19881_v45, %v8864_v48 }
 0xebd   : > { %14161 = vmatmul.mubr.f32.gmra.mxu0 %v8859_v49  ;;  %v13756_v10 = vpop.f32.mrf.mxu1  ;;  %v7210_v32 = vpop.f32.mrf.mxu0  ;;  %14293 = vmatprep.subr.mxu0 %v9555_v0 }
 0xebe   : > { %14163 = vmatprep.mubr.f32.mxu0 %v8892_v29  ;;  %v18482_v14 = vadd.f32 %v13756_v10, %v13676_v13  ;;  %14294 = vmatpush3.msra.mxu0 %v9555_v0 }
 0xebf   : > { %14235 = vmatmul.mubr.f32.gmra.mxu1 %v18358_v35  ;;  %v7415_v60 = vpop.f32.mrf.mxu1  ;;  %v13685_v57 = vpop.f32.mrf.mxu0  ;;  %14295 = vmatprep.subr.mxu0 %v9554_v20 }
 0xec0   : > { %14237 = vmatprep.mubr.f32.mxu1 %v18361_v43  ;;  %v18486_v40 = vadd.f32 %v7415_v60, %v7190_v50  ;;  %14296 = vmatpush3.msra.mxu0 %v9554_v20  ;;  %v8866_v50 = vld [vmem:[#allocation5 + $0xd7] sm:$0xff]  ;;  %v8868_v20 = vld [vmem:[#allocation5 + $0xe7] sm:$0xff] }
 0xec1   : > { %14164 = vmatmul.mubr.f32.gmra.mxu0 %v8861_v3  ;;  %v13759_v35 = vpop.f32.mrf.mxu1  ;;  %v18489_v13 = vpop.f32.mrf.mxu0  ;;  %14297 = vmatprep.subr.mxu0 %v9553_v51  ;;  %v8898_v45 = vmul.f32 %v19884_v5, %v8866_v50 }
 0xec2   : > { %14166 = vmatprep.mubr.f32.mxu0 %v8894_v59  ;;  %v18491_v43 = vadd.f32 %v13759_v35, %v13679_v27  ;;  %14298 = vmatpush3.msra.mxu0 %v9553_v51  ;;  %v8870_v51 = vld [vmem:[#allocation5 + $0xf7] sm:$0xff] }
 0xec3   : > { %14238 = vmatmul.mubr.f32.gmra.mxu1 %v18366_v7  ;;  %v7425_v52 = vpop.f32.mrf.mxu1  ;;  %v13688_v49 = vpop.f32.mrf.mxu0 }
 0xec4   : > { %14240 = vmatprep.mubr.f32.mxu1 %v18369_v56  ;;  %v18495_v29 = vadd.f32 %v7425_v52, %v7200_v33  ;;  %v8865_v56 = vld [vmem:[#allocation5 + $0xcf] sm:$0xff] }
 0xec5   : > { %14167 = vmatmul.mubr.f32.gmra.mxu0 %v8863_v28  ;;  %v13762_v0 = vpop.f32.mrf.mxu1  ;;  %v18498_v7 = vpop.f32.mrf.mxu0 }
 0xec6   : > { %14169 = vmatprep.mubr.f32.mxu0 %v8896_v11  ;;  %v18500_v27 = vadd.f32 %v13762_v0, %v13682_v26  ;;  %v8900_v26 = vmul.f32 %v19886_v61, %v8868_v20 }
 0xec7   : > { %14241 = vmatmul.mubr.f32.gmra.mxu1 %v18374_v24  ;;  %v7435_v6 = vpop.f32.mrf.mxu1  ;;  %v13691_v25 = vpop.f32.mrf.mxu0 }
 0xec8   : > { %14243 = vmatprep.mubr.f32.mxu1 %v18377_v2  ;;  %v18504_v10 = vadd.f32 %v7435_v6, %v7210_v32  ;;  %v8867_v2 = vld [vmem:[#allocation5 + $0xdf] sm:$0xff] }
 0xec9   : > { %14170 = vmatmul.mubr.f32.gmra.mxu0 %v8865_v56  ;;  %v13765_v33 = vpop.f32.mrf.mxu1  ;;  %v18507_v24 = vpop.f32.mrf.mxu0 }
 0xeca   : > { %14172 = vmatprep.mubr.f32.mxu0 %v8898_v45  ;;  %v18509_v3 = vadd.f32 %v13765_v33, %v13685_v57  ;;  %v8869_v57 = vld [vmem:[#allocation5 + $0xef] sm:$0xff]  ;;  %v8875_v45 = vld [vmem:[#allocation5 + $0x11f] sm:$0xff] }
 0xecb   : > { %14244 = vmatmul.mubr.f32.gmra.mxu1 %v18382_v44  ;;  %v18513_v5 = vpop.f32.mrf.mxu1  ;;  %v13694_v59 = vpop.f32.mrf.mxu0 }
 0xecc   : > { %14246 = vmatprep.mubr.f32.mxu1 %v18385_v15  ;;  %v8902_v15 = vmul.f32 %v18079_v19, %v8870_v51  ;;  %v19903_v51 = vld [vmem:[#allocation62_spill] sm:$0xff] }
 0xecd   : > { %14173 = vmatmul.mubr.f32.gmra.mxu0 %v8867_v2  ;;  %v18516_v60 = vpop.f32.mrf.mxu0 }
 0xece   : > { %14175 = vmatprep.mubr.f32.mxu0 %v8900_v26  ;;  %v13768_v32 = vpop.f32.mrf.mxu1 }
 0xecf   : > { %14247 = vmatmul.mubr.f32.gmra.mxu1 %v18390_v31  ;;  %v18518_v44 = vadd.f32 %v13768_v32, %v13688_v49  ;;  %v13697_v61 = vpop.f32.mrf.mxu0  ;;  %v8871_v31 = vld [vmem:[#allocation5 + $0xff] sm:$0xff]  ;;  %v8874_v49 = vld [vmem:[#allocation5 + $0x117] sm:$0xff] }
 0xed0   : > { %14249 = vmatprep.mubr.f32.mxu1 %v18393_v9  ;;  %v18522_v48 = vpop.f32.mrf.mxu1 }
 0xed1   : > { %14176 = vmatmul.mubr.f32.gmra.mxu0 %v8869_v57  ;;  %v7260_v28 = vpop.f32.mrf.mxu0 }
 0xed2   : > { %14178 = vmatprep.mubr.f32.mxu0 %v8902_v15  ;;  %v13771_v35 = vpop.f32.mrf.mxu1 }
 0xed3   : > { %14250 = vmatmul.mubr.f32.gmra.mxu1 %v18398_v12  ;;  %v18525_v11 = vadd.f32 %v13771_v35, %v13691_v25  ;;  %v8906_v12 = vmul.f32 %v18141_v54, %v8874_v49 }
 0xed4   : > { %14252 = vmatprep.mubr.f32.mxu1 %v18401_v30  ;;  %v18528_v52 = vpop.f32.mrf.mxu1  ;;  %v13700_v9 = vpop.f32.mrf.mxu0 }
 0xed5   : > { %14179 = vmatmul.mubr.f32.gmra.mxu0 %v8871_v31  ;;  %v9493_v31 = vld [vmem:[#allocation5 + $0x51] sm:$0xff] }
 0xed6   : > { %14181 = vmatprep.mubr.f32.mxu0 %v18198_v53  ;;  %v13774_v19 = vpop.f32.mrf.mxu1  ;;  %v7270_v50 = vpop.f32.mrf.mxu0 }
 0xed7   : > { %14253 = vmatmul.mubr.f32.gmra.mxu1 %v18406_v55  ;;  %v18532_v0 = vadd.f32 %v13774_v19, %v13694_v59  ;;  %v9492_v19 = vld [vmem:[#allocation5 + $0x49] sm:$0xff] }
 0xed8   : > { %14255 = vmatprep.mubr.f32.mxu1 %v18409_v1  ;;  %v18536_v56 = vpop.f32.mrf.mxu1  ;;  %v13703_v30 = vpop.f32.mrf.mxu0  ;;  %v9488_v1 = vld [vmem:[#allocation5 + $0x29] sm:$0xff] }
 0xed9   : > { %14182 = vmatmul.mubr.f32.gmra.mxu0 %v18321_v46 }
 0xeda   : > { %14184 = vmatprep.mubr.f32.mxu0 %v8906_v12  ;;  %v7280_v53 = vpop.f32.mrf.mxu0 }
 0xedb   : > { %v13777_v6 = vpop.f32.mrf.mxu1  ;;  %14256 = vmatmul.mubr.f32.gmra.mxu1 %v18414_v4  ;;  %v9491_v4 = vld [vmem:[#allocation5 + $0x41] sm:$0xff] }
 0xedc   : > { %v18540_v25 = vadd.f32 %v13777_v6, %v13697_v61  ;;  %14258 = vmatprep.mubr.f32.mxu1 %v18417_v39  ;;  %v13706_v20 = vpop.f32.mrf.mxu0  ;;  %v9490_v39 = vld [vmem:[#allocation5 + $0x39] sm:$0xff] }
 0xedd   : > { %v7485_v55 = vpop.f32.mrf.mxu1  ;;  %14185 = vmatmul.mubr.f32.gmra.mxu0 %v8875_v45  ;;  %v19904_v61 = vld [vmem:[#allocation61_spill] sm:$0xff]  ;;  %v19905_v45 = vld [vmem:[#allocation71_spill] sm:$0xff] }
 0xede   : > { %v18543_v54 = vadd.f32 %v7485_v55, %v7260_v28  ;;  %14299 = vmatprep.mubr.f32.mxu0 %v9488_v1  ;;  %v7290_v46 = vpop.f32.mrf.mxu0  ;;  %v9523_v35 = vmul.f32 %v19904_v61, %v9491_v4  ;;  %v9525_v6 = vmul.f32 %v19905_v45, %v9493_v31  ;;  %v9495_v1 = vld [vmem:[#allocation5 + $0x61] sm:$0xff]  ;;  %v9498_v45 = vld [vmem:[#allocation5 + $0x79] sm:$0xff] }
 0xedf   : > { %v13780_v33 = vpop.f32.mrf.mxu1  ;;  %14259 = vmatmul.mubr.f32.gmra.mxu1 %v18422_v36 }
 0xee0   : > { %v18546_v2 = vadd.f32 %v13780_v33, %v13700_v9  ;;  %14261 = vmatprep.mubr.f32.mxu1 %v18425_v34  ;;  %v13821_v59 = vpop.f32.mrf.mxu0  ;;  %v14614_v34 = vld [vmem:[#allocation2] sm:$0xff]  ;;  %v19906_v33 = vmov 1.0  }
 0xee1   : > { %v7495_v26 = vpop.f32.mrf.mxu1  ;;  %14300 = vmatmul.mubr.f32.vlgmr.msra.gmra.mxu0 %v19903_v51  ;;  %v7831_v57 = vadd.f32 %v13821_v59, %v18194_v47 }
 0xee2   : > { %v18550_v32 = vadd.f32 %v7495_v26, %v7270_v50  ;;  %14302 = vmatprep.mubr.f32.mxu0 %v9490_v39  ;;  %v7671_v36 = vpop.f32.mrf.mxu0 }
 0xee3   : > { %v13783_v15 = vpop.f32.mrf.mxu1  ;;  %14262 = vmatmul.mubr.f32.gmra.mxu1 %v18430_v23 }
 0xee4   : > { %v18555_v28 = vadd.f32 %v13783_v15, %v13703_v30  ;;  %14264 = vmatprep.mubr.f32.mxu1 %v14614_v34  ;;  %v13824_v49 = vpop.f32.mrf.mxu0  ;;  %v9527_v15 = vmul.f32 %v17789_v16, %v9495_v1 }
 0xee5   : > { %v7505_v9 = vpop.f32.mrf.mxu1  ;;  %14303 = vmatmul.mubr.f32.gmra.mxu0 %v9523_v35  ;;  %v7833_v47 = vadd.f32 %v13824_v49, %v18454_v21  ;;  %v7366_v21 = vadd.f32 %v18451_v17, %v18440_v22  ;;  %v9496_v49 = vld [vmem:[#allocation5 + $0x69] sm:$0xff] }
 0xee6   : > { %v18557_v50 = vadd.f32 %v7505_v9, %v7280_v53  ;;  %14305 = vmatprep.mubr.f32.mxu0 %v9492_v19  ;;  %v7681_v23 = vpop.f32.mrf.mxu0  ;;  %v9494_v53 = vld [vmem:[#allocation5 + $0x59] sm:$0xff] }
 0xee7   : > { %v13786_v12 = vpop.f32.mrf.mxu1  ;;  %14265 = vmatmul.mubr.f32.gmra.mxu1 %v14614_v34  ;;  %v7832_v30 = vadd.f32 %v7681_v23, %v18458_v37  ;;  %v7830_v37 = vadd.f32 %v7671_v36, %v7366_v21  ;;  %v9497_v34 = vld [vmem:[#allocation5 + $0x71] sm:$0xff]  ;;  %v19907_v19 = vld [vmem:[#allocation73_spill] sm:$0xff] }
 0xee8   : > { %v18561_v55 = vadd.f32 %v13786_v12, %v13706_v20  ;;  %9892 = vmatprep.mubr.f32.mxu1 %v19906_v33  ;;  %v13827_v26 = vpop.f32.mrf.mxu0  ;;  %v9529_v12 = vmul.f32 %v19907_v19, %v9497_v34  ;;  %v9499_v36 = vld [vmem:[#allocation5 + $0x81] sm:$0xff]  ;;  %v9502_v19 = vld [vmem:[#allocation5 + $0x99] sm:$0xff] }
 0xee9   : > { %v7515_v4 = vpop.f32.mrf.mxu1  ;;  %14306 = vmatmul.mubr.f32.gmra.mxu0 %v9525_v6  ;;  %v7835_v51 = vadd.f32 %v13827_v26, %v18461_v8  ;;  %v19908_v26 = vld [vmem:[#allocation49_spill] sm:$0xff] }
 0xeea   : > { %v18567_v59 = vadd.f32 %v7515_v4, %v7290_v46  ;;  %14308 = vmatprep.mubr.f32.mxu0 %v9494_v53  ;;  %v7691_v20 = vpop.f32.mrf.mxu0  ;;  %v9531_v53 = vmul.f32 %v19908_v26, %v9499_v36  ;;  %v9504_v26 = vld [vmem:[#allocation5 + $0xa9] sm:$0xff] }
 0xeeb   : > { %v13901_v39 = vpop.f32.mrf.mxu1  ;;  %v7834_v35 = vadd.f32 %v7691_v20, %v18465_v38 }
 0xeec   : > { %v18571_v61 = vadd.f32 %v13901_v39, %v7831_v57  ;;  %v9501_v39 = vld [vmem:[#allocation5 + $0x91] sm:$0xff] }
 0xeed   : > { %v8009_v31 = vpop.f32.mrf.mxu1  ;;  %v13830_v9 = vpop.f32.mrf.mxu0  ;;  %14309 = vmatmul.mubr.f32.gmra.mxu0 %v9527_v15  ;;  %v9500_v15 = vld [vmem:[#allocation5 + $0x89] sm:$0xff] }
 0xeee   : > { %v18574_v22 = vadd.f32 %v8009_v31, %v7830_v37  ;;  %v7837_v17 = vadd.f32 %v13830_v9, %v18468_v18  ;;  %14311 = vmatprep.mubr.f32.mxu0 %v9496_v49  ;;  %v19909_v31 = vld [vmem:[#allocation54_spill] sm:$0xff] }
 0xeef   : > { %v13904_v8 = vpop.f32.mrf.mxu1  ;;  %v7701_v46 = vpop.f32.mrf.mxu0  ;;  %v9533_v9 = vmul.f32 %v19909_v31, %v9501_v39  ;;  %v9506_v31 = vld [vmem:[#allocation5 + $0xb9] sm:$0xff] }
 0xef0   : > { %v18578_v16 = vadd.f32 %v13904_v8, %v7833_v47  ;;  %v7836_v57 = vadd.f32 %v7701_v46, %v18472_v63  ;;  %v9503_v8 = vld [vmem:[#allocation5 + $0xa1] sm:$0xff] }
 0xef1   : > { %v8019_v38 = vpop.f32.mrf.mxu1  ;;  %v13833_v23 = vpop.f32.mrf.mxu0  ;;  %14312 = vmatmul.mubr.f32.gmra.mxu0 %v9529_v12 }
 0xef2   : > { %v18581_v6 = vadd.f32 %v8019_v38, %v7832_v30  ;;  %v7839_v1 = vadd.f32 %v13833_v23, %v18475_v58  ;;  %14314 = vmatprep.mubr.f32.mxu0 %v9498_v45  ;;  %v19910_v38 = vld [vmem:[#allocation59_spill] sm:$0xff] }
 0xef3   : > { %v13907_v18 = vpop.f32.mrf.mxu1  ;;  %v7711_v4 = vpop.f32.mrf.mxu0  ;;  %v9535_v23 = vmul.f32 %v19910_v38, %v9503_v8 }
 0xef4   : > { %v18585_v21 = vadd.f32 %v13907_v18, %v7835_v51  ;;  %v7838_v47 = vadd.f32 %v7711_v4, %v18479_v42  ;;  %v9505_v18 = vld [vmem:[#allocation5 + $0xb1] sm:$0xff] }
 0xef5   : > { %v8029_v63 = vpop.f32.mrf.mxu1  ;;  %v13836_v20 = vpop.f32.mrf.mxu0  ;;  %14315 = vmatmul.mubr.f32.gmra.mxu0 %v9531_v53 }
 0xef6   : > { %v18588_v37 = vadd.f32 %v8029_v63, %v7834_v35  ;;  %v7841_v30 = vadd.f32 %v13836_v20, %v18482_v14  ;;  %14317 = vmatprep.mubr.f32.mxu0 %v9500_v15  ;;  %v19911_v63 = vld [vmem:[#allocation37_spill] sm:$0xff] }
 0xef7   : > { %v13910_v58 = vpop.f32.mrf.mxu1  ;;  %v7721_v34 = vpop.f32.mrf.mxu0  ;;  %v9537_v20 = vmul.f32 %v19911_v63, %v9505_v18  ;;  %v7446_v63 = vadd.f32 %v18513_v5, %v18489_v13  ;;  %v9512_v13 = vld [vmem:[#allocation5 + $0xe9] sm:$0xff]  ;;  %v7476_v5 = vadd.f32 %v18536_v56, %v18516_v60 }
 0xef8   : > { %v18592_v49 = vadd.f32 %v13910_v58, %v7837_v17  ;;  %v7840_v51 = vadd.f32 %v7721_v34, %v18486_v40  ;;  %v9507_v58 = vld [vmem:[#allocation5 + $0xc1] sm:$0xff] }
 0xef9   : > { %v8039_v42 = vpop.f32.mrf.mxu1  ;;  %v13839_v46 = vpop.f32.mrf.mxu0  ;;  %14318 = vmatmul.mubr.f32.gmra.mxu0 %v9533_v9 }
 0xefa   : > { %v18595_v12 = vadd.f32 %v8039_v42, %v7836_v57  ;;  %v7843_v35 = vadd.f32 %v13839_v46, %v18491_v43  ;;  %14320 = vmatprep.mubr.f32.mxu0 %v9502_v19  ;;  %v19912_v42 = vld [vmem:[#allocation74_spill] sm:$0xff] }
 0xefb   : > { %v13913_v14 = vpop.f32.mrf.mxu1  ;;  %v7731_v36 = vpop.f32.mrf.mxu0  ;;  %v9539_v46 = vmul.f32 %v19912_v42, %v9507_v58 }
 0xefc   : > { %v18599_v45 = vadd.f32 %v13913_v14, %v7839_v1  ;;  %v7842_v17 = vadd.f32 %v7731_v36, %v18495_v29 }
 0xefd   : > { %v8049_v40 = vpop.f32.mrf.mxu1  ;;  %v13842_v4 = vpop.f32.mrf.mxu0  ;;  %14321 = vmatmul.mubr.f32.gmra.mxu0 %v9535_v23 }
 0xefe   : > { %v18602_v53 = vadd.f32 %v8049_v40, %v7838_v47  ;;  %v7845_v57 = vadd.f32 %v13842_v4, %v18500_v27  ;;  %14323 = vmatprep.mubr.f32.mxu0 %v9504_v26  ;;  %v9511_v26 = vld [vmem:[#allocation5 + $0xe1] sm:$0xff] }
 0xeff   : > { %v13916_v43 = vpop.f32.mrf.mxu1  ;;  %v7741_v39 = vpop.f32.mrf.mxu0 }
 0xf00   : > { %v18606_v15 = vadd.f32 %v13916_v43, %v7841_v30  ;;  %v7844_v1 = vadd.f32 %v7741_v39, %v18504_v10  ;;  %v9509_v30 = vld [vmem:[#allocation5 + $0xd1] sm:$0xff]  ;;  %v9508_v10 = vld [vmem:[#allocation5 + $0xc9] sm:$0xff]  ;;  %v9510_v39 = vld [vmem:[#allocation5 + $0xd9] sm:$0xff] }
 0xf01   : > { %v8059_v29 = vpop.f32.mrf.mxu1  ;;  %v13845_v34 = vpop.f32.mrf.mxu0  ;;  %14324 = vmatmul.mubr.f32.gmra.mxu0 %v9537_v20 }
 0xf02   : > { %v18609_v9 = vadd.f32 %v8059_v29, %v7840_v51  ;;  %v7847_v47 = vadd.f32 %v13845_v34, %v18509_v3  ;;  %14326 = vmatprep.mubr.f32.mxu0 %v9506_v31  ;;  %v19913_v3 = vld [vmem:[#allocation79_spill] sm:$0xff] }
 0xf03   : > { %v13919_v27 = vpop.f32.mrf.mxu1  ;;  %v7751_v8 = vpop.f32.mrf.mxu0  ;;  %v9541_v40 = vmul.f32 %v19913_v3, %v9509_v30 }
 0xf04   : > { %v18613_v19 = vadd.f32 %v13919_v27, %v7843_v35  ;;  %v7846_v31 = vadd.f32 %v7751_v8, %v7446_v63  ;;  %v19915_v8 = vld [vmem:[#allocation84_spill] sm:$0xff] }
 0xf05   : > { %v8069_v14 = vpop.f32.mrf.mxu1  ;;  %v13848_v36 = vpop.f32.mrf.mxu0  ;;  %14327 = vmatmul.mubr.f32.gmra.mxu0 %v9539_v46  ;;  %v9513_v46 = vld [vmem:[#allocation5 + $0xf1] sm:$0xff] }
 0xf06   : > { %v18615_v38 = vadd.f32 %v8069_v14, %v7842_v17  ;;  %v7849_v23 = vadd.f32 %v13848_v36, %v18518_v44  ;;  %14329 = vmatprep.mubr.f32.mxu0 %v9508_v10  ;;  %v7466_v17 = vadd.f32 %v18528_v52, %v18507_v24  ;;  %v7456_v24 = vadd.f32 %v18522_v48, %v18498_v7  ;;  %v9514_v7 = vld [vmem:[#allocation5 + $0xf9] sm:$0xff] }
 0xf07   : > { %v13922_v51 = vpop.f32.mrf.mxu1  ;;  %v7761_v18 = vpop.f32.mrf.mxu0  ;;  %v9545_v36 = vmul.f32 %v19915_v8, %v9513_v46 }
 0xf08   : > { %v18619_v4 = vadd.f32 %v13922_v51, %v7845_v57  ;;  %v19914_v57 = vld [vmem:[#allocation82_spill] sm:$0xff]  ;;  %v7848_v10 = vadd.f32 %v7761_v18, %v7456_v24 }
 0xf09   : > { %v8079_v43 = vpop.f32.mrf.mxu1  ;;  %v13851_v35 = vpop.f32.mrf.mxu0  ;;  %14330 = vmatmul.mubr.f32.gmra.mxu0 %v9541_v40  ;;  %v9543_v34 = vmul.f32 %v19914_v57, %v9511_v26  ;;  %v9515_v40 = vld [vmem:[#allocation5 + $0x101] sm:$0xff] }
 0xf0a   : > { %v18625_v20 = vadd.f32 %v8079_v43, %v7844_v1  ;;  %v7851_v44 = vadd.f32 %v13851_v35, %v18525_v11  ;;  %14332 = vmatprep.mubr.f32.mxu0 %v9510_v39  ;;  %v19916_v35 = vld [vmem:[#allocation86_spill] sm:$0xff] }
 0xf0b   : > { %v13925_v58 = vpop.f32.mrf.mxu1  ;;  %v7771_v29 = vpop.f32.mrf.mxu0  ;;  %v9547_v39 = vmul.f32 %v19916_v35, %v9515_v40  ;;  %v9519_v57 = vld [vmem:[#allocation5 + $0x121] sm:$0xff] }
 0xf0c   : > { %v18629_v27 = vadd.f32 %v13925_v58, %v7847_v47  ;;  %v7850_v42 = vadd.f32 %v7771_v29, %v7466_v17 }
 0xf0d   : > { %v8089_v30 = vpop.f32.mrf.mxu1  ;;  %v13854_v14 = vpop.f32.mrf.mxu0  ;;  %14333 = vmatmul.mubr.f32.gmra.mxu0 %v9543_v34 }
 0xf0e   : > { %v18635_v11 = vadd.f32 %v8089_v30, %v7846_v31  ;;  %v7853_v52 = vadd.f32 %v13854_v14, %v18532_v0  ;;  %14335 = vmatprep.mubr.f32.mxu0 %v9512_v13  ;;  %v9518_v31 = vld [vmem:[#allocation5 + $0x119] sm:$0xff]  ;;  %v9551_v13 = vmul.f32 %v18302_v62, %v9519_v57 }
 0xf0f   : > { %v13928_v1 = vpop.f32.mrf.mxu1  ;;  %v7781_v47 = vpop.f32.mrf.mxu0 }
 0xf10   : > { %v18639_v51 = vadd.f32 %v13928_v1, %v7849_v23  ;;  %v7852_v3 = vadd.f32 %v7781_v47, %v7476_v5 }
 0xf11   : > { %v8099_v26 = vpop.f32.mrf.mxu1  ;;  %v13857_v43 = vpop.f32.mrf.mxu0  ;;  %14336 = vmatmul.mubr.f32.gmra.mxu0 %v9545_v36 }
 0xf12   : > { %v18641_v48 = vadd.f32 %v8099_v26, %v7848_v10  ;;  %v7855_v60 = vadd.f32 %v13857_v43, %v18540_v25  ;;  %14338 = vmatprep.mubr.f32.mxu0 %v9514_v7 }
 0xf13   : > { %v13931_v0 = vpop.f32.mrf.mxu1  ;;  %v7791_v56 = vpop.f32.mrf.mxu0 }
 0xf14   : > { %v18645_v63 = vadd.f32 %v13931_v0, %v7851_v44  ;;  %v7854_v23 = vadd.f32 %v7791_v56, %v18543_v54  ;;  %v19917_v54 = vld [vmem:[#allocation88_spill] sm:$0xff] }
 0xf15   : > { %v8109_v18 = vpop.f32.mrf.mxu1  ;;  %v13860_v17 = vpop.f32.mrf.mxu0  ;;  %14339 = vmatmul.mubr.f32.gmra.mxu0 %v9547_v39 }
 0xf16   : > { %v18648_v58 = vadd.f32 %v8109_v18, %v7850_v42  ;;  %v7857_v29 = vadd.f32 %v13860_v17, %v18546_v2  ;;  %14341 = vmatprep.mubr.f32.mxu0 %v18438_v41 }
 0xf17   : > { %v13934_v25 = vpop.f32.mrf.mxu1  ;;  %v7801_v34 = vpop.f32.mrf.mxu0 }
 0xf18   : > { %v18652_v46 = vadd.f32 %v13934_v25, %v7853_v52  ;;  %v7856_v44 = vadd.f32 %v7801_v34, %v18550_v32 }
 0xf19   : > { %v8119_v30 = vpop.f32.mrf.mxu1  ;;  %v13863_v14 = vpop.f32.mrf.mxu0  ;;  %14342 = vmatmul.mubr.f32.gmra.mxu0 %v19917_v54 }
 0xf1a   : > { %v18657_v42 = vadd.f32 %v8119_v30, %v7852_v3  ;;  %v7859_v2 = vadd.f32 %v13863_v14, %v18555_v28  ;;  %14344 = vmatprep.mubr.f32.mxu0 %v9518_v31 }
 0xf1b   : > { %v13937_v41 = vpop.f32.mrf.mxu1  ;;  %v7811_v24 = vpop.f32.mrf.mxu0 }
 0xf1c   : > { %v18660_v5 = vadd.f32 %v13937_v41, %v7855_v60  ;;  %v7858_v52 = vadd.f32 %v7811_v24, %v18557_v50 }
 0xf1d   : > { %v8129_v1 = vpop.f32.mrf.mxu1  ;;  %v13866_v47 = vpop.f32.mrf.mxu0  ;;  %14345 = vmatmul.mubr.f32.gmra.mxu0 %v9551_v13 }
 0xf1e   : > { %v18663_v32 = vadd.f32 %v8129_v1, %v7854_v23  ;;  %v7861_v8 = vadd.f32 %v13866_v47, %v18561_v55  ;;  %9994 = vmatprep.mubr.f32.mxu0 %v19906_v33 }
 0xf1f   : > { %v13940_v62 = vpop.f32.mrf.mxu1  ;;  %v7821_v36 = vpop.f32.mrf.mxu0 }
 0xf20   : > { %v18667_v10 = vadd.f32 %v13940_v62, %v7857_v29  ;;  %v7860_v28 = vadd.f32 %v7821_v36, %v18567_v59 }
 0xf21   : > { %v8139_v3 = vpop.f32.mrf.mxu1  ;;  %v13981_v40 = vpop.f32.mrf.mxu0 }
 0xf22   : > { %v18670_v26 = vadd.f32 %v8139_v3, %v7856_v44  ;;  %v8475_v50 = vadd.f32 %v13981_v40, %v18571_v61 }
 0xf23   : > { %v13943_v43 = vpop.f32.mrf.mxu1  ;;  %v8315_v7 = vpop.f32.mrf.mxu0 }
 0xf24   : > { %v18673_v60 = vadd.f32 %v13943_v43, %v7859_v2  ;;  %v8474_v55 = vadd.f32 %v8315_v7, %v18574_v22 }
 0xf25   : > { %v8149_v0 = vpop.f32.mrf.mxu1  ;;  %v13984_v56 = vpop.f32.mrf.mxu0 }
 0xf26   : > { %v18676_v35 = vadd.f32 %v8149_v0, %v7858_v52  ;;  %v8477_v39 = vadd.f32 %v13984_v56, %v18578_v16 }
 0xf27   : > { %v13946_v23 = vpop.f32.mrf.mxu1  ;;  %v8325_v59 = vpop.f32.mrf.mxu0 }
 0xf28   : > { %v18679_v18 = vadd.f32 %v13946_v23, %v7861_v8  ;;  %v8476_v17 = vadd.f32 %v8325_v59, %v18581_v6 }
 0xf29   : > { %v8159_v29 = vpop.f32.mrf.mxu1  ;;  %v13987_v61 = vpop.f32.mrf.mxu0 }
 0xf2a   : > { %v18682_v57 = vadd.f32 %v8159_v29, %v7860_v28  ;;  %v8479_v25 = vadd.f32 %v13987_v61, %v18585_v21 }
 0xf2b   : > { %v14061_v34 = vpop.f32.mrf.mxu1  ;;  %v8335_v22 = vpop.f32.mrf.mxu0 }
 0xf2c   : > { %v18685_v31 = vadd.f32 %v14061_v34, %v8475_v50  ;;  %v8478_v44 = vadd.f32 %v8335_v22, %v18588_v37 }
 0xf2d   : > { %v8653_v30 = vpop.f32.mrf.mxu1  ;;  %v13990_v16 = vpop.f32.mrf.mxu0 }
 0xf2e   : > { %v18688_v14 = vadd.f32 %v8653_v30, %v8474_v55  ;;  %v8481_v54 = vadd.f32 %v13990_v16, %v18592_v49 }
 0xf2f   : > { %v14064_v13 = vpop.f32.mrf.mxu1  ;;  %v8345_v6 = vpop.f32.mrf.mxu0 }
 0xf30   : > { %v18691_v2 = vadd.f32 %v14064_v13, %v8477_v39  ;;  %v8480_v41 = vadd.f32 %v8345_v6, %v18595_v12 }
 0xf31   : > { %v8663_v24 = vpop.f32.mrf.mxu1  ;;  %v13993_v21 = vpop.f32.mrf.mxu0 }
 0xf32   : > { %v18694_v52 = vadd.f32 %v8663_v24, %v8476_v17  ;;  %v8483_v1 = vadd.f32 %v13993_v21, %v18599_v45 }
 0xf33   : > { %v14067_v47 = vpop.f32.mrf.mxu1  ;;  %v8355_v37 = vpop.f32.mrf.mxu0 }
 0xf34   : > { %v18697_v8 = vadd.f32 %v14067_v47, %v8479_v25  ;;  %v8482_v62 = vadd.f32 %v8355_v37, %v18602_v53 }
 0xf35   : > { %v8673_v36 = vpop.f32.mrf.mxu1  ;;  %v13996_v49 = vpop.f32.mrf.mxu0 }
 0xf36   : > { %v18700_v28 = vadd.f32 %v8673_v36, %v8478_v44  ;;  %v8485_v3 = vadd.f32 %v13996_v49, %v18606_v15 }
 0xf37   : > { %v14070_v40 = vpop.f32.mrf.mxu1  ;;  %v8365_v12 = vpop.f32.mrf.mxu0 }
 0xf38   : > { %v18703_v50 = vadd.f32 %v14070_v40, %v8481_v54  ;;  %v8484_v43 = vadd.f32 %v8365_v12, %v18609_v9 }
 0xf39   : > { %v8683_v7 = vpop.f32.mrf.mxu1  ;;  %v13999_v45 = vpop.f32.mrf.mxu0 }
 0xf3a   : > { %v18706_v55 = vadd.f32 %v8683_v7, %v8480_v41  ;;  %v8487_v0 = vadd.f32 %v13999_v45, %v18613_v19 }
 0xf3b   : > { %v14073_v56 = vpop.f32.mrf.mxu1  ;;  %v8375_v53 = vpop.f32.mrf.mxu0 }
 0xf3c   : > { %v18709_v39 = vadd.f32 %v14073_v56, %v8483_v1  ;;  %v8486_v23 = vadd.f32 %v8375_v53, %v18615_v38 }
 0xf3d   : > { %v8693_v59 = vpop.f32.mrf.mxu1  ;;  %v14002_v15 = vpop.f32.mrf.mxu0 }
 0xf3e   : > { %v18712_v17 = vadd.f32 %v8693_v59, %v8482_v62  ;;  %v8489_v29 = vadd.f32 %v14002_v15, %v18619_v4 }
 0xf3f   : > { %v14076_v61 = vpop.f32.mrf.mxu1  ;;  %v8385_v9 = vpop.f32.mrf.mxu0 }
 0xf40   : > { %v18715_v25 = vadd.f32 %v14076_v61, %v8485_v3  ;;  %v8488_v34 = vadd.f32 %v8385_v9, %v18625_v20 }
 0xf41   : > { %v8703_v22 = vpop.f32.mrf.mxu1  ;;  %v14005_v19 = vpop.f32.mrf.mxu0 }
 0xf42   : > { %v18718_v44 = vadd.f32 %v8703_v22, %v8484_v43  ;;  %v8491_v30 = vadd.f32 %v14005_v19, %v18629_v27 }
 0xf43   : > { %v14079_v16 = vpop.f32.mrf.mxu1  ;;  %v8395_v38 = vpop.f32.mrf.mxu0 }
 0xf44   : > { %v18721_v54 = vadd.f32 %v14079_v16, %v8487_v0  ;;  %v8490_v13 = vadd.f32 %v8395_v38, %v18635_v11 }
 0xf45   : > { %v8713_v6 = vpop.f32.mrf.mxu1  ;;  %v14008_v4 = vpop.f32.mrf.mxu0 }
 0xf46   : > { %v18724_v41 = vadd.f32 %v8713_v6, %v8486_v23  ;;  %v8493_v24 = vadd.f32 %v14008_v4, %v18639_v51 }
 0xf47   : > { %v14082_v21 = vpop.f32.mrf.mxu1  ;;  %v8405_v20 = vpop.f32.mrf.mxu0 }
 0xf48   : > { %v18727_v1 = vadd.f32 %v14082_v21, %v8489_v29  ;;  %v8492_v47 = vadd.f32 %v8405_v20, %v18641_v48 }
 0xf49   : > { %v8723_v37 = vpop.f32.mrf.mxu1  ;;  %v14011_v27 = vpop.f32.mrf.mxu0 }
 0xf4a   : > { %v18730_v62 = vadd.f32 %v8723_v37, %v8488_v34  ;;  %v8495_v36 = vadd.f32 %v14011_v27, %v18645_v63 }
 0xf4b   : > { %v14085_v49 = vpop.f32.mrf.mxu1  ;;  %v8415_v11 = vpop.f32.mrf.mxu0 }
 0xf4c   : > { %v18733_v3 = vadd.f32 %v14085_v49, %v8491_v30  ;;  %v8494_v40 = vadd.f32 %v8415_v11, %v18648_v58 }
 0xf4d   : > { %v8733_v12 = vpop.f32.mrf.mxu1  ;;  %v14014_v51 = vpop.f32.mrf.mxu0 }
 0xf4e   : > { %v18736_v43 = vadd.f32 %v8733_v12, %v8490_v13  ;;  %v8497_v7 = vadd.f32 %v14014_v51, %v18652_v46 }
 0xf4f   : > { %v14088_v45 = vpop.f32.mrf.mxu1  ;;  %v8425_v48 = vpop.f32.mrf.mxu0 }
 0xf50   : > { %v18739_v0 = vadd.f32 %v14088_v45, %v8493_v24  ;;  %v8496_v56 = vadd.f32 %v8425_v48, %v18657_v42 }
 0xf51   : > { %v8743_v53 = vpop.f32.mrf.mxu1  ;;  %v14017_v63 = vpop.f32.mrf.mxu0 }
 0xf52   : > { %v18742_v23 = vadd.f32 %v8743_v53, %v8492_v47  ;;  %v8499_v59 = vadd.f32 %v14017_v63, %v18660_v5 }
 0xf53   : > { %v14091_v15 = vpop.f32.mrf.mxu1  ;;  %v8435_v58 = vpop.f32.mrf.mxu0 }
 0xf54   : > { %v18745_v29 = vadd.f32 %v14091_v15, %v8495_v36  ;;  %v8498_v61 = vadd.f32 %v8435_v58, %v18663_v32 }
 0xf55   : > { %v8753_v9 = vpop.f32.mrf.mxu1  ;;  %v14020_v46 = vpop.f32.mrf.mxu0 }
 0xf56   : > { %v18748_v34 = vadd.f32 %v8753_v9, %v8494_v40  ;;  %v8501_v22 = vadd.f32 %v14020_v46, %v18667_v10 }
 0xf57   : > { %v14094_v19 = vpop.f32.mrf.mxu1  ;;  %v8445_v42 = vpop.f32.mrf.mxu0 }
 0xf58   : > { %v18751_v30 = vadd.f32 %v14094_v19, %v8497_v7  ;;  %v8500_v16 = vadd.f32 %v8445_v42, %v18670_v26 }
 0xf59   : > { %v8763_v38 = vpop.f32.mrf.mxu1  ;;  %v14023_v5 = vpop.f32.mrf.mxu0 }
 0xf5a   : > { %v18754_v13 = vadd.f32 %v8763_v38, %v8496_v56  ;;  %v8503_v6 = vadd.f32 %v14023_v5, %v18673_v60 }
 0xf5b   : > { %v14097_v4 = vpop.f32.mrf.mxu1  ;;  %v8455_v32 = vpop.f32.mrf.mxu0 }
 0xf5c   : > { %v18757_v24 = vadd.f32 %v14097_v4, %v8499_v59  ;;  %v8502_v21 = vadd.f32 %v8455_v32, %v18676_v35 }
 0xf5d   : > { %v8773_v20 = vpop.f32.mrf.mxu1  ;;  %v14026_v10 = vpop.f32.mrf.mxu0 }
 0xf5e   : > { %v18760_v47 = vadd.f32 %v8773_v20, %v8498_v61  ;;  %v18763_v37 = vadd.f32 %v14026_v10, %v18679_v18 }
 0xf5f   : > { %v14100_v26 = vpop.f32.mrf.mxu1  ;;  %v8465_v27 = vpop.f32.mrf.mxu0 }
 0xf60   : > { %v18765_v36 = vadd.f32 %v14100_v26, %v8501_v22  ;;  %v18768_v49 = vadd.f32 %v8465_v27, %v18682_v57 }
 0xf61   : > { %v8783_v60 = vpop.f32.mrf.mxu1  ;;  %v14141_v11 = vpop.f32.mrf.mxu0 }
 0xf62   : > { %v18770_v40 = vadd.f32 %v8783_v60, %v8500_v16  ;;  %v9151_v35 = vadd.f32 %v14141_v11, %v18685_v31 }
 0xf63   : > { %v14103_v12 = vpop.f32.mrf.mxu1  ;;  %v8991_v51 = vpop.f32.mrf.mxu0 }
 0xf64   : > { %v18773_v7 = vadd.f32 %v14103_v12, %v8503_v6  ;;  %v9150_v18 = vadd.f32 %v8991_v51, %v18688_v14 }
 0xf65   : > { %v8793_v45 = vpop.f32.mrf.mxu1  ;;  %v14144_v48 = vpop.f32.mrf.mxu0 }
 0xf66   : > { %v18776_v56 = vadd.f32 %v8793_v45, %v8502_v21  ;;  %v9153_v53 = vadd.f32 %v14144_v48, %v18691_v2 }
 0xf67   : > { %v18779_v57 = vpop.f32.mrf.mxu1  ;;  %v9001_v63 = vpop.f32.mrf.mxu0 }
 0xf68   : > { %v9152_v59 = vadd.f32 %v9001_v63, %v18694_v52 }
 0xf69   : > { %v18782_v15 = vpop.f32.mrf.mxu1  ;;  %v14147_v31 = vpop.f32.mrf.mxu0 }
 0xf6a   : > { %v9155_v58 = vadd.f32 %v14147_v31, %v18697_v8 }
 0xf6b   : > { %v14221_v61 = vpop.f32.mrf.mxu1  ;;  %v9011_v9 = vpop.f32.mrf.mxu0 }
 0xf6c   : > { %v18785_v46 = vadd.f32 %v14221_v61, %v9151_v35  ;;  %v9154_v14 = vadd.f32 %v9011_v9, %v18700_v28 }
 0xf6d   : > { %v9297_v22 = vpop.f32.mrf.mxu1  ;;  %v14150_v19 = vpop.f32.mrf.mxu0 }
 0xf6e   : > { %v18788_v42 = vadd.f32 %v9297_v22, %v9150_v18  ;;  %v9157_v2 = vadd.f32 %v14150_v19, %v18703_v50 }
 0xf6f   : > { %v14224_v16 = vpop.f32.mrf.mxu1  ;;  %v9021_v38 = vpop.f32.mrf.mxu0 }
 0xf70   : > { %v18791_v52 = vadd.f32 %v14224_v16, %v9153_v53  ;;  %v9156_v5 = vadd.f32 %v9021_v38, %v18706_v55 }
 0xf71   : > { %v9307_v6 = vpop.f32.mrf.mxu1  ;;  %v14153_v8 = vpop.f32.mrf.mxu0 }
 0xf72   : > { %v18794_v4 = vadd.f32 %v9307_v6, %v9152_v59  ;;  %v18797_v32 = vadd.f32 %v14153_v8, %v18709_v39 }
 0xf73   : > { %v14227_v28 = vpop.f32.mrf.mxu1  ;;  %v9031_v21 = vpop.f32.mrf.mxu0 }
 0xf74   : > { %v18799_v20 = vadd.f32 %v14227_v28, %v9155_v58  ;;  %v18802_v10 = vadd.f32 %v9031_v21, %v18712_v17 }
 0xf75   : > { %v9317_v50 = vpop.f32.mrf.mxu1  ;;  %v14156_v26 = vpop.f32.mrf.mxu0 }
 0xf76   : > { %v18804_v27 = vadd.f32 %v9317_v50, %v9154_v14  ;;  %v18807_v55 = vadd.f32 %v14156_v26, %v18715_v25 }
 0xf77   : > { %v14230_v60 = vpop.f32.mrf.mxu1  ;;  %v9041_v11 = vpop.f32.mrf.mxu0 }
 0xf78   : > { %v18809_v35 = vadd.f32 %v14230_v60, %v9157_v2  ;;  %v18812_v39 = vadd.f32 %v9041_v11, %v18718_v44 }
 0xf79   : > { %v9327_v12 = vpop.f32.mrf.mxu1  ;;  %v14159_v51 = vpop.f32.mrf.mxu0 }
 0xf7a   : > { %v18814_v18 = vadd.f32 %v9327_v12, %v9156_v5  ;;  %v18817_v17 = vadd.f32 %v14159_v51, %v18721_v54 }
 0xf7b   : > { %v9051_v45 = vpop.f32.mrf.mxu0  ;;  %v18825_v63 = vpop.f32.mrf.mxu1 }
 0xf7c   : > { %v18820_v48 = vadd.f32 %v9051_v45, %v18724_v41 }
 0xf7d   : > { %v14162_v25 = vpop.f32.mrf.mxu0  ;;  %v18833_v54 = vpop.f32.mrf.mxu1 }
 0xf7e   : > { %v18823_v53 = vadd.f32 %v14162_v25, %v18727_v1 }
 0xf7f   : > { %v9061_v59 = vpop.f32.mrf.mxu0  ;;  %v18841_v14 = vpop.f32.mrf.mxu1 }
 0xf80   : > { %v18828_v44 = vadd.f32 %v9061_v59, %v18730_v62 }
 0xf81   : > { %v14165_v31 = vpop.f32.mrf.mxu0  ;;  %v18849_v2 = vpop.f32.mrf.mxu1 }
 0xf82   : > { %v18831_v58 = vadd.f32 %v14165_v31, %v18733_v3 }
 0xf83   : > { %v9071_v61 = vpop.f32.mrf.mxu0  ;;  %v18857_v5 = vpop.f32.mrf.mxu1 }
 0xf84   : > { %19918 = vst [vmem:[#allocation50_spill] sm:$0xff] %v18831_v58  ;;  %v18836_v41 = vadd.f32 %v9071_v61, %v18736_v43 }
 0xf85   : > { %v14168_v9 = vpop.f32.mrf.mxu0  ;;  %v18865_v28 = vpop.f32.mrf.mxu1 }
 0xf86   : > { %19919 = vst [vmem:[#allocation70_spill] sm:$0xff] %v18836_v41  ;;  %v18839_v1 = vadd.f32 %v14168_v9, %v18739_v0 }
 0xf87   : > { %v9081_v22 = vpop.f32.mrf.mxu0  ;;  %v18873_v26 = vpop.f32.mrf.mxu1 }
 0xf88   : > { %19920 = vst [vmem:[#allocation63_spill] sm:$0xff] %v18839_v1  ;;  %v18844_v62 = vadd.f32 %v9081_v22, %v18742_v23  ;;  %v9471_v1 = vadd.f32 %v18873_v26, %v18823_v53 }
 0xf89   : > { %v14171_v19 = vpop.f32.mrf.mxu0  ;;  %v18881_v12 = vpop.f32.mrf.mxu1 }
 0xf8a   : > { %19921 = vst [vmem:[#allocation68_spill] sm:$0xff] %v18844_v62  ;;  %v18847_v3 = vadd.f32 %v14171_v19, %v18745_v29 }
 0xf8b   : > { %v9091_v16 = vpop.f32.mrf.mxu0  ;;  %v18886_v25 = vpop.f32.mrf.mxu1 }
 0xf8c   : > { %19922 = vst [vmem:[#allocation48_spill] sm:$0xff] %v18847_v3  ;;  %v18852_v43 = vadd.f32 %v9091_v16, %v18748_v34  ;;  %19924 = vst [vmem:[#allocation47_spill] sm:$0xff] %v18886_v25 }
 0xf8d   : > { %v14174_v38 = vpop.f32.mrf.mxu0 }
 0xf8e   : > { %19923 = vst [vmem:[#allocation72_spill] sm:$0xff] %v18852_v43  ;;  %v18855_v0 = vadd.f32 %v14174_v38, %v18751_v30 }
 0xf8f   : > { %v9101_v6 = vpop.f32.mrf.mxu0 }
 0xf90   : > { %v18860_v23 = vadd.f32 %v9101_v6, %v18754_v13 }
 0xf91   : > { %v14177_v8 = vpop.f32.mrf.mxu0 }
 0xf92   : > { %v18863_v29 = vadd.f32 %v14177_v8, %v18757_v24 }
 0xf93   : > { %v9111_v21 = vpop.f32.mrf.mxu0 }
 0xf94   : > { %v18868_v34 = vadd.f32 %v9111_v21, %v18760_v47 }
 0xf95   : > { %v14180_v50 = vpop.f32.mrf.mxu0 }
 0xf96   : > { %v18871_v30 = vadd.f32 %v14180_v50, %v18765_v36 }
 0xf97   : > { %v9121_v60 = vpop.f32.mrf.mxu0 }
 0xf98   : > { %v18876_v13 = vadd.f32 %v9121_v60, %v18770_v40  ;;  %v18891_v40 = vpop.f32.mrf.mxu1 }
 0xf99   : > { %v14183_v11 = vpop.f32.mrf.mxu0  ;;  %19926 = vst [vmem:[#allocation53_spill] sm:$0xff] %v18891_v40 }
 0xf9a   : > { %v18879_v24 = vadd.f32 %v14183_v11, %v18773_v7 }
 0xf9b   : > { %v9131_v51 = vpop.f32.mrf.mxu0 }
 0xf9c   : > { %v18884_v47 = vadd.f32 %v9131_v51, %v18776_v56  ;;  %v18899_v56 = vpop.f32.mrf.mxu1 }
 0xf9d   : > { %v14186_v45 = vpop.f32.mrf.mxu0  ;;  %19929 = vst [vmem:[#allocation51_spill] sm:$0xff] %v18899_v56 }
 0xf9e   : > { %v18907_v6 = vpop.f32.mrf.mxu1 }
 0xf9f   : > { %v9141_v36 = vpop.f32.mrf.mxu0  ;;  %19932 = vst [vmem:[#allocation55_spill] sm:$0xff] %v18907_v6 }
 0xfa0   : > { %v18915_v50 = vpop.f32.mrf.mxu1 }
 0xfa1   : > { %v14301_v59 = vpop.f32.mrf.mxu0  ;;  %19935 = vst [vmem:[#allocation44_spill] sm:$0xff] %v18915_v50 }
 0xfa2   : > { %v18889_v31 = vadd.f32 %v14301_v59, %v18785_v46 }
 0xfa3   : > { %v9635_v61 = vpop.f32.mrf.mxu0 }
 0xfa4   : > { %19925 = vst [vmem:[#allocation45_spill] sm:$0xff] %v18889_v31  ;;  %v18894_v7 = vadd.f32 %v9635_v61, %v18788_v42 }
 0xfa5   : > { %v14304_v9 = vpop.f32.mrf.mxu0 }
 0xfa6   : > { %19927 = vst [vmem:[#allocation43_spill] sm:$0xff] %v18894_v7  ;;  %v18897_v22 = vadd.f32 %v14304_v9, %v18791_v52 }
 0xfa7   : > { %v9645_v19 = vpop.f32.mrf.mxu0 }
 0xfa8   : > { %19928 = vst [vmem:[#allocation58_spill] sm:$0xff] %v18897_v22  ;;  %v18902_v16 = vadd.f32 %v9645_v19, %v18794_v4 }
 0xfa9   : > { %v14307_v38 = vpop.f32.mrf.mxu0 }
 0xfaa   : > { %19930 = vst [vmem:[#allocation57_spill] sm:$0xff] %v18902_v16  ;;  %v18905_v46 = vadd.f32 %v14307_v38, %v18799_v20  ;;  %v18922_v20 = vpop.f32.mrf.mxu1 }
 0xfab   : > { %v9655_v8 = vpop.f32.mrf.mxu0  ;;  %19937 = vst [vmem:[#allocation40_spill] sm:$0xff] %v18922_v20 }
 0xfac   : > { %19931 = vst [vmem:[#allocation41_spill] sm:$0xff] %v18905_v46  ;;  %v18910_v42 = vadd.f32 %v9655_v8, %v18804_v27  ;;  %v18928_v27 = vpop.f32.mrf.mxu1 }
 0xfad   : > { %v14310_v21 = vpop.f32.mrf.mxu0 }
 0xfae   : > { %19933 = vst [vmem:[#allocation39_spill] sm:$0xff] %v18910_v42  ;;  %v18913_v52 = vadd.f32 %v14310_v21, %v18809_v35  ;;  %v18932_v9 = vpop.f32.mrf.mxu1 }
 0xfaf   : > { %v9665_v60 = vpop.f32.mrf.mxu0 }
 0xfb0   : > { %19934 = vst [vmem:[#allocation60_spill] sm:$0xff] %v18913_v52  ;;  %v18918_v4 = vadd.f32 %v9665_v60, %v18814_v18  ;;  %v18934_v8 = vpop.f32.mrf.mxu1 }
 0xfb1   : > { %v18920_v11 = vpop.f32.mrf.mxu0 }
 0xfb2   : > { %19936 = vst [vmem:[#allocation78_spill] sm:$0xff] %v18918_v4  ;;  %v18938_v60 = vpop.f32.mrf.mxu1 }
 0xfb3   : > { %v18924_v51 = vpop.f32.mrf.mxu0 }
 0xfb4   : > { %v14260_v31 = vpop.f32.mrf.mxu1 }
 0xfb5   : > { %v18926_v59 = vpop.f32.mrf.mxu0 }
 0xfb6   : > { %v9427_v40 = vpop.f32.mrf.mxu1 }
 0xfb7   : > { %v18930_v61 = vpop.f32.mrf.mxu0 }
 0xfb8   : > { %v14263_v25 = vpop.f32.mrf.mxu1 }
 0xfb9   : > { %v14319_v35 = vpop.f32.mrf.mxu0 }
 0xfba   : > { %v9437_v46 = vpop.f32.mrf.mxu1 }
 0xfbb   : > { %v9695_v19 = vpop.f32.mrf.mxu0 }
 0xfbd   : > { %v14322_v38 = vpop.f32.mrf.mxu0 }
 0xfbe   : > { %v18966_v50 = vadd.f32 %v14322_v38, %v9471_v1  ;;  %v9468_v1 = vadd.f32 %v18865_v28, %v18820_v48  ;;  %v9467_v48 = vadd.f32 %v18841_v14, %v18807_v55  ;;  %v9466_v55 = vadd.f32 %v18849_v2, %v18812_v39 }
 0xfbf   : > { %v9705_v18 = vpop.f32.mrf.mxu0  ;;  %v9465_v2 = vadd.f32 %v18825_v63, %v18797_v32  ;;  %v9464_v63 = vadd.f32 %v18833_v54, %v18802_v10 }
 0xfc0   : > { %v18998_v28 = vadd.f32 %v9695_v19, %v9468_v1  ;;  %v19012_v14 = vadd.f32 %v18926_v59, %v9467_v48 }
 0xfc1   : > { %v18936_v21 = vpop.f32.mrf.mxu0  ;;  %v19057_v54 = vadd.f32 %v18924_v51, %v9464_v63 }
 0xfc2   : > { %19938 = vst [vmem:[#allocation77_spill] sm:$0xff] %v18936_v21 }
 0xfc3   : > { %v18940_v33 = vpop.f32.mrf.mxu0 }
 0xfc4   : > { %19939 = vst [vmem:[#allocation75_spill] sm:$0xff] %v18940_v33 }
 0xfc5   : > { %v18942_v7 = vpop.f32.mrf.mxu0 }
 0xfc6   : > { %19940 = vst [vmem:[#allocation81_spill] sm:$0xff] %v18942_v7  ;;  %v14266_v7 = vpop.f32.mrf.mxu1 }
 0xfc7   : > { %v18944_v16 = vpop.f32.mrf.mxu0 }
 0xfc8   : > { %19941 = vst [vmem:[#allocation67_spill] sm:$0xff] %v18944_v16  ;;  %v8843_v16 = vadd.f32 %v18779_v57, %v18763_v37  ;;  %v9447_v52 = vpop.f32.mrf.mxu1  ;;  %v9485_v37 = vadd.f32 %v14263_v25, %v18879_v24 }
 0xfc9   : > { %v18946_v22 = vpop.f32.mrf.mxu0 }
 0xfca   : > { %19942 = vst [vmem:[#allocation69_spill] sm:$0xff] %v18946_v22  ;;  %v9181_v56 = vadd.f32 %v14186_v45, %v8843_v16 }
 0xfcb   : > { %v18948_v41 = vpop.f32.mrf.mxu0 }
 0xfcc   : > { %19943 = vst [vmem:[#allocation65_spill] sm:$0xff] %v18948_v41  ;;  %v8842_v41 = vadd.f32 %v18782_v15, %v18768_v49  ;;  %v9487_v43 = vadd.f32 %v14266_v7, %v9181_v56  ;;  %v9469_v49 = vadd.f32 %v18857_v5, %v18817_v17  ;;  %v9913_v17 = vmul.f32 %v18966_v50, %v18966_v50 }
 0xfcd   : > { %v18950_v42 = vpop.f32.mrf.mxu0  ;;  %v9909_v7 = vmul.f32 %v19012_v14, %v19012_v14  ;;  %v19960_v48 = vld [vmem:[#allocation81_spill] sm:$0xff] }
 0xfce   : > { %19944 = vst [vmem:[#allocation66_spill] sm:$0xff] %v18950_v42  ;;  %v9180_v20 = vadd.f32 %v9141_v36, %v8842_v41  ;;  %v9484_v41 = vadd.f32 %v9437_v46, %v18884_v47  ;;  %v19027_v36 = vadd.f32 %v18930_v61, %v9466_v55  ;;  %v19950_v61 = vld [vmem:[#allocation72_spill] sm:$0xff] }
 0xfcf   : > { %v18952_v58 = vpop.f32.mrf.mxu0 }
 0xfd0   : > { %19945 = vst [vmem:[#allocation46_spill] sm:$0xff] %v18952_v58  ;;  %v9470_v58 = vadd.f32 %v18881_v12, %v18828_v44  ;;  %v9486_v57 = vadd.f32 %v9447_v52, %v9180_v20  ;;  %v9908_v56 = vmul.f32 %v19027_v36, %v19027_v36 }
 0xfd1   : > { %v18954_v21 = vpop.f32.mrf.mxu0  ;;  %v19952_v19 = vld [vmem:[#allocation69_spill] sm:$0xff] }
 0xfd2   : > { %v18973_v15 = vadd.f32 %v9705_v18, %v9470_v58  ;;  %v9483_v58 = vadd.f32 %v14260_v31, %v18871_v30  ;;  %v9482_v30 = vadd.f32 %v9427_v40, %v18876_v13  ;;  %v9910_v31 = vmul.f32 %v18998_v28, %v18998_v28  ;;  %v19953_v18 = vld [vmem:[#allocation60_spill] sm:$0xff] }
 0xfd3   : > { %v18956_v6 = vpop.f32.mrf.mxu0  ;;  %v19043_v40 = vadd.f32 %v18920_v11, %v9465_v2  ;;  %v19948_v11 = vld [vmem:[#allocation44_spill] sm:$0xff]  ;;  %v19964_v2 = vld [vmem:[#allocation67_spill] sm:$0xff] }
 0xfd4   : > { %v9912_v24 = vmul.f32 %v18973_v15, %v18973_v15 }
 0xfd5   : > { %v14340_v33 = vpop.f32.mrf.mxu0  ;;  %v19946_v16 = vld [vmem:[#allocation66_spill] sm:$0xff]  ;;  %v9907_v52 = vmul.f32 %v19043_v40, %v19043_v40 }
 0xfd6   : > { %v19004_v12 = vadd.f32 %v14340_v33, %v9483_v58  ;;  %v9481_v33 = vadd.f32 %v18934_v8, %v18863_v29  ;;  %v19959_v58 = vld [vmem:[#allocation55_spill] sm:$0xff] }
 0xfd7   : > { %v9765_v62 = vpop.f32.mrf.mxu0  ;;  %v19949_v51 = vld [vmem:[#allocation46_spill] sm:$0xff] }
 0xfd8   : > { %v19019_v13 = vadd.f32 %v9765_v62, %v9482_v30  ;;  %v9480_v62 = vadd.f32 %v18938_v60, %v18868_v34  ;;  %v19035_v29 = vadd.f32 %v18954_v21, %v9481_v33  ;;  %v9925_v32 = vmul.f32 %v19004_v12, %v19004_v12  ;;  %v19954_v60 = vld [vmem:[#allocation63_spill] sm:$0xff] }
 0xfd9   : > { %v14343_v4 = vpop.f32.mrf.mxu0  ;;  %v9479_v34 = vadd.f32 %v18928_v27, %v18855_v0  ;;  %v9478_v0 = vadd.f32 %v18932_v9, %v18860_v23  ;;  %v9906_v27 = vmul.f32 %v19057_v54, %v19057_v54  ;;  %v9905_v21 = vmul.f32 %v19953_v18, %v19953_v18  ;;  %v19963_v33 = vld [vmem:[#allocation47_spill] sm:$0xff] }
 0xfda   : > { %v18976_v26 = vadd.f32 %v14343_v4, %v9485_v37  ;;  %v9924_v10 = vmul.f32 %v19019_v13, %v19019_v13  ;;  %v19947_v4 = vld [vmem:[#allocation48_spill] sm:$0xff]  ;;  %v19955_v37 = vld [vmem:[#allocation51_spill] sm:$0xff] }
 0xfdb   : > { %v9775_v22 = vpop.f32.mrf.mxu0  ;;  %v19065_v46 = vadd.f32 %v19946_v16, %v9479_v34  ;;  %v9477_v20 = vadd.f32 %v19948_v11, %v19947_v4  ;;  %v19076_v23 = vadd.f32 %v19949_v51, %v9478_v0  ;;  %v19967_v34 = vld [vmem:[#allocation53_spill] sm:$0xff]  ;;  %v19970_v4 = vld [vmem:[#allocation75_spill] sm:$0xff] }
 0xfdc   : > { %v9927_v47 = vmul.f32 %v18976_v26, %v18976_v26  ;;  %v19971_v51 = vld [vmem:[#allocation57_spill] sm:$0xff] }
 0xfdd   : > { %v14346_v3 = vpop.f32.mrf.mxu0  ;;  %v19087_v38 = vadd.f32 %v19952_v19, %v9477_v20  ;;  %v9921_v8 = vmul.f32 %v19065_v46, %v19065_v46  ;;  %v19973_v19 = vld [vmem:[#allocation43_spill] sm:$0xff] }
 0xfde   : > { %v18969_v42 = vadd.f32 %v14346_v3, %v9487_v43  ;;  %v18985_v3 = vadd.f32 %v14319_v35, %v9469_v49  ;;  %v18991_v43 = vadd.f32 %v9775_v22, %v9484_v41  ;;  %v19051_v22 = vadd.f32 %v18956_v6, %v9480_v62  ;;  %v19951_v35 = vld [vmem:[#allocation40_spill] sm:$0xff]  ;;  %v19956_v49 = vld [vmem:[#allocation65_spill] sm:$0xff] }
 0xfdf   : > { %v9785_v53 = vpop.f32.mrf.mxu0  ;;  %v9923_v6 = vmul.f32 %v19035_v29, %v19035_v29  ;;  %v9476_v9 = vadd.f32 %v19951_v35, %v19950_v61  ;;  %v9920_v41 = vmul.f32 %v19076_v23, %v19076_v23  ;;  %v9919_v30 = vmul.f32 %v19087_v38, %v19087_v38  ;;  %v19972_v61 = vld [vmem:[#allocation45_spill] sm:$0xff] }
 0xfe0   : > { %v18978_v45 = vadd.f32 %v9785_v53, %v9486_v57  ;;  %12180 = vmatprep.subr.mxu1 %v18969_v42  ;;  %v9929_v44 = vmul.f32 %v18969_v42, %v18969_v42  ;;  %v9911_v25 = vmul.f32 %v18985_v3, %v18985_v3  ;;  %v9926_v39 = vmul.f32 %v18991_v43, %v18991_v43 }
 0xfe1   : > { %12181 = vmatpush3.msra.mxu1 %v18966_v50  ;;  %v9922_v59 = vmul.f32 %v19051_v22, %v19051_v22  ;;  %v9475_v57 = vadd.f32 %v19955_v37, %v19954_v60  ;;  %v19098_v53 = vadd.f32 %v19956_v49, %v9476_v9  ;;  %v9899_v35 = vmul.f32 %v19972_v61, %v19972_v61  ;;  %v19161_v60 = vld [vmem:[#allocation2] sm:$0xff]  ;;  %v14616_v37 = vld [vmem:[%s19666_s0 + $0x78] sm:$0xff]  ;;  %v14618_v49 = vld [vmem:[%s19666_s0 + $0x68] sm:$0xff] }
 0xfe2   : > { %12182 = vmatprep.subr.mxu1 %v18978_v45  ;;  %12215 = vmatprep.subr.mxu0 %v9929_v44  ;;  %v9928_v5 = vmul.f32 %v18978_v45, %v18978_v45  ;;  %v19957_v44 = vld [vmem:[#allocation78_spill] sm:$0xff] }
 0xfe3   : > { %12183 = vmatpush3.msra.mxu1 %v18973_v15  ;;  %12216 = vmatpush3.msra.mxu0 %v9913_v17  ;;  %v9904_v1 = vmul.f32 %v19957_v44, %v19957_v44  ;;  %v19958_v17 = vld [vmem:[#allocation68_spill] sm:$0xff]  ;;  %v9918_v62 = vmul.f32 %v19098_v53, %v19098_v53 }
 0xfe4   : > { %12184 = vmatprep.subr.mxu1 %v18976_v26  ;;  %12217 = vmatprep.subr.mxu0 %v9928_v5  ;;  %v9474_v5 = vadd.f32 %v19959_v58, %v19958_v17  ;;  %v14621_v17 = vld [vmem:[%s19666_s0 + $0x50] sm:$0xff]  ;;  %v14622_v58 = vld [vmem:[%s19666_s0 + $0x48] sm:$0xff] }
 0xfe5   : > { %12185 = vmatpush3.msra.mxu1 %v18985_v3  ;;  %12218 = vmatpush3.msra.mxu0 %v9912_v24  ;;  %v19109_v24 = vadd.f32 %v19960_v48, %v9475_v57  ;;  %v14617_v57 = vld [vmem:[%s19666_s0 + $0x70] sm:$0xff]  ;;  %v14624_v48 = vld [vmem:[%s19666_s0 + $0x38] sm:$0xff] }
 0xfe6   : > { %12186 = vmatprep.subr.mxu1 %v18991_v43  ;;  %12219 = vmatprep.subr.mxu0 %v9927_v47  ;;  %v19961_v47 = vld [vmem:[#allocation41_spill] sm:$0xff] }
 0xfe7   : > { %12187 = vmatpush3.msra.mxu1 %v18998_v28  ;;  %12220 = vmatpush3.msra.mxu0 %v9911_v25  ;;  %v9903_v55 = vmul.f32 %v19961_v47, %v19961_v47  ;;  %v19962_v25 = vld [vmem:[#allocation50_spill] sm:$0xff]  ;;  %v9917_v16 = vmul.f32 %v19109_v24, %v19109_v24 }
 0xfe8   : > { %12188 = vmatprep.subr.mxu1 %v19004_v12  ;;  %12221 = vmatprep.subr.mxu0 %v9926_v39  ;;  %v9473_v39 = vadd.f32 %v19963_v33, %v19962_v25  ;;  %v14627_v25 = vld [vmem:[%s19666_s0 + $0x20] sm:$0xff]  ;;  %v14628_v33 = vld [vmem:[%s19666_s0 + $0x18] sm:$0xff] }
 0xfe9   : > { %12189 = vmatpush3.msra.mxu1 %v19012_v14  ;;  %12222 = vmatpush3.msra.mxu0 %v9910_v31  ;;  %v19120_v31 = vadd.f32 %v19964_v2, %v9474_v5  ;;  %v14623_v5 = vld [vmem:[%s19666_s0 + $0x40] sm:$0xff]  ;;  %v14630_v2 = vld [vmem:[%s19666_s0 + $0x8] sm:$0xff] }
 0xfea   : > { %12190 = vmatprep.subr.mxu1 %v19019_v13  ;;  %12223 = vmatprep.subr.mxu0 %v9925_v32  ;;  %v19965_v32 = vld [vmem:[#allocation39_spill] sm:$0xff] }
 0xfeb   : > { %12191 = vmatpush3.msra.mxu1 %v19027_v36  ;;  %12224 = vmatpush3.msra.mxu0 %v9909_v7  ;;  %v9902_v63 = vmul.f32 %v19965_v32, %v19965_v32  ;;  %v19966_v7 = vld [vmem:[#allocation70_spill] sm:$0xff]  ;;  %v9916_v20 = vmul.f32 %v19120_v31, %v19120_v31 }
 0xfec   : > { %12192 = vmatprep.subr.mxu1 %v19035_v29  ;;  %12225 = vmatprep.subr.mxu0 %v9924_v10  ;;  %v9472_v10 = vadd.f32 %v19967_v34, %v19966_v7 }
 0xfed   : > { %12193 = vmatpush3.msra.mxu1 %v19043_v40  ;;  %12226 = vmatpush3.msra.mxu0 %v9908_v56  ;;  %v19968_v56 = vld [vmem:[#allocation77_spill] sm:$0xff] }
 0xfee   : > { %12194 = vmatprep.subr.mxu1 %v19051_v22  ;;  %12227 = vmatprep.subr.mxu0 %v9923_v6  ;;  %v19131_v0 = vadd.f32 %v19968_v56, %v9473_v39  ;;  %v19969_v6 = vld [vmem:[#allocation58_spill] sm:$0xff]  ;;  %v19140_v11 = vadd.f32 %v19970_v4, %v9472_v10  ;;  %v14629_v39 = vld [vmem:[%s19666_s0 + $0x10] sm:$0xff] }
 0xfef   : > { %12195 = vmatpush3.msra.mxu1 %v19057_v54  ;;  %12228 = vmatpush3.msra.mxu0 %v9907_v52  ;;  %v9901_v52 = vmul.f32 %v19969_v6, %v19969_v6  ;;  %v14633_v4 = vld [vmem:[#allocation9 + $0x10] sm:$0xff] }
 0xff0   : > { %12196 = vmatprep.subr.mxu1 %v19065_v46  ;;  %12229 = vmatprep.subr.mxu0 %v9922_v59  ;;  %v9900_v59 = vmul.f32 %v19971_v51, %v19971_v51  ;;  %v9914_v9 = vmul.f32 %v19140_v11, %v19140_v11 }
 0xff1   : > { %12197 = vmatpush3.msra.mxu1 %v19953_v18  ;;  %12230 = vmatpush3.msra.mxu0 %v9906_v27  ;;  %v9915_v27 = vmul.f32 %v19131_v0, %v19131_v0 }
 0xff2   : > { %12198 = vmatprep.subr.mxu1 %v19076_v23  ;;  %12231 = vmatprep.subr.mxu0 %v9921_v8  ;;  %v9898_v8 = vmul.f32 %v19973_v19, %v19973_v19 }
 0xff3   : > { %12199 = vmatpush3.msra.mxu1 %v19957_v44  ;;  %12232 = vmatpush3.msra.mxu0 %v9905_v21  ;;  %v19974_v21 = vmov 1.0  }
 0xff4   : > { %12200 = vmatprep.subr.mxu1 %v19087_v38  ;;  %12233 = vmatprep.subr.mxu0 %v9920_v41  ;;  %v14619_v41 = vld [vmem:[%s19666_s0 + $0x60] sm:$0xff] }
 0xff5   : > { %12201 = vmatpush3.msra.mxu1 %v19961_v47  ;;  %12234 = vmatpush3.msra.mxu0 %v9904_v1  ;;  %v14620_v1 = vld [vmem:[%s19666_s0 + $0x58] sm:$0xff] }
 0xff6   : > { %12202 = vmatprep.subr.mxu1 %v19098_v53  ;;  %12235 = vmatprep.subr.mxu0 %v9919_v30  ;;  %v14625_v30 = vld [vmem:[%s19666_s0 + $0x30] sm:$0xff] }
 0xff7   : > { %12203 = vmatpush3.msra.mxu1 %v19965_v32  ;;  %12236 = vmatpush3.msra.mxu0 %v9903_v55  ;;  %v14626_v55 = vld [vmem:[%s19666_s0 + $0x28] sm:$0xff] }
 0xff8   : > { %12204 = vmatprep.subr.mxu1 %v19109_v24  ;;  %12237 = vmatprep.subr.mxu0 %v9918_v62  ;;  %v14631_v62 = vld [vmem:[%s19666_s0] sm:$0xff] }
 0xff9   : > { %12205 = vmatpush3.msra.mxu1 %v19969_v6  ;;  %12238 = vmatpush3.msra.mxu0 %v9902_v63 }
 0xffa   : > { %12206 = vmatprep.subr.mxu1 %v19120_v31  ;;  %12239 = vmatprep.subr.mxu0 %v9917_v16 }
 0xffb   : > { %12207 = vmatpush3.msra.mxu1 %v19971_v51  ;;  %12240 = vmatpush3.msra.mxu0 %v9901_v52  ;;  %v14632_v52 = vld [vmem:[#allocation9 + $0x18] sm:$0xff] }
 0xffc   : > { %12208 = vmatprep.subr.mxu1 %v19131_v0  ;;  %12241 = vmatprep.subr.mxu0 %v9916_v20  ;;  %v14634_v20 = vld [vmem:[#allocation9 + $0x8] sm:$0xff] }
 0xffd   : > { %12209 = vmatpush3.msra.mxu1 %v19972_v61  ;;  %12242 = vmatpush3.msra.mxu0 %v9900_v59  ;;  %v14635_v59 = vld [vmem:[#allocation9] sm:$0xff] }
 0xffe   : > { %12210 = vmatprep.subr.mxu1 %v19140_v11  ;;  %12243 = vmatprep.subr.mxu0 %v9915_v27 }
 0xfff   : > { %12211 = vmatpush3.msra.mxu1 %v19973_v19  ;;  %12244 = vmatpush3.msra.mxu0 %v9899_v35 }
0x1000   : > { %9893 = vmatmul.mubr.f32.vlgmr.msra.gmra.mxu1 %v19974_v21  ;;  %12245 = vmatprep.subr.mxu0 %v9914_v9 }
0x1001   : > { %12246 = vmatpush3.msra.mxu0 %v9898_v8  ;;  %14347 = vmatprep.subr.mxu1 %v19161_v60 }
0x1002   : > { %9995 = vmatmul.mubr.f32.vlgmr.msra.gmra.mxu0 %v19974_v21  ;;  %14348 = vmatpush3.msra.mxu1 %v14616_v37 }
0x1003   : > { %14349 = vmatprep.subr.mxu1 %v19161_v60  ;;  %14382 = vmatprep.subr.mxu0 %v19161_v60 }
0x1004   : > { %14350 = vmatpush3.msra.mxu1 %v14617_v57  ;;  %14383 = vmatpush3.msra.mxu0 %v14616_v37 }
0x1005   : > { %14351 = vmatprep.subr.mxu1 %v19161_v60  ;;  %14384 = vmatprep.subr.mxu0 %v19161_v60 }
0x1006   : > { %14352 = vmatpush3.msra.mxu1 %v14618_v49  ;;  %14385 = vmatpush3.msra.mxu0 %v14617_v57 }
0x1007   : > { %14353 = vmatprep.subr.mxu1 %v19161_v60  ;;  %14386 = vmatprep.subr.mxu0 %v19161_v60 }
0x1008   : > { %14354 = vmatpush3.msra.mxu1 %v14619_v41  ;;  %14387 = vmatpush3.msra.mxu0 %v14618_v49 }
0x1009   : > { %14355 = vmatprep.subr.mxu1 %v19161_v60  ;;  %14388 = vmatprep.subr.mxu0 %v19161_v60 }
0x100a   : > { %14356 = vmatpush3.msra.mxu1 %v14620_v1  ;;  %14389 = vmatpush3.msra.mxu0 %v14619_v41 }
0x100b   : > { %14357 = vmatprep.subr.mxu1 %v19161_v60  ;;  %14390 = vmatprep.subr.mxu0 %v19161_v60 }
0x100c   : > { %14358 = vmatpush3.msra.mxu1 %v14621_v17  ;;  %14391 = vmatpush3.msra.mxu0 %v14620_v1 }
0x100d   : > { %14359 = vmatprep.subr.mxu1 %v19161_v60  ;;  %14392 = vmatprep.subr.mxu0 %v19161_v60 }
0x100e   : > { %14360 = vmatpush3.msra.mxu1 %v14622_v58  ;;  %14393 = vmatpush3.msra.mxu0 %v14621_v17 }
0x100f   : > { %14361 = vmatprep.subr.mxu1 %v19161_v60  ;;  %14394 = vmatprep.subr.mxu0 %v19161_v60 }
0x1010   : > { %14362 = vmatpush3.msra.mxu1 %v14623_v5  ;;  %14395 = vmatpush3.msra.mxu0 %v14622_v58 }
0x1011   : > { %14363 = vmatprep.subr.mxu1 %v19161_v60  ;;  %14396 = vmatprep.subr.mxu0 %v19161_v60 }
0x1012   : > { %14364 = vmatpush3.msra.mxu1 %v14624_v48  ;;  %14397 = vmatpush3.msra.mxu0 %v14623_v5 }
0x1013   : > { %14365 = vmatprep.subr.mxu1 %v19161_v60  ;;  %14398 = vmatprep.subr.mxu0 %v19161_v60 }
0x1014   : > { %14366 = vmatpush3.msra.mxu1 %v14625_v30  ;;  %14399 = vmatpush3.msra.mxu0 %v14624_v48 }
0x1015   : > { %14367 = vmatprep.subr.mxu1 %v19161_v60  ;;  %14400 = vmatprep.subr.mxu0 %v19161_v60 }
0x1016   : > { %14368 = vmatpush3.msra.mxu1 %v14626_v55  ;;  %14401 = vmatpush3.msra.mxu0 %v14625_v30 }
0x1017   : > { %14369 = vmatprep.subr.mxu1 %v19161_v60  ;;  %14402 = vmatprep.subr.mxu0 %v19161_v60 }
0x1018   : > { %14370 = vmatpush3.msra.mxu1 %v14627_v25  ;;  %14403 = vmatpush3.msra.mxu0 %v14626_v55 }
0x1019   : > { %14371 = vmatprep.subr.mxu1 %v19161_v60  ;;  %14404 = vmatprep.subr.mxu0 %v19161_v60 }
0x101a   : > { %14372 = vmatpush3.msra.mxu1 %v14628_v33  ;;  %14405 = vmatpush3.msra.mxu0 %v14627_v25 }
0x101b   : > { %14373 = vmatprep.subr.mxu1 %v19161_v60  ;;  %14406 = vmatprep.subr.mxu0 %v19161_v60 }
0x101c   : > { %14374 = vmatpush3.msra.mxu1 %v14629_v39  ;;  %14407 = vmatpush3.msra.mxu0 %v14628_v33 }
0x101d   : > { %14375 = vmatprep.subr.mxu1 %v19161_v60  ;;  %14408 = vmatprep.subr.mxu0 %v19161_v60 }
0x101e   : > { %14376 = vmatpush3.msra.mxu1 %v14630_v2  ;;  %14409 = vmatpush3.msra.mxu0 %v14629_v39 }
0x101f   : > { %14377 = vmatprep.subr.mxu1 %v19161_v60  ;;  %14410 = vmatprep.subr.mxu0 %v19161_v60 }
0x1020   : > { %14378 = vmatpush3.msra.mxu1 %v14631_v62  ;;  %14379 = vmatprep.mubr.msk.f32.mxu1 %vm14975_vm4, %v19161_v60 }
0x1021   : > { %14411 = vmatpush3.msra.mxu0 %v14630_v2  ;;  %14414 = vmatprep.mubr.msk.f32.mxu0 %vm14975_vm4, %v19161_v60 }
0x1022   : > { %14412 = vmatprep.subr.mxu0 %v19161_v60  ;;  %14417 = vmatprep.subr.mxu1 %v19161_v60 }
0x1023   : > { %14413 = vmatpush3.msra.mxu0 %v14631_v62 }
0x10c0   : > { %v12212_v63 = vpop.f32.mrf.mxu1 }
0x10c2   : > { %v12213_v7 = vpop.f32.mrf.mxu1  ;;  %v12247_v34 = vpop.f32.mrf.mxu0 }
0x10c3   : > { %v12214_v10 = vadd.f32 %v12213_v7, %v12212_v63 }
0x10c4   : > { %v12248_v56 = vpop.f32.mrf.mxu0 }
0x10c5   : > { %v12249_v16 = vadd.f32 %v12248_v56, %v12247_v34  ;;  %14380 = vmatmul.mubr.f32.vlgmr.msra.gmra.mxu1 %v12214_v10 }
0x10c6   : > { %14418 = vmatpush3.msra.mxu1 %v14632_v52  ;;  %14425 = vmatprep.mubr.msk.f32.mxu1 %vm14975_vm4, %v19161_v60 }
0x10c7   : > { %14415 = vmatmul.mubr.f32.vlgmr.msra.gmra.mxu0 %v12249_v16  ;;  %14419 = vmatprep.subr.mxu1 %v19161_v60 }
0x10c8   : > { %14420 = vmatpush3.msra.mxu1 %v14633_v4 }
0x10c9   : > { %14421 = vmatprep.subr.mxu1 %v19161_v60 }
0x10ca   : > { %14422 = vmatpush3.msra.mxu1 %v14634_v20 }
0x10cb   : > { %14423 = vmatprep.subr.mxu1 %v19161_v60 }
0x10cc   : > { %14424 = vmatpush3.msra.mxu1 %v14635_v59 }
0x10cd   : > { %14428 = vmatprep.subr.mxu1 %v19161_v60 }
0x1185   : > { %v10066_v27 = vpop.f32.mrf.mxu1 }
0x1186   : > { %v10140_v35 = vmul.f32 0.001953125, %v10066_v27 }
0x1187   : > { %v10136_v9 = vpop.f32.mrf.mxu0  ;;  %v14381_v8 = vpop.f32.mrf.mxu1 }
0x1188   : > { %v10142_v21 = vmul.f32 %v10140_v35, %v10140_v35  ;;  %v10141_v37 = vmul.f32 0.001953125, %v10136_v9  ;;  %14426 = vmatmul.mubr.msk.f32.vlgmr.msra.gmra.mxu1 %vm2115_vm6, %v10140_v35 }
0x1189   : > { %14429 = vmatpush3.msra.mxu1 %v14632_v52  ;;  %14436 = vmatprep.mubr.msk.f32.mxu1 %vm14975_vm4, %v19161_v60  ;;  %v14416_v57 = vpop.f32.mrf.mxu0 }
0x118a   : > { %v10143_v49 = vsub.f32 %v10141_v37, %v10142_v21  ;;  %14430 = vmatprep.subr.mxu1 %v19161_v60 }
0x118b   : > { %14431 = vmatpush3.msra.mxu1 %v14633_v4 }
0x118c   : > { %v10144_v41 = vmax.f32 %v10143_v49, 0.0  ;;  %14432 = vmatprep.subr.mxu1 %v19161_v60 }
0x118d   : > { %14433 = vmatpush3.msra.mxu1 %v14634_v20 }
0x118e   : > { %v10145_v1 = vadd.f32 1e-05, %v10144_v41  ;;  %14434 = vmatprep.subr.mxu1 %v19161_v60 }
0x118f   : > { %14435 = vmatpush3.msra.mxu1 %v14635_v59 }
0x1190   : > { %14571 = vrsqrt.f32 %v10145_v1 }
0x119d   : > { %v14572_v17 = vpop.eup %14571 }
0x119e   : > { %14437 = vmatmul.mubr.msk.f32.vlgmr.msra.gmra.mxu1 %vm2115_vm6, %v14572_v17 }
0x119f   : > { %14861 = shalt.err (!%p14858_p8)
}
0x11a0   : > { %s14862_s28 = scalar_lea.hbm %s19266_s21, 1024  ;;  %s14866_s7 = scalar_lea.hbm %s19976_s16, 2048 }
0x11a1   : > { %p14863_p9 = scmp.ne.s32.totalorder %s19266_s21, %s14862_s28  ;;  %p14867_p12 = scmp.lt.s32.totalorder %s19266_s21, %s19976_s16 }
0x11a2   : > { %p14868_p4 = scmp.lt.s32.totalorder %s14866_s7, %s14862_s28 }
0x11a3   : > { %p14864_p0 = pnand %p14863_p9, %p19977_p7 }
0x11a4   : > { %p14869_p1 = por %p14868_p4, %p14867_p12 }
0x11a5   : > { %p14865_p5 = pneg %p14864_p0 }
0x11a7   : > { %p14870_p2 = pnand %p14869_p1, %p14865_p5 }
0x11a9   : > { %14873 = shalt.err (!%p14870_p2)
}
0x11aa   : > { %s19616_s29 = smov 128   ;;  %s19617_s27 = smov 8   ;;  %v19981_v39 = vld [vmem:[#allocation38_spill] sm:$0xff] }
0x11ab   : > { %s19978_s22 = scalar_lea.sflag [#allocation8], %s15330_s23  ;;  %s19979_s28 = sld [smem:[#allocation99_spill]] }
0x11ac   : > { %14467 = dma.vmem_to_hbm [thread:$0]  (%p19977_p7), %s19269_s1, 1024, %s19266_s21, %s19978_s22, %s19616_s29, %s19616_s29, %s19617_s27  }
0x11ad   : > { %s19980_s11 = sld [smem:[#allocation100_spill]]  ;;  %s10688_s21 = sshll.u32 %s15330_s23, 8 }
0x11ae   : > { %s19366_s1 = scalar_lea.vmem [#allocation20], %s10688_s21  ;;  %s10979_s22 = sshll.u32 %s15122_s26, 12 }
0x11af   : > { %s10469_s2 = sshll.u32 %s19366_s1, 4  ;;  %s10440_s7 = scalar_lea.sflag [#allocation21], %s15330_s23  ;;  %s19415_s2 = int_to_ptr.vmem [resolvable:$true] %s10469_s2 }
0x11b0   : > { %s14980_s21 = smov [#allocation20]  }
0x11b1   : > { %v9826_v5 = vld [vmem:[%s19979_s28] sm:$0x1]  ;;  %s19982_s28 = sld [smem:[#allocation102_spill]] }
0x11b3   : > { %v9827_v55 = vld [vmem:[%s19980_s11] sm:$0x1]  ;;  %s14874_s11 = scalar_lea.vmem %s19415_s2, 4096 }
0x11b4   : > { %p14875_p3 = scmp.ne.s32.totalorder %s19415_s2, %s14874_s11 }
0x11b6   : > { %p14876_p13 = pnand %p14875_p3, %p19977_p7 }
0x11b7   : > { %s19413_s3 = scalar_lea.hbm %s19982_s28, %s10979_s22  ;;  %s14878_s22 = sshll.u32 %s14980_s21, 4  ;;  %s14879_s22 = int_to_ptr.vmem [resolvable:$false] %s14878_s22 }
0x11b8   : > { %p14877_p6 = pneg %p14876_p13  ;;  %s14880_s26 = scalar_lea.vmem %s14879_s22, 8192 }
0x11b9   : > { %p14881_p11 = scmp.lt.s32.totalorder %s19415_s2, %s14879_s22  ;;  %p14882_p10 = scmp.lt.s32.totalorder %s14880_s26, %s14874_s11 }
0x11bb   : > { %p14883_p8 = por %p14882_p10, %p14881_p11 }
0x11bd   : > { %p14884_p9 = pnand %p14883_p8, %p14877_p6 }
0x1248   : > { %v10216_v60 = vpop.f32.mrf.mxu1 }
0x124a   : > { %v14427_v58 = vpop.f32.mrf.mxu1 }
0x125e   : > { %v10289_v48 = vpop.f32.mrf.mxu1 }
0x125f   : > { %v10293_v30 = vmul.f32 %v10289_v48, %v9826_v5 }
0x1260   : > { %v14438_v25 = vpop.f32.mrf.mxu1 }
0x1261   : > { %v10294_v33 = vmul.f32 %v10293_v30, %v10216_v60  ;;  %v10299_v2 = vrot.slane %v10293_v30, %v19981_v39 }
0x1263   : > { %v10295_v62 = vsub.f32 %v9827_v55, %v10294_v33  ;;  %v10300_v63 = vmul.f32 %v10299_v2, %v19973_v19  ;;  %v10301_v7 = vmul.f32 %v10299_v2, %v19972_v61  ;;  %v10302_v34 = vmul.f32 %v10299_v2, %v19971_v51 }
0x1264   : > { %v10303_v10 = vmul.f32 %v10299_v2, %v19969_v6  ;;  %v10304_v56 = vmul.f32 %v10299_v2, %v19965_v32  ;;  %v10305_v16 = vmul.f32 %v10299_v2, %v19961_v47  ;;  %v10306_v52 = vmul.f32 %v10299_v2, %v19957_v44 }
0x1265   : > { %v10336_v4 = vrot.slane %v10295_v62, %v19981_v39  ;;  %v10307_v20 = vmul.f32 %v10299_v2, %v19953_v18  ;;  %v10308_v59 = vmul.f32 %v10299_v2, %v19057_v54  ;;  %v10309_v19 = vmul.f32 %v10299_v2, %v19043_v40 }
0x1266   : > { %v10310_v61 = vmul.f32 %v10299_v2, %v19027_v36  ;;  %v10311_v51 = vmul.f32 %v10299_v2, %v19012_v14  ;;  %v10312_v6 = vmul.f32 %v10299_v2, %v18998_v28  ;;  %v10313_v32 = vmul.f32 %v10299_v2, %v18985_v3 }
0x1267   : > { %v10314_v47 = vmul.f32 %v10299_v2, %v18973_v15  ;;  %v10315_v44 = vmul.f32 %v10299_v2, %v18966_v50  ;;  %v10316_v27 = vmul.f32 %v10299_v2, %v19140_v11  ;;  %v10317_v18 = vmul.f32 %v10299_v2, %v19131_v0 }
0x1268   : > { %v10318_v54 = vmul.f32 %v10299_v2, %v19120_v31  ;;  %v10319_v40 = vmul.f32 %v10299_v2, %v19109_v24  ;;  %v10320_v36 = vmul.f32 %v10299_v2, %v19098_v53  ;;  %v10321_v14 = vmul.f32 %v10299_v2, %v19087_v38 }
0x1269   : > { %v10322_v28 = vmul.f32 %v10299_v2, %v19076_v23  ;;  %v10323_v3 = vmul.f32 %v10299_v2, %v19065_v46  ;;  %v10324_v15 = vmul.f32 %v10299_v2, %v19051_v22  ;;  %v10325_v50 = vmul.f32 %v10299_v2, %v19035_v29 }
0x126a   : > { %v10326_v11 = vmul.f32 %v10299_v2, %v19019_v13  ;;  %v10327_v0 = vmul.f32 %v10299_v2, %v19004_v12  ;;  %v10328_v31 = vmul.f32 %v10299_v2, %v18991_v43  ;;  %v10329_v24 = vmul.f32 %v10299_v2, %v18976_v26 }
0x126b   : > { %v10330_v53 = vmul.f32 %v10299_v2, %v18978_v45  ;;  %v10331_v38 = vmul.f32 %v10299_v2, %v18969_v42  ;;  %v10338_v23 = vadd.f32 %v10336_v4, %v10300_v63  ;;  %v10339_v35 = vadd.f32 %v10336_v4, %v10301_v7 }
0x126c   : > { %v10340_v46 = vadd.f32 %v10336_v4, %v10302_v34  ;;  %v10341_v9 = vadd.f32 %v10336_v4, %v10303_v10  ;;  %v10342_v22 = vadd.f32 %v10336_v4, %v10304_v56  ;;  %v10343_v8 = vadd.f32 %v10336_v4, %v10305_v16 }
0x126d   : > { %v10344_v29 = vadd.f32 %v10336_v4, %v10306_v52  ;;  %v10345_v21 = vadd.f32 %v10336_v4, %v10307_v20  ;;  %v10346_v13 = vadd.f32 %v10336_v4, %v10308_v59  ;;  %v10347_v37 = vadd.f32 %v10336_v4, %v10309_v19 }
0x126e   : > { %v10348_v12 = vadd.f32 %v10336_v4, %v10310_v61  ;;  %v10349_v57 = vadd.f32 %v10336_v4, %v10311_v51  ;;  %v10350_v43 = vadd.f32 %v10336_v4, %v10312_v6  ;;  %v10351_v49 = vadd.f32 %v10336_v4, %v10313_v32 }
0x126f   : > { %v10352_v26 = vadd.f32 %v10336_v4, %v10314_v47  ;;  %v10353_v45 = vadd.f32 %v10336_v4, %v10315_v44  ;;  %v10354_v41 = vadd.f32 %v10336_v4, %v10316_v27  ;;  %v10355_v1 = vadd.f32 %v10336_v4, %v10317_v18 }
0x1270   : > { %v19338_v42 = vadd.f32 %v10336_v4, %v10318_v54  ;;  %v19340_v17 = vadd.f32 %v10336_v4, %v10319_v40  ;;  %v19342_v60 = vadd.f32 %v10336_v4, %v10320_v36  ;;  %v19344_v58 = vadd.f32 %v10336_v4, %v10321_v14 }
0x1271   : > { %v19346_v5 = vadd.f32 %v10336_v4, %v10322_v28  ;;  %v19348_v48 = vadd.f32 %v10336_v4, %v10323_v3  ;;  %v19350_v30 = vadd.f32 %v10336_v4, %v10324_v15  ;;  %v19352_v55 = vadd.f32 %v10336_v4, %v10325_v50 }
0x1272   : > { %v19354_v25 = vadd.f32 %v10336_v4, %v10326_v11  ;;  %v19356_v33 = vadd.f32 %v10336_v4, %v10327_v0  ;;  %v19358_v39 = vadd.f32 %v10336_v4, %v10328_v31  ;;  %v19360_v2 = vadd.f32 %v10336_v4, %v10329_v24 }
0x1273   : > { %v19362_v62 = vadd.f32 %v10336_v4, %v10330_v53  ;;  %v19364_v63 = vadd.f32 %v10336_v4, %v10331_v38  ;;  %v10370_v7 = vmax.f32 %v10338_v23, 0.0  ;;  %v10371_v34 = vmax.f32 %v10339_v35, 0.0 }
0x1274   : > { %v10372_v10 = vmax.f32 %v10340_v46, 0.0  ;;  %v10373_v56 = vmax.f32 %v10341_v9, 0.0  ;;  %v10374_v16 = vmax.f32 %v10342_v22, 0.0  ;;  %v10375_v52 = vmax.f32 %v10343_v8, 0.0 }
0x1275   : > { %v10376_v20 = vmax.f32 %v10344_v29, 0.0  ;;  %v10377_v59 = vmax.f32 %v10345_v21, 0.0  ;;  %v10378_v19 = vmax.f32 %v10346_v13, 0.0  ;;  %v10379_v61 = vmax.f32 %v10347_v37, 0.0  ;;  %10402 = vst [vmem:[%s19366_s1] sm:$0xff] %v10370_v7  ;;  %10403 = vst [vmem:[%s19366_s1 + $0x8] sm:$0xff] %v10371_v34 }
0x1276   : > { %v10380_v4 = vmax.f32 %v10348_v12, 0.0  ;;  %v10381_v51 = vmax.f32 %v10349_v57, 0.0  ;;  %v10382_v6 = vmax.f32 %v10350_v43, 0.0  ;;  %v10383_v32 = vmax.f32 %v10351_v49, 0.0  ;;  %10404 = vst [vmem:[%s19366_s1 + $0x10] sm:$0xff] %v10372_v10  ;;  %10405 = vst [vmem:[%s19366_s1 + $0x18] sm:$0xff] %v10373_v56 }
0x1277   : > { %10406 = vst [vmem:[%s19366_s1 + $0x20] sm:$0xff] %v10374_v16  ;;  %10407 = vst [vmem:[%s19366_s1 + $0x28] sm:$0xff] %v10375_v52  ;;  %v10384_v47 = vmax.f32 %v10352_v26, 0.0  ;;  %v10385_v44 = vmax.f32 %v10353_v45, 0.0  ;;  %v10386_v27 = vmax.f32 %v10354_v41, 0.0  ;;  %v10387_v18 = vmax.f32 %v10355_v1, 0.0 }
0x1278   : > { %10408 = vst [vmem:[%s19366_s1 + $0x30] sm:$0xff] %v10376_v20  ;;  %10409 = vst [vmem:[%s19366_s1 + $0x38] sm:$0xff] %v10377_v59  ;;  %v10388_v54 = vmax.f32 %v19338_v42, 0.0  ;;  %v10389_v40 = vmax.f32 %v19340_v17, 0.0  ;;  %v10390_v36 = vmax.f32 %v19342_v60, 0.0  ;;  %v10391_v14 = vmax.f32 %v19344_v58, 0.0 }
0x1279   : > { %10410 = vst [vmem:[%s19366_s1 + $0x40] sm:$0xff] %v10378_v19  ;;  %10411 = vst [vmem:[%s19366_s1 + $0x48] sm:$0xff] %v10379_v61  ;;  %v10392_v28 = vmax.f32 %v19346_v5, 0.0  ;;  %v10393_v3 = vmax.f32 %v19348_v48, 0.0  ;;  %v10394_v15 = vmax.f32 %v19350_v30, 0.0  ;;  %v10395_v50 = vmax.f32 %v19352_v55, 0.0 }
0x127a   : > { %10412 = vst [vmem:[%s19366_s1 + $0x50] sm:$0xff] %v10380_v4  ;;  %10413 = vst [vmem:[%s19366_s1 + $0x58] sm:$0xff] %v10381_v51  ;;  %v10396_v11 = vmax.f32 %v19354_v25, 0.0  ;;  %v10397_v0 = vmax.f32 %v19356_v33, 0.0  ;;  %v10398_v31 = vmax.f32 %v19358_v39, 0.0  ;;  %v10399_v24 = vmax.f32 %v19360_v2, 0.0 }
0x127b   : > { %10414 = vst [vmem:[%s19366_s1 + $0x60] sm:$0xff] %v10382_v6  ;;  %10415 = vst [vmem:[%s19366_s1 + $0x68] sm:$0xff] %v10383_v32  ;;  %v10400_v53 = vmax.f32 %v19362_v62, 0.0  ;;  %v10401_v38 = vmax.f32 %v19364_v63, 0.0 }
0x127c   : > { %10416 = vst [vmem:[%s19366_s1 + $0x70] sm:$0xff] %v10384_v47  ;;  %10417 = vst [vmem:[%s19366_s1 + $0x78] sm:$0xff] %v10385_v44 }
0x127d   : > { %10418 = vst [vmem:[%s19366_s1 + $0x80] sm:$0xff] %v10386_v27  ;;  %10419 = vst [vmem:[%s19366_s1 + $0x88] sm:$0xff] %v10387_v18 }
0x127e   : > { %10420 = vst [vmem:[%s19366_s1 + $0x90] sm:$0xff] %v10388_v54  ;;  %10421 = vst [vmem:[%s19366_s1 + $0x98] sm:$0xff] %v10389_v40 }
0x127f   : > { %10422 = vst [vmem:[%s19366_s1 + $0xa0] sm:$0xff] %v10390_v36  ;;  %10423 = vst [vmem:[%s19366_s1 + $0xa8] sm:$0xff] %v10391_v14 }
0x1280   : > { %10424 = vst [vmem:[%s19366_s1 + $0xb0] sm:$0xff] %v10392_v28  ;;  %10425 = vst [vmem:[%s19366_s1 + $0xb8] sm:$0xff] %v10393_v3 }
0x1281   : > { %10426 = vst [vmem:[%s19366_s1 + $0xc0] sm:$0xff] %v10394_v15  ;;  %10427 = vst [vmem:[%s19366_s1 + $0xc8] sm:$0xff] %v10395_v50 }
0x1282   : > { %10428 = vst [vmem:[%s19366_s1 + $0xd0] sm:$0xff] %v10396_v11  ;;  %10429 = vst [vmem:[%s19366_s1 + $0xd8] sm:$0xff] %v10397_v0 }
0x1283   : > { %10430 = vst [vmem:[%s19366_s1 + $0xe0] sm:$0xff] %v10398_v31  ;;  %10431 = vst [vmem:[%s19366_s1 + $0xe8] sm:$0xff] %v10399_v24 }
0x1284   : > { %10432 = vst [vmem:[%s19366_s1 + $0xf0] sm:$0xff] %v10400_v53  ;;  %10433 = vst [vmem:[%s19366_s1 + $0xf8] sm:$0xff] %v10401_v38 }
0x1285   : > { %14887 = shalt.err (!%p14884_p9)
}
0x1286   : > { %s14888_s1 = scalar_lea.hbm %s19413_s3, 4096  ;;  %s14892_s21 = scalar_lea.hbm %s19982_s28, 8192 }
0x1287   : > { %p14889_p0 = scmp.ne.s32.totalorder %s19413_s3, %s14888_s1  ;;  %p14893_p4 = scmp.lt.s32.totalorder %s19413_s3, %s19982_s28 }
0x1288   : > { %p14894_p1 = scmp.lt.s32.totalorder %s14892_s21, %s14888_s1 }
0x1289   : > { %p14890_p5 = pnand %p14889_p0, %p19977_p7 }
0x128a   : > { %p14895_p2 = por %p14894_p1, %p14893_p4 }
0x128b   : > { %p14891_p12 = pneg %p14890_p5 }
0x128d   : > { %p14896_p3 = pnand %p14895_p2, %p14891_p12 }
0x128f   : > { %14899 = shalt.err (!%p14896_p3)
}
0x1290   : > { %s19983_s11 = smov 8   ;;  %s19984_s22 = smov 128  }
0x1291   : > { %14468 = dma.vmem_to_hbm [thread:$0]  (%p19977_p7), %s19415_s2, 4096, %s19413_s3, %s10440_s7, %s19984_s22, %s19984_s22, %s19983_s11  }
0x1292 PF: > { %s19985_s26 = sld [smem:[#allocation30_spill]]  ;;  %p19988_p6 = scmp.ge.s32.totalorder %s14962_s25, 2 }
0x1293   : > { %s19986_s23 = sld [smem:[#allocation35_spill]] }
0x1298   : > { %s10484_s24 = sand.u32 1, %s19985_s26  }
0x1299   : > { %p19987_p13 = scmp.ne.s32.totalorder %s19986_s23, 0  ;;  %s10485_s29 = scalar_lea.sflag [#allocation8], %s10484_s24 }
0x129b   : > { %p14498_p11 = pnand %p19988_p6, %p19987_p13 }
0x129d   : > { %p14499_p10 = pneg %p14498_p11 }
0x129f   : > { %14941 = dma.done.wait (%p14499_p10), %s10485_s29, 1024  }
0x12a0   : > { %14943 = vsyncadd (%p14499_p10), %s10485_s29, 4294966272  ;;  %s10494_s27 = scalar_lea.sflag [#allocation21], %s10484_s24 }
0x12a1   : > { %14945 = dma.done.wait (%p14499_p10), %s10494_s27, 4096  }
0x12a2   : > { %14947 = vsyncadd (%p14499_p10), %s10494_s27, 4294963200  ;;  %s19989_s25 = sld [smem:[#allocation32_spill]]  ;;  %s19992_s4 = smov %s14954_s30 }
0x12a3   : > { %s19990_s1 = sld [smem:[#allocation31_spill]] }
0x12a4   : > { %s19991_s24 = sld [smem:[#allocation33_spill]] }
0x12a8   : > { %p43_p7 = scmp.ge.s32.totalorder %s19989_s25, 4  }
0x12a9   : > { %s19993_s30 = smov %s19990_s1 }
0x12aa   :  { %45 = sbr.rel (!%p43_p7) target bundleno = 25 (0x19), region = 232 }
0x12af   :  { %10499 = vsyncpa [#allocation7], 1 }
0x12b0   :  { %10501 = vsyncpa [#allocation7 + $0x1], 1 }
0x12b1   :  { %10502 = vsyncpa [#allocation10], 1 }
0x12b2   :  { %10503 = vsyncpa [#allocation14], 1 }
0x12b3   :  { %10504 = vsyncpa [#allocation17], 1 }
0x12b4   :  { %10505 = vsyncpa [#allocation8], 1 }
0x12b5   :  { %10507 = vsyncpa [#allocation8 + $0x1], 1 }
0x12b6   :  { %10508 = vsyncpa [#allocation21], 1 }
0x12b7   :  { %10510 = vsyncpa [#allocation21 + $0x1], 1 }

</bundles_post_ra>
